<compile_context>
chip_gen: v5e
topology: v5e:2x2
jax: 0.10.0
libtpu: 0.0.40
codegen_flags: <defaults>
</compile_context>

<pallas_src>
import functools
import math

import numpy as np

import jax
import jax.numpy as jnp
from jax import lax
from jax.experimental import pallas as pl
from jax.experimental.pallas import tpu as pltpu


CDTYPE = jnp.bfloat16   # activation / weight compute dtype (f32 accumulation)


# ---------------------------------------------------------------------------
# TPU-generation aware knobs
# ---------------------------------------------------------------------------
def _device_kind():
    try:
        return jax.devices()[0].device_kind.lower()
    except Exception:
        return ""


_KIND = _device_kind()
_IS_MODERN = any(s in _KIND for s in ("v6", "v7"))     # bf16 EUP / 256-deep MXU
_EXP_DTYPE = jnp.bfloat16 if _IS_MODERN else jnp.float32
_TK_CAP = 512 if _IS_MODERN else 256                   # v5e: single vst slot -> 256


def _detect_vmem_limit():
    try:
        cap = int(pltpu.get_tpu_info().vmem_capacity_bytes)
    except Exception:
        return None
    if cap <= 64 * 1024 * 1024:
        return 40 * 1024 * 1024                        # v7x: leave compiler headroom
    return min((cap * 3) // 4, 100 * 1024 * 1024)


_VMEM_LIMIT = _detect_vmem_limit()


def _cparams(*semantics):
    kwargs = dict(dimension_semantics=tuple(semantics))
    if _VMEM_LIMIT is not None:
        kwargs["vmem_limit_bytes"] = _VMEM_LIMIT
    return pltpu.CompilerParams(**kwargs)


def _largest_divisor_tile(n, candidates):
    for t in candidates:
        if t <= n and n % t == 0:
            return t
    return n


def _attn_tiles(n):
    # TQ sized by (TK, TQ) f32 spill budget; TK larger to amortize kv steps.
    tq = _largest_divisor_tile(n, (256, 128))
    tk = _largest_divisor_tile(n, tuple(t for t in (512, 256, 128) if t <= _TK_CAP))
    return tq, tk


# ---------------------------------------------------------------------------
# 3x3 tap geometry (compile-time constants): flattened offsets, border masks,
# overlap-add count map (4/6/9), lane padding for the conv halo.
# ---------------------------------------------------------------------------
def _make_geometry(H, W, B):
    hh, ww = np.meshgrid(np.arange(H), np.arange(W), indexing="ij")
    offsets, rows = [], []
    for ry in (-1, 0, 1):
        for rx in (-1, 0, 1):
            offsets.append(ry * W + rx)
            valid = (hh + ry >= 0) & (hh + ry < H) & (ww + rx >= 0) & (ww + rx < W)
            rows.append(valid.reshape(-1))
    mask = np.stack(rows, axis=0).astype(np.float32)                    # (9, N)
    inv_count = (1.0 / mask.sum(axis=0, keepdims=True)).astype(np.float32)
    pad = ((W + 1 + 127) // 128) * 128                                  # halo, lane aligned
    return {
        "offsets": tuple(offsets),
        "mask_img": jnp.asarray(mask, jnp.float32),                     # (9, N)
        "inv_count": jnp.asarray(inv_count, jnp.float32),               # (1, N)
        "conv_mask": jnp.asarray(np.tile(mask, (1, B)), jnp.float32),   # (9, B*N)
        "pad": pad,
    }


# ---------------------------------------------------------------------------
# Kernel 1: fused 3x3 conv (stride 1, zero pad 1), batch folded into lanes.
# The 9 shifted taps are stacked into one f32 VMEM scratch (direct slice-stores,
# no concatenate) and contracted with ONE K=9*Cin MXU matmul per lane tile.
# ---------------------------------------------------------------------------
def _conv3x3_kernel(x_ref, mask_ref, w_ref, b_ref, o_ref, tap_ref,
                    *, offsets, pad, ts, cin, relu):
    base = pl.multiple_of(pl.program_id(0) * ts, 128)
    window = x_ref[:, pl.ds(base, ts + 2 * pad)]          # (Cin, TS + 2*pad), halo included
    masks = mask_ref[...]                                 # (9, TS) f32
    for t, off in enumerate(offsets):
        lo = pad + off                                    # static slice inside the window
        tap_ref[t * cin:(t + 1) * cin, :] = window[:, lo:lo + ts] * masks[t:t + 1, :]
    y = jnp.dot(w_ref[...], tap_ref[...].astype(w_ref.dtype),
                preferred_element_type=jnp.float32) + b_ref[...]
    if relu:
        y = jnp.maximum(y, 0.0)
    o_ref[...] = y.astype(o_ref.dtype)


def conv3x3(x, w, b, geo, *, relu):
    cin, nb = x.shape                                     # x: (Cin, B*N)
    cout = w.shape[0]
    pad = geo["pad"]
    ts = _largest_divisor_tile(nb, (4096, 2048, 1024, 512, 256, 128))
    xp = jnp.pad(x, ((0, 0), (pad, pad)))                 # zero halo (borders are masked)
    npad = nb + 2 * pad
    kern = functools.partial(_conv3x3_kernel, offsets=geo["offsets"],
                             pad=pad, ts=ts, cin=cin, relu=relu)
    return pl.pallas_call(
        kern,
        out_shape=jax.ShapeDtypeStruct((cout, nb), x.dtype),
        grid=(nb // ts,),
        in_specs=[
            pl.BlockSpec((cin, npad), lambda ti: (0, 0)),      # resident padded input
            pl.BlockSpec((9, ts), lambda ti: (0, ti)),         # border mask tile
            pl.BlockSpec((cout, 9 * cin), lambda ti: (0, 0)),  # flat conv weight
            pl.BlockSpec((cout, 1), lambda ti: (0, 0)),
        ],
        out_specs=pl.BlockSpec((cout, ts), lambda ti: (0, ti)),
        scratch_shapes=[pltpu.VMEM((9 * cin, ts), jnp.float32)],
        compiler_params=_cparams("parallel"),
    )(xp, geo["conv_mask"], w, b)


# ---------------------------------------------------------------------------
# Shared online-softmax loop (K/V are VMEM-resident scratch refs; kv chunks are
# sliced in-kernel -> no kv re-streaming from HBM, no kv grid axis).
# ---------------------------------------------------------------------------
def _online_softmax(q, k_ref, v_ref, *, tk, exp_dtype):
    n = k_ref.shape[1]
    dv = v_ref.shape[0]
    tq = q.shape[1]
    steps = n // tk

    def body(kc, carry):
        m, l, acc = carry
        ks = pl.multiple_of(kc * tk, 128)
        k = k_ref[:, pl.ds(ks, tk)].astype(CDTYPE)                       # (Dq, TK)
        v = v_ref[:, pl.ds(ks, tk)].astype(CDTYPE)                       # (Dv, TK)
        s = lax.dot_general(k, q, (((0,), (0,)), ((), ())),
                            preferred_element_type=jnp.float32)          # (TK, TQ)
        m_new = jnp.maximum(m, jnp.max(s, axis=0, keepdims=True))
        alpha = jnp.exp(m - m_new)
        p = jnp.exp((s - m_new).astype(exp_dtype))                       # bf16 EUP on v6e/v7x
        l_new = alpha * l + jnp.sum(p, axis=0, keepdims=True, dtype=jnp.float32)
        pv = lax.dot_general(v, p.astype(v.dtype), (((1,), (0,)), ((), ())),
                             preferred_element_type=jnp.float32)          # (Dv, TQ)
        return m_new, l_new, alpha * acc + pv

    m0 = jnp.full((1, tq), -jnp.inf, jnp.float32)
    l0 = jnp.zeros((1, tq), jnp.float32)
    a0 = jnp.zeros((dv, tq), jnp.float32)
    _, l, acc = lax.fori_loop(0, steps, body, (m0, l0, a0), unroll=(steps <= 8))
    return acc, l


# ---------------------------------------------------------------------------
# Kernel 2: fully-fused NonLocal branch.
# qkv projection (k/v once per image into VMEM scratch), flash attention, and
# the W_o + bias + residual epilogue all live in one kernel.
# ---------------------------------------------------------------------------
def _nl_flash_kernel(xq_ref, xkv_ref, wth_ref, bth_ref, wph_ref, bph_ref,
                     wg_ref, bg_ref, wo_ref, bo_ref, o_ref, k_s, v_s,
                     *, tk, exp_dtype):
    qi = pl.program_id(1)

    @pl.when(qi == 0)                                     # once per image (b changes)
    def _():
        xkv = xkv_ref[...]                                # (C, N)
        k_s[...] = (jnp.dot(wph_ref[...], xkv, preferred_element_type=jnp.float32)
                    + bph_ref[...]).astype(k_s.dtype)
        v_s[...] = (jnp.dot(wg_ref[...], xkv, preferred_element_type=jnp.float32)
                    + bg_ref[...]).astype(v_s.dtype)

    xq = xq_ref[...]                                      # (C, TQ)
    q = (jnp.dot(wth_ref[...], xq, preferred_element_type=jnp.float32)
         + bth_ref[...]).astype(CDTYPE)                   # (ci, TQ)

    acc, l = _online_softmax(q, k_s, v_s, tk=tk, exp_dtype=exp_dtype)
    y = acc * pl.reciprocal(l, approx=True)               # (ci, TQ)
    out = (jnp.dot(wo_ref[...], y.astype(wo_ref.dtype),
                   preferred_element_type=jnp.float32)
           + bo_ref[...] + xq.astype(jnp.float32))        # residual fused in epilogue
    o_ref[...] = out.astype(o_ref.dtype)


def nl_attention(x, p, *, B, N):
    C = x.shape[0]
    ci = p["ci"]
    tq, tk = _attn_tiles(N)
    qt = N // tq
    kern = functools.partial(_nl_flash_kernel, tk=tk, exp_dtype=_EXP_DTYPE)
    return pl.pallas_call(
        kern,
        out_shape=jax.ShapeDtypeStruct((C, B * N), x.dtype),
        grid=(B, qt),
        in_specs=[
            pl.BlockSpec((C, tq), lambda b, qi: (0, b * qt + qi)),   # q tile
            pl.BlockSpec((C, N), lambda b, qi: (0, b)),              # kv image (DMA'd once per b)
            pl.BlockSpec((ci, C), lambda b, qi: (0, 0)),             # w_theta
            pl.BlockSpec((ci, 1), lambda b, qi: (0, 0)),
            pl.BlockSpec((ci, C), lambda b, qi: (0, 0)),             # w_phi
            pl.BlockSpec((ci, 1), lambda b, qi: (0, 0)),
            pl.BlockSpec((ci, C), lambda b, qi: (0, 0)),             # w_g
            pl.BlockSpec((ci, 1), lambda b, qi: (0, 0)),
            pl.BlockSpec((C, ci), lambda b, qi: (0, 0)),             # w_o
            pl.BlockSpec((C, 1), lambda b, qi: (0, 0)),
        ],
        out_specs=pl.BlockSpec((C, tq), lambda b, qi: (0, b * qt + qi)),
        scratch_shapes=[pltpu.VMEM((ci, N), CDTYPE),                 # resident K
                        pltpu.VMEM((ci, N), CDTYPE)],                # resident V
        compiler_params=_cparams("parallel", "arbitrary"),
    )(x, x, p["w_th"], p["b_th"], p["w_ph"], p["b_ph"],
      p["w_g"], p["b_g"], p["w_o"], p["b_o"])


# ---------------------------------------------------------------------------
# Kernel 3: fused CES attention.  Prologue (once per image): theta/phi/g
# projection + 9-tap patch extraction (roll + border mask, incremental L2 key
# norm) into f32 VMEM scratch.  Body: flash attention over the resident patch
# K/V.  Only the output patches yp ever touch HBM.
# ---------------------------------------------------------------------------
def _ces_flash_kernel(xkv_ref, mask_ref, wth_ref, bth_ref, wph_ref, bph_ref,
                      wg_ref, bg_ref, yp_ref, qp_s, kp_s, vp_s,
                      *, ci, tk, offsets, eps, exp_dtype):
    qi = pl.program_id(1)
    n = kp_s.shape[1]
    tq = yp_ref.shape[1]

    @pl.when(qi == 0)                                     # once per image
    def _():
        xkv = xkv_ref[...]                                # (C, N)
        th = jnp.dot(wth_ref[...], xkv, preferred_element_type=jnp.float32) + bth_ref[...]
        ph = jnp.dot(wph_ref[...], xkv, preferred_element_type=jnp.float32) + bph_ref[...]
        g = jnp.dot(wg_ref[...], xkv, preferred_element_type=jnp.float32) + bg_ref[...]
        masks = mask_ref[...]                             # (9, N) f32
        ssq = jnp.zeros((1, n), jnp.float32)              # incremental L2 of key patches
        for t, off in enumerate(offsets):
            m_t = masks[t:t + 1, :]
            sh = (-off) % n
            th_t = (pltpu.roll(th, sh, axis=1) if sh else th) * m_t
            ph_t = (pltpu.roll(ph, sh, axis=1) if sh else ph) * m_t
            g_t = (pltpu.roll(g, sh, axis=1) if sh else g) * m_t
            qp_s[t * ci:(t + 1) * ci, :] = th_t           # direct slice-stores (no concat)
            kp_s[t * ci:(t + 1) * ci, :] = ph_t
            vp_s[t * ci:(t + 1) * ci, :] = g_t
            ssq = ssq + jnp.sum(ph_t * ph_t, axis=0, keepdims=True)
        inv = 1.0 / jnp.maximum(jnp.sqrt(ssq), eps)       # escape-NaN key normalisation
        kp_s[...] = kp_s[...] * inv

    qs = pl.multiple_of(qi * tq, 128)
    q = qp_s[:, pl.ds(qs, tq)].astype(CDTYPE)             # (9*ci, TQ) query patches
    acc, l = _online_softmax(q, kp_s, vp_s, tk=tk, exp_dtype=exp_dtype)
    yp_ref[...] = (acc * pl.reciprocal(l, approx=True)).astype(yp_ref.dtype)


def ces_attention(x, p, geo, *, B, N):
    C = x.shape[0]
    ci = p["ci"]
    tq, tk = _attn_tiles(N)
    qt = N // tq
    kern = functools.partial(_ces_flash_kernel, ci=ci, tk=tk,
                             offsets=geo["offsets"], eps=1e-4, exp_dtype=_EXP_DTYPE)
    return pl.pallas_call(
        kern,
        out_shape=jax.ShapeDtypeStruct((9 * ci, B * N), x.dtype),
        grid=(B, qt),
        in_specs=[
            pl.BlockSpec((C, N), lambda b, qi: (0, b)),              # image (DMA'd once per b)
            pl.BlockSpec((9, N), lambda b, qi: (0, 0)),              # per-image border mask
            pl.BlockSpec((ci, C), lambda b, qi: (0, 0)),             # w_theta (CES scale folded)
            pl.BlockSpec((ci, 1), lambda b, qi: (0, 0)),
            pl.BlockSpec((ci, C), lambda b, qi: (0, 0)),             # w_phi
            pl.BlockSpec((ci, 1), lambda b, qi: (0, 0)),
            pl.BlockSpec((ci, C), lambda b, qi: (0, 0)),             # w_g
            pl.BlockSpec((ci, 1), lambda b, qi: (0, 0)),
        ],
        out_specs=pl.BlockSpec((9 * ci, tq), lambda b, qi: (0, b * qt + qi)),
        scratch_shapes=[pltpu.VMEM((9 * ci, N), jnp.float32),        # query patches
                        pltpu.VMEM((9 * ci, N), jnp.float32),        # key patches (normalised)
                        pltpu.VMEM((9 * ci, N), jnp.float32)],       # value patches
        compiler_params=_cparams("parallel", "arbitrary"),
    )(x, geo["mask_img"], p["w_th"], p["b_th"], p["w_ph"], p["b_ph"],
      p["w_g"], p["b_g"])


# ---------------------------------------------------------------------------
# Kernel 4: CES fold (overlap-add) + 1/count normalisation + output 1x1 conv
# + residual, fused.  1/count is a baked 4/6/9 border map constant.
# ---------------------------------------------------------------------------
def _ces_fold_kernel(yp_ref, mask_ref, invc_ref, x_ref, wo_ref, bo_ref, o_ref,
                     *, offsets, ci):
    n = o_ref.shape[1]
    yp = yp_ref[...].astype(jnp.float32)                  # (9*ci, N)
    masks = mask_ref[...]
    folded = jnp.zeros((ci, n), jnp.float32)
    for t, off in enumerate(offsets):
        contrib = yp[t * ci:(t + 1) * ci, :] * masks[t:t + 1, :]
        sh = off % n
        folded = folded + (pltpu.roll(contrib, sh, axis=1) if sh else contrib)
    folded = folded * invc_ref[...]
    y = jnp.dot(wo_ref[...], folded.astype(wo_ref.dtype),
                preferred_element_type=jnp.float32)
    o_ref[...] = (y + bo_ref[...] + x_ref[...].astype(jnp.float32)).astype(o_ref.dtype)


def ces_fold_project(yp, x, p, geo, *, B, N):
    C = x.shape[0]
    ci = p["ci"]
    kern = functools.partial(_ces_fold_kernel, offsets=geo["offsets"], ci=ci)
    return pl.pallas_call(
        kern,
        out_shape=jax.ShapeDtypeStruct((C, B * N), x.dtype),
        grid=(B,),
        in_specs=[
            pl.BlockSpec((9 * ci, N), lambda b: (0, b)),
            pl.BlockSpec((9, N), lambda b: (0, 0)),
            pl.BlockSpec((1, N), lambda b: (0, 0)),
            pl.BlockSpec((C, N), lambda b: (0, b)),
            pl.BlockSpec((C, ci), lambda b: (0, 0)),
            pl.BlockSpec((C, 1), lambda b: (0, 0)),
        ],
        out_specs=pl.BlockSpec((C, N), lambda b: (0, b)),
        compiler_params=_cparams("parallel"),
    )(yp, geo["mask_img"], geo["inv_count"], x, p["w_o"], p["b_o"])


# ---------------------------------------------------------------------------
# Module forwards (internal layout: (C, B*H*W))
# ---------------------------------------------------------------------------
def dncnn_forward(layers, x, geo):
    h = x
    for (w, b, relu) in layers:
        h = conv3x3(h, w, b, geo, relu=relu)
    return h


def merge_block_forward(p, x, geo, *, B, N):
    C = x.shape[0]
    # CES (patch-wise contextual attention) branch.
    yp = ces_attention(x, p["CA"], geo, B=B, N=N)
    ca = ces_fold_project(yp, x, p["CA"], geo, B=B, N=N)
    # NonLocal (embedded Gaussian) branch -- one fused kernel.
    nl = nl_attention(x, p["NL"], B=B, N=N)
    # FC gating path: tiny (M = B) -> plain XLA.
    xf = x.astype(jnp.float32).reshape(C, B, N)
    vec = jnp.mean(xf, axis=2).T                          # adaptive avg-pool -> (B, C)
    vec = jax.nn.relu(vec @ p["fc1_w"] + p["fc1_b"])
    vec = vec @ p["fc2_w"] + p["fc2_b"]                   # (B, 2C)
    gate = jax.nn.softmax(vec.reshape(B, C, 2), axis=-1)
    w1 = gate[:, :, 0].T[:, :, None]                      # (C, B, 1)
    w2 = gate[:, :, 1].T[:, :, None]
    out = (ca.astype(jnp.float32).reshape(C, B, N) * w1
           + nl.astype(jnp.float32).reshape(C, B, N) * w2)
    return out.reshape(C, B * N).astype(x.dtype)


def mergenet_forward(params, x_nchw, *, compute_dtype=CDTYPE):
    B, C, H, W = x_nchw.shape
    N = H * W
    assert N % 128 == 0, "H*W must be a multiple of 128 lanes"   # TODO(synk): general sizes
    geo = _make_geometry(H, W, B)
    h = jnp.transpose(x_nchw, (1, 0, 2, 3)).reshape(C, B * N).astype(compute_dtype)
    for kind, p in params:
        if kind == "dncnn":
            h = dncnn_forward(p, h, geo)
        else:
            h = merge_block_forward(p, h, geo, B=B, N=N)
    out = h.astype(x_nchw.dtype).reshape(-1, B, H, W).transpose(1, 0, 2, 3)
    return x_nchw + out                                   # MergeNet residual


# ---------------------------------------------------------------------------
# Deterministic parameter init (PyTorch-style uniform fan-in bounds)
# ---------------------------------------------------------------------------
def _uniform(key, shape, bound, dtype=jnp.float32):
    return jax.random.uniform(key, shape, jnp.float32, -bound, bound).astype(dtype)


def init_conv3x3(key, cin, cout, *, bias=True):
    kw, kb = jax.random.split(key)
    bound = 1.0 / math.sqrt(9 * cin)
    w = _uniform(kw, (cout, 9 * cin), bound, CDTYPE)      # flat (tap-major) weight layout
    b = _uniform(kb, (cout, 1), bound) if bias else jnp.zeros((cout, 1), jnp.float32)
    return w, b


def init_dncnn(key, cin, cout, feat, depth):
    keys = jax.random.split(key, depth)
    layers = []
    w, b = init_conv3x3(keys[0], cin, feat)
    layers.append((w, b, True))
    bn_scale = 1.0 / math.sqrt(1.0 + 1e-5)                # folded eval-mode BatchNorm
    for d in range(depth - 2):
        w, b = init_conv3x3(keys[1 + d], feat, feat, bias=False)
        layers.append(((w.astype(jnp.float32) * bn_scale).astype(CDTYPE), b, True))
    w, b = init_conv3x3(keys[depth - 1], feat, cout)
    layers.append((w, b, False))
    return layers


def init_attention_branch(key, c, ci, *, softmax_scale=None):
    k = jax.random.split(key, 8)
    bc = 1.0 / math.sqrt(c)
    w_th = _uniform(k[0], (ci, c), bc)
    b_th = _uniform(k[1], (ci, 1), bc)
    if softmax_scale is not None:
        # fold the CES softmax scale into the theta (= query) projection
        w_th = w_th * softmax_scale
        b_th = b_th * softmax_scale
    bo = 1.0 / math.sqrt(ci)
    return {
        "ci": ci,
        "w_th": w_th.astype(CDTYPE), "b_th": b_th,
        "w_ph": _uniform(k[2], (ci, c), bc, CDTYPE), "b_ph": _uniform(k[3], (ci, 1), bc),
        "w_g": _uniform(k[4], (ci, c), bc, CDTYPE), "b_g": _uniform(k[5], (ci, 1), bc),
        "w_o": _uniform(k[6], (c, ci), bo, CDTYPE), "b_o": _uniform(k[7], (c, 1), bo),
    }


def init_merge_block(key, c, vlen):
    ci = max(c // 2, 1)
    k = jax.random.split(key, 6)
    return {
        "NL": init_attention_branch(k[0], c, ci),
        "CA": init_attention_branch(k[1], c, ci, softmax_scale=10.0),
        "fc1_w": _uniform(k[2], (c, vlen), 1.0 / math.sqrt(c)),
        "fc1_b": _uniform(k[3], (vlen,), 1.0 / math.sqrt(c)),
        "fc2_w": _uniform(k[4], (vlen, 2 * c), 1.0 / math.sqrt(vlen)),
        "fc2_b": _uniform(k[5], (2 * c,), 1.0 / math.sqrt(vlen)),
    }


def init_mergenet(key, in_channels, inter, vlen, depth, num_merge_block):
    params = []
    keys = jax.random.split(key, 2 * num_merge_block + 1)
    ki = 0
    for i in range(num_merge_block):
        cin = in_channels if i == 0 else inter
        params.append(("dncnn", init_dncnn(keys[ki], cin, inter, inter, depth))); ki += 1
        params.append(("merge", init_merge_block(keys[ki], inter, vlen))); ki += 1
    params.append(("dncnn", init_dncnn(keys[ki], inter, in_channels, inter, depth)))
    return params


# ---------------------------------------------------------------------------
if __name__ == "__main__":
    key = jax.random.PRNGKey(0)
    kp, kx = jax.random.split(key)

    in_channels, intermediate_channels = 4, 8
    vector_length, dncnn_depth, num_merge_block = 8, 3, 1

    params = init_mergenet(kp, in_channels, intermediate_channels,
                           vector_length, dncnn_depth, num_merge_block)

    x = jax.random.normal(kx, (2, in_channels, 16, 16), jnp.float32)  # NCHW

    fwd = jax.jit(lambda inp: mergenet_forward(params, inp))
    out = fwd(x)
    jax.block_until_ready(out)

    assert out.shape == x.shape and out.dtype == x.dtype
    assert bool(jnp.all(jnp.isfinite(out)))
    print("KERNEL_OK")
</pallas_src>

<mosaic_0001>
module attributes {stable_mosaic.version = 11 : i64} {
  func.func @_conv3x3_kernel(%arg0: i32, %arg1: memref<4x768xbf16, #tpu.memory_space<vmem>>, %arg2: memref<9x512xf32, #tpu.memory_space<vmem>>, %arg3: memref<8x36xbf16, #tpu.memory_space<vmem>>, %arg4: memref<8x1xf32, #tpu.memory_space<vmem>>, %arg5: memref<8x512xbf16, #tpu.memory_space<vmem>>, %arg6: memref<36x512xf32, #tpu.memory_space<vmem>>) attributes {dimension_semantics = [#tpu.dimension_semantics<parallel>], iteration_bounds = array<i64: 1>, scalar_prefetch = 0 : i64, scratch_operands = 1 : i64, tpu.core_type = #tpu.core_type<tc>, window_params = [{pipeline_mode = #tpu.pipeline_mode<synchronous>, transform_indices = @transform_0, window_bounds = array<i64: 4, 768>}, {transform_indices = @transform_1, window_bounds = array<i64: 9, 512>}, {pipeline_mode = #tpu.pipeline_mode<synchronous>, transform_indices = @transform_2, window_bounds = array<i64: 8, 36>}, {pipeline_mode = #tpu.pipeline_mode<synchronous>, transform_indices = @transform_3, window_bounds = array<i64: 8, 1>}, {transform_indices = @transform_4, window_bounds = array<i64: 8, 512>}]} {
    %c512_i32 = arith.constant 512 : i32
    %0 = arith.muli %arg0, %c512_i32 : i32
    %1 = tpu.assume_multiple %0, 128 : i32
    %c0 = arith.constant 0 : index
    %2 = arith.index_cast %1 : i32 to index
    %3 = vector.load %arg1[%c0, %2] : memref<4x768xbf16, #tpu.memory_space<vmem>>, vector<4x768xbf16>
    %c0_0 = arith.constant 0 : index
    %c0_1 = arith.constant 0 : index
    %4 = vector.load %arg2[%c0_0, %c0_1] : memref<9x512xf32, #tpu.memory_space<vmem>>, vector<9x512xf32>
    %5 = vector.extract_strided_slice %3 {offsets = [0, 111], sizes = [4, 512], strides = [1, 1]} : vector<4x768xbf16> to vector<4x512xbf16>
    %6 = vector.extract_strided_slice %4 {offsets = [0, 0], sizes = [1, 512], strides = [1, 1]} : vector<9x512xf32> to vector<1x512xf32>
    %7 = arith.extf %5 : vector<4x512xbf16> to vector<4x512xf32>
    %8 = vector.broadcast %6 : vector<1x512xf32> to vector<4x512xf32>
    %9 = arith.mulf %7, %8 : vector<4x512xf32>
    %c0_2 = arith.constant 0 : index
    %c0_3 = arith.constant 0 : index
    %10 = vector.load %arg6[%c0_2, %c0_3] : memref<36x512xf32, #tpu.memory_space<vmem>>, vector<4x512xf32>
    tpu.vector_store %arg6[%c0_2, %c0_3], %9 {strides = array<i32>} : memref<36x512xf32, #tpu.memory_space<vmem>>, vector<4x512xf32>,
    %11 = vector.extract_strided_slice %3 {offsets = [0, 112], sizes = [4, 512], strides = [1, 1]} : vector<4x768xbf16> to vector<4x512xbf16>
    %12 = vector.extract_strided_slice %4 {offsets = [1, 0], sizes = [1, 512], strides = [1, 1]} : vector<9x512xf32> to vector<1x512xf32>
    %13 = arith.extf %11 : vector<4x512xbf16> to vector<4x512xf32>
    %14 = vector.broadcast %12 : vector<1x512xf32> to vector<4x512xf32>
    %15 = arith.mulf %13, %14 : vector<4x512xf32>
    %c4 = arith.constant 4 : index
    %c0_4 = arith.constant 0 : index
    %16 = vector.load %arg6[%c4, %c0_4] : memref<36x512xf32, #tpu.memory_space<vmem>>, vector<4x512xf32>
    tpu.vector_store %arg6[%c4, %c0_4], %15 {strides = array<i32>} : memref<36x512xf32, #tpu.memory_space<vmem>>, vector<4x512xf32>,
    %17 = vector.extract_strided_slice %3 {offsets = [0, 113], sizes = [4, 512], strides = [1, 1]} : vector<4x768xbf16> to vector<4x512xbf16>
    %18 = vector.extract_strided_slice %4 {offsets = [2, 0], sizes = [1, 512], strides = [1, 1]} : vector<9x512xf32> to vector<1x512xf32>
    %19 = arith.extf %17 : vector<4x512xbf16> to vector<4x512xf32>
    %20 = vector.broadcast %18 : vector<1x512xf32> to vector<4x512xf32>
    %21 = arith.mulf %19, %20 : vector<4x512xf32>
    %c8 = arith.constant 8 : index
    %c0_5 = arith.constant 0 : index
    %22 = vector.load %arg6[%c8, %c0_5] : memref<36x512xf32, #tpu.memory_space<vmem>>, vector<4x512xf32>
    tpu.vector_store %arg6[%c8, %c0_5], %21 {strides = array<i32>} : memref<36x512xf32, #tpu.memory_space<vmem>>, vector<4x512xf32>,
    %23 = vector.extract_strided_slice %3 {offsets = [0, 127], sizes = [4, 512], strides = [1, 1]} : vector<4x768xbf16> to vector<4x512xbf16>
    %24 = vector.extract_strided_slice %4 {offsets = [3, 0], sizes = [1, 512], strides = [1, 1]} : vector<9x512xf32> to vector<1x512xf32>
    %25 = arith.extf %23 : vector<4x512xbf16> to vector<4x512xf32>
    %26 = vector.broadcast %24 : vector<1x512xf32> to vector<4x512xf32>
    %27 = arith.mulf %25, %26 : vector<4x512xf32>
    %c12 = arith.constant 12 : index
    %c0_6 = arith.constant 0 : index
    %28 = vector.load %arg6[%c12, %c0_6] : memref<36x512xf32, #tpu.memory_space<vmem>>, vector<4x512xf32>
    tpu.vector_store %arg6[%c12, %c0_6], %27 {strides = array<i32>} : memref<36x512xf32, #tpu.memory_space<vmem>>, vector<4x512xf32>,
    %29 = vector.extract_strided_slice %3 {offsets = [0, 128], sizes = [4, 512], strides = [1, 1]} : vector<4x768xbf16> to vector<4x512xbf16>
    %30 = vector.extract_strided_slice %4 {offsets = [4, 0], sizes = [1, 512], strides = [1, 1]} : vector<9x512xf32> to vector<1x512xf32>
    %31 = arith.extf %29 : vector<4x512xbf16> to vector<4x512xf32>
    %32 = vector.broadcast %30 : vector<1x512xf32> to vector<4x512xf32>
    %33 = arith.mulf %31, %32 : vector<4x512xf32>
    %c16 = arith.constant 16 : index
    %c0_7 = arith.constant 0 : index
    %34 = vector.load %arg6[%c16, %c0_7] : memref<36x512xf32, #tpu.memory_space<vmem>>, vector<4x512xf32>
    tpu.vector_store %arg6[%c16, %c0_7], %33 {strides = array<i32>} : memref<36x512xf32, #tpu.memory_space<vmem>>, vector<4x512xf32>,
    %35 = vector.extract_strided_slice %3 {offsets = [0, 129], sizes = [4, 512], strides = [1, 1]} : vector<4x768xbf16> to vector<4x512xbf16>
    %36 = vector.extract_strided_slice %4 {offsets = [5, 0], sizes = [1, 512], strides = [1, 1]} : vector<9x512xf32> to vector<1x512xf32>
    %37 = arith.extf %35 : vector<4x512xbf16> to vector<4x512xf32>
    %38 = vector.broadcast %36 : vector<1x512xf32> to vector<4x512xf32>
    %39 = arith.mulf %37, %38 : vector<4x512xf32>
    %c20 = arith.constant 20 : index
    %c0_8 = arith.constant 0 : index
    %40 = vector.load %arg6[%c20, %c0_8] : memref<36x512xf32, #tpu.memory_space<vmem>>, vector<4x512xf32>
    tpu.vector_store %arg6[%c20, %c0_8], %39 {strides = array<i32>} : memref<36x512xf32, #tpu.memory_space<vmem>>, vector<4x512xf32>,
    %41 = vector.extract_strided_slice %3 {offsets = [0, 143], sizes = [4, 512], strides = [1, 1]} : vector<4x768xbf16> to vector<4x512xbf16>
    %42 = vector.extract_strided_slice %4 {offsets = [6, 0], sizes = [1, 512], strides = [1, 1]} : vector<9x512xf32> to vector<1x512xf32>
    %43 = arith.extf %41 : vector<4x512xbf16> to vector<4x512xf32>
    %44 = vector.broadcast %42 : vector<1x512xf32> to vector<4x512xf32>
    %45 = arith.mulf %43, %44 : vector<4x512xf32>
    %c24 = arith.constant 24 : index
    %c0_9 = arith.constant 0 : index
    %46 = vector.load %arg6[%c24, %c0_9] : memref<36x512xf32, #tpu.memory_space<vmem>>, vector<4x512xf32>
    tpu.vector_store %arg6[%c24, %c0_9], %45 {strides = array<i32>} : memref<36x512xf32, #tpu.memory_space<vmem>>, vector<4x512xf32>,
    %47 = vector.extract_strided_slice %3 {offsets = [0, 144], sizes = [4, 512], strides = [1, 1]} : vector<4x768xbf16> to vector<4x512xbf16>
    %48 = vector.extract_strided_slice %4 {offsets = [7, 0], sizes = [1, 512], strides = [1, 1]} : vector<9x512xf32> to vector<1x512xf32>
    %49 = arith.extf %47 : vector<4x512xbf16> to vector<4x512xf32>
    %50 = vector.broadcast %48 : vector<1x512xf32> to vector<4x512xf32>
    %51 = arith.mulf %49, %50 : vector<4x512xf32>
    %c28 = arith.constant 28 : index
    %c0_10 = arith.constant 0 : index
    %52 = vector.load %arg6[%c28, %c0_10] : memref<36x512xf32, #tpu.memory_space<vmem>>, vector<4x512xf32>
    tpu.vector_store %arg6[%c28, %c0_10], %51 {strides = array<i32>} : memref<36x512xf32, #tpu.memory_space<vmem>>, vector<4x512xf32>,
    %53 = vector.extract_strided_slice %3 {offsets = [0, 145], sizes = [4, 512], strides = [1, 1]} : vector<4x768xbf16> to vector<4x512xbf16>
    %54 = vector.extract_strided_slice %4 {offsets = [8, 0], sizes = [1, 512], strides = [1, 1]} : vector<9x512xf32> to vector<1x512xf32>
    %55 = arith.extf %53 : vector<4x512xbf16> to vector<4x512xf32>
    %56 = vector.broadcast %54 : vector<1x512xf32> to vector<4x512xf32>
    %57 = arith.mulf %55, %56 : vector<4x512xf32>
    %c32 = arith.constant 32 : index
    %c0_11 = arith.constant 0 : index
    %58 = vector.load %arg6[%c32, %c0_11] : memref<36x512xf32, #tpu.memory_space<vmem>>, vector<4x512xf32>
    tpu.vector_store %arg6[%c32, %c0_11], %57 {strides = array<i32>} : memref<36x512xf32, #tpu.memory_space<vmem>>, vector<4x512xf32>,
    %c0_12 = arith.constant 0 : index
    %c0_13 = arith.constant 0 : index
    %59 = vector.load %arg3[%c0_12, %c0_13] : memref<8x36xbf16, #tpu.memory_space<vmem>>, vector<8x36xbf16>
    %c0_14 = arith.constant 0 : index
    %c0_15 = arith.constant 0 : index
    %60 = vector.load %arg6[%c0_14, %c0_15] : memref<36x512xf32, #tpu.memory_space<vmem>>, vector<36x512xf32>
    %61 = arith.truncf %60 : vector<36x512xf32> to vector<36x512xbf16>
    %cst = arith.constant dense<0.000000e+00> : vector<8x512xf32>
    %62 = tpu.matmul %59, %61, %cst {dimension_numbers = #tpu.dot_dimension_numbers<[1], [0], [0], [1], [0, 0, 1, 1], [], []>} : vector<8x36xbf16>, vector<36x512xbf16>, vector<8x512xf32> -> vector<8x512xf32>
    %c0_16 = arith.constant 0 : index
    %c0_17 = arith.constant 0 : index
    %63 = vector.load %arg4[%c0_16, %c0_17] : memref<8x1xf32, #tpu.memory_space<vmem>>, vector<8x1xf32>
    %64 = vector.broadcast %63 : vector<8x1xf32> to vector<8x512xf32>
    %65 = arith.addf %62, %64 : vector<8x512xf32>
    %cst_18 = arith.constant 0.000000e+00 : f32
    %66 = vector.broadcast %cst_18 : f32 to vector<8x512xf32>
    %67 = arith.maximumf %65, %66 : vector<8x512xf32>
    %68 = arith.truncf %67 : vector<8x512xf32> to vector<8x512xbf16>
    %c0_19 = arith.constant 0 : index
    %c0_20 = arith.constant 0 : index
    %69 = vector.load %arg5[%c0_19, %c0_20] : memref<8x512xbf16, #tpu.memory_space<vmem>>, vector<8x512xbf16>
    tpu.vector_store %arg5[%c0_19, %c0_20], %68 {strides = array<i32>} : memref<8x512xbf16, #tpu.memory_space<vmem>>, vector<8x512xbf16>,
    return
  }
  func.func @transform_0(%arg0: i32) -> (i32, i32) {
    %c0_i32 = arith.constant 0 : i32
    %c0_i32_0 = arith.constant 0 : i32
    %c0_i32_1 = arith.constant 0 : i32
    return %c0_i32, %c0_i32_0 : i32, i32
  }
  func.func @transform_1(%arg0: i32) -> (i32, i32) {
    %c0_i32 = arith.constant 0 : i32
    %c0_i32_0 = arith.constant 0 : i32
    return %c0_i32, %arg0 : i32, i32
  }
  func.func @transform_2(%arg0: i32) -> (i32, i32) {
    %c0_i32 = arith.constant 0 : i32
    %c0_i32_0 = arith.constant 0 : i32
    %c0_i32_1 = arith.constant 0 : i32
    return %c0_i32, %c0_i32_0 : i32, i32
  }
  func.func @transform_3(%arg0: i32) -> (i32, i32) {
    %c0_i32 = arith.constant 0 : i32
    %c0_i32_0 = arith.constant 0 : i32
    %c0_i32_1 = arith.constant 0 : i32
    return %c0_i32, %c0_i32_0 : i32, i32
  }
  func.func @transform_4(%arg0: i32) -> (i32, i32) {
    %c0_i32 = arith.constant 0 : i32
    %c0_i32_0 = arith.constant 0 : i32
    return %c0_i32, %arg0 : i32, i32
  }
}

module attributes {stable_mosaic.version = 11 : i64} {
  func.func @_conv3x3_kernel(%arg0: i32, %arg1: memref<8x768xbf16, #tpu.memory_space<vmem>>, %arg2: memref<9x512xf32, #tpu.memory_space<vmem>>, %arg3: memref<8x72xbf16, #tpu.memory_space<vmem>>, %arg4: memref<8x1xf32, #tpu.memory_space<vmem>>, %arg5: memref<8x512xbf16, #tpu.memory_space<vmem>>, %arg6: memref<72x512xf32, #tpu.memory_space<vmem>>) attributes {dimension_semantics = [#tpu.dimension_semantics<parallel>], iteration_bounds = array<i64: 1>, scalar_prefetch = 0 : i64, scratch_operands = 1 : i64, tpu.core_type = #tpu.core_type<tc>, window_params = [{pipeline_mode = #tpu.pipeline_mode<synchronous>, transform_indices = @transform_0, window_bounds = array<i64: 8, 768>}, {transform_indices = @transform_1, window_bounds = array<i64: 9, 512>}, {pipeline_mode = #tpu.pipeline_mode<synchronous>, transform_indices = @transform_2, window_bounds = array<i64: 8, 72>}, {pipeline_mode = #tpu.pipeline_mode<synchronous>, transform_indices = @transform_3, window_bounds = array<i64: 8, 1>}, {transform_indices = @transform_4, window_bounds = array<i64: 8, 512>}]} {
    %c512_i32 = arith.constant 512 : i32
    %0 = arith.muli %arg0, %c512_i32 : i32
    %1 = tpu.assume_multiple %0, 128 : i32
    %c0 = arith.constant 0 : index
    %2 = arith.index_cast %1 : i32 to index
    %3 = vector.load %arg1[%c0, %2] : memref<8x768xbf16, #tpu.memory_space<vmem>>, vector<8x768xbf16>
    %c0_0 = arith.constant 0 : index
    %c0_1 = arith.constant 0 : index
    %4 = vector.load %arg2[%c0_0, %c0_1] : memref<9x512xf32, #tpu.memory_space<vmem>>, vector<9x512xf32>
    %5 = vector.extract_strided_slice %3 {offsets = [0, 111], sizes = [8, 512], strides = [1, 1]} : vector<8x768xbf16> to vector<8x512xbf16>
    %6 = vector.extract_strided_slice %4 {offsets = [0, 0], sizes = [1, 512], strides = [1, 1]} : vector<9x512xf32> to vector<1x512xf32>
    %7 = arith.extf %5 : vector<8x512xbf16> to vector<8x512xf32>
    %8 = vector.broadcast %6 : vector<1x512xf32> to vector<8x512xf32>
    %9 = arith.mulf %7, %8 : vector<8x512xf32>
    %c0_2 = arith.constant 0 : index
    %c0_3 = arith.constant 0 : index
    %10 = vector.load %arg6[%c0_2, %c0_3] : memref<72x512xf32, #tpu.memory_space<vmem>>, vector<8x512xf32>
    tpu.vector_store %arg6[%c0_2, %c0_3], %9 {strides = array<i32>} : memref<72x512xf32, #tpu.memory_space<vmem>>, vector<8x512xf32>,
    %11 = vector.extract_strided_slice %3 {offsets = [0, 112], sizes = [8, 512], strides = [1, 1]} : vector<8x768xbf16> to vector<8x512xbf16>
    %12 = vector.extract_strided_slice %4 {offsets = [1, 0], sizes = [1, 512], strides = [1, 1]} : vector<9x512xf32> to vector<1x512xf32>
    %13 = arith.extf %11 : vector<8x512xbf16> to vector<8x512xf32>
    %14 = vector.broadcast %12 : vector<1x512xf32> to vector<8x512xf32>
    %15 = arith.mulf %13, %14 : vector<8x512xf32>
    %c8 = arith.constant 8 : index
    %c0_4 = arith.constant 0 : index
    %16 = vector.load %arg6[%c8, %c0_4] : memref<72x512xf32, #tpu.memory_space<vmem>>, vector<8x512xf32>
    tpu.vector_store %arg6[%c8, %c0_4], %15 {strides = array<i32>} : memref<72x512xf32, #tpu.memory_space<vmem>>, vector<8x512xf32>,
    %17 = vector.extract_strided_slice %3 {offsets = [0, 113], sizes = [8, 512], strides = [1, 1]} : vector<8x768xbf16> to vector<8x512xbf16>
    %18 = vector.extract_strided_slice %4 {offsets = [2, 0], sizes = [1, 512], strides = [1, 1]} : vector<9x512xf32> to vector<1x512xf32>
    %19 = arith.extf %17 : vector<8x512xbf16> to vector<8x512xf32>
    %20 = vector.broadcast %18 : vector<1x512xf32> to vector<8x512xf32>
    %21 = arith.mulf %19, %20 : vector<8x512xf32>
    %c16 = arith.constant 16 : index
    %c0_5 = arith.constant 0 : index
    %22 = vector.load %arg6[%c16, %c0_5] : memref<72x512xf32, #tpu.memory_space<vmem>>, vector<8x512xf32>
    tpu.vector_store %arg6[%c16, %c0_5], %21 {strides = array<i32>} : memref<72x512xf32, #tpu.memory_space<vmem>>, vector<8x512xf32>,
    %23 = vector.extract_strided_slice %3 {offsets = [0, 127], sizes = [8, 512], strides = [1, 1]} : vector<8x768xbf16> to vector<8x512xbf16>
    %24 = vector.extract_strided_slice %4 {offsets = [3, 0], sizes = [1, 512], strides = [1, 1]} : vector<9x512xf32> to vector<1x512xf32>
    %25 = arith.extf %23 : vector<8x512xbf16> to vector<8x512xf32>
    %26 = vector.broadcast %24 : vector<1x512xf32> to vector<8x512xf32>
    %27 = arith.mulf %25, %26 : vector<8x512xf32>
    %c24 = arith.constant 24 : index
    %c0_6 = arith.constant 0 : index
    %28 = vector.load %arg6[%c24, %c0_6] : memref<72x512xf32, #tpu.memory_space<vmem>>, vector<8x512xf32>
    tpu.vector_store %arg6[%c24, %c0_6], %27 {strides = array<i32>} : memref<72x512xf32, #tpu.memory_space<vmem>>, vector<8x512xf32>,
    %29 = vector.extract_strided_slice %3 {offsets = [0, 128], sizes = [8, 512], strides = [1, 1]} : vector<8x768xbf16> to vector<8x512xbf16>
    %30 = vector.extract_strided_slice %4 {offsets = [4, 0], sizes = [1, 512], strides = [1, 1]} : vector<9x512xf32> to vector<1x512xf32>
    %31 = arith.extf %29 : vector<8x512xbf16> to vector<8x512xf32>
    %32 = vector.broadcast %30 : vector<1x512xf32> to vector<8x512xf32>
    %33 = arith.mulf %31, %32 : vector<8x512xf32>
    %c32 = arith.constant 32 : index
    %c0_7 = arith.constant 0 : index
    %34 = vector.load %arg6[%c32, %c0_7] : memref<72x512xf32, #tpu.memory_space<vmem>>, vector<8x512xf32>
    tpu.vector_store %arg6[%c32, %c0_7], %33 {strides = array<i32>} : memref<72x512xf32, #tpu.memory_space<vmem>>, vector<8x512xf32>,
    %35 = vector.extract_strided_slice %3 {offsets = [0, 129], sizes = [8, 512], strides = [1, 1]} : vector<8x768xbf16> to vector<8x512xbf16>
    %36 = vector.extract_strided_slice %4 {offsets = [5, 0], sizes = [1, 512], strides = [1, 1]} : vector<9x512xf32> to vector<1x512xf32>
    %37 = arith.extf %35 : vector<8x512xbf16> to vector<8x512xf32>
    %38 = vector.broadcast %36 : vector<1x512xf32> to vector<8x512xf32>
    %39 = arith.mulf %37, %38 : vector<8x512xf32>
    %c40 = arith.constant 40 : index
    %c0_8 = arith.constant 0 : index
    %40 = vector.load %arg6[%c40, %c0_8] : memref<72x512xf32, #tpu.memory_space<vmem>>, vector<8x512xf32>
    tpu.vector_store %arg6[%c40, %c0_8], %39 {strides = array<i32>} : memref<72x512xf32, #tpu.memory_space<vmem>>, vector<8x512xf32>,
    %41 = vector.extract_strided_slice %3 {offsets = [0, 143], sizes = [8, 512], strides = [1, 1]} : vector<8x768xbf16> to vector<8x512xbf16>
    %42 = vector.extract_strided_slice %4 {offsets = [6, 0], sizes = [1, 512], strides = [1, 1]} : vector<9x512xf32> to vector<1x512xf32>
    %43 = arith.extf %41 : vector<8x512xbf16> to vector<8x512xf32>
    %44 = vector.broadcast %42 : vector<1x512xf32> to vector<8x512xf32>
    %45 = arith.mulf %43, %44 : vector<8x512xf32>
    %c48 = arith.constant 48 : index
    %c0_9 = arith.constant 0 : index
    %46 = vector.load %arg6[%c48, %c0_9] : memref<72x512xf32, #tpu.memory_space<vmem>>, vector<8x512xf32>
    tpu.vector_store %arg6[%c48, %c0_9], %45 {strides = array<i32>} : memref<72x512xf32, #tpu.memory_space<vmem>>, vector<8x512xf32>,
    %47 = vector.extract_strided_slice %3 {offsets = [0, 144], sizes = [8, 512], strides = [1, 1]} : vector<8x768xbf16> to vector<8x512xbf16>
    %48 = vector.extract_strided_slice %4 {offsets = [7, 0], sizes = [1, 512], strides = [1, 1]} : vector<9x512xf32> to vector<1x512xf32>
    %49 = arith.extf %47 : vector<8x512xbf16> to vector<8x512xf32>
    %50 = vector.broadcast %48 : vector<1x512xf32> to vector<8x512xf32>
    %51 = arith.mulf %49, %50 : vector<8x512xf32>
    %c56 = arith.constant 56 : index
    %c0_10 = arith.constant 0 : index
    %52 = vector.load %arg6[%c56, %c0_10] : memref<72x512xf32, #tpu.memory_space<vmem>>, vector<8x512xf32>
    tpu.vector_store %arg6[%c56, %c0_10], %51 {strides = array<i32>} : memref<72x512xf32, #tpu.memory_space<vmem>>, vector<8x512xf32>,
    %53 = vector.extract_strided_slice %3 {offsets = [0, 145], sizes = [8, 512], strides = [1, 1]} : vector<8x768xbf16> to vector<8x512xbf16>
    %54 = vector.extract_strided_slice %4 {offsets = [8, 0], sizes = [1, 512], strides = [1, 1]} : vector<9x512xf32> to vector<1x512xf32>
    %55 = arith.extf %53 : vector<8x512xbf16> to vector<8x512xf32>
    %56 = vector.broadcast %54 : vector<1x512xf32> to vector<8x512xf32>
    %57 = arith.mulf %55, %56 : vector<8x512xf32>
    %c64 = arith.constant 64 : index
    %c0_11 = arith.constant 0 : index
    %58 = vector.load %arg6[%c64, %c0_11] : memref<72x512xf32, #tpu.memory_space<vmem>>, vector<8x512xf32>
    tpu.vector_store %arg6[%c64, %c0_11], %57 {strides = array<i32>} : memref<72x512xf32, #tpu.memory_space<vmem>>, vector<8x512xf32>,
    %c0_12 = arith.constant 0 : index
    %c0_13 = arith.constant 0 : index
    %59 = vector.load %arg3[%c0_12, %c0_13] : memref<8x72xbf16, #tpu.memory_space<vmem>>, vector<8x72xbf16>
    %c0_14 = arith.constant 0 : index
    %c0_15 = arith.constant 0 : index
    %60 = vector.load %arg6[%c0_14, %c0_15] : memref<72x512xf32, #tpu.memory_space<vmem>>, vector<72x512xf32>
    %61 = arith.truncf %60 : vector<72x512xf32> to vector<72x512xbf16>
    %cst = arith.constant dense<0.000000e+00> : vector<8x512xf32>
    %62 = tpu.matmul %59, %61, %cst {dimension_numbers = #tpu.dot_dimension_numbers<[1], [0], [0], [1], [0, 0, 1, 1], [], []>} : vector<8x72xbf16>, vector<72x512xbf16>, vector<8x512xf32> -> vector<8x512xf32>
    %c0_16 = arith.constant 0 : index
    %c0_17 = arith.constant 0 : index
    %63 = vector.load %arg4[%c0_16, %c0_17] : memref<8x1xf32, #tpu.memory_space<vmem>>, vector<8x1xf32>
    %64 = vector.broadcast %63 : vector<8x1xf32> to vector<8x512xf32>
    %65 = arith.addf %62, %64 : vector<8x512xf32>
    %cst_18 = arith.constant 0.000000e+00 : f32
    %66 = vector.broadcast %cst_18 : f32 to vector<8x512xf32>
    %67 = arith.maximumf %65, %66 : vector<8x512xf32>
    %68 = arith.truncf %67 : vector<8x512xf32> to vector<8x512xbf16>
    %c0_19 = arith.constant 0 : index
    %c0_20 = arith.constant 0 : index
    %69 = vector.load %arg5[%c0_19, %c0_20] : memref<8x512xbf16, #tpu.memory_space<vmem>>, vector<8x512xbf16>
    tpu.vector_store %arg5[%c0_19, %c0_20], %68 {strides = array<i32>} : memref<8x512xbf16, #tpu.memory_space<vmem>>, vector<8x512xbf16>,
    return
  }
  func.func @transform_0(%arg0: i32) -> (i32, i32) {
    %c0_i32 = arith.constant 0 : i32
    %c0_i32_0 = arith.constant 0 : i32
    %c0_i32_1 = arith.constant 0 : i32
    return %c0_i32, %c0_i32_0 : i32, i32
  }
  func.func @transform_1(%arg0: i32) -> (i32, i32) {
    %c0_i32 = arith.constant 0 : i32
    %c0_i32_0 = arith.constant 0 : i32
    return %c0_i32, %arg0 : i32, i32
  }
  func.func @transform_2(%arg0: i32) -> (i32, i32) {
    %c0_i32 = arith.constant 0 : i32
    %c0_i32_0 = arith.constant 0 : i32
    %c0_i32_1 = arith.constant 0 : i32
    return %c0_i32, %c0_i32_0 : i32, i32
  }
  func.func @transform_3(%arg0: i32) -> (i32, i32) {
    %c0_i32 = arith.constant 0 : i32
    %c0_i32_0 = arith.constant 0 : i32
    %c0_i32_1 = arith.constant 0 : i32
    return %c0_i32, %c0_i32_0 : i32, i32
  }
  func.func @transform_4(%arg0: i32) -> (i32, i32) {
    %c0_i32 = arith.constant 0 : i32
    %c0_i32_0 = arith.constant 0 : i32
    return %c0_i32, %arg0 : i32, i32
  }
}

module attributes {stable_mosaic.version = 11 : i64} {
  func.func @_conv3x3_kernel(%arg0: i32, %arg1: memref<8x768xbf16, #tpu.memory_space<vmem>>, %arg2: memref<9x512xf32, #tpu.memory_space<vmem>>, %arg3: memref<8x72xbf16, #tpu.memory_space<vmem>>, %arg4: memref<8x1xf32, #tpu.memory_space<vmem>>, %arg5: memref<8x512xbf16, #tpu.memory_space<vmem>>, %arg6: memref<72x512xf32, #tpu.memory_space<vmem>>) attributes {dimension_semantics = [#tpu.dimension_semantics<parallel>], iteration_bounds = array<i64: 1>, scalar_prefetch = 0 : i64, scratch_operands = 1 : i64, tpu.core_type = #tpu.core_type<tc>, window_params = [{pipeline_mode = #tpu.pipeline_mode<synchronous>, transform_indices = @transform_0, window_bounds = array<i64: 8, 768>}, {transform_indices = @transform_1, window_bounds = array<i64: 9, 512>}, {pipeline_mode = #tpu.pipeline_mode<synchronous>, transform_indices = @transform_2, window_bounds = array<i64: 8, 72>}, {pipeline_mode = #tpu.pipeline_mode<synchronous>, transform_indices = @transform_3, window_bounds = array<i64: 8, 1>}, {transform_indices = @transform_4, window_bounds = array<i64: 8, 512>}]} {
    %c512_i32 = arith.constant 512 : i32
    %0 = arith.muli %arg0, %c512_i32 : i32
    %1 = tpu.assume_multiple %0, 128 : i32
    %c0 = arith.constant 0 : index
    %2 = arith.index_cast %1 : i32 to index
    %3 = vector.load %arg1[%c0, %2] : memref<8x768xbf16, #tpu.memory_space<vmem>>, vector<8x768xbf16>
    %c0_0 = arith.constant 0 : index
    %c0_1 = arith.constant 0 : index
    %4 = vector.load %arg2[%c0_0, %c0_1] : memref<9x512xf32, #tpu.memory_space<vmem>>, vector<9x512xf32>
    %5 = vector.extract_strided_slice %3 {offsets = [0, 111], sizes = [8, 512], strides = [1, 1]} : vector<8x768xbf16> to vector<8x512xbf16>
    %6 = vector.extract_strided_slice %4 {offsets = [0, 0], sizes = [1, 512], strides = [1, 1]} : vector<9x512xf32> to vector<1x512xf32>
    %7 = arith.extf %5 : vector<8x512xbf16> to vector<8x512xf32>
    %8 = vector.broadcast %6 : vector<1x512xf32> to vector<8x512xf32>
    %9 = arith.mulf %7, %8 : vector<8x512xf32>
    %c0_2 = arith.constant 0 : index
    %c0_3 = arith.constant 0 : index
    %10 = vector.load %arg6[%c0_2, %c0_3] : memref<72x512xf32, #tpu.memory_space<vmem>>, vector<8x512xf32>
    tpu.vector_store %arg6[%c0_2, %c0_3], %9 {strides = array<i32>} : memref<72x512xf32, #tpu.memory_space<vmem>>, vector<8x512xf32>,
    %11 = vector.extract_strided_slice %3 {offsets = [0, 112], sizes = [8, 512], strides = [1, 1]} : vector<8x768xbf16> to vector<8x512xbf16>
    %12 = vector.extract_strided_slice %4 {offsets = [1, 0], sizes = [1, 512], strides = [1, 1]} : vector<9x512xf32> to vector<1x512xf32>
    %13 = arith.extf %11 : vector<8x512xbf16> to vector<8x512xf32>
    %14 = vector.broadcast %12 : vector<1x512xf32> to vector<8x512xf32>
    %15 = arith.mulf %13, %14 : vector<8x512xf32>
    %c8 = arith.constant 8 : index
    %c0_4 = arith.constant 0 : index
    %16 = vector.load %arg6[%c8, %c0_4] : memref<72x512xf32, #tpu.memory_space<vmem>>, vector<8x512xf32>
    tpu.vector_store %arg6[%c8, %c0_4], %15 {strides = array<i32>} : memref<72x512xf32, #tpu.memory_space<vmem>>, vector<8x512xf32>,
    %17 = vector.extract_strided_slice %3 {offsets = [0, 113], sizes = [8, 512], strides = [1, 1]} : vector<8x768xbf16> to vector<8x512xbf16>
    %18 = vector.extract_strided_slice %4 {offsets = [2, 0], sizes = [1, 512], strides = [1, 1]} : vector<9x512xf32> to vector<1x512xf32>
    %19 = arith.extf %17 : vector<8x512xbf16> to vector<8x512xf32>
    %20 = vector.broadcast %18 : vector<1x512xf32> to vector<8x512xf32>
    %21 = arith.mulf %19, %20 : vector<8x512xf32>
    %c16 = arith.constant 16 : index
    %c0_5 = arith.constant 0 : index
    %22 = vector.load %arg6[%c16, %c0_5] : memref<72x512xf32, #tpu.memory_space<vmem>>, vector<8x512xf32>
    tpu.vector_store %arg6[%c16, %c0_5], %21 {strides = array<i32>} : memref<72x512xf32, #tpu.memory_space<vmem>>, vector<8x512xf32>,
    %23 = vector.extract_strided_slice %3 {offsets = [0, 127], sizes = [8, 512], strides = [1, 1]} : vector<8x768xbf16> to vector<8x512xbf16>
    %24 = vector.extract_strided_slice %4 {offsets = [3, 0], sizes = [1, 512], strides = [1, 1]} : vector<9x512xf32> to vector<1x512xf32>
    %25 = arith.extf %23 : vector<8x512xbf16> to vector<8x512xf32>
    %26 = vector.broadcast %24 : vector<1x512xf32> to vector<8x512xf32>
    %27 = arith.mulf %25, %26 : vector<8x512xf32>
    %c24 = arith.constant 24 : index
    %c0_6 = arith.constant 0 : index
    %28 = vector.load %arg6[%c24, %c0_6] : memref<72x512xf32, #tpu.memory_space<vmem>>, vector<8x512xf32>
    tpu.vector_store %arg6[%c24, %c0_6], %27 {strides = array<i32>} : memref<72x512xf32, #tpu.memory_space<vmem>>, vector<8x512xf32>,
    %29 = vector.extract_strided_slice %3 {offsets = [0, 128], sizes = [8, 512], strides = [1, 1]} : vector<8x768xbf16> to vector<8x512xbf16>
    %30 = vector.extract_strided_slice %4 {offsets = [4, 0], sizes = [1, 512], strides = [1, 1]} : vector<9x512xf32> to vector<1x512xf32>
    %31 = arith.extf %29 : vector<8x512xbf16> to vector<8x512xf32>
    %32 = vector.broadcast %30 : vector<1x512xf32> to vector<8x512xf32>
    %33 = arith.mulf %31, %32 : vector<8x512xf32>
    %c32 = arith.constant 32 : index
    %c0_7 = arith.constant 0 : index
    %34 = vector.load %arg6[%c32, %c0_7] : memref<72x512xf32, #tpu.memory_space<vmem>>, vector<8x512xf32>
    tpu.vector_store %arg6[%c32, %c0_7], %33 {strides = array<i32>} : memref<72x512xf32, #tpu.memory_space<vmem>>, vector<8x512xf32>,
    %35 = vector.extract_strided_slice %3 {offsets = [0, 129], sizes = [8, 512], strides = [1, 1]} : vector<8x768xbf16> to vector<8x512xbf16>
    %36 = vector.extract_strided_slice %4 {offsets = [5, 0], sizes = [1, 512], strides = [1, 1]} : vector<9x512xf32> to vector<1x512xf32>
    %37 = arith.extf %35 : vector<8x512xbf16> to vector<8x512xf32>
    %38 = vector.broadcast %36 : vector<1x512xf32> to vector<8x512xf32>
    %39 = arith.mulf %37, %38 : vector<8x512xf32>
    %c40 = arith.constant 40 : index
    %c0_8 = arith.constant 0 : index
    %40 = vector.load %arg6[%c40, %c0_8] : memref<72x512xf32, #tpu.memory_space<vmem>>, vector<8x512xf32>
    tpu.vector_store %arg6[%c40, %c0_8], %39 {strides = array<i32>} : memref<72x512xf32, #tpu.memory_space<vmem>>, vector<8x512xf32>,
    %41 = vector.extract_strided_slice %3 {offsets = [0, 143], sizes = [8, 512], strides = [1, 1]} : vector<8x768xbf16> to vector<8x512xbf16>
    %42 = vector.extract_strided_slice %4 {offsets = [6, 0], sizes = [1, 512], strides = [1, 1]} : vector<9x512xf32> to vector<1x512xf32>
    %43 = arith.extf %41 : vector<8x512xbf16> to vector<8x512xf32>
    %44 = vector.broadcast %42 : vector<1x512xf32> to vector<8x512xf32>
    %45 = arith.mulf %43, %44 : vector<8x512xf32>
    %c48 = arith.constant 48 : index
    %c0_9 = arith.constant 0 : index
    %46 = vector.load %arg6[%c48, %c0_9] : memref<72x512xf32, #tpu.memory_space<vmem>>, vector<8x512xf32>
    tpu.vector_store %arg6[%c48, %c0_9], %45 {strides = array<i32>} : memref<72x512xf32, #tpu.memory_space<vmem>>, vector<8x512xf32>,
    %47 = vector.extract_strided_slice %3 {offsets = [0, 144], sizes = [8, 512], strides = [1, 1]} : vector<8x768xbf16> to vector<8x512xbf16>
    %48 = vector.extract_strided_slice %4 {offsets = [7, 0], sizes = [1, 512], strides = [1, 1]} : vector<9x512xf32> to vector<1x512xf32>
    %49 = arith.extf %47 : vector<8x512xbf16> to vector<8x512xf32>
    %50 = vector.broadcast %48 : vector<1x512xf32> to vector<8x512xf32>
    %51 = arith.mulf %49, %50 : vector<8x512xf32>
    %c56 = arith.constant 56 : index
    %c0_10 = arith.constant 0 : index
    %52 = vector.load %arg6[%c56, %c0_10] : memref<72x512xf32, #tpu.memory_space<vmem>>, vector<8x512xf32>
    tpu.vector_store %arg6[%c56, %c0_10], %51 {strides = array<i32>} : memref<72x512xf32, #tpu.memory_space<vmem>>, vector<8x512xf32>,
    %53 = vector.extract_strided_slice %3 {offsets = [0, 145], sizes = [8, 512], strides = [1, 1]} : vector<8x768xbf16> to vector<8x512xbf16>
    %54 = vector.extract_strided_slice %4 {offsets = [8, 0], sizes = [1, 512], strides = [1, 1]} : vector<9x512xf32> to vector<1x512xf32>
    %55 = arith.extf %53 : vector<8x512xbf16> to vector<8x512xf32>
    %56 = vector.broadcast %54 : vector<1x512xf32> to vector<8x512xf32>
    %57 = arith.mulf %55, %56 : vector<8x512xf32>
    %c64 = arith.constant 64 : index
    %c0_11 = arith.constant 0 : index
    %58 = vector.load %arg6[%c64, %c0_11] : memref<72x512xf32, #tpu.memory_space<vmem>>, vector<8x512xf32>
    tpu.vector_store %arg6[%c64, %c0_11], %57 {strides = array<i32>} : memref<72x512xf32, #tpu.memory_space<vmem>>, vector<8x512xf32>,
    %c0_12 = arith.constant 0 : index
    %c0_13 = arith.constant 0 : index
    %59 = vector.load %arg3[%c0_12, %c0_13] : memref<8x72xbf16, #tpu.memory_space<vmem>>, vector<8x72xbf16>
    %c0_14 = arith.constant 0 : index
    %c0_15 = arith.constant 0 : index
    %60 = vector.load %arg6[%c0_14, %c0_15] : memref<72x512xf32, #tpu.memory_space<vmem>>, vector<72x512xf32>
    %61 = arith.truncf %60 : vector<72x512xf32> to vector<72x512xbf16>
    %cst = arith.constant dense<0.000000e+00> : vector<8x512xf32>
    %62 = tpu.matmul %59, %61, %cst {dimension_numbers = #tpu.dot_dimension_numbers<[1], [0], [0], [1], [0, 0, 1, 1], [], []>} : vector<8x72xbf16>, vector<72x512xbf16>, vector<8x512xf32> -> vector<8x512xf32>
    %c0_16 = arith.constant 0 : index
    %c0_17 = arith.constant 0 : index
    %63 = vector.load %arg4[%c0_16, %c0_17] : memref<8x1xf32, #tpu.memory_space<vmem>>, vector<8x1xf32>
    %64 = vector.broadcast %63 : vector<8x1xf32> to vector<8x512xf32>
    %65 = arith.addf %62, %64 : vector<8x512xf32>
    %66 = arith.truncf %65 : vector<8x512xf32> to vector<8x512xbf16>
    %c0_18 = arith.constant 0 : index
    %c0_19 = arith.constant 0 : index
    %67 = vector.load %arg5[%c0_18, %c0_19] : memref<8x512xbf16, #tpu.memory_space<vmem>>, vector<8x512xbf16>
    tpu.vector_store %arg5[%c0_18, %c0_19], %66 {strides = array<i32>} : memref<8x512xbf16, #tpu.memory_space<vmem>>, vector<8x512xbf16>,
    return
  }
  func.func @transform_0(%arg0: i32) -> (i32, i32) {
    %c0_i32 = arith.constant 0 : i32
    %c0_i32_0 = arith.constant 0 : i32
    %c0_i32_1 = arith.constant 0 : i32
    return %c0_i32, %c0_i32_0 : i32, i32
  }
  func.func @transform_1(%arg0: i32) -> (i32, i32) {
    %c0_i32 = arith.constant 0 : i32
    %c0_i32_0 = arith.constant 0 : i32
    return %c0_i32, %arg0 : i32, i32
  }
  func.func @transform_2(%arg0: i32) -> (i32, i32) {
    %c0_i32 = arith.constant 0 : i32
    %c0_i32_0 = arith.constant 0 : i32
    %c0_i32_1 = arith.constant 0 : i32
    return %c0_i32, %c0_i32_0 : i32, i32
  }
  func.func @transform_3(%arg0: i32) -> (i32, i32) {
    %c0_i32 = arith.constant 0 : i32
    %c0_i32_0 = arith.constant 0 : i32
    %c0_i32_1 = arith.constant 0 : i32
    return %c0_i32, %c0_i32_0 : i32, i32
  }
  func.func @transform_4(%arg0: i32) -> (i32, i32) {
    %c0_i32 = arith.constant 0 : i32
    %c0_i32_0 = arith.constant 0 : i32
    return %c0_i32, %arg0 : i32, i32
  }
}

module attributes {stable_mosaic.version = 11 : i64} {
  func.func @_nl_flash_kernel(%arg0: i32, %arg1: i32, %arg2: memref<8x256xbf16, #tpu.memory_space<vmem>>, %arg3: memref<8x256xbf16, #tpu.memory_space<vmem>>, %arg4: memref<4x8xbf16, #tpu.memory_space<vmem>>, %arg5: memref<4x1xf32, #tpu.memory_space<vmem>>, %arg6: memref<4x8xbf16, #tpu.memory_space<vmem>>, %arg7: memref<4x1xf32, #tpu.memory_space<vmem>>, %arg8: memref<4x8xbf16, #tpu.memory_space<vmem>>, %arg9: memref<4x1xf32, #tpu.memory_space<vmem>>, %arg10: memref<8x4xbf16, #tpu.memory_space<vmem>>, %arg11: memref<8x1xf32, #tpu.memory_space<vmem>>, %arg12: memref<8x256xbf16, #tpu.memory_space<vmem>>, %arg13: memref<4x256xbf16, #tpu.memory_space<vmem>>, %arg14: memref<4x256xbf16, #tpu.memory_space<vmem>>) attributes {dimension_semantics = [#tpu.dimension_semantics<parallel>, #tpu.dimension_semantics<arbitrary>], iteration_bounds = array<i64: 2, 1>, scalar_prefetch = 0 : i64, scratch_operands = 2 : i64, tpu.core_type = #tpu.core_type<tc>, window_params = [{transform_indices = @transform_0, window_bounds = array<i64: 8, 256>}, {transform_indices = @transform_1, window_bounds = array<i64: 8, 256>}, {pipeline_mode = #tpu.pipeline_mode<synchronous>, transform_indices = @transform_2, window_bounds = array<i64: 4, 8>}, {pipeline_mode = #tpu.pipeline_mode<synchronous>, transform_indices = @transform_3, window_bounds = array<i64: 4, 1>}, {pipeline_mode = #tpu.pipeline_mode<synchronous>, transform_indices = @transform_4, window_bounds = array<i64: 4, 8>}, {pipeline_mode = #tpu.pipeline_mode<synchronous>, transform_indices = @transform_5, window_bounds = array<i64: 4, 1>}, {pipeline_mode = #tpu.pipeline_mode<synchronous>, transform_indices = @transform_6, window_bounds = array<i64: 4, 8>}, {pipeline_mode = #tpu.pipeline_mode<synchronous>, transform_indices = @transform_7, window_bounds = array<i64: 4, 1>}, {pipeline_mode = #tpu.pipeline_mode<synchronous>, transform_indices = @transform_8, window_bounds = array<i64: 8, 4>}, {pipeline_mode = #tpu.pipeline_mode<synchronous>, transform_indices = @transform_9, window_bounds = array<i64: 8, 1>}, {transform_indices = @transform_10, window_bounds = array<i64: 8, 256>}]} {
    %c0_i32 = arith.constant 0 : i32
    %0 = arith.cmpi eq, %arg1, %c0_i32 : i32
    %1 = arith.extui %0 : i1 to i32
    %c0_i32_0 = arith.constant 0 : i32
    %2 = arith.cmpi ne, %1, %c0_i32_0 : i32
    scf.if %2 {
      %c0_23 = arith.constant 0 : index
      %c0_24 = arith.constant 0 : index
      %50 = vector.load %arg3[%c0_23, %c0_24] : memref<8x256xbf16, #tpu.memory_space<vmem>>, vector<8x256xbf16>
      %c0_25 = arith.constant 0 : index
      %c0_26 = arith.constant 0 : index
      %51 = vector.load %arg6[%c0_25, %c0_26] : memref<4x8xbf16, #tpu.memory_space<vmem>>, vector<4x8xbf16>
      %cst_27 = arith.constant dense<0.000000e+00> : vector<4x256xf32>
      %52 = tpu.matmul %51, %50, %cst_27 {dimension_numbers = #tpu.dot_dimension_numbers<[1], [0], [0], [1], [0, 0, 1, 1], [], []>} : vector<4x8xbf16>, vector<8x256xbf16>, vector<4x256xf32> -> vector<4x256xf32>
      %c0_28 = arith.constant 0 : index
      %c0_29 = arith.constant 0 : index
      %53 = vector.load %arg7[%c0_28, %c0_29] : memref<4x1xf32, #tpu.memory_space<vmem>>, vector<4x1xf32>
      %54 = vector.broadcast %53 : vector<4x1xf32> to vector<4x256xf32>
      %55 = arith.addf %52, %54 : vector<4x256xf32>
      %56 = arith.truncf %55 : vector<4x256xf32> to vector<4x256xbf16>
      %c0_30 = arith.constant 0 : index
      %c0_31 = arith.constant 0 : index
      %57 = vector.load %arg13[%c0_30, %c0_31] : memref<4x256xbf16, #tpu.memory_space<vmem>>, vector<4x256xbf16>
      tpu.vector_store %arg13[%c0_30, %c0_31], %56 {strides = array<i32>} : memref<4x256xbf16, #tpu.memory_space<vmem>>, vector<4x256xbf16>,
      %c0_32 = arith.constant 0 : index
      %c0_33 = arith.constant 0 : index
      %58 = vector.load %arg8[%c0_32, %c0_33] : memref<4x8xbf16, #tpu.memory_space<vmem>>, vector<4x8xbf16>
      %cst_34 = arith.constant dense<0.000000e+00> : vector<4x256xf32>
      %59 = tpu.matmul %58, %50, %cst_34 {dimension_numbers = #tpu.dot_dimension_numbers<[1], [0], [0], [1], [0, 0, 1, 1], [], []>} : vector<4x8xbf16>, vector<8x256xbf16>, vector<4x256xf32> -> vector<4x256xf32>
      %c0_35 = arith.constant 0 : index
      %c0_36 = arith.constant 0 : index
      %60 = vector.load %arg9[%c0_35, %c0_36] : memref<4x1xf32, #tpu.memory_space<vmem>>, vector<4x1xf32>
      %61 = vector.broadcast %60 : vector<4x1xf32> to vector<4x256xf32>
      %62 = arith.addf %59, %61 : vector<4x256xf32>
      %63 = arith.truncf %62 : vector<4x256xf32> to vector<4x256xbf16>
      %c0_37 = arith.constant 0 : index
      %c0_38 = arith.constant 0 : index
      %64 = vector.load %arg14[%c0_37, %c0_38] : memref<4x256xbf16, #tpu.memory_space<vmem>>, vector<4x256xbf16>
      tpu.vector_store %arg14[%c0_37, %c0_38], %63 {strides = array<i32>} : memref<4x256xbf16, #tpu.memory_space<vmem>>, vector<4x256xbf16>,
    } else {
    }
    %c0 = arith.constant 0 : index
    %c0_1 = arith.constant 0 : index
    %3 = vector.load %arg2[%c0, %c0_1] : memref<8x256xbf16, #tpu.memory_space<vmem>>, vector<8x256xbf16>
    %c0_2 = arith.constant 0 : index
    %c0_3 = arith.constant 0 : index
    %4 = vector.load %arg4[%c0_2, %c0_3] : memref<4x8xbf16, #tpu.memory_space<vmem>>, vector<4x8xbf16>
    %cst = arith.constant dense<0.000000e+00> : vector<4x256xf32>
    %5 = tpu.matmul %4, %3, %cst {dimension_numbers = #tpu.dot_dimension_numbers<[1], [0], [0], [1], [0, 0, 1, 1], [], []>} : vector<4x8xbf16>, vector<8x256xbf16>, vector<4x256xf32> -> vector<4x256xf32>
    %c0_4 = arith.constant 0 : index
    %c0_5 = arith.constant 0 : index
    %6 = vector.load %arg5[%c0_4, %c0_5] : memref<4x1xf32, #tpu.memory_space<vmem>>, vector<4x1xf32>
    %7 = vector.broadcast %6 : vector<4x1xf32> to vector<4x256xf32>
    %8 = arith.addf %5, %7 : vector<4x256xf32>
    %9 = arith.truncf %8 : vector<4x256xf32> to vector<4x256xbf16>
    %cst_6 = arith.constant 0xFF800000 : f32
    %10 = vector.broadcast %cst_6 : f32 to vector<1x256xf32>
    %cst_7 = arith.constant 0.000000e+00 : f32
    %11 = vector.broadcast %cst_7 : f32 to vector<1x256xf32>
    %cst_8 = arith.constant 0.000000e+00 : f32
    %12 = vector.broadcast %cst_8 : f32 to vector<4x256xf32>
    %c0_i32_9 = arith.constant 0 : i32
    %c256_i32 = arith.constant 256 : i32
    %13 = arith.muli %c0_i32_9, %c256_i32 : i32
    %14 = tpu.assume_multiple %13, 128 : i32
    %c0_10 = arith.constant 0 : index
    %15 = arith.index_cast %14 : i32 to index
    %16 = vector.load %arg13[%c0_10, %15] : memref<4x256xbf16, #tpu.memory_space<vmem>>, vector<4x256xbf16>
    %c0_11 = arith.constant 0 : index
    %17 = arith.index_cast %14 : i32 to index
    %18 = vector.load %arg14[%c0_11, %17] : memref<4x256xbf16, #tpu.memory_space<vmem>>, vector<4x256xbf16>
    %cst_12 = arith.constant dense<0.000000e+00> : vector<256x256xf32>
    %19 = tpu.matmul %16, %9, %cst_12 {dimension_numbers = #tpu.dot_dimension_numbers<[0], [0], [1], [1], [0, 1, 1, 1], [], []>} : vector<4x256xbf16>, vector<4x256xbf16>, vector<256x256xf32> -> vector<256x256xf32>
    %cst_13 = arith.constant dense<0xFF800000> : vector<256xf32>
    %20 = vector.multi_reduction <maximumf>, %19, %cst_13 [0] : vector<256x256xf32> to vector<256xf32>
    %21 = vector.shape_cast %20 : vector<256xf32> to vector<1x256xf32>
    %22 = arith.maximumf %10, %21 : vector<1x256xf32>
    %23 = arith.subf %10, %22 : vector<1x256xf32>
    %24 = math.exp %23 : vector<1x256xf32>
    %25 = vector.broadcast %22 : vector<1x256xf32> to vector<256x256xf32>
    %26 = arith.subf %19, %25 : vector<256x256xf32>
    %27 = math.exp %26 : vector<256x256xf32>
    %28 = arith.mulf %24, %11 : vector<1x256xf32>
    %cst_14 = arith.constant dense<0.000000e+00> : vector<256xf32>
    %29 = vector.multi_reduction <add>, %27, %cst_14 [0] : vector<256x256xf32> to vector<256xf32>
    %30 = vector.shape_cast %29 : vector<256xf32> to vector<1x256xf32>
    %31 = arith.addf %28, %30 : vector<1x256xf32>
    %32 = arith.truncf %27 : vector<256x256xf32> to vector<256x256xbf16>
    %cst_15 = arith.constant dense<0.000000e+00> : vector<4x256xf32>
    %33 = tpu.matmul %18, %32, %cst_15 {dimension_numbers = #tpu.dot_dimension_numbers<[1], [0], [0], [1], [0, 0, 1, 1], [], []>} : vector<4x256xbf16>, vector<256x256xbf16>, vector<4x256xf32> -> vector<4x256xf32>
    %34 = vector.broadcast %24 : vector<1x256xf32> to vector<4x256xf32>
    %35 = arith.mulf %34, %12 : vector<4x256xf32>
    %36 = arith.addf %35, %33 : vector<4x256xf32>
    %c1_i32 = arith.constant 1 : i32
    %37 = tpu.reciprocal %31 {approx = true} : vector<1x256xf32> -> vector<1x256xf32>
    %38 = vector.broadcast %37 : vector<1x256xf32> to vector<4x256xf32>
    %39 = arith.mulf %36, %38 : vector<4x256xf32>
    %c0_16 = arith.constant 0 : index
    %c0_17 = arith.constant 0 : index
    %40 = vector.load %arg10[%c0_16, %c0_17] : memref<8x4xbf16, #tpu.memory_space<vmem>>, vector<8x4xbf16>
    %41 = arith.truncf %39 : vector<4x256xf32> to vector<4x256xbf16>
    %cst_18 = arith.constant dense<0.000000e+00> : vector<8x256xf32>
    %42 = tpu.matmul %40, %41, %cst_18 {dimension_numbers = #tpu.dot_dimension_numbers<[1], [0], [0], [1], [0, 0, 1, 1], [], []>} : vector<8x4xbf16>, vector<4x256xbf16>, vector<8x256xf32> -> vector<8x256xf32>
    %c0_19 = arith.constant 0 : index
    %c0_20 = arith.constant 0 : index
    %43 = vector.load %arg11[%c0_19, %c0_20] : memref<8x1xf32, #tpu.memory_space<vmem>>, vector<8x1xf32>
    %44 = vector.broadcast %43 : vector<8x1xf32> to vector<8x256xf32>
    %45 = arith.addf %42, %44 : vector<8x256xf32>
    %46 = arith.extf %3 : vector<8x256xbf16> to vector<8x256xf32>
    %47 = arith.addf %45, %46 : vector<8x256xf32>
    %48 = arith.truncf %47 : vector<8x256xf32> to vector<8x256xbf16>
    %c0_21 = arith.constant 0 : index
    %c0_22 = arith.constant 0 : index
    %49 = vector.load %arg12[%c0_21, %c0_22] : memref<8x256xbf16, #tpu.memory_space<vmem>>, vector<8x256xbf16>
    tpu.vector_store %arg12[%c0_21, %c0_22], %48 {strides = array<i32>} : memref<8x256xbf16, #tpu.memory_space<vmem>>, vector<8x256xbf16>,
    return
  }
  func.func @transform_0(%arg0: i32, %arg1: i32) -> (i32, i32) {
    %c1_i32 = arith.constant 1 : i32
    %0 = arith.muli %arg0, %c1_i32 : i32
    %1 = arith.addi %0, %arg1 : i32
    %c0_i32 = arith.constant 0 : i32
    %c0_i32_0 = arith.constant 0 : i32
    return %c0_i32, %1 : i32, i32
  }
  func.func @transform_1(%arg0: i32, %arg1: i32) -> (i32, i32) {
    %c0_i32 = arith.constant 0 : i32
    %c0_i32_0 = arith.constant 0 : i32
    return %c0_i32, %arg0 : i32, i32
  }
  func.func @transform_2(%arg0: i32, %arg1: i32) -> (i32, i32) {
    %c0_i32 = arith.constant 0 : i32
    %c0_i32_0 = arith.constant 0 : i32
    %c0_i32_1 = arith.constant 0 : i32
    return %c0_i32, %c0_i32_0 : i32, i32
  }
  func.func @transform_3(%arg0: i32, %arg1: i32) -> (i32, i32) {
    %c0_i32 = arith.constant 0 : i32
    %c0_i32_0 = arith.constant 0 : i32
    %c0_i32_1 = arith.constant 0 : i32
    return %c0_i32, %c0_i32_0 : i32, i32
  }
  func.func @transform_4(%arg0: i32, %arg1: i32) -> (i32, i32) {
    %c0_i32 = arith.constant 0 : i32
    %c0_i32_0 = arith.constant 0 : i32
    %c0_i32_1 = arith.constant 0 : i32
    return %c0_i32, %c0_i32_0 : i32, i32
  }
  func.func @transform_5(%arg0: i32, %arg1: i32) -> (i32, i32) {
    %c0_i32 = arith.constant 0 : i32
    %c0_i32_0 = arith.constant 0 : i32
    %c0_i32_1 = arith.constant 0 : i32
    return %c0_i32, %c0_i32_0 : i32, i32
  }
  func.func @transform_6(%arg0: i32, %arg1: i32) -> (i32, i32) {
    %c0_i32 = arith.constant 0 : i32
    %c0_i32_0 = arith.constant 0 : i32
    %c0_i32_1 = arith.constant 0 : i32
    return %c0_i32, %c0_i32_0 : i32, i32
  }
  func.func @transform_7(%arg0: i32, %arg1: i32) -> (i32, i32) {
    %c0_i32 = arith.constant 0 : i32
    %c0_i32_0 = arith.constant 0 : i32
    %c0_i32_1 = arith.constant 0 : i32
    return %c0_i32, %c0_i32_0 : i32, i32
  }
  func.func @transform_8(%arg0: i32, %arg1: i32) -> (i32, i32) {
    %c0_i32 = arith.constant 0 : i32
    %c0_i32_0 = arith.constant 0 : i32
    %c0_i32_1 = arith.constant 0 : i32
    return %c0_i32, %c0_i32_0 : i32, i32
  }
  func.func @transform_9(%arg0: i32, %arg1: i32) -> (i32, i32) {
    %c0_i32 = arith.constant 0 : i32
    %c0_i32_0 = arith.constant 0 : i32
    %c0_i32_1 = arith.constant 0 : i32
    return %c0_i32, %c0_i32_0 : i32, i32
  }
  func.func @transform_10(%arg0: i32, %arg1: i32) -> (i32, i32) {
    %c1_i32 = arith.constant 1 : i32
    %0 = arith.muli %arg0, %c1_i32 : i32
    %1 = arith.addi %0, %arg1 : i32
    %c0_i32 = arith.constant 0 : i32
    %c0_i32_0 = arith.constant 0 : i32
    return %c0_i32, %1 : i32, i32
  }
}

module attributes {stable_mosaic.version = 11 : i64} {
  func.func @_ces_fold_kernel(%arg0: i32, %arg1: memref<36x256xbf16, #tpu.memory_space<vmem>>, %arg2: memref<9x256xf32, #tpu.memory_space<vmem>>, %arg3: memref<1x256xf32, #tpu.memory_space<vmem>>, %arg4: memref<8x256xbf16, #tpu.memory_space<vmem>>, %arg5: memref<8x4xbf16, #tpu.memory_space<vmem>>, %arg6: memref<8x1xf32, #tpu.memory_space<vmem>>, %arg7: memref<8x256xbf16, #tpu.memory_space<vmem>>) attributes {dimension_semantics = [#tpu.dimension_semantics<parallel>], iteration_bounds = array<i64: 2>, scalar_prefetch = 0 : i64, scratch_operands = 0 : i64, tpu.core_type = #tpu.core_type<tc>, window_params = [{transform_indices = @transform_0, window_bounds = array<i64: 36, 256>}, {pipeline_mode = #tpu.pipeline_mode<synchronous>, transform_indices = @transform_1, window_bounds = array<i64: 9, 256>}, {pipeline_mode = #tpu.pipeline_mode<synchronous>, transform_indices = @transform_2, window_bounds = array<i64: 1, 256>}, {transform_indices = @transform_3, window_bounds = array<i64: 8, 256>}, {pipeline_mode = #tpu.pipeline_mode<synchronous>, transform_indices = @transform_4, window_bounds = array<i64: 8, 4>}, {pipeline_mode = #tpu.pipeline_mode<synchronous>, transform_indices = @transform_5, window_bounds = array<i64: 8, 1>}, {transform_indices = @transform_6, window_bounds = array<i64: 8, 256>}]} {
    %c0 = arith.constant 0 : index
    %c0_0 = arith.constant 0 : index
    %0 = vector.load %arg1[%c0, %c0_0] : memref<36x256xbf16, #tpu.memory_space<vmem>>, vector<36x256xbf16>
    %1 = arith.extf %0 : vector<36x256xbf16> to vector<36x256xf32>
    %c0_1 = arith.constant 0 : index
    %c0_2 = arith.constant 0 : index
    %2 = vector.load %arg2[%c0_1, %c0_2] : memref<9x256xf32, #tpu.memory_space<vmem>>, vector<9x256xf32>
    %cst = arith.constant 0.000000e+00 : f32
    %3 = vector.broadcast %cst : f32 to vector<4x256xf32>
    %4 = vector.extract_strided_slice %1 {offsets = [0, 0], sizes = [4, 256], strides = [1, 1]} : vector<36x256xf32> to vector<4x256xf32>
    %5 = vector.extract_strided_slice %2 {offsets = [0, 0], sizes = [1, 256], strides = [1, 1]} : vector<9x256xf32> to vector<1x256xf32>
    %6 = vector.broadcast %5 : vector<1x256xf32> to vector<4x256xf32>
    %7 = arith.mulf %4, %6 : vector<4x256xf32>
    %c239_i32 = arith.constant 239 : i32
    %8 = tpu.dynamic_rotate %7 by %c239_i32 dim 1 : vector<4x256xf32>, i32 -> vector<4x256xf32>
    %9 = arith.addf %3, %8 : vector<4x256xf32>
    %10 = vector.extract_strided_slice %1 {offsets = [4, 0], sizes = [4, 256], strides = [1, 1]} : vector<36x256xf32> to vector<4x256xf32>
    %11 = vector.extract_strided_slice %2 {offsets = [1, 0], sizes = [1, 256], strides = [1, 1]} : vector<9x256xf32> to vector<1x256xf32>
    %12 = vector.broadcast %11 : vector<1x256xf32> to vector<4x256xf32>
    %13 = arith.mulf %10, %12 : vector<4x256xf32>
    %c240_i32 = arith.constant 240 : i32
    %14 = tpu.dynamic_rotate %13 by %c240_i32 dim 1 : vector<4x256xf32>, i32 -> vector<4x256xf32>
    %15 = arith.addf %9, %14 : vector<4x256xf32>
    %16 = vector.extract_strided_slice %1 {offsets = [8, 0], sizes = [4, 256], strides = [1, 1]} : vector<36x256xf32> to vector<4x256xf32>
    %17 = vector.extract_strided_slice %2 {offsets = [2, 0], sizes = [1, 256], strides = [1, 1]} : vector<9x256xf32> to vector<1x256xf32>
    %18 = vector.broadcast %17 : vector<1x256xf32> to vector<4x256xf32>
    %19 = arith.mulf %16, %18 : vector<4x256xf32>
    %c241_i32 = arith.constant 241 : i32
    %20 = tpu.dynamic_rotate %19 by %c241_i32 dim 1 : vector<4x256xf32>, i32 -> vector<4x256xf32>
    %21 = arith.addf %15, %20 : vector<4x256xf32>
    %22 = vector.extract_strided_slice %1 {offsets = [12, 0], sizes = [4, 256], strides = [1, 1]} : vector<36x256xf32> to vector<4x256xf32>
    %23 = vector.extract_strided_slice %2 {offsets = [3, 0], sizes = [1, 256], strides = [1, 1]} : vector<9x256xf32> to vector<1x256xf32>
    %24 = vector.broadcast %23 : vector<1x256xf32> to vector<4x256xf32>
    %25 = arith.mulf %22, %24 : vector<4x256xf32>
    %c255_i32 = arith.constant 255 : i32
    %26 = tpu.dynamic_rotate %25 by %c255_i32 dim 1 : vector<4x256xf32>, i32 -> vector<4x256xf32>
    %27 = arith.addf %21, %26 : vector<4x256xf32>
    %28 = vector.extract_strided_slice %1 {offsets = [16, 0], sizes = [4, 256], strides = [1, 1]} : vector<36x256xf32> to vector<4x256xf32>
    %29 = vector.extract_strided_slice %2 {offsets = [4, 0], sizes = [1, 256], strides = [1, 1]} : vector<9x256xf32> to vector<1x256xf32>
    %30 = vector.broadcast %29 : vector<1x256xf32> to vector<4x256xf32>
    %31 = arith.mulf %28, %30 : vector<4x256xf32>
    %32 = arith.addf %27, %31 : vector<4x256xf32>
    %33 = vector.extract_strided_slice %1 {offsets = [20, 0], sizes = [4, 256], strides = [1, 1]} : vector<36x256xf32> to vector<4x256xf32>
    %34 = vector.extract_strided_slice %2 {offsets = [5, 0], sizes = [1, 256], strides = [1, 1]} : vector<9x256xf32> to vector<1x256xf32>
    %35 = vector.broadcast %34 : vector<1x256xf32> to vector<4x256xf32>
    %36 = arith.mulf %33, %35 : vector<4x256xf32>
    %c1_i32 = arith.constant 1 : i32
    %37 = tpu.dynamic_rotate %36 by %c1_i32 dim 1 : vector<4x256xf32>, i32 -> vector<4x256xf32>
    %38 = arith.addf %32, %37 : vector<4x256xf32>
    %39 = vector.extract_strided_slice %1 {offsets = [24, 0], sizes = [4, 256], strides = [1, 1]} : vector<36x256xf32> to vector<4x256xf32>
    %40 = vector.extract_strided_slice %2 {offsets = [6, 0], sizes = [1, 256], strides = [1, 1]} : vector<9x256xf32> to vector<1x256xf32>
    %41 = vector.broadcast %40 : vector<1x256xf32> to vector<4x256xf32>
    %42 = arith.mulf %39, %41 : vector<4x256xf32>
    %c15_i32 = arith.constant 15 : i32
    %43 = tpu.dynamic_rotate %42 by %c15_i32 dim 1 : vector<4x256xf32>, i32 -> vector<4x256xf32>
    %44 = arith.addf %38, %43 : vector<4x256xf32>
    %45 = vector.extract_strided_slice %1 {offsets = [28, 0], sizes = [4, 256], strides = [1, 1]} : vector<36x256xf32> to vector<4x256xf32>
    %46 = vector.extract_strided_slice %2 {offsets = [7, 0], sizes = [1, 256], strides = [1, 1]} : vector<9x256xf32> to vector<1x256xf32>
    %47 = vector.broadcast %46 : vector<1x256xf32> to vector<4x256xf32>
    %48 = arith.mulf %45, %47 : vector<4x256xf32>
    %c16_i32 = arith.constant 16 : i32
    %49 = tpu.dynamic_rotate %48 by %c16_i32 dim 1 : vector<4x256xf32>, i32 -> vector<4x256xf32>
    %50 = arith.addf %44, %49 : vector<4x256xf32>
    %51 = vector.extract_strided_slice %1 {offsets = [32, 0], sizes = [4, 256], strides = [1, 1]} : vector<36x256xf32> to vector<4x256xf32>
    %52 = vector.extract_strided_slice %2 {offsets = [8, 0], sizes = [1, 256], strides = [1, 1]} : vector<9x256xf32> to vector<1x256xf32>
    %53 = vector.broadcast %52 : vector<1x256xf32> to vector<4x256xf32>
    %54 = arith.mulf %51, %53 : vector<4x256xf32>
    %c17_i32 = arith.constant 17 : i32
    %55 = tpu.dynamic_rotate %54 by %c17_i32 dim 1 : vector<4x256xf32>, i32 -> vector<4x256xf32>
    %56 = arith.addf %50, %55 : vector<4x256xf32>
    %c0_3 = arith.constant 0 : index
    %c0_4 = arith.constant 0 : index
    %57 = vector.load %arg3[%c0_3, %c0_4] : memref<1x256xf32, #tpu.memory_space<vmem>>, vector<1x256xf32>
    %58 = vector.broadcast %57 : vector<1x256xf32> to vector<4x256xf32>
    %59 = arith.mulf %56, %58 : vector<4x256xf32>
    %c0_5 = arith.constant 0 : index
    %c0_6 = arith.constant 0 : index
    %60 = vector.load %arg5[%c0_5, %c0_6] : memref<8x4xbf16, #tpu.memory_space<vmem>>, vector<8x4xbf16>
    %61 = arith.truncf %59 : vector<4x256xf32> to vector<4x256xbf16>
    %cst_7 = arith.constant dense<0.000000e+00> : vector<8x256xf32>
    %62 = tpu.matmul %60, %61, %cst_7 {dimension_numbers = #tpu.dot_dimension_numbers<[1], [0], [0], [1], [0, 0, 1, 1], [], []>} : vector<8x4xbf16>, vector<4x256xbf16>, vector<8x256xf32> -> vector<8x256xf32>
    %c0_8 = arith.constant 0 : index
    %c0_9 = arith.constant 0 : index
    %63 = vector.load %arg6[%c0_8, %c0_9] : memref<8x1xf32, #tpu.memory_space<vmem>>, vector<8x1xf32>
    %64 = vector.broadcast %63 : vector<8x1xf32> to vector<8x256xf32>
    %65 = arith.addf %62, %64 : vector<8x256xf32>
    %c0_10 = arith.constant 0 : index
    %c0_11 = arith.constant 0 : index
    %66 = vector.load %arg4[%c0_10, %c0_11] : memref<8x256xbf16, #tpu.memory_space<vmem>>, vector<8x256xbf16>
    %67 = arith.extf %66 : vector<8x256xbf16> to vector<8x256xf32>
    %68 = arith.addf %65, %67 : vector<8x256xf32>
    %69 = arith.truncf %68 : vector<8x256xf32> to vector<8x256xbf16>
    %c0_12 = arith.constant 0 : index
    %c0_13 = arith.constant 0 : index
    %70 = vector.load %arg7[%c0_12, %c0_13] : memref<8x256xbf16, #tpu.memory_space<vmem>>, vector<8x256xbf16>
    tpu.vector_store %arg7[%c0_12, %c0_13], %69 {strides = array<i32>} : memref<8x256xbf16, #tpu.memory_space<vmem>>, vector<8x256xbf16>,
    return
  }
  func.func @transform_0(%arg0: i32) -> (i32, i32) {
    %c0_i32 = arith.constant 0 : i32
    %c0_i32_0 = arith.constant 0 : i32
    return %c0_i32, %arg0 : i32, i32
  }
  func.func @transform_1(%arg0: i32) -> (i32, i32) {
    %c0_i32 = arith.constant 0 : i32
    %c0_i32_0 = arith.constant 0 : i32
    %c0_i32_1 = arith.constant 0 : i32
    return %c0_i32, %c0_i32_0 : i32, i32
  }
  func.func @transform_2(%arg0: i32) -> (i32, i32) {
    %c0_i32 = arith.constant 0 : i32
    %c0_i32_0 = arith.constant 0 : i32
    %c0_i32_1 = arith.constant 0 : i32
    return %c0_i32, %c0_i32_0 : i32, i32
  }
  func.func @transform_3(%arg0: i32) -> (i32, i32) {
    %c0_i32 = arith.constant 0 : i32
    %c0_i32_0 = arith.constant 0 : i32
    return %c0_i32, %arg0 : i32, i32
  }
  func.func @transform_4(%arg0: i32) -> (i32, i32) {
    %c0_i32 = arith.constant 0 : i32
    %c0_i32_0 = arith.constant 0 : i32
    %c0_i32_1 = arith.constant 0 : i32
    return %c0_i32, %c0_i32_0 : i32, i32
  }
  func.func @transform_5(%arg0: i32) -> (i32, i32) {
    %c0_i32 = arith.constant 0 : i32
    %c0_i32_0 = arith.constant 0 : i32
    %c0_i32_1 = arith.constant 0 : i32
    return %c0_i32, %c0_i32_0 : i32, i32
  }
  func.func @transform_6(%arg0: i32) -> (i32, i32) {
    %c0_i32 = arith.constant 0 : i32
    %c0_i32_0 = arith.constant 0 : i32
    return %c0_i32, %arg0 : i32, i32
  }
}

module attributes {stable_mosaic.version = 11 : i64} {
  func.func @_ces_flash_kernel(%arg0: i32, %arg1: i32, %arg2: memref<8x256xbf16, #tpu.memory_space<vmem>>, %arg3: memref<9x256xf32, #tpu.memory_space<vmem>>, %arg4: memref<4x8xbf16, #tpu.memory_space<vmem>>, %arg5: memref<4x1xf32, #tpu.memory_space<vmem>>, %arg6: memref<4x8xbf16, #tpu.memory_space<vmem>>, %arg7: memref<4x1xf32, #tpu.memory_space<vmem>>, %arg8: memref<4x8xbf16, #tpu.memory_space<vmem>>, %arg9: memref<4x1xf32, #tpu.memory_space<vmem>>, %arg10: memref<36x256xbf16, #tpu.memory_space<vmem>>, %arg11: memref<36x256xf32, #tpu.memory_space<vmem>>, %arg12: memref<36x256xf32, #tpu.memory_space<vmem>>, %arg13: memref<36x256xf32, #tpu.memory_space<vmem>>) attributes {dimension_semantics = [#tpu.dimension_semantics<parallel>, #tpu.dimension_semantics<arbitrary>], iteration_bounds = array<i64: 2, 1>, scalar_prefetch = 0 : i64, scratch_operands = 3 : i64, tpu.core_type = #tpu.core_type<tc>, window_params = [{transform_indices = @transform_0, window_bounds = array<i64: 8, 256>}, {pipeline_mode = #tpu.pipeline_mode<synchronous>, transform_indices = @transform_1, window_bounds = array<i64: 9, 256>}, {pipeline_mode = #tpu.pipeline_mode<synchronous>, transform_indices = @transform_2, window_bounds = array<i64: 4, 8>}, {pipeline_mode = #tpu.pipeline_mode<synchronous>, transform_indices = @transform_3, window_bounds = array<i64: 4, 1>}, {pipeline_mode = #tpu.pipeline_mode<synchronous>, transform_indices = @transform_4, window_bounds = array<i64: 4, 8>}, {pipeline_mode = #tpu.pipeline_mode<synchronous>, transform_indices = @transform_5, window_bounds = array<i64: 4, 1>}, {pipeline_mode = #tpu.pipeline_mode<synchronous>, transform_indices = @transform_6, window_bounds = array<i64: 4, 8>}, {pipeline_mode = #tpu.pipeline_mode<synchronous>, transform_indices = @transform_7, window_bounds = array<i64: 4, 1>}, {transform_indices = @transform_8, window_bounds = array<i64: 36, 256>}]} {
    %c0_i32 = arith.constant 0 : i32
    %0 = arith.cmpi eq, %arg1, %c0_i32 : i32
    %1 = arith.extui %0 : i1 to i32
    %c0_i32_0 = arith.constant 0 : i32
    %2 = arith.cmpi ne, %1, %c0_i32_0 : i32
    scf.if %2 {
      %c0_13 = arith.constant 0 : index
      %c0_14 = arith.constant 0 : index
      %42 = vector.load %arg2[%c0_13, %c0_14] : memref<8x256xbf16, #tpu.memory_space<vmem>>, vector<8x256xbf16>
      %c0_15 = arith.constant 0 : index
      %c0_16 = arith.constant 0 : index
      %43 = vector.load %arg4[%c0_15, %c0_16] : memref<4x8xbf16, #tpu.memory_space<vmem>>, vector<4x8xbf16>
      %cst_17 = arith.constant dense<0.000000e+00> : vector<4x256xf32>
      %44 = tpu.matmul %43, %42, %cst_17 {dimension_numbers = #tpu.dot_dimension_numbers<[1], [0], [0], [1], [0, 0, 1, 1], [], []>} : vector<4x8xbf16>, vector<8x256xbf16>, vector<4x256xf32> -> vector<4x256xf32>
      %c0_18 = arith.constant 0 : index
      %c0_19 = arith.constant 0 : index
      %45 = vector.load %arg5[%c0_18, %c0_19] : memref<4x1xf32, #tpu.memory_space<vmem>>, vector<4x1xf32>
      %46 = vector.broadcast %45 : vector<4x1xf32> to vector<4x256xf32>
      %47 = arith.addf %44, %46 : vector<4x256xf32>
      %c0_20 = arith.constant 0 : index
      %c0_21 = arith.constant 0 : index
      %48 = vector.load %arg6[%c0_20, %c0_21] : memref<4x8xbf16, #tpu.memory_space<vmem>>, vector<4x8xbf16>
      %cst_22 = arith.constant dense<0.000000e+00> : vector<4x256xf32>
      %49 = tpu.matmul %48, %42, %cst_22 {dimension_numbers = #tpu.dot_dimension_numbers<[1], [0], [0], [1], [0, 0, 1, 1], [], []>} : vector<4x8xbf16>, vector<8x256xbf16>, vector<4x256xf32> -> vector<4x256xf32>
      %c0_23 = arith.constant 0 : index
      %c0_24 = arith.constant 0 : index
      %50 = vector.load %arg7[%c0_23, %c0_24] : memref<4x1xf32, #tpu.memory_space<vmem>>, vector<4x1xf32>
      %51 = vector.broadcast %50 : vector<4x1xf32> to vector<4x256xf32>
      %52 = arith.addf %49, %51 : vector<4x256xf32>
      %c0_25 = arith.constant 0 : index
      %c0_26 = arith.constant 0 : index
      %53 = vector.load %arg8[%c0_25, %c0_26] : memref<4x8xbf16, #tpu.memory_space<vmem>>, vector<4x8xbf16>
      %cst_27 = arith.constant dense<0.000000e+00> : vector<4x256xf32>
      %54 = tpu.matmul %53, %42, %cst_27 {dimension_numbers = #tpu.dot_dimension_numbers<[1], [0], [0], [1], [0, 0, 1, 1], [], []>} : vector<4x8xbf16>, vector<8x256xbf16>, vector<4x256xf32> -> vector<4x256xf32>
      %c0_28 = arith.constant 0 : index
      %c0_29 = arith.constant 0 : index
      %55 = vector.load %arg9[%c0_28, %c0_29] : memref<4x1xf32, #tpu.memory_space<vmem>>, vector<4x1xf32>
      %56 = vector.broadcast %55 : vector<4x1xf32> to vector<4x256xf32>
      %57 = arith.addf %54, %56 : vector<4x256xf32>
      %c0_30 = arith.constant 0 : index
      %c0_31 = arith.constant 0 : index
      %58 = vector.load %arg3[%c0_30, %c0_31] : memref<9x256xf32, #tpu.memory_space<vmem>>, vector<9x256xf32>
      %cst_32 = arith.constant 0.000000e+00 : f32
      %59 = vector.broadcast %cst_32 : f32 to vector<1x256xf32>
      %60 = vector.extract_strided_slice %58 {offsets = [0, 0], sizes = [1, 256], strides = [1, 1]} : vector<9x256xf32> to vector<1x256xf32>
      %c17_i32 = arith.constant 17 : i32
      %61 = tpu.dynamic_rotate %47 by %c17_i32 dim 1 : vector<4x256xf32>, i32 -> vector<4x256xf32>
      %62 = vector.broadcast %60 : vector<1x256xf32> to vector<4x256xf32>
      %63 = arith.mulf %61, %62 : vector<4x256xf32>
      %c17_i32_33 = arith.constant 17 : i32
      %64 = tpu.dynamic_rotate %52 by %c17_i32_33 dim 1 : vector<4x256xf32>, i32 -> vector<4x256xf32>
      %65 = vector.broadcast %60 : vector<1x256xf32> to vector<4x256xf32>
      %66 = arith.mulf %64, %65 : vector<4x256xf32>
      %c17_i32_34 = arith.constant 17 : i32
      %67 = tpu.dynamic_rotate %57 by %c17_i32_34 dim 1 : vector<4x256xf32>, i32 -> vector<4x256xf32>
      %68 = vector.broadcast %60 : vector<1x256xf32> to vector<4x256xf32>
      %69 = arith.mulf %67, %68 : vector<4x256xf32>
      %c0_35 = arith.constant 0 : index
      %c0_36 = arith.constant 0 : index
      %70 = vector.load %arg11[%c0_35, %c0_36] : memref<36x256xf32, #tpu.memory_space<vmem>>, vector<4x256xf32>
      tpu.vector_store %arg11[%c0_35, %c0_36], %63 {strides = array<i32>} : memref<36x256xf32, #tpu.memory_space<vmem>>, vector<4x256xf32>,
      %c0_37 = arith.constant 0 : index
      %c0_38 = arith.constant 0 : index
      %71 = vector.load %arg12[%c0_37, %c0_38] : memref<36x256xf32, #tpu.memory_space<vmem>>, vector<4x256xf32>
      tpu.vector_store %arg12[%c0_37, %c0_38], %66 {strides = array<i32>} : memref<36x256xf32, #tpu.memory_space<vmem>>, vector<4x256xf32>,
      %c0_39 = arith.constant 0 : index
      %c0_40 = arith.constant 0 : index
      %72 = vector.load %arg13[%c0_39, %c0_40] : memref<36x256xf32, #tpu.memory_space<vmem>>, vector<4x256xf32>
      tpu.vector_store %arg13[%c0_39, %c0_40], %69 {strides = array<i32>} : memref<36x256xf32, #tpu.memory_space<vmem>>, vector<4x256xf32>,
      %73 = arith.mulf %66, %66 : vector<4x256xf32>
      %cst_41 = arith.constant dense<0.000000e+00> : vector<256xf32>
      %74 = vector.multi_reduction <add>, %73, %cst_41 [0] : vector<4x256xf32> to vector<256xf32>
      %75 = vector.shape_cast %74 : vector<256xf32> to vector<1x256xf32>
      %76 = arith.addf %59, %75 : vector<1x256xf32>
      %77 = vector.extract_strided_slice %58 {offsets = [1, 0], sizes = [1, 256], strides = [1, 1]} : vector<9x256xf32> to vector<1x256xf32>
      %c16_i32 = arith.constant 16 : i32
      %78 = tpu.dynamic_rotate %47 by %c16_i32 dim 1 : vector<4x256xf32>, i32 -> vector<4x256xf32>
      %79 = vector.broadcast %77 : vector<1x256xf32> to vector<4x256xf32>
      %80 = arith.mulf %78, %79 : vector<4x256xf32>
      %c16_i32_42 = arith.constant 16 : i32
      %81 = tpu.dynamic_rotate %52 by %c16_i32_42 dim 1 : vector<4x256xf32>, i32 -> vector<4x256xf32>
      %82 = vector.broadcast %77 : vector<1x256xf32> to vector<4x256xf32>
      %83 = arith.mulf %81, %82 : vector<4x256xf32>
      %c16_i32_43 = arith.constant 16 : i32
      %84 = tpu.dynamic_rotate %57 by %c16_i32_43 dim 1 : vector<4x256xf32>, i32 -> vector<4x256xf32>
      %85 = vector.broadcast %77 : vector<1x256xf32> to vector<4x256xf32>
      %86 = arith.mulf %84, %85 : vector<4x256xf32>
      %c4 = arith.constant 4 : index
      %c0_44 = arith.constant 0 : index
      %87 = vector.load %arg11[%c4, %c0_44] : memref<36x256xf32, #tpu.memory_space<vmem>>, vector<4x256xf32>
      tpu.vector_store %arg11[%c4, %c0_44], %80 {strides = array<i32>} : memref<36x256xf32, #tpu.memory_space<vmem>>, vector<4x256xf32>,
      %c4_45 = arith.constant 4 : index
      %c0_46 = arith.constant 0 : index
      %88 = vector.load %arg12[%c4_45, %c0_46] : memref<36x256xf32, #tpu.memory_space<vmem>>, vector<4x256xf32>
      tpu.vector_store %arg12[%c4_45, %c0_46], %83 {strides = array<i32>} : memref<36x256xf32, #tpu.memory_space<vmem>>, vector<4x256xf32>,
      %c4_47 = arith.constant 4 : index
      %c0_48 = arith.constant 0 : index
      %89 = vector.load %arg13[%c4_47, %c0_48] : memref<36x256xf32, #tpu.memory_space<vmem>>, vector<4x256xf32>
      tpu.vector_store %arg13[%c4_47, %c0_48], %86 {strides = array<i32>} : memref<36x256xf32, #tpu.memory_space<vmem>>, vector<4x256xf32>,
      %90 = arith.mulf %83, %83 : vector<4x256xf32>
      %cst_49 = arith.constant dense<0.000000e+00> : vector<256xf32>
      %91 = vector.multi_reduction <add>, %90, %cst_49 [0] : vector<4x256xf32> to vector<256xf32>
      %92 = vector.shape_cast %91 : vector<256xf32> to vector<1x256xf32>
      %93 = arith.addf %76, %92 : vector<1x256xf32>
      %94 = vector.extract_strided_slice %58 {offsets = [2, 0], sizes = [1, 256], strides = [1, 1]} : vector<9x256xf32> to vector<1x256xf32>
      %c15_i32 = arith.constant 15 : i32
      %95 = tpu.dynamic_rotate %47 by %c15_i32 dim 1 : vector<4x256xf32>, i32 -> vector<4x256xf32>
      %96 = vector.broadcast %94 : vector<1x256xf32> to vector<4x256xf32>
      %97 = arith.mulf %95, %96 : vector<4x256xf32>
      %c15_i32_50 = arith.constant 15 : i32
      %98 = tpu.dynamic_rotate %52 by %c15_i32_50 dim 1 : vector<4x256xf32>, i32 -> vector<4x256xf32>
      %99 = vector.broadcast %94 : vector<1x256xf32> to vector<4x256xf32>
      %100 = arith.mulf %98, %99 : vector<4x256xf32>
      %c15_i32_51 = arith.constant 15 : i32
      %101 = tpu.dynamic_rotate %57 by %c15_i32_51 dim 1 : vector<4x256xf32>, i32 -> vector<4x256xf32>
      %102 = vector.broadcast %94 : vector<1x256xf32> to vector<4x256xf32>
      %103 = arith.mulf %101, %102 : vector<4x256xf32>
      %c8 = arith.constant 8 : index
      %c0_52 = arith.constant 0 : index
      %104 = vector.load %arg11[%c8, %c0_52] : memref<36x256xf32, #tpu.memory_space<vmem>>, vector<4x256xf32>
      tpu.vector_store %arg11[%c8, %c0_52], %97 {strides = array<i32>} : memref<36x256xf32, #tpu.memory_space<vmem>>, vector<4x256xf32>,
      %c8_53 = arith.constant 8 : index
      %c0_54 = arith.constant 0 : index
      %105 = vector.load %arg12[%c8_53, %c0_54] : memref<36x256xf32, #tpu.memory_space<vmem>>, vector<4x256xf32>
      tpu.vector_store %arg12[%c8_53, %c0_54], %100 {strides = array<i32>} : memref<36x256xf32, #tpu.memory_space<vmem>>, vector<4x256xf32>,
      %c8_55 = arith.constant 8 : index
      %c0_56 = arith.constant 0 : index
      %106 = vector.load %arg13[%c8_55, %c0_56] : memref<36x256xf32, #tpu.memory_space<vmem>>, vector<4x256xf32>
      tpu.vector_store %arg13[%c8_55, %c0_56], %103 {strides = array<i32>} : memref<36x256xf32, #tpu.memory_space<vmem>>, vector<4x256xf32>,
      %107 = arith.mulf %100, %100 : vector<4x256xf32>
      %cst_57 = arith.constant dense<0.000000e+00> : vector<256xf32>
      %108 = vector.multi_reduction <add>, %107, %cst_57 [0] : vector<4x256xf32> to vector<256xf32>
      %109 = vector.shape_cast %108 : vector<256xf32> to vector<1x256xf32>
      %110 = arith.addf %93, %109 : vector<1x256xf32>
      %111 = vector.extract_strided_slice %58 {offsets = [3, 0], sizes = [1, 256], strides = [1, 1]} : vector<9x256xf32> to vector<1x256xf32>
      %c1_i32_58 = arith.constant 1 : i32
      %112 = tpu.dynamic_rotate %47 by %c1_i32_58 dim 1 : vector<4x256xf32>, i32 -> vector<4x256xf32>
      %113 = vector.broadcast %111 : vector<1x256xf32> to vector<4x256xf32>
      %114 = arith.mulf %112, %113 : vector<4x256xf32>
      %c1_i32_59 = arith.constant 1 : i32
      %115 = tpu.dynamic_rotate %52 by %c1_i32_59 dim 1 : vector<4x256xf32>, i32 -> vector<4x256xf32>
      %116 = vector.broadcast %111 : vector<1x256xf32> to vector<4x256xf32>
      %117 = arith.mulf %115, %116 : vector<4x256xf32>
      %c1_i32_60 = arith.constant 1 : i32
      %118 = tpu.dynamic_rotate %57 by %c1_i32_60 dim 1 : vector<4x256xf32>, i32 -> vector<4x256xf32>
      %119 = vector.broadcast %111 : vector<1x256xf32> to vector<4x256xf32>
      %120 = arith.mulf %118, %119 : vector<4x256xf32>
      %c12 = arith.constant 12 : index
      %c0_61 = arith.constant 0 : index
      %121 = vector.load %arg11[%c12, %c0_61] : memref<36x256xf32, #tpu.memory_space<vmem>>, vector<4x256xf32>
      tpu.vector_store %arg11[%c12, %c0_61], %114 {strides = array<i32>} : memref<36x256xf32, #tpu.memory_space<vmem>>, vector<4x256xf32>,
      %c12_62 = arith.constant 12 : index
      %c0_63 = arith.constant 0 : index
      %122 = vector.load %arg12[%c12_62, %c0_63] : memref<36x256xf32, #tpu.memory_space<vmem>>, vector<4x256xf32>
      tpu.vector_store %arg12[%c12_62, %c0_63], %117 {strides = array<i32>} : memref<36x256xf32, #tpu.memory_space<vmem>>, vector<4x256xf32>,
      %c12_64 = arith.constant 12 : index
      %c0_65 = arith.constant 0 : index
      %123 = vector.load %arg13[%c12_64, %c0_65] : memref<36x256xf32, #tpu.memory_space<vmem>>, vector<4x256xf32>
      tpu.vector_store %arg13[%c12_64, %c0_65], %120 {strides = array<i32>} : memref<36x256xf32, #tpu.memory_space<vmem>>, vector<4x256xf32>,
      %124 = arith.mulf %117, %117 : vector<4x256xf32>
      %cst_66 = arith.constant dense<0.000000e+00> : vector<256xf32>
      %125 = vector.multi_reduction <add>, %124, %cst_66 [0] : vector<4x256xf32> to vector<256xf32>
      %126 = vector.shape_cast %125 : vector<256xf32> to vector<1x256xf32>
      %127 = arith.addf %110, %126 : vector<1x256xf32>
      %128 = vector.extract_strided_slice %58 {offsets = [4, 0], sizes = [1, 256], strides = [1, 1]} : vector<9x256xf32> to vector<1x256xf32>
      %129 = vector.broadcast %128 : vector<1x256xf32> to vector<4x256xf32>
      %130 = arith.mulf %47, %129 : vector<4x256xf32>
      %131 = vector.broadcast %128 : vector<1x256xf32> to vector<4x256xf32>
      %132 = arith.mulf %52, %131 : vector<4x256xf32>
      %133 = vector.broadcast %128 : vector<1x256xf32> to vector<4x256xf32>
      %134 = arith.mulf %57, %133 : vector<4x256xf32>
      %c16 = arith.constant 16 : index
      %c0_67 = arith.constant 0 : index
      %135 = vector.load %arg11[%c16, %c0_67] : memref<36x256xf32, #tpu.memory_space<vmem>>, vector<4x256xf32>
      tpu.vector_store %arg11[%c16, %c0_67], %130 {strides = array<i32>} : memref<36x256xf32, #tpu.memory_space<vmem>>, vector<4x256xf32>,
      %c16_68 = arith.constant 16 : index
      %c0_69 = arith.constant 0 : index
      %136 = vector.load %arg12[%c16_68, %c0_69] : memref<36x256xf32, #tpu.memory_space<vmem>>, vector<4x256xf32>
      tpu.vector_store %arg12[%c16_68, %c0_69], %132 {strides = array<i32>} : memref<36x256xf32, #tpu.memory_space<vmem>>, vector<4x256xf32>,
      %c16_70 = arith.constant 16 : index
      %c0_71 = arith.constant 0 : index
      %137 = vector.load %arg13[%c16_70, %c0_71] : memref<36x256xf32, #tpu.memory_space<vmem>>, vector<4x256xf32>
      tpu.vector_store %arg13[%c16_70, %c0_71], %134 {strides = array<i32>} : memref<36x256xf32, #tpu.memory_space<vmem>>, vector<4x256xf32>,
      %138 = arith.mulf %132, %132 : vector<4x256xf32>
      %cst_72 = arith.constant dense<0.000000e+00> : vector<256xf32>
      %139 = vector.multi_reduction <add>, %138, %cst_72 [0] : vector<4x256xf32> to vector<256xf32>
      %140 = vector.shape_cast %139 : vector<256xf32> to vector<1x256xf32>
      %141 = arith.addf %127, %140 : vector<1x256xf32>
      %142 = vector.extract_strided_slice %58 {offsets = [5, 0], sizes = [1, 256], strides = [1, 1]} : vector<9x256xf32> to vector<1x256xf32>
      %c255_i32 = arith.constant 255 : i32
      %143 = tpu.dynamic_rotate %47 by %c255_i32 dim 1 : vector<4x256xf32>, i32 -> vector<4x256xf32>
      %144 = vector.broadcast %142 : vector<1x256xf32> to vector<4x256xf32>
      %145 = arith.mulf %143, %144 : vector<4x256xf32>
      %c255_i32_73 = arith.constant 255 : i32
      %146 = tpu.dynamic_rotate %52 by %c255_i32_73 dim 1 : vector<4x256xf32>, i32 -> vector<4x256xf32>
      %147 = vector.broadcast %142 : vector<1x256xf32> to vector<4x256xf32>
      %148 = arith.mulf %146, %147 : vector<4x256xf32>
      %c255_i32_74 = arith.constant 255 : i32
      %149 = tpu.dynamic_rotate %57 by %c255_i32_74 dim 1 : vector<4x256xf32>, i32 -> vector<4x256xf32>
      %150 = vector.broadcast %142 : vector<1x256xf32> to vector<4x256xf32>
      %151 = arith.mulf %149, %150 : vector<4x256xf32>
      %c20 = arith.constant 20 : index
      %c0_75 = arith.constant 0 : index
      %152 = vector.load %arg11[%c20, %c0_75] : memref<36x256xf32, #tpu.memory_space<vmem>>, vector<4x256xf32>
      tpu.vector_store %arg11[%c20, %c0_75], %145 {strides = array<i32>} : memref<36x256xf32, #tpu.memory_space<vmem>>, vector<4x256xf32>,
      %c20_76 = arith.constant 20 : index
      %c0_77 = arith.constant 0 : index
      %153 = vector.load %arg12[%c20_76, %c0_77] : memref<36x256xf32, #tpu.memory_space<vmem>>, vector<4x256xf32>
      tpu.vector_store %arg12[%c20_76, %c0_77], %148 {strides = array<i32>} : memref<36x256xf32, #tpu.memory_space<vmem>>, vector<4x256xf32>,
      %c20_78 = arith.constant 20 : index
      %c0_79 = arith.constant 0 : index
      %154 = vector.load %arg13[%c20_78, %c0_79] : memref<36x256xf32, #tpu.memory_space<vmem>>, vector<4x256xf32>
      tpu.vector_store %arg13[%c20_78, %c0_79], %151 {strides = array<i32>} : memref<36x256xf32, #tpu.memory_space<vmem>>, vector<4x256xf32>,
      %155 = arith.mulf %148, %148 : vector<4x256xf32>
      %cst_80 = arith.constant dense<0.000000e+00> : vector<256xf32>
      %156 = vector.multi_reduction <add>, %155, %cst_80 [0] : vector<4x256xf32> to vector<256xf32>
      %157 = vector.shape_cast %156 : vector<256xf32> to vector<1x256xf32>
      %158 = arith.addf %141, %157 : vector<1x256xf32>
      %159 = vector.extract_strided_slice %58 {offsets = [6, 0], sizes = [1, 256], strides = [1, 1]} : vector<9x256xf32> to vector<1x256xf32>
      %c241_i32 = arith.constant 241 : i32
      %160 = tpu.dynamic_rotate %47 by %c241_i32 dim 1 : vector<4x256xf32>, i32 -> vector<4x256xf32>
      %161 = vector.broadcast %159 : vector<1x256xf32> to vector<4x256xf32>
      %162 = arith.mulf %160, %161 : vector<4x256xf32>
      %c241_i32_81 = arith.constant 241 : i32
      %163 = tpu.dynamic_rotate %52 by %c241_i32_81 dim 1 : vector<4x256xf32>, i32 -> vector<4x256xf32>
      %164 = vector.broadcast %159 : vector<1x256xf32> to vector<4x256xf32>
      %165 = arith.mulf %163, %164 : vector<4x256xf32>
      %c241_i32_82 = arith.constant 241 : i32
      %166 = tpu.dynamic_rotate %57 by %c241_i32_82 dim 1 : vector<4x256xf32>, i32 -> vector<4x256xf32>
      %167 = vector.broadcast %159 : vector<1x256xf32> to vector<4x256xf32>
      %168 = arith.mulf %166, %167 : vector<4x256xf32>
      %c24 = arith.constant 24 : index
      %c0_83 = arith.constant 0 : index
      %169 = vector.load %arg11[%c24, %c0_83] : memref<36x256xf32, #tpu.memory_space<vmem>>, vector<4x256xf32>
      tpu.vector_store %arg11[%c24, %c0_83], %162 {strides = array<i32>} : memref<36x256xf32, #tpu.memory_space<vmem>>, vector<4x256xf32>,
      %c24_84 = arith.constant 24 : index
      %c0_85 = arith.constant 0 : index
      %170 = vector.load %arg12[%c24_84, %c0_85] : memref<36x256xf32, #tpu.memory_space<vmem>>, vector<4x256xf32>
      tpu.vector_store %arg12[%c24_84, %c0_85], %165 {strides = array<i32>} : memref<36x256xf32, #tpu.memory_space<vmem>>, vector<4x256xf32>,
      %c24_86 = arith.constant 24 : index
      %c0_87 = arith.constant 0 : index
      %171 = vector.load %arg13[%c24_86, %c0_87] : memref<36x256xf32, #tpu.memory_space<vmem>>, vector<4x256xf32>
      tpu.vector_store %arg13[%c24_86, %c0_87], %168 {strides = array<i32>} : memref<36x256xf32, #tpu.memory_space<vmem>>, vector<4x256xf32>,
      %172 = arith.mulf %165, %165 : vector<4x256xf32>
      %cst_88 = arith.constant dense<0.000000e+00> : vector<256xf32>
      %173 = vector.multi_reduction <add>, %172, %cst_88 [0] : vector<4x256xf32> to vector<256xf32>
      %174 = vector.shape_cast %173 : vector<256xf32> to vector<1x256xf32>
      %175 = arith.addf %158, %174 : vector<1x256xf32>
      %176 = vector.extract_strided_slice %58 {offsets = [7, 0], sizes = [1, 256], strides = [1, 1]} : vector<9x256xf32> to vector<1x256xf32>
      %c240_i32 = arith.constant 240 : i32
      %177 = tpu.dynamic_rotate %47 by %c240_i32 dim 1 : vector<4x256xf32>, i32 -> vector<4x256xf32>
      %178 = vector.broadcast %176 : vector<1x256xf32> to vector<4x256xf32>
      %179 = arith.mulf %177, %178 : vector<4x256xf32>
      %c240_i32_89 = arith.constant 240 : i32
      %180 = tpu.dynamic_rotate %52 by %c240_i32_89 dim 1 : vector<4x256xf32>, i32 -> vector<4x256xf32>
      %181 = vector.broadcast %176 : vector<1x256xf32> to vector<4x256xf32>
      %182 = arith.mulf %180, %181 : vector<4x256xf32>
      %c240_i32_90 = arith.constant 240 : i32
      %183 = tpu.dynamic_rotate %57 by %c240_i32_90 dim 1 : vector<4x256xf32>, i32 -> vector<4x256xf32>
      %184 = vector.broadcast %176 : vector<1x256xf32> to vector<4x256xf32>
      %185 = arith.mulf %183, %184 : vector<4x256xf32>
      %c28 = arith.constant 28 : index
      %c0_91 = arith.constant 0 : index
      %186 = vector.load %arg11[%c28, %c0_91] : memref<36x256xf32, #tpu.memory_space<vmem>>, vector<4x256xf32>
      tpu.vector_store %arg11[%c28, %c0_91], %179 {strides = array<i32>} : memref<36x256xf32, #tpu.memory_space<vmem>>, vector<4x256xf32>,
      %c28_92 = arith.constant 28 : index
      %c0_93 = arith.constant 0 : index
      %187 = vector.load %arg12[%c28_92, %c0_93] : memref<36x256xf32, #tpu.memory_space<vmem>>, vector<4x256xf32>
      tpu.vector_store %arg12[%c28_92, %c0_93], %182 {strides = array<i32>} : memref<36x256xf32, #tpu.memory_space<vmem>>, vector<4x256xf32>,
      %c28_94 = arith.constant 28 : index
      %c0_95 = arith.constant 0 : index
      %188 = vector.load %arg13[%c28_94, %c0_95] : memref<36x256xf32, #tpu.memory_space<vmem>>, vector<4x256xf32>
      tpu.vector_store %arg13[%c28_94, %c0_95], %185 {strides = array<i32>} : memref<36x256xf32, #tpu.memory_space<vmem>>, vector<4x256xf32>,
      %189 = arith.mulf %182, %182 : vector<4x256xf32>
      %cst_96 = arith.constant dense<0.000000e+00> : vector<256xf32>
      %190 = vector.multi_reduction <add>, %189, %cst_96 [0] : vector<4x256xf32> to vector<256xf32>
      %191 = vector.shape_cast %190 : vector<256xf32> to vector<1x256xf32>
      %192 = arith.addf %175, %191 : vector<1x256xf32>
      %193 = vector.extract_strided_slice %58 {offsets = [8, 0], sizes = [1, 256], strides = [1, 1]} : vector<9x256xf32> to vector<1x256xf32>
      %c239_i32 = arith.constant 239 : i32
      %194 = tpu.dynamic_rotate %47 by %c239_i32 dim 1 : vector<4x256xf32>, i32 -> vector<4x256xf32>
      %195 = vector.broadcast %193 : vector<1x256xf32> to vector<4x256xf32>
      %196 = arith.mulf %194, %195 : vector<4x256xf32>
      %c239_i32_97 = arith.constant 239 : i32
      %197 = tpu.dynamic_rotate %52 by %c239_i32_97 dim 1 : vector<4x256xf32>, i32 -> vector<4x256xf32>
      %198 = vector.broadcast %193 : vector<1x256xf32> to vector<4x256xf32>
      %199 = arith.mulf %197, %198 : vector<4x256xf32>
      %c239_i32_98 = arith.constant 239 : i32
      %200 = tpu.dynamic_rotate %57 by %c239_i32_98 dim 1 : vector<4x256xf32>, i32 -> vector<4x256xf32>
      %201 = vector.broadcast %193 : vector<1x256xf32> to vector<4x256xf32>
      %202 = arith.mulf %200, %201 : vector<4x256xf32>
      %c32 = arith.constant 32 : index
      %c0_99 = arith.constant 0 : index
      %203 = vector.load %arg11[%c32, %c0_99] : memref<36x256xf32, #tpu.memory_space<vmem>>, vector<4x256xf32>
      tpu.vector_store %arg11[%c32, %c0_99], %196 {strides = array<i32>} : memref<36x256xf32, #tpu.memory_space<vmem>>, vector<4x256xf32>,
      %c32_100 = arith.constant 32 : index
      %c0_101 = arith.constant 0 : index
      %204 = vector.load %arg12[%c32_100, %c0_101] : memref<36x256xf32, #tpu.memory_space<vmem>>, vector<4x256xf32>
      tpu.vector_store %arg12[%c32_100, %c0_101], %199 {strides = array<i32>} : memref<36x256xf32, #tpu.memory_space<vmem>>, vector<4x256xf32>,
      %c32_102 = arith.constant 32 : index
      %c0_103 = arith.constant 0 : index
      %205 = vector.load %arg13[%c32_102, %c0_103] : memref<36x256xf32, #tpu.memory_space<vmem>>, vector<4x256xf32>
      tpu.vector_store %arg13[%c32_102, %c0_103], %202 {strides = array<i32>} : memref<36x256xf32, #tpu.memory_space<vmem>>, vector<4x256xf32>,
      %206 = arith.mulf %199, %199 : vector<4x256xf32>
      %cst_104 = arith.constant dense<0.000000e+00> : vector<256xf32>
      %207 = vector.multi_reduction <add>, %206, %cst_104 [0] : vector<4x256xf32> to vector<256xf32>
      %208 = vector.shape_cast %207 : vector<256xf32> to vector<1x256xf32>
      %209 = arith.addf %192, %208 : vector<1x256xf32>
      %210 = math.sqrt %209 : vector<1x256xf32>
      %cst_105 = arith.constant 9.99999974E-5 : f32
      %211 = vector.broadcast %cst_105 : f32 to vector<1x256xf32>
      %212 = arith.maximumf %210, %211 : vector<1x256xf32>
      %cst_106 = arith.constant 1.000000e+00 : f32
      %213 = vector.broadcast %cst_106 : f32 to vector<1x256xf32>
      %214 = arith.divf %213, %212 : vector<1x256xf32>
      %c0_107 = arith.constant 0 : index
      %c0_108 = arith.constant 0 : index
      %215 = vector.load %arg12[%c0_107, %c0_108] : memref<36x256xf32, #tpu.memory_space<vmem>>, vector<36x256xf32>
      %216 = vector.broadcast %214 : vector<1x256xf32> to vector<36x256xf32>
      %217 = arith.mulf %215, %216 : vector<36x256xf32>
      %c0_109 = arith.constant 0 : index
      %c0_110 = arith.constant 0 : index
      %218 = vector.load %arg12[%c0_109, %c0_110] : memref<36x256xf32, #tpu.memory_space<vmem>>, vector<36x256xf32>
      tpu.vector_store %arg12[%c0_109, %c0_110], %217 {strides = array<i32>} : memref<36x256xf32, #tpu.memory_space<vmem>>, vector<36x256xf32>,
    } else {
    }
    %c256_i32 = arith.constant 256 : i32
    %3 = arith.muli %arg1, %c256_i32 : i32
    %4 = tpu.assume_multiple %3, 128 : i32
    %c0 = arith.constant 0 : index
    %5 = arith.index_cast %4 : i32 to index
    %6 = vector.load %arg11[%c0, %5] : memref<36x256xf32, #tpu.memory_space<vmem>>, vector<36x256xf32>
    %7 = arith.truncf %6 : vector<36x256xf32> to vector<36x256xbf16>
    %cst = arith.constant 0xFF800000 : f32
    %8 = vector.broadcast %cst : f32 to vector<1x256xf32>
    %cst_1 = arith.constant 0.000000e+00 : f32
    %9 = vector.broadcast %cst_1 : f32 to vector<1x256xf32>
    %cst_2 = arith.constant 0.000000e+00 : f32
    %10 = vector.broadcast %cst_2 : f32 to vector<36x256xf32>
    %c0_i32_3 = arith.constant 0 : i32
    %c256_i32_4 = arith.constant 256 : i32
    %11 = arith.muli %c0_i32_3, %c256_i32_4 : i32
    %12 = tpu.assume_multiple %11, 128 : i32
    %c0_5 = arith.constant 0 : index
    %13 = arith.index_cast %12 : i32 to index
    %14 = vector.load %arg12[%c0_5, %13] : memref<36x256xf32, #tpu.memory_space<vmem>>, vector<36x256xf32>
    %15 = arith.truncf %14 : vector<36x256xf32> to vector<36x256xbf16>
    %c0_6 = arith.constant 0 : index
    %16 = arith.index_cast %12 : i32 to index
    %17 = vector.load %arg13[%c0_6, %16] : memref<36x256xf32, #tpu.memory_space<vmem>>, vector<36x256xf32>
    %18 = arith.truncf %17 : vector<36x256xf32> to vector<36x256xbf16>
    %cst_7 = arith.constant dense<0.000000e+00> : vector<256x256xf32>
    %19 = tpu.matmul %15, %7, %cst_7 {dimension_numbers = #tpu.dot_dimension_numbers<[0], [0], [1], [1], [0, 1, 1, 1], [], []>} : vector<36x256xbf16>, vector<36x256xbf16>, vector<256x256xf32> -> vector<256x256xf32>
    %cst_8 = arith.constant dense<0xFF800000> : vector<256xf32>
    %20 = vector.multi_reduction <maximumf>, %19, %cst_8 [0] : vector<256x256xf32> to vector<256xf32>
    %21 = vector.shape_cast %20 : vector<256xf32> to vector<1x256xf32>
    %22 = arith.maximumf %8, %21 : vector<1x256xf32>
    %23 = arith.subf %8, %22 : vector<1x256xf32>
    %24 = math.exp %23 : vector<1x256xf32>
    %25 = vector.broadcast %22 : vector<1x256xf32> to vector<256x256xf32>
    %26 = arith.subf %19, %25 : vector<256x256xf32>
    %27 = math.exp %26 : vector<256x256xf32>
    %28 = arith.mulf %24, %9 : vector<1x256xf32>
    %cst_9 = arith.constant dense<0.000000e+00> : vector<256xf32>
    %29 = vector.multi_reduction <add>, %27, %cst_9 [0] : vector<256x256xf32> to vector<256xf32>
    %30 = vector.shape_cast %29 : vector<256xf32> to vector<1x256xf32>
    %31 = arith.addf %28, %30 : vector<1x256xf32>
    %32 = arith.truncf %27 : vector<256x256xf32> to vector<256x256xbf16>
    %cst_10 = arith.constant dense<0.000000e+00> : vector<36x256xf32>
    %33 = tpu.matmul %18, %32, %cst_10 {dimension_numbers = #tpu.dot_dimension_numbers<[1], [0], [0], [1], [0, 0, 1, 1], [], []>} : vector<36x256xbf16>, vector<256x256xbf16>, vector<36x256xf32> -> vector<36x256xf32>
    %34 = vector.broadcast %24 : vector<1x256xf32> to vector<36x256xf32>
    %35 = arith.mulf %34, %10 : vector<36x256xf32>
    %36 = arith.addf %35, %33 : vector<36x256xf32>
    %c1_i32 = arith.constant 1 : i32
    %37 = tpu.reciprocal %31 {approx = true} : vector<1x256xf32> -> vector<1x256xf32>
    %38 = vector.broadcast %37 : vector<1x256xf32> to vector<36x256xf32>
    %39 = arith.mulf %36, %38 : vector<36x256xf32>
    %40 = arith.truncf %39 : vector<36x256xf32> to vector<36x256xbf16>
    %c0_11 = arith.constant 0 : index
    %c0_12 = arith.constant 0 : index
    %41 = vector.load %arg10[%c0_11, %c0_12] : memref<36x256xbf16, #tpu.memory_space<vmem>>, vector<36x256xbf16>
    tpu.vector_store %arg10[%c0_11, %c0_12], %40 {strides = array<i32>} : memref<36x256xbf16, #tpu.memory_space<vmem>>, vector<36x256xbf16>,
    return
  }
  func.func @transform_0(%arg0: i32, %arg1: i32) -> (i32, i32) {
    %c0_i32 = arith.constant 0 : i32
    %c0_i32_0 = arith.constant 0 : i32
    return %c0_i32, %arg0 : i32, i32
  }
  func.func @transform_1(%arg0: i32, %arg1: i32) -> (i32, i32) {
    %c0_i32 = arith.constant 0 : i32
    %c0_i32_0 = arith.constant 0 : i32
    %c0_i32_1 = arith.constant 0 : i32
    return %c0_i32, %c0_i32_0 : i32, i32
  }
  func.func @transform_2(%arg0: i32, %arg1: i32) -> (i32, i32) {
    %c0_i32 = arith.constant 0 : i32
    %c0_i32_0 = arith.constant 0 : i32
    %c0_i32_1 = arith.constant 0 : i32
    return %c0_i32, %c0_i32_0 : i32, i32
  }
  func.func @transform_3(%arg0: i32, %arg1: i32) -> (i32, i32) {
    %c0_i32 = arith.constant 0 : i32
    %c0_i32_0 = arith.constant 0 : i32
    %c0_i32_1 = arith.constant 0 : i32
    return %c0_i32, %c0_i32_0 : i32, i32
  }
  func.func @transform_4(%arg0: i32, %arg1: i32) -> (i32, i32) {
    %c0_i32 = arith.constant 0 : i32
    %c0_i32_0 = arith.constant 0 : i32
    %c0_i32_1 = arith.constant 0 : i32
    return %c0_i32, %c0_i32_0 : i32, i32
  }
  func.func @transform_5(%arg0: i32, %arg1: i32) -> (i32, i32) {
    %c0_i32 = arith.constant 0 : i32
    %c0_i32_0 = arith.constant 0 : i32
    %c0_i32_1 = arith.constant 0 : i32
    return %c0_i32, %c0_i32_0 : i32, i32
  }
  func.func @transform_6(%arg0: i32, %arg1: i32) -> (i32, i32) {
    %c0_i32 = arith.constant 0 : i32
    %c0_i32_0 = arith.constant 0 : i32
    %c0_i32_1 = arith.constant 0 : i32
    return %c0_i32, %c0_i32_0 : i32, i32
  }
  func.func @transform_7(%arg0: i32, %arg1: i32) -> (i32, i32) {
    %c0_i32 = arith.constant 0 : i32
    %c0_i32_0 = arith.constant 0 : i32
    %c0_i32_1 = arith.constant 0 : i32
    return %c0_i32, %c0_i32_0 : i32, i32
  }
  func.func @transform_8(%arg0: i32, %arg1: i32) -> (i32, i32) {
    %c1_i32 = arith.constant 1 : i32
    %0 = arith.muli %arg0, %c1_i32 : i32
    %1 = arith.addi %0, %arg1 : i32
    %c0_i32 = arith.constant 0 : i32
    %c0_i32_0 = arith.constant 0 : i32
    return %c0_i32, %1 : i32, i32
  }
}

module attributes {stable_mosaic.version = 11 : i64} {
  func.func @_conv3x3_kernel(%arg0: i32, %arg1: memref<8x768xbf16, #tpu.memory_space<vmem>>, %arg2: memref<9x512xf32, #tpu.memory_space<vmem>>, %arg3: memref<4x72xbf16, #tpu.memory_space<vmem>>, %arg4: memref<4x1xf32, #tpu.memory_space<vmem>>, %arg5: memref<4x512xbf16, #tpu.memory_space<vmem>>, %arg6: memref<72x512xf32, #tpu.memory_space<vmem>>) attributes {dimension_semantics = [#tpu.dimension_semantics<parallel>], iteration_bounds = array<i64: 1>, scalar_prefetch = 0 : i64, scratch_operands = 1 : i64, tpu.core_type = #tpu.core_type<tc>, window_params = [{pipeline_mode = #tpu.pipeline_mode<synchronous>, transform_indices = @transform_0, window_bounds = array<i64: 8, 768>}, {transform_indices = @transform_1, window_bounds = array<i64: 9, 512>}, {pipeline_mode = #tpu.pipeline_mode<synchronous>, transform_indices = @transform_2, window_bounds = array<i64: 4, 72>}, {pipeline_mode = #tpu.pipeline_mode<synchronous>, transform_indices = @transform_3, window_bounds = array<i64: 4, 1>}, {transform_indices = @transform_4, window_bounds = array<i64: 4, 512>}]} {
    %c512_i32 = arith.constant 512 : i32
    %0 = arith.muli %arg0, %c512_i32 : i32
    %1 = tpu.assume_multiple %0, 128 : i32
    %c0 = arith.constant 0 : index
    %2 = arith.index_cast %1 : i32 to index
    %3 = vector.load %arg1[%c0, %2] : memref<8x768xbf16, #tpu.memory_space<vmem>>, vector<8x768xbf16>
    %c0_0 = arith.constant 0 : index
    %c0_1 = arith.constant 0 : index
    %4 = vector.load %arg2[%c0_0, %c0_1] : memref<9x512xf32, #tpu.memory_space<vmem>>, vector<9x512xf32>
    %5 = vector.extract_strided_slice %3 {offsets = [0, 111], sizes = [8, 512], strides = [1, 1]} : vector<8x768xbf16> to vector<8x512xbf16>
    %6 = vector.extract_strided_slice %4 {offsets = [0, 0], sizes = [1, 512], strides = [1, 1]} : vector<9x512xf32> to vector<1x512xf32>
    %7 = arith.extf %5 : vector<8x512xbf16> to vector<8x512xf32>
    %8 = vector.broadcast %6 : vector<1x512xf32> to vector<8x512xf32>
    %9 = arith.mulf %7, %8 : vector<8x512xf32>
    %c0_2 = arith.constant 0 : index
    %c0_3 = arith.constant 0 : index
    %10 = vector.load %arg6[%c0_2, %c0_3] : memref<72x512xf32, #tpu.memory_space<vmem>>, vector<8x512xf32>
    tpu.vector_store %arg6[%c0_2, %c0_3], %9 {strides = array<i32>} : memref<72x512xf32, #tpu.memory_space<vmem>>, vector<8x512xf32>,
    %11 = vector.extract_strided_slice %3 {offsets = [0, 112], sizes = [8, 512], strides = [1, 1]} : vector<8x768xbf16> to vector<8x512xbf16>
    %12 = vector.extract_strided_slice %4 {offsets = [1, 0], sizes = [1, 512], strides = [1, 1]} : vector<9x512xf32> to vector<1x512xf32>
    %13 = arith.extf %11 : vector<8x512xbf16> to vector<8x512xf32>
    %14 = vector.broadcast %12 : vector<1x512xf32> to vector<8x512xf32>
    %15 = arith.mulf %13, %14 : vector<8x512xf32>
    %c8 = arith.constant 8 : index
    %c0_4 = arith.constant 0 : index
    %16 = vector.load %arg6[%c8, %c0_4] : memref<72x512xf32, #tpu.memory_space<vmem>>, vector<8x512xf32>
    tpu.vector_store %arg6[%c8, %c0_4], %15 {strides = array<i32>} : memref<72x512xf32, #tpu.memory_space<vmem>>, vector<8x512xf32>,
    %17 = vector.extract_strided_slice %3 {offsets = [0, 113], sizes = [8, 512], strides = [1, 1]} : vector<8x768xbf16> to vector<8x512xbf16>
    %18 = vector.extract_strided_slice %4 {offsets = [2, 0], sizes = [1, 512], strides = [1, 1]} : vector<9x512xf32> to vector<1x512xf32>
    %19 = arith.extf %17 : vector<8x512xbf16> to vector<8x512xf32>
    %20 = vector.broadcast %18 : vector<1x512xf32> to vector<8x512xf32>
    %21 = arith.mulf %19, %20 : vector<8x512xf32>
    %c16 = arith.constant 16 : index
    %c0_5 = arith.constant 0 : index
    %22 = vector.load %arg6[%c16, %c0_5] : memref<72x512xf32, #tpu.memory_space<vmem>>, vector<8x512xf32>
    tpu.vector_store %arg6[%c16, %c0_5], %21 {strides = array<i32>} : memref<72x512xf32, #tpu.memory_space<vmem>>, vector<8x512xf32>,
    %23 = vector.extract_strided_slice %3 {offsets = [0, 127], sizes = [8, 512], strides = [1, 1]} : vector<8x768xbf16> to vector<8x512xbf16>
    %24 = vector.extract_strided_slice %4 {offsets = [3, 0], sizes = [1, 512], strides = [1, 1]} : vector<9x512xf32> to vector<1x512xf32>
    %25 = arith.extf %23 : vector<8x512xbf16> to vector<8x512xf32>
    %26 = vector.broadcast %24 : vector<1x512xf32> to vector<8x512xf32>
    %27 = arith.mulf %25, %26 : vector<8x512xf32>
    %c24 = arith.constant 24 : index
    %c0_6 = arith.constant 0 : index
    %28 = vector.load %arg6[%c24, %c0_6] : memref<72x512xf32, #tpu.memory_space<vmem>>, vector<8x512xf32>
    tpu.vector_store %arg6[%c24, %c0_6], %27 {strides = array<i32>} : memref<72x512xf32, #tpu.memory_space<vmem>>, vector<8x512xf32>,
    %29 = vector.extract_strided_slice %3 {offsets = [0, 128], sizes = [8, 512], strides = [1, 1]} : vector<8x768xbf16> to vector<8x512xbf16>
    %30 = vector.extract_strided_slice %4 {offsets = [4, 0], sizes = [1, 512], strides = [1, 1]} : vector<9x512xf32> to vector<1x512xf32>
    %31 = arith.extf %29 : vector<8x512xbf16> to vector<8x512xf32>
    %32 = vector.broadcast %30 : vector<1x512xf32> to vector<8x512xf32>
    %33 = arith.mulf %31, %32 : vector<8x512xf32>
    %c32 = arith.constant 32 : index
    %c0_7 = arith.constant 0 : index
    %34 = vector.load %arg6[%c32, %c0_7] : memref<72x512xf32, #tpu.memory_space<vmem>>, vector<8x512xf32>
    tpu.vector_store %arg6[%c32, %c0_7], %33 {strides = array<i32>} : memref<72x512xf32, #tpu.memory_space<vmem>>, vector<8x512xf32>,
    %35 = vector.extract_strided_slice %3 {offsets = [0, 129], sizes = [8, 512], strides = [1, 1]} : vector<8x768xbf16> to vector<8x512xbf16>
    %36 = vector.extract_strided_slice %4 {offsets = [5, 0], sizes = [1, 512], strides = [1, 1]} : vector<9x512xf32> to vector<1x512xf32>
    %37 = arith.extf %35 : vector<8x512xbf16> to vector<8x512xf32>
    %38 = vector.broadcast %36 : vector<1x512xf32> to vector<8x512xf32>
    %39 = arith.mulf %37, %38 : vector<8x512xf32>
    %c40 = arith.constant 40 : index
    %c0_8 = arith.constant 0 : index
    %40 = vector.load %arg6[%c40, %c0_8] : memref<72x512xf32, #tpu.memory_space<vmem>>, vector<8x512xf32>
    tpu.vector_store %arg6[%c40, %c0_8], %39 {strides = array<i32>} : memref<72x512xf32, #tpu.memory_space<vmem>>, vector<8x512xf32>,
    %41 = vector.extract_strided_slice %3 {offsets = [0, 143], sizes = [8, 512], strides = [1, 1]} : vector<8x768xbf16> to vector<8x512xbf16>
    %42 = vector.extract_strided_slice %4 {offsets = [6, 0], sizes = [1, 512], strides = [1, 1]} : vector<9x512xf32> to vector<1x512xf32>
    %43 = arith.extf %41 : vector<8x512xbf16> to vector<8x512xf32>
    %44 = vector.broadcast %42 : vector<1x512xf32> to vector<8x512xf32>
    %45 = arith.mulf %43, %44 : vector<8x512xf32>
    %c48 = arith.constant 48 : index
    %c0_9 = arith.constant 0 : index
    %46 = vector.load %arg6[%c48, %c0_9] : memref<72x512xf32, #tpu.memory_space<vmem>>, vector<8x512xf32>
    tpu.vector_store %arg6[%c48, %c0_9], %45 {strides = array<i32>} : memref<72x512xf32, #tpu.memory_space<vmem>>, vector<8x512xf32>,
    %47 = vector.extract_strided_slice %3 {offsets = [0, 144], sizes = [8, 512], strides = [1, 1]} : vector<8x768xbf16> to vector<8x512xbf16>
    %48 = vector.extract_strided_slice %4 {offsets = [7, 0], sizes = [1, 512], strides = [1, 1]} : vector<9x512xf32> to vector<1x512xf32>
    %49 = arith.extf %47 : vector<8x512xbf16> to vector<8x512xf32>
    %50 = vector.broadcast %48 : vector<1x512xf32> to vector<8x512xf32>
    %51 = arith.mulf %49, %50 : vector<8x512xf32>
    %c56 = arith.constant 56 : index
    %c0_10 = arith.constant 0 : index
    %52 = vector.load %arg6[%c56, %c0_10] : memref<72x512xf32, #tpu.memory_space<vmem>>, vector<8x512xf32>
    tpu.vector_store %arg6[%c56, %c0_10], %51 {strides = array<i32>} : memref<72x512xf32, #tpu.memory_space<vmem>>, vector<8x512xf32>,
    %53 = vector.extract_strided_slice %3 {offsets = [0, 145], sizes = [8, 512], strides = [1, 1]} : vector<8x768xbf16> to vector<8x512xbf16>
    %54 = vector.extract_strided_slice %4 {offsets = [8, 0], sizes = [1, 512], strides = [1, 1]} : vector<9x512xf32> to vector<1x512xf32>
    %55 = arith.extf %53 : vector<8x512xbf16> to vector<8x512xf32>
    %56 = vector.broadcast %54 : vector<1x512xf32> to vector<8x512xf32>
    %57 = arith.mulf %55, %56 : vector<8x512xf32>
    %c64 = arith.constant 64 : index
    %c0_11 = arith.constant 0 : index
    %58 = vector.load %arg6[%c64, %c0_11] : memref<72x512xf32, #tpu.memory_space<vmem>>, vector<8x512xf32>
    tpu.vector_store %arg6[%c64, %c0_11], %57 {strides = array<i32>} : memref<72x512xf32, #tpu.memory_space<vmem>>, vector<8x512xf32>,
    %c0_12 = arith.constant 0 : index
    %c0_13 = arith.constant 0 : index
    %59 = vector.load %arg3[%c0_12, %c0_13] : memref<4x72xbf16, #tpu.memory_space<vmem>>, vector<4x72xbf16>
    %c0_14 = arith.constant 0 : index
    %c0_15 = arith.constant 0 : index
    %60 = vector.load %arg6[%c0_14, %c0_15] : memref<72x512xf32, #tpu.memory_space<vmem>>, vector<72x512xf32>
    %61 = arith.truncf %60 : vector<72x512xf32> to vector<72x512xbf16>
    %cst = arith.constant dense<0.000000e+00> : vector<4x512xf32>
    %62 = tpu.matmul %59, %61, %cst {dimension_numbers = #tpu.dot_dimension_numbers<[1], [0], [0], [1], [0, 0, 1, 1], [], []>} : vector<4x72xbf16>, vector<72x512xbf16>, vector<4x512xf32> -> vector<4x512xf32>
    %c0_16 = arith.constant 0 : index
    %c0_17 = arith.constant 0 : index
    %63 = vector.load %arg4[%c0_16, %c0_17] : memref<4x1xf32, #tpu.memory_space<vmem>>, vector<4x1xf32>
    %64 = vector.broadcast %63 : vector<4x1xf32> to vector<4x512xf32>
    %65 = arith.addf %62, %64 : vector<4x512xf32>
    %66 = arith.truncf %65 : vector<4x512xf32> to vector<4x512xbf16>
    %c0_18 = arith.constant 0 : index
    %c0_19 = arith.constant 0 : index
    %67 = vector.load %arg5[%c0_18, %c0_19] : memref<4x512xbf16, #tpu.memory_space<vmem>>, vector<4x512xbf16>
    tpu.vector_store %arg5[%c0_18, %c0_19], %66 {strides = array<i32>} : memref<4x512xbf16, #tpu.memory_space<vmem>>, vector<4x512xbf16>,
    return
  }
  func.func @transform_0(%arg0: i32) -> (i32, i32) {
    %c0_i32 = arith.constant 0 : i32
    %c0_i32_0 = arith.constant 0 : i32
    %c0_i32_1 = arith.constant 0 : i32
    return %c0_i32, %c0_i32_0 : i32, i32
  }
  func.func @transform_1(%arg0: i32) -> (i32, i32) {
    %c0_i32 = arith.constant 0 : i32
    %c0_i32_0 = arith.constant 0 : i32
    return %c0_i32, %arg0 : i32, i32
  }
  func.func @transform_2(%arg0: i32) -> (i32, i32) {
    %c0_i32 = arith.constant 0 : i32
    %c0_i32_0 = arith.constant 0 : i32
    %c0_i32_1 = arith.constant 0 : i32
    return %c0_i32, %c0_i32_0 : i32, i32
  }
  func.func @transform_3(%arg0: i32) -> (i32, i32) {
    %c0_i32 = arith.constant 0 : i32
    %c0_i32_0 = arith.constant 0 : i32
    %c0_i32_1 = arith.constant 0 : i32
    return %c0_i32, %c0_i32_0 : i32, i32
  }
  func.func @transform_4(%arg0: i32) -> (i32, i32) {
    %c0_i32 = arith.constant 0 : i32
    %c0_i32_0 = arith.constant 0 : i32
    return %c0_i32, %arg0 : i32, i32
  }
}

</mosaic_0001>

<bundles_post_ra>
// kernel: _lambda_.10
= control target key start
LH: loop header
LB: loop body
LE: loop exit
PB: predicated region body
PF: predicated region fallthrough
CT: control target
= control target key end

     0   :  { %s631_s21 = smov 113   ;;  %s632_s22 = smov 127   ;;  %vm229_vm0 = vcmask 1039360   ;;  %vm171_vm1 = vcmask 924672   ;;  %vm113_vm2 = vcmask 916480   ;;  %vm55_vm3 = vcmask 908288   ;;  %s873_s1 = inlined_call_operand.vmem [shape: f32[9,512], index: 1, kind: input, shape index: {}]   ;;  %s874_s0 = inlined_call_operand.vmem [shape: bf16[8,768], index: 0, kind: input, shape index: {}]   ;;  %s875_s3 = inlined_call_operand.vmem [shape: f32[8,1], index: 3, kind: input, shape index: {}]   ;;  %s876_s2 = inlined_call_operand.vmem [shape: bf16[8,72], index: 2, kind: input, shape index: {}]   ;;  %s877_s4 = inlined_call_operand.vmem [shape: bf16[8,512], index: 4, kind: output, shape index: {}]  }
   0x1   :  { %v668_v0 = vld [vmem:[%s873_s1 + $0x18] sm:$0xff]  ;;  %v673_v1 = vld [vmem:[%s873_s1 + $0x10] sm:$0xff]  ;;  %v678_v2 = vld [vmem:[%s873_s1 + $0x8] sm:$0xff]  ;;  %s633_s23 = smov 111   ;;  %s634_s24 = smov 112   ;;  %vm277_vm4 = vcmask 1043456  }
   0x2   :  { %v158_v3 = vperm.slane %v668_v0, 2  ;;  %v215_v4 = vperm.slane %v673_v1, 3  ;;  %v156_v5 = vperm.slane %v678_v2, 2  ;;  %v216_v6 = vperm.slane %v668_v0, 3  ;;  %v704_v15 = vld [vmem:[%s873_s1] sm:$0xff]  ;;  %v716_v20 = vld [vmem:[%s874_s0 + $0x8] sm:$0xff] }
   0x3   :  { %v214_v7 = vperm.slane %v678_v2, 3  ;;  %v157_v8 = vperm.slane %v673_v1, 2  ;;  %v42_v9 = vperm.slane %v668_v0, 0  ;;  %v41_v10 = vperm.slane %v673_v1, 0  ;;  %v725_v21 = vld [vmem:[%s874_s0 + $0x10] sm:$0xff]  ;;  %v735_v22 = vld [vmem:[%s874_s0] sm:$0xff] }
   0x4   :  { %169 = vrot.lane.b32.xlu1 %v158_v3, %s631_s21  ;;  %225 = vrot.lane.b32.xlu2 %v215_v4, %s632_s22  ;;  %v40_v11 = vperm.slane %v678_v2, 0  ;;  %v100_v12 = vperm.slane %v668_v0, 1  ;;  %v99_v13 = vperm.slane %v673_v1, 1  ;;  %v98_v14 = vperm.slane %v678_v2, 1  ;;  %s635_s0 = smov 17   ;;  %s636_s7 = smov 1  }
   0x5   :  { %165 = vrot.lane.b32.xlu0 %v156_v5, %s631_s21  ;;  %v213_v16 = vperm.slane %v704_v15, 3  ;;  %v39_v17 = vperm.slane %v704_v15, 0  ;;  %v155_v18 = vperm.slane %v704_v15, 2  ;;  %v97_v19 = vperm.slane %v704_v15, 1  ;;  %s637_s8 = smov 15   ;;  %s638_s9 = smov 16  }
   0x6   :  { %v38_v29 = vunpack.c.l.bf16 %v725_v21  ;;  %v34_v30 = vunpack.c.l.bf16 %v735_v22  ;;  %v36_v36 = vunpack.c.l.bf16 %v716_v20  ;;  %v37_v39 = vunpack.c.h.bf16 %v716_v20 }
   0x7   :  { %v35_v48 = vunpack.c.h.bf16 %v735_v22  ;;  %vm258_vm5 = vcmask 7168   ;;  %vm200_vm6 = vcmask 121856   ;;  %vm84_vm7 = vcmask 138240  }
   0x8   :  { %vm142_vm8 = vcmask 130048   ;;  %vm489_vm9 = vcmask 588800  }
   0xc   :  { %227 = vrot.lane.b32.xlu2 %v216_v6, %s632_s22  ;;  %223 = vrot.lane.b32.xlu1 %v214_v7, %s632_s22 }
   0xd   :  { %167 = vrot.lane.b32.xlu0 %v157_v8, %s631_s21 }
  0x14   :  { %53 = vrot.lane.b32.xlu2 %v42_v9, %s633_s23  ;;  %51 = vrot.lane.b32.xlu1 %v41_v10, %s633_s23 }
  0x15   :  { %49 = vrot.lane.b32.xlu0 %v40_v11, %s633_s23 }
  0x1c   :  { %111 = vrot.lane.b32.xlu2 %v100_v12, %s634_s24  ;;  %109 = vrot.lane.b32.xlu1 %v99_v13, %s634_s24 }
  0x1d   :  { %107 = vrot.lane.b32.xlu0 %v98_v14, %s634_s24 }
  0x24   :  { %221 = vrot.lane.b32.xlu1 %v213_v16, %s632_s22  ;;  %47 = vrot.lane.b32.xlu2 %v39_v17, %s633_s23 }
  0x25   :  { %163 = vrot.lane.b32.xlu0 %v155_v18, %s631_s21 }
  0x2c   :  { %396 = vrot.lane.b32.xlu1 %v716_v20, %s633_s23  ;;  %398 = vrot.lane.b32.xlu2 %v725_v21, %s633_s23 }
  0x2d   :  { %105 = vrot.lane.b32.xlu0 %v97_v19, %s634_s24 }
  0x34   :  { %334 = vrot.lane.b32.xlu1 %v725_v21, %s631_s21  ;;  %364 = vrot.lane.b32.xlu2 %v716_v20, %s634_s24 }
  0x35   :  { %332 = vrot.lane.b32.xlu0 %v716_v20, %s631_s21 }
  0x3c   :  { %394 = vrot.lane.b32.xlu1 %v735_v22, %s633_s23  ;;  %300 = vrot.lane.b32.xlu2 %v716_v20, %s632_s22 }
  0x3d   :  { %366 = vrot.lane.b32.xlu0 %v725_v21, %s634_s24 }
  0x44   :  { %330 = vrot.lane.b32.xlu1 %v735_v22, %s631_s21  ;;  %362 = vrot.lane.b32.xlu2 %v735_v22, %s634_s24 }
  0x45   :  { %302 = vrot.lane.b32.xlu0 %v725_v21, %s632_s22 }
  0x4d   :  { %298 = vrot.lane.b32.xlu0 %v735_v22, %s632_s22 }
  0x5e   :  { %v226_v23 = vpop.permute.xlu2 %225 }
  0x66   :  { %v228_v24 = vpop.permute.xlu2 %227 }
  0x67   :  { %v232_v40 = vsel %vm229_vm0, %v226_v23, %v228_v24  ;;  %v242_v50 = vmul.f32 %v228_v24, %v38_v29 }
  0x68   :  { %v241_v43 = vmul.f32 %v232_v40, %v37_v39  ;;  %v628_v40 = vld [vmem:[%s873_s1 + $0x28] ss:$0 sm:$0xff] }
  0x6e   :  { %v54_v25 = vpop.permute.xlu2 %53 }
  0x6f   :  { %v68_v31 = vmul.f32 %v54_v25, %v38_v29 }
  0x76   :  { %v170_v26 = vpop.permute.xlu1 %169  ;;  %v112_v27 = vpop.permute.xlu2 %111 }
  0x77   :  { %v166_v28 = vpop.permute.xlu0 %165  ;;  %v184_v53 = vmul.f32 %v170_v26, %v38_v29  ;;  %v126_v7 = vmul.f32 %v112_v27, %v38_v29 }
  0x7e   :  { %v751_v32 = vpop.permute.xlu1 %223  ;;  %v753_v33 = vpop.permute.xlu2 %47 }
  0x7f   :  { %v168_v34 = vpop.permute.xlu0 %167  ;;  %v64_v35 = vmul.f32 %v753_v33, %v34_v30  ;;  %v231_v38 = vsel %vm229_vm0, %v751_v32, %v226_v23 }
  0x80   :  { %v240_v41 = vmul.f32 %v231_v38, %v36_v36  ;;  %v173_v58 = vsel %vm171_vm1, %v166_v28, %v168_v34  ;;  %v174_v59 = vsel %vm171_vm1, %v168_v34, %v170_v26 }
  0x81   :  { %v595_v37 = vpack.i.bf16 %v64_v35, %v68_v31  ;;  %v182_v61 = vmul.f32 %v173_v58, %v36_v36  ;;  %v183_v62 = vmul.f32 %v174_v59, %v37_v39 }
  0x82   :  { %v605_v45 = vpack.i.bf16 %v241_v43, %v240_v41 }
  0x83   :  { %596 = vrot.lane.b32.xlu0 %v595_v37, %s635_s0  ;;  %v600_v6 = vpack.i.bf16 %v183_v62, %v182_v61 }
  0x86   :  { %v52_v42 = vpop.permute.xlu1 %51  ;;  %v399_v19 = vpop.permute.xlu2 %398 }
  0x87   :  { %v50_v44 = vpop.permute.xlu0 %49  ;;  %v58_v10 = vsel %vm55_vm3, %v52_v42, %v54_v25 }
  0x88   :  { %v57_v11 = vsel %vm55_vm3, %v50_v44, %v52_v42  ;;  %v67_v16 = vmul.f32 %v58_v10, %v37_v39  ;;  %v56_v25 = vsel %vm55_vm3, %v753_v33, %v50_v44 }
  0x89   :  { %v66_v17 = vmul.f32 %v57_v11, %v36_v36  ;;  %v629_v11 = vld [vmem:[%s873_s1 + $0x30] ss:$0 sm:$0xff] }
  0x8b   :  { %606 = vrot.lane.b32.xlu0 %v605_v45, %s636_s7  ;;  %v610_v23 = vpack.i.bf16 %v67_v16, %v66_v17 }
  0x8e   :  { %v110_v46 = vpop.permute.xlu1 %109  ;;  %v365_v29 = vpop.permute.xlu2 %364 }
  0x8f   :  { %v108_v47 = vpop.permute.xlu0 %107  ;;  %v116_v8 = vsel %vm113_vm2, %v110_v46, %v112_v27 }
  0x90   :  { %v115_v9 = vsel %vm113_vm2, %v108_v47, %v110_v46  ;;  %v125_v13 = vmul.f32 %v116_v8, %v37_v39  ;;  %v627_v39 = vld [vmem:[%s873_s1 + $0x20] ss:$0 sm:$0xff] }
  0x91   :  { %v124_v14 = vmul.f32 %v115_v9, %v36_v36 }
  0x93   :  { %v615_v18 = vpack.i.bf16 %v125_v13, %v124_v14  ;;  %v630_v13 = vld [vmem:[%s873_s1 + $0x38] ss:$0 sm:$0xff] }
  0x96   :  { %v222_v49 = vpop.permute.xlu1 %221  ;;  %v780_v34 = vpop.permute.xlu2 %300 }
  0x97   :  { %v238_v51 = vmul.f32 %v222_v49, %v34_v30  ;;  %v164_v52 = vpop.permute.xlu0 %163  ;;  %v230_v24 = vsel %vm229_vm0, %v222_v49, %v751_v32 }
  0x98   :  { %v172_v54 = vsel %vm171_vm1, %v164_v52, %v166_v28  ;;  %v180_v55 = vmul.f32 %v164_v52, %v34_v30  ;;  %v239_v26 = vmul.f32 %v230_v24, %v35_v48  ;;  %v65_v28 = vmul.f32 %v56_v25, %v35_v48 }
  0x99   :  { %v590_v56 = vpack.i.bf16 %v238_v51, %v242_v50  ;;  %v181_v57 = vmul.f32 %v172_v54, %v35_v48  ;;  %v350_v25 = vperm.slane %v704_v15, 6 }
  0x9a   :  { %v585_v60 = vpack.i.bf16 %v180_v55, %v184_v53 }
  0x9b   :  { %192 = vrot.lane.b32.xlu0 %v181_v57, %s637_s8  ;;  %591 = vrot.lane.b32.xlu1 %v590_v56, %s636_s7 }
  0x9c   :  { %586 = vrot.lane.b32.xlu2 %v585_v60, %s637_s8 }
  0x9e   :  { %v397_v27 = vpop.permute.xlu1 %396  ;;  %v363_v44 = vpop.permute.xlu2 %362 }
  0x9f   :  { %v106_v63 = vpop.permute.xlu0 %105  ;;  %v401_v35 = vrot.slane %v397_v27, 4  ;;  %v368_v53 = vrot.slane %v363_v44, 4 }
  0xa0   :  { %v114_v3 = vsel %vm113_vm2, %v106_v63, %v108_v47  ;;  %v122_v4 = vmul.f32 %v106_v63, %v34_v30  ;;  %v402_v47 = vrot.slane %v399_v19, 4 }
  0xa1   :  { %v123_v5 = vmul.f32 %v114_v3, %v35_v48  ;;  %v369_v48 = vrot.slane %v365_v29, 4 }
  0xa2   :  { %v406_v58 = vsel %vm277_vm4, %v401_v35, %v402_v47 }
  0xa3   :  { %v620_v12 = vpack.i.bf16 %v123_v5, %v122_v4  ;;  %601 = vrot.lane.b32.xlu1 %v600_v6, %s637_s8  ;;  %v371_v63 = vsel %vm277_vm4, %v368_v53, %v369_v48  ;;  %v305_v5 = vrot.slane %v780_v34, 4  ;;  %v407_v6 = vsel %vm55_vm3, %v406_v58, %v399_v19 }
  0xa4   :  { %140 = vrot.lane.b32.xlu2 %v126_v7, %s638_s9  ;;  %v412_v10 = vunpack.c.l.bf16 %v407_v6  ;;  %v276_v58 = vrot.slane %v725_v21, 4 }
  0xa5   :  { %621 = vrot.lane.b32.xlu0 %v620_v12, %s638_s9  ;;  %v413_v12 = vunpack.c.h.bf16 %v407_v6  ;;  %v320_v6 = vperm.slane %v673_v1, 5 }
  0xa6   :  { %v335_v30 = vpop.permute.xlu1 %334  ;;  %v420_v19 = vmul.f32 %v629_v11, %v412_v10 }
  0xa7   :  { %v333_v31 = vpop.permute.xlu0 %332  ;;  %v338_v32 = vrot.slane %v335_v30, 4 }
  0xa8   :  { %v337_v43 = vrot.slane %v333_v31, 4 }
  0xaa   :  { %v342_v49 = vsel %vm277_vm4, %v337_v43, %v338_v32 }
  0xab   :  { %616 = vrot.lane.b32.xlu1 %v615_v18, %s638_s9  ;;  %v343_v59 = vsel %vm171_vm1, %v342_v49, %v335_v30  ;;  %v373_v18 = vsel %vm113_vm2, %v371_v63, %v365_v29  ;;  %v351_v30 = vperm.slane %v678_v2, 6  ;;  %v352_v29 = vperm.slane %v673_v1, 6 }
  0xac   :  { %611 = vrot.lane.b32.xlu2 %v610_v23, %s635_s0  ;;  %v348_v4 = vunpack.c.l.bf16 %v343_v59  ;;  %v349_v7 = vunpack.c.h.bf16 %v343_v59  ;;  %v421_v23 = vmul.f32 %v630_v13, %v413_v12  ;;  %v379_v32 = vunpack.c.h.bf16 %v373_v18 }
  0xad   :  { %v274_v63 = vrot.slane %v735_v22, 4  ;;  %v286_v22 = vperm.slane %v704_v15, 4 }
  0xae   :  { %v395_v36 = vpop.permute.xlu1 %394 }
  0xaf   :  { %v400_v37 = vrot.slane %v395_v36, 4  ;;  %v367_v38 = vpop.permute.xlu0 %366  ;;  %v482_v36 = vpack.c.bf16 %v421_v23, %v421_v23 }
  0xb0   :  { %v370_v41 = vrot.slane %v367_v38, 4 }
  0xb1   :  { %v403_v33 = vsel %vm277_vm4, %v400_v37, %v401_v35  ;;  %v481_v35 = vpack.c.bf16 %v420_v19, %v420_v19 }
  0xb2   :  { %v405_v42 = vsel %vm55_vm3, %v403_v33, %v397_v27  ;;  %v374_v52 = vsel %vm277_vm4, %v369_v48, %v370_v41  ;;  %v382_v27 = vperm.slane %v704_v15, 7  ;;  %v384_v41 = vperm.slane %v673_v1, 7 }
  0xb3   :  { %250 = vrot.lane.b32.xlu1 %v239_v26, %s636_s7  ;;  %v410_v45 = vunpack.c.l.bf16 %v405_v42  ;;  %v411_v46 = vunpack.c.h.bf16 %v405_v42  ;;  %v375_v60 = vsel %vm113_vm2, %v374_v52, %v367_v38  ;;  %v378_v26 = vunpack.c.l.bf16 %v373_v18 }
  0xb4   :  { %76 = vrot.lane.b32.xlu2 %v65_v28, %s635_s0  ;;  %v380_v8 = vunpack.c.l.bf16 %v375_v60  ;;  %v381_v14 = vunpack.c.h.bf16 %v375_v60  ;;  %v353_v42 = vperm.slane %v668_v0, 6 }
  0xb5   :  { %v418_v50 = vmul.f32 %v627_v39, %v410_v45  ;;  %v419_v51 = vmul.f32 %v628_v40, %v411_v46  ;;  %v386_v38 = vmul.f32 %v382_v27, %v378_v26  ;;  %v501_v39 = vsel %vm277_vm4, %v481_v35, 0 }
  0xb6   :  { %v331_v54 = vpop.permute.xlu1 %330  ;;  %v504_v40 = vsel %vm277_vm4, %v482_v36, 0  ;;  %535 = vmatpush.bf16.msra.mxu2 %v501_v39  ;;  %v356_v45 = vmul.f32 %v352_v29, %v348_v4  ;;  %v385_v46 = vperm.slane %v668_v0, 7  ;;  %v388_v47 = vmul.f32 %v384_v41, %v380_v8 }
  0xb7   :  { %v336_v55 = vrot.slane %v331_v54, 4  ;;  %v479_v56 = vpack.c.bf16 %v418_v50, %v418_v50  ;;  %v480_v57 = vpack.c.bf16 %v419_v51, %v419_v51  ;;  %v303_v9 = vpop.permute.xlu0 %302  ;;  %548 = vmatpush.bf16.msra.mxu3 %v504_v40  ;;  %v357_v48 = vmul.f32 %v353_v42, %v349_v7 }
  0xb8   :  { %v306_v16 = vrot.slane %v303_v9, 4  ;;  %v389_v50 = vmul.f32 %v385_v46, %v381_v14  ;;  %v477_v52 = vpack.c.bf16 %v388_v47, %v356_v45  ;;  %v288_v4 = vperm.slane %v673_v1, 4 }
  0xb9   :  { %v495_v61 = vsel %vm277_vm4, %v479_v56, 0  ;;  %v498_v62 = vsel %vm277_vm4, %v480_v57, 0  ;;  %v339_v3 = vsel %vm277_vm4, %v336_v55, %v337_v43  ;;  %v275_v57 = vrot.slane %v716_v20, 4 }
  0xba   :  { %509 = vmatpush.bf16.msra.mxu0 %v495_v61  ;;  %522 = vmatpush.bf16.msra.mxu1 %v498_v62  ;;  %v341_v17 = vsel %vm171_vm1, %v339_v3, %v333_v31  ;;  %v383_v31 = vperm.slane %v678_v2, 7  ;;  %v310_v51 = vsel %vm277_vm4, %v305_v5, %v306_v16  ;;  %v478_v54 = vpack.c.bf16 %v389_v50, %v357_v48 }
  0xbb   :  { %v346_v24 = vunpack.c.l.bf16 %v341_v17  ;;  %v347_v28 = vunpack.c.h.bf16 %v341_v17  ;;  %536 = vmatpush.bf16.msra.mxu2 %v477_v52  ;;  %v311_v56 = vsel %vm229_vm0, %v310_v51, %v303_v9  ;;  %v279_v62 = vsel %vm277_vm4, %v275_v57, %v276_v58 }
  0xbc   :  { %v387_v44 = vmul.f32 %v383_v31, %v379_v32  ;;  %549 = vmatpush.bf16.msra.mxu3 %v478_v54  ;;  %v316_v59 = vunpack.c.l.bf16 %v311_v56  ;;  %v317_v61 = vunpack.c.h.bf16 %v311_v56  ;;  %v284_v3 = vunpack.c.l.bf16 %v279_v62 }
  0xbd   :  { %v354_v37 = vmul.f32 %v350_v25, %v346_v24  ;;  %v355_v33 = vmul.f32 %v351_v30, %v347_v28  ;;  %v285_v7 = vunpack.c.h.bf16 %v279_v62  ;;  %v289_v8 = vperm.slane %v668_v0, 4 }
  0xbe   :  { %v321_v20 = vperm.slane %v668_v0, 5  ;;  %v278_v21 = vsel %vm277_vm4, %v274_v63, %v275_v57  ;;  %v292_v9 = vmul.f32 %v288_v4, %v284_v3  ;;  %v324_v10 = vmul.f32 %v320_v6, %v316_v59  ;;  %v426_v3 = vld [vmem:[%s876_s2] sm:$0xf] }
  0xbf   :  { %v475_v43 = vpack.c.bf16 %v386_v38, %v354_v37  ;;  %v476_v49 = vpack.c.bf16 %v387_v44, %v355_v33  ;;  %v299_v53 = vpop.permute.xlu0 %298  ;;  %v282_v11 = vunpack.c.l.bf16 %v278_v21  ;;  %v293_v12 = vmul.f32 %v289_v8, %v285_v7  ;;  %v483_v37 = vld [vmem:[%s875_s3] sm:$0xff] }
  0xc0   :  { %v304_v55 = vrot.slane %v299_v53, 4  ;;  %v325_v13 = vmul.f32 %v321_v20, %v317_v61  ;;  %v318_v1 = vperm.slane %v704_v15, 5  ;;  %v473_v16 = vpack.c.bf16 %v324_v10, %v292_v9 }
  0xc1   :  { %510 = vmatpush.bf16.msra.mxu0 %v475_v43  ;;  %523 = vmatpush.bf16.msra.mxu1 %v476_v49  ;;  %v290_v17 = vmul.f32 %v286_v22, %v282_v11  ;;  %v283_v18 = vunpack.c.h.bf16 %v278_v21  ;;  %v287_v0 = vperm.slane %v678_v2, 4  ;;  %v639_v38 = vmov 0  }
  0xc2   :  { %v307_v60 = vsel %vm277_vm4, %v304_v55, %v305_v5  ;;  %v474_v19 = vpack.c.bf16 %v325_v13, %v293_v12  ;;  %537 = vmatpush.bf16.msra.mxu2 %v473_v16  ;;  %625 = vset.pattern.permute.xlu1 %v639_v38 }
  0xc3   :  { %v309_v5 = vsel %vm229_vm0, %v307_v60, %v780_v34  ;;  %v319_v34 = vperm.slane %v678_v2, 5  ;;  %v291_v25 = vmul.f32 %v287_v0, %v283_v18  ;;  %626 = vset.pattern.permute.xlu0 %v639_v38  ;;  %486 = vperm.xlu1 %625, %v483_v37  }
  0xc4   :  { %v314_v14 = vunpack.c.l.bf16 %v309_v5  ;;  %v315_v24 = vunpack.c.h.bf16 %v309_v5  ;;  %550 = vmatpush.bf16.msra.mxu3 %v474_v19 }
  0xc6   :  { %v322_v23 = vmul.f32 %v318_v1, %v314_v14  ;;  %v323_v27 = vmul.f32 %v319_v34, %v315_v24 }
  0xc8   :  { %v471_v26 = vpack.c.bf16 %v322_v23, %v290_v17  ;;  %v472_v28 = vpack.c.bf16 %v323_v27, %v291_v25 }
  0xca   :  { %511 = vmatpush.bf16.msra.mxu0 %v471_v26  ;;  %524 = vmatpush.bf16.msra.mxu1 %v472_v28 }
  0xf5   :  { %v837_v15 = vpop.permute.xlu0 %596 }
  0xf6   :  { %v587_v30 = vpop.permute.xlu2 %586  ;;  %v598_v53 = vunpack.i.l.bf16 %v837_v15  ;;  %v599_v12 = vunpack.i.h.bf16 %v837_v15 }
  0xf7   :  { %v588_v39 = vunpack.i.l.bf16 %v587_v30  ;;  %v589_v63 = vunpack.i.h.bf16 %v587_v30 }
  0xfd   :  { %v607_v32 = vpop.permute.xlu0 %606 }
  0xfe   :  { %v141_v36 = vpop.permute.xlu2 %140  ;;  %v609_v2 = vunpack.i.h.bf16 %v607_v32  ;;  %v608_v33 = vunpack.i.l.bf16 %v607_v32 }
 0x100   :  { %v261_v43 = vsel %vm258_vm5, %v608_v33, %v609_v2 }
 0x106   :  { %v612_v46 = vpop.permute.xlu2 %611 }
 0x107   :  { %v614_v50 = vunpack.i.h.bf16 %v612_v46  ;;  %v613_v51 = vunpack.i.l.bf16 %v612_v46 }
 0x109   :  { %v87_v56 = vsel %vm84_vm7, %v613_v51, %v614_v50  ;;  %v88_v58 = vsel %vm84_vm7, %v614_v50, %v598_v53 }
 0x10d   :  { %v592_v35 = vpop.permute.xlu1 %591  ;;  %v193_v47 = vpop.permute.xlu0 %192 }
 0x10e   :  { %v593_v31 = vunpack.i.l.bf16 %v592_v35  ;;  %v594_v4 = vunpack.i.h.bf16 %v592_v35  ;;  %v201_v8 = vsel %vm200_vm6, %v589_v63, %v193_v47  ;;  %v77_v10 = vpop.permute.xlu2 %76 }
 0x10f   :  { %v85_v1 = vsel %vm84_vm7, %v599_v12, %v77_v10  ;;  %v86_v16 = vsel %vm84_vm7, %v77_v10, %v613_v51 }
 0x110   :  { %v262_v45 = vsel %vm258_vm5, %v609_v2, %v593_v31 }
 0x115   :  { %v602_v29 = vpop.permute.xlu1 %601 }
 0x116   :  { %v604_v40 = vunpack.i.h.bf16 %v602_v29  ;;  %v603_v41 = vunpack.i.l.bf16 %v602_v29 }
 0x117   :  { %v622_v60 = vpop.permute.xlu0 %621 }
 0x118   :  { %v203_v42 = vsel %vm200_vm6, %v603_v41, %v604_v40  ;;  %v204_v44 = vsel %vm200_vm6, %v604_v40, %v588_v39  ;;  %v624_v6 = vunpack.i.h.bf16 %v622_v60  ;;  %v623_v7 = vunpack.i.l.bf16 %v622_v60 }
 0x119   :  { %v469_v48 = vpack.c.bf16 %v261_v43, %v203_v42  ;;  %v470_v49 = vpack.c.bf16 %v262_v45, %v204_v44  ;;  %v202_v9 = vsel %vm200_vm6, %v193_v47, %v603_v41 }
 0x11a   :  { %v143_v13 = vsel %vm142_vm8, %v623_v7, %v624_v6 }
 0x11b   :  { %538 = vmatpush.bf16.msra.mxu2 %v469_v48  ;;  %551 = vmatpush.bf16.msra.mxu3 %v470_v49  ;;  %v463_v17 = vpack.c.bf16 %v143_v13, %v85_v1 }
 0x11d   :  { %v617_v52 = vpop.permute.xlu1 %616 }
 0x11e   :  { %v619_v54 = vunpack.i.h.bf16 %v617_v52  ;;  %v618_v55 = vunpack.i.l.bf16 %v617_v52 }
 0x120   :  { %v145_v57 = vsel %vm142_vm8, %v618_v55, %v619_v54  ;;  %v146_v59 = vsel %vm142_vm8, %v619_v54, %v141_v36  ;;  %v144_v14 = vsel %vm142_vm8, %v624_v6, %v618_v55 }
 0x121   :  { %v465_v61 = vpack.c.bf16 %v145_v57, %v87_v56  ;;  %v466_v62 = vpack.c.bf16 %v146_v59, %v88_v58  ;;  %v464_v18 = vpack.c.bf16 %v144_v14, %v86_v16 }
 0x123   :  { %539 = vmatpush.bf16.msra.mxu2 %v465_v61  ;;  %552 = vmatpush.bf16.msra.mxu3 %v466_v62 }
 0x125   :  { %v251_v20 = vpop.permute.xlu1 %250 }
 0x126   :  { %v259_v21 = vsel %vm258_vm5, %v594_v4, %v251_v20  ;;  %v260_v5 = vsel %vm258_vm5, %v251_v20, %v608_v33  ;;  %574 = vmatmul.msk.bf16.vlgmr.msra.gmra.mxu2 %vm489_vm9, %v426_v3  ;;  %575 = vmatmul.msk.bf16.vlgmr.msra.gmra.mxu3 %vm489_vm9, %v426_v3 }
 0x127   :  { %v467_v11 = vpack.c.bf16 %v259_v21, %v201_v8  ;;  %v468_v22 = vpack.c.bf16 %v260_v5, %v202_v9 }
 0x129   :  { %512 = vmatpush.bf16.msra.mxu0 %v467_v11  ;;  %525 = vmatpush.bf16.msra.mxu1 %v468_v22 }
 0x12d   :  { %513 = vmatpush.bf16.msra.mxu0 %v463_v17  ;;  %526 = vmatpush.bf16.msra.mxu1 %v464_v18 }
 0x130   :  { %572 = vmatmul.msk.bf16.vlgmr.msra.gmra.mxu0 %vm489_vm9, %v426_v3  ;;  %573 = vmatmul.msk.bf16.vlgmr.msra.gmra.mxu1 %vm489_vm9, %v426_v3 }
 0x135   :  { %v487_v0 = vpop.permute.xlu1 %486 }
 0x1a9   :  { %v541_v19 = vpop.f32.mrf.mxu2  ;;  %v554_v23 = vpop.f32.mrf.mxu3 }
 0x1aa   :  { %v542_v24 = vadd.f32 %v541_v19, %v487_v0  ;;  %v555_v34 = vadd.f32 %v554_v23, %v487_v0 }
 0x1ac   :  { %v560_v25 = vmax.f32 %v542_v24, 0.0  ;;  %v561_v26 = vmax.f32 %v555_v34, 0.0 }
 0x1ad   :  { %v515_v27 = vpop.f32.mrf.mxu0  ;;  %v528_v28 = vpop.f32.mrf.mxu1 }
 0x1ae   :  { %v563_v30 = vpack.c.bf16 %v561_v26, %v560_v25  ;;  %v516_v15 = vadd.f32 %v515_v27, %v487_v0  ;;  %v529_v35 = vadd.f32 %v528_v28, %v487_v0 }
 0x1b0   :  { %v558_v36 = vmax.f32 %v516_v15, 0.0  ;;  %v559_v37 = vmax.f32 %v529_v35, 0.0  ;;  %565 = vst [vmem:[%s877_s4 + $0x8] sm:$0xff] %v563_v30 }
 0x1b1   :  { %v543_v32 = vpop.f32.mrf.mxu2  ;;  %v556_v38 = vpop.f32.mrf.mxu3 }
 0x1b2   :  { %v562_v2 = vpack.c.bf16 %v559_v37, %v558_v36 }
 0x1b4   :  { %564 = vst [vmem:[%s877_s4] sm:$0xff] %v562_v2 }
 0x1b5   :  { %v517_v33 = vpop.f32.mrf.mxu0  ;;  %v530_v31 = vpop.f32.mrf.mxu1 }

// kernel: _lambda_.11
= control target key start
LH: loop header
LB: loop body
LE: loop exit
PB: predicated region body
PF: predicated region fallthrough
CT: control target
= control target key end

     0   :  { %s627_s21 = smov 113   ;;  %s628_s22 = smov 127   ;;  %vm229_vm0 = vcmask 1039360   ;;  %vm171_vm1 = vcmask 924672   ;;  %vm113_vm2 = vcmask 916480   ;;  %vm55_vm3 = vcmask 908288   ;;  %s869_s1 = inlined_call_operand.vmem [shape: f32[9,512], index: 1, kind: input, shape index: {}]   ;;  %s870_s0 = inlined_call_operand.vmem [shape: bf16[8,768], index: 0, kind: input, shape index: {}]   ;;  %s871_s3 = inlined_call_operand.vmem [shape: f32[8,1], index: 3, kind: input, shape index: {}]   ;;  %s872_s2 = inlined_call_operand.vmem [shape: bf16[8,72], index: 2, kind: input, shape index: {}]   ;;  %s873_s4 = inlined_call_operand.vmem [shape: bf16[8,512], index: 4, kind: output, shape index: {}]  }
   0x1   :  { %v664_v0 = vld [vmem:[%s869_s1 + $0x18] sm:$0xff]  ;;  %v669_v1 = vld [vmem:[%s869_s1 + $0x10] sm:$0xff]  ;;  %v674_v2 = vld [vmem:[%s869_s1 + $0x8] sm:$0xff]  ;;  %s629_s23 = smov 111   ;;  %s630_s24 = smov 112   ;;  %vm277_vm4 = vcmask 1043456  }
   0x2   :  { %v158_v3 = vperm.slane %v664_v0, 2  ;;  %v215_v4 = vperm.slane %v669_v1, 3  ;;  %v156_v5 = vperm.slane %v674_v2, 2  ;;  %v216_v6 = vperm.slane %v664_v0, 3  ;;  %v700_v15 = vld [vmem:[%s869_s1] sm:$0xff]  ;;  %v712_v20 = vld [vmem:[%s870_s0 + $0x8] sm:$0xff] }
   0x3   :  { %v214_v7 = vperm.slane %v674_v2, 3  ;;  %v157_v8 = vperm.slane %v669_v1, 2  ;;  %v42_v9 = vperm.slane %v664_v0, 0  ;;  %v41_v10 = vperm.slane %v669_v1, 0  ;;  %v721_v21 = vld [vmem:[%s870_s0 + $0x10] sm:$0xff]  ;;  %v731_v22 = vld [vmem:[%s870_s0] sm:$0xff] }
   0x4   :  { %169 = vrot.lane.b32.xlu1 %v158_v3, %s627_s21  ;;  %225 = vrot.lane.b32.xlu2 %v215_v4, %s628_s22  ;;  %v40_v11 = vperm.slane %v674_v2, 0  ;;  %v100_v12 = vperm.slane %v664_v0, 1  ;;  %v99_v13 = vperm.slane %v669_v1, 1  ;;  %v98_v14 = vperm.slane %v674_v2, 1  ;;  %s631_s0 = smov 17   ;;  %s632_s7 = smov 1  }
   0x5   :  { %165 = vrot.lane.b32.xlu0 %v156_v5, %s627_s21  ;;  %v213_v16 = vperm.slane %v700_v15, 3  ;;  %v39_v17 = vperm.slane %v700_v15, 0  ;;  %v155_v18 = vperm.slane %v700_v15, 2  ;;  %v97_v19 = vperm.slane %v700_v15, 1  ;;  %s633_s8 = smov 15   ;;  %s634_s9 = smov 16  }
   0x6   :  { %v38_v29 = vunpack.c.l.bf16 %v721_v21  ;;  %v34_v30 = vunpack.c.l.bf16 %v731_v22  ;;  %v36_v36 = vunpack.c.l.bf16 %v712_v20  ;;  %v37_v39 = vunpack.c.h.bf16 %v712_v20 }
   0x7   :  { %v35_v48 = vunpack.c.h.bf16 %v731_v22  ;;  %vm258_vm5 = vcmask 7168   ;;  %vm200_vm6 = vcmask 121856   ;;  %vm84_vm7 = vcmask 138240  }
   0x8   :  { %vm142_vm8 = vcmask 130048   ;;  %vm489_vm9 = vcmask 588800  }
   0xc   :  { %227 = vrot.lane.b32.xlu2 %v216_v6, %s628_s22  ;;  %223 = vrot.lane.b32.xlu1 %v214_v7, %s628_s22 }
   0xd   :  { %167 = vrot.lane.b32.xlu0 %v157_v8, %s627_s21 }
  0x14   :  { %53 = vrot.lane.b32.xlu2 %v42_v9, %s629_s23  ;;  %51 = vrot.lane.b32.xlu1 %v41_v10, %s629_s23 }
  0x15   :  { %49 = vrot.lane.b32.xlu0 %v40_v11, %s629_s23 }
  0x1c   :  { %111 = vrot.lane.b32.xlu2 %v100_v12, %s630_s24  ;;  %109 = vrot.lane.b32.xlu1 %v99_v13, %s630_s24 }
  0x1d   :  { %107 = vrot.lane.b32.xlu0 %v98_v14, %s630_s24 }
  0x24   :  { %221 = vrot.lane.b32.xlu1 %v213_v16, %s628_s22  ;;  %47 = vrot.lane.b32.xlu2 %v39_v17, %s629_s23 }
  0x25   :  { %163 = vrot.lane.b32.xlu0 %v155_v18, %s627_s21 }
  0x2c   :  { %396 = vrot.lane.b32.xlu1 %v712_v20, %s629_s23  ;;  %398 = vrot.lane.b32.xlu2 %v721_v21, %s629_s23 }
  0x2d   :  { %105 = vrot.lane.b32.xlu0 %v97_v19, %s630_s24 }
  0x34   :  { %334 = vrot.lane.b32.xlu1 %v721_v21, %s627_s21  ;;  %364 = vrot.lane.b32.xlu2 %v712_v20, %s630_s24 }
  0x35   :  { %332 = vrot.lane.b32.xlu0 %v712_v20, %s627_s21 }
  0x3c   :  { %394 = vrot.lane.b32.xlu1 %v731_v22, %s629_s23  ;;  %300 = vrot.lane.b32.xlu2 %v712_v20, %s628_s22 }
  0x3d   :  { %366 = vrot.lane.b32.xlu0 %v721_v21, %s630_s24 }
  0x44   :  { %330 = vrot.lane.b32.xlu1 %v731_v22, %s627_s21  ;;  %362 = vrot.lane.b32.xlu2 %v731_v22, %s630_s24 }
  0x45   :  { %302 = vrot.lane.b32.xlu0 %v721_v21, %s628_s22 }
  0x4d   :  { %298 = vrot.lane.b32.xlu0 %v731_v22, %s628_s22 }
  0x5e   :  { %v226_v23 = vpop.permute.xlu2 %225 }
  0x66   :  { %v228_v24 = vpop.permute.xlu2 %227 }
  0x67   :  { %v232_v40 = vsel %vm229_vm0, %v226_v23, %v228_v24  ;;  %v242_v50 = vmul.f32 %v228_v24, %v38_v29 }
  0x68   :  { %v241_v43 = vmul.f32 %v232_v40, %v37_v39  ;;  %v624_v40 = vld [vmem:[%s869_s1 + $0x28] ss:$0 sm:$0xff] }
  0x6e   :  { %v54_v25 = vpop.permute.xlu2 %53 }
  0x6f   :  { %v68_v31 = vmul.f32 %v54_v25, %v38_v29 }
  0x76   :  { %v170_v26 = vpop.permute.xlu1 %169  ;;  %v112_v27 = vpop.permute.xlu2 %111 }
  0x77   :  { %v166_v28 = vpop.permute.xlu0 %165  ;;  %v184_v53 = vmul.f32 %v170_v26, %v38_v29  ;;  %v126_v7 = vmul.f32 %v112_v27, %v38_v29 }
  0x7e   :  { %v747_v32 = vpop.permute.xlu1 %223  ;;  %v749_v33 = vpop.permute.xlu2 %47 }
  0x7f   :  { %v168_v34 = vpop.permute.xlu0 %167  ;;  %v64_v35 = vmul.f32 %v749_v33, %v34_v30  ;;  %v231_v38 = vsel %vm229_vm0, %v747_v32, %v226_v23 }
  0x80   :  { %v240_v41 = vmul.f32 %v231_v38, %v36_v36  ;;  %v173_v58 = vsel %vm171_vm1, %v166_v28, %v168_v34  ;;  %v174_v59 = vsel %vm171_vm1, %v168_v34, %v170_v26 }
  0x81   :  { %v591_v37 = vpack.i.bf16 %v64_v35, %v68_v31  ;;  %v182_v61 = vmul.f32 %v173_v58, %v36_v36  ;;  %v183_v62 = vmul.f32 %v174_v59, %v37_v39 }
  0x82   :  { %v601_v45 = vpack.i.bf16 %v241_v43, %v240_v41 }
  0x83   :  { %592 = vrot.lane.b32.xlu0 %v591_v37, %s631_s0  ;;  %v596_v6 = vpack.i.bf16 %v183_v62, %v182_v61 }
  0x86   :  { %v52_v42 = vpop.permute.xlu1 %51  ;;  %v399_v19 = vpop.permute.xlu2 %398 }
  0x87   :  { %v50_v44 = vpop.permute.xlu0 %49  ;;  %v58_v10 = vsel %vm55_vm3, %v52_v42, %v54_v25 }
  0x88   :  { %v57_v11 = vsel %vm55_vm3, %v50_v44, %v52_v42  ;;  %v67_v16 = vmul.f32 %v58_v10, %v37_v39  ;;  %v56_v25 = vsel %vm55_vm3, %v749_v33, %v50_v44 }
  0x89   :  { %v66_v17 = vmul.f32 %v57_v11, %v36_v36  ;;  %v625_v11 = vld [vmem:[%s869_s1 + $0x30] ss:$0 sm:$0xff] }
  0x8b   :  { %602 = vrot.lane.b32.xlu0 %v601_v45, %s632_s7  ;;  %v606_v23 = vpack.i.bf16 %v67_v16, %v66_v17 }
  0x8e   :  { %v110_v46 = vpop.permute.xlu1 %109  ;;  %v365_v29 = vpop.permute.xlu2 %364 }
  0x8f   :  { %v108_v47 = vpop.permute.xlu0 %107  ;;  %v116_v8 = vsel %vm113_vm2, %v110_v46, %v112_v27 }
  0x90   :  { %v115_v9 = vsel %vm113_vm2, %v108_v47, %v110_v46  ;;  %v125_v13 = vmul.f32 %v116_v8, %v37_v39  ;;  %v623_v39 = vld [vmem:[%s869_s1 + $0x20] ss:$0 sm:$0xff] }
  0x91   :  { %v124_v14 = vmul.f32 %v115_v9, %v36_v36 }
  0x93   :  { %v611_v18 = vpack.i.bf16 %v125_v13, %v124_v14  ;;  %v626_v13 = vld [vmem:[%s869_s1 + $0x38] ss:$0 sm:$0xff] }
  0x96   :  { %v222_v49 = vpop.permute.xlu1 %221  ;;  %v776_v34 = vpop.permute.xlu2 %300 }
  0x97   :  { %v238_v51 = vmul.f32 %v222_v49, %v34_v30  ;;  %v164_v52 = vpop.permute.xlu0 %163  ;;  %v230_v24 = vsel %vm229_vm0, %v222_v49, %v747_v32 }
  0x98   :  { %v172_v54 = vsel %vm171_vm1, %v164_v52, %v166_v28  ;;  %v180_v55 = vmul.f32 %v164_v52, %v34_v30  ;;  %v239_v26 = vmul.f32 %v230_v24, %v35_v48  ;;  %v65_v28 = vmul.f32 %v56_v25, %v35_v48 }
  0x99   :  { %v586_v56 = vpack.i.bf16 %v238_v51, %v242_v50  ;;  %v181_v57 = vmul.f32 %v172_v54, %v35_v48  ;;  %v350_v25 = vperm.slane %v700_v15, 6 }
  0x9a   :  { %v581_v60 = vpack.i.bf16 %v180_v55, %v184_v53 }
  0x9b   :  { %192 = vrot.lane.b32.xlu0 %v181_v57, %s633_s8  ;;  %587 = vrot.lane.b32.xlu1 %v586_v56, %s632_s7 }
  0x9c   :  { %582 = vrot.lane.b32.xlu2 %v581_v60, %s633_s8 }
  0x9e   :  { %v397_v27 = vpop.permute.xlu1 %396  ;;  %v363_v44 = vpop.permute.xlu2 %362 }
  0x9f   :  { %v106_v63 = vpop.permute.xlu0 %105  ;;  %v401_v35 = vrot.slane %v397_v27, 4  ;;  %v368_v53 = vrot.slane %v363_v44, 4 }
  0xa0   :  { %v114_v3 = vsel %vm113_vm2, %v106_v63, %v108_v47  ;;  %v122_v4 = vmul.f32 %v106_v63, %v34_v30  ;;  %v402_v47 = vrot.slane %v399_v19, 4 }
  0xa1   :  { %v123_v5 = vmul.f32 %v114_v3, %v35_v48  ;;  %v369_v48 = vrot.slane %v365_v29, 4 }
  0xa2   :  { %v406_v58 = vsel %vm277_vm4, %v401_v35, %v402_v47 }
  0xa3   :  { %v616_v12 = vpack.i.bf16 %v123_v5, %v122_v4  ;;  %597 = vrot.lane.b32.xlu1 %v596_v6, %s633_s8  ;;  %v371_v63 = vsel %vm277_vm4, %v368_v53, %v369_v48  ;;  %v305_v5 = vrot.slane %v776_v34, 4  ;;  %v407_v6 = vsel %vm55_vm3, %v406_v58, %v399_v19 }
  0xa4   :  { %140 = vrot.lane.b32.xlu2 %v126_v7, %s634_s9  ;;  %v412_v10 = vunpack.c.l.bf16 %v407_v6  ;;  %v276_v58 = vrot.slane %v721_v21, 4 }
  0xa5   :  { %617 = vrot.lane.b32.xlu0 %v616_v12, %s634_s9  ;;  %v413_v12 = vunpack.c.h.bf16 %v407_v6  ;;  %v320_v6 = vperm.slane %v669_v1, 5 }
  0xa6   :  { %v335_v30 = vpop.permute.xlu1 %334  ;;  %v420_v19 = vmul.f32 %v625_v11, %v412_v10 }
  0xa7   :  { %v333_v31 = vpop.permute.xlu0 %332  ;;  %v338_v32 = vrot.slane %v335_v30, 4 }
  0xa8   :  { %v337_v43 = vrot.slane %v333_v31, 4 }
  0xaa   :  { %v342_v49 = vsel %vm277_vm4, %v337_v43, %v338_v32 }
  0xab   :  { %612 = vrot.lane.b32.xlu1 %v611_v18, %s634_s9  ;;  %v343_v59 = vsel %vm171_vm1, %v342_v49, %v335_v30  ;;  %v373_v18 = vsel %vm113_vm2, %v371_v63, %v365_v29  ;;  %v351_v30 = vperm.slane %v674_v2, 6  ;;  %v352_v29 = vperm.slane %v669_v1, 6 }
  0xac   :  { %607 = vrot.lane.b32.xlu2 %v606_v23, %s631_s0  ;;  %v348_v4 = vunpack.c.l.bf16 %v343_v59  ;;  %v349_v7 = vunpack.c.h.bf16 %v343_v59  ;;  %v421_v23 = vmul.f32 %v626_v13, %v413_v12  ;;  %v379_v32 = vunpack.c.h.bf16 %v373_v18 }
  0xad   :  { %v274_v63 = vrot.slane %v731_v22, 4  ;;  %v286_v22 = vperm.slane %v700_v15, 4 }
  0xae   :  { %v395_v36 = vpop.permute.xlu1 %394 }
  0xaf   :  { %v400_v37 = vrot.slane %v395_v36, 4  ;;  %v367_v38 = vpop.permute.xlu0 %366  ;;  %v482_v36 = vpack.c.bf16 %v421_v23, %v421_v23 }
  0xb0   :  { %v370_v41 = vrot.slane %v367_v38, 4 }
  0xb1   :  { %v403_v33 = vsel %vm277_vm4, %v400_v37, %v401_v35  ;;  %v481_v35 = vpack.c.bf16 %v420_v19, %v420_v19 }
  0xb2   :  { %v405_v42 = vsel %vm55_vm3, %v403_v33, %v397_v27  ;;  %v374_v52 = vsel %vm277_vm4, %v369_v48, %v370_v41  ;;  %v382_v27 = vperm.slane %v700_v15, 7  ;;  %v384_v41 = vperm.slane %v669_v1, 7 }
  0xb3   :  { %250 = vrot.lane.b32.xlu1 %v239_v26, %s632_s7  ;;  %v410_v45 = vunpack.c.l.bf16 %v405_v42  ;;  %v411_v46 = vunpack.c.h.bf16 %v405_v42  ;;  %v375_v60 = vsel %vm113_vm2, %v374_v52, %v367_v38  ;;  %v378_v26 = vunpack.c.l.bf16 %v373_v18 }
  0xb4   :  { %76 = vrot.lane.b32.xlu2 %v65_v28, %s631_s0  ;;  %v380_v8 = vunpack.c.l.bf16 %v375_v60  ;;  %v381_v14 = vunpack.c.h.bf16 %v375_v60  ;;  %v353_v42 = vperm.slane %v664_v0, 6 }
  0xb5   :  { %v418_v50 = vmul.f32 %v623_v39, %v410_v45  ;;  %v419_v51 = vmul.f32 %v624_v40, %v411_v46  ;;  %v386_v38 = vmul.f32 %v382_v27, %v378_v26  ;;  %v501_v39 = vsel %vm277_vm4, %v481_v35, 0 }
  0xb6   :  { %v331_v54 = vpop.permute.xlu1 %330  ;;  %v504_v40 = vsel %vm277_vm4, %v482_v36, 0  ;;  %535 = vmatpush.bf16.msra.mxu2 %v501_v39  ;;  %v356_v45 = vmul.f32 %v352_v29, %v348_v4  ;;  %v385_v46 = vperm.slane %v664_v0, 7  ;;  %v388_v47 = vmul.f32 %v384_v41, %v380_v8 }
  0xb7   :  { %v336_v55 = vrot.slane %v331_v54, 4  ;;  %v479_v56 = vpack.c.bf16 %v418_v50, %v418_v50  ;;  %v480_v57 = vpack.c.bf16 %v419_v51, %v419_v51  ;;  %v303_v9 = vpop.permute.xlu0 %302  ;;  %548 = vmatpush.bf16.msra.mxu3 %v504_v40  ;;  %v357_v48 = vmul.f32 %v353_v42, %v349_v7 }
  0xb8   :  { %v306_v16 = vrot.slane %v303_v9, 4  ;;  %v389_v50 = vmul.f32 %v385_v46, %v381_v14  ;;  %v477_v52 = vpack.c.bf16 %v388_v47, %v356_v45  ;;  %v288_v4 = vperm.slane %v669_v1, 4 }
  0xb9   :  { %v495_v61 = vsel %vm277_vm4, %v479_v56, 0  ;;  %v498_v62 = vsel %vm277_vm4, %v480_v57, 0  ;;  %v339_v3 = vsel %vm277_vm4, %v336_v55, %v337_v43  ;;  %v275_v57 = vrot.slane %v712_v20, 4 }
  0xba   :  { %509 = vmatpush.bf16.msra.mxu0 %v495_v61  ;;  %522 = vmatpush.bf16.msra.mxu1 %v498_v62  ;;  %v341_v17 = vsel %vm171_vm1, %v339_v3, %v333_v31  ;;  %v383_v31 = vperm.slane %v674_v2, 7  ;;  %v310_v51 = vsel %vm277_vm4, %v305_v5, %v306_v16  ;;  %v478_v54 = vpack.c.bf16 %v389_v50, %v357_v48 }
  0xbb   :  { %v346_v24 = vunpack.c.l.bf16 %v341_v17  ;;  %v347_v28 = vunpack.c.h.bf16 %v341_v17  ;;  %536 = vmatpush.bf16.msra.mxu2 %v477_v52  ;;  %v311_v56 = vsel %vm229_vm0, %v310_v51, %v303_v9  ;;  %v279_v62 = vsel %vm277_vm4, %v275_v57, %v276_v58 }
  0xbc   :  { %v387_v44 = vmul.f32 %v383_v31, %v379_v32  ;;  %549 = vmatpush.bf16.msra.mxu3 %v478_v54  ;;  %v316_v59 = vunpack.c.l.bf16 %v311_v56  ;;  %v317_v61 = vunpack.c.h.bf16 %v311_v56  ;;  %v284_v3 = vunpack.c.l.bf16 %v279_v62 }
  0xbd   :  { %v354_v37 = vmul.f32 %v350_v25, %v346_v24  ;;  %v355_v33 = vmul.f32 %v351_v30, %v347_v28  ;;  %v285_v7 = vunpack.c.h.bf16 %v279_v62  ;;  %v289_v8 = vperm.slane %v664_v0, 4 }
  0xbe   :  { %v321_v20 = vperm.slane %v664_v0, 5  ;;  %v278_v21 = vsel %vm277_vm4, %v274_v63, %v275_v57  ;;  %v292_v9 = vmul.f32 %v288_v4, %v284_v3  ;;  %v324_v10 = vmul.f32 %v320_v6, %v316_v59  ;;  %v426_v3 = vld [vmem:[%s872_s2] sm:$0xf] }
  0xbf   :  { %v475_v43 = vpack.c.bf16 %v386_v38, %v354_v37  ;;  %v476_v49 = vpack.c.bf16 %v387_v44, %v355_v33  ;;  %v299_v53 = vpop.permute.xlu0 %298  ;;  %v282_v11 = vunpack.c.l.bf16 %v278_v21  ;;  %v293_v12 = vmul.f32 %v289_v8, %v285_v7  ;;  %v483_v37 = vld [vmem:[%s871_s3] sm:$0xff] }
  0xc0   :  { %v304_v55 = vrot.slane %v299_v53, 4  ;;  %v325_v13 = vmul.f32 %v321_v20, %v317_v61  ;;  %v318_v1 = vperm.slane %v700_v15, 5  ;;  %v473_v16 = vpack.c.bf16 %v324_v10, %v292_v9 }
  0xc1   :  { %510 = vmatpush.bf16.msra.mxu0 %v475_v43  ;;  %523 = vmatpush.bf16.msra.mxu1 %v476_v49  ;;  %v290_v17 = vmul.f32 %v286_v22, %v282_v11  ;;  %v283_v18 = vunpack.c.h.bf16 %v278_v21  ;;  %v287_v0 = vperm.slane %v674_v2, 4  ;;  %v635_v38 = vmov 0  }
  0xc2   :  { %v307_v60 = vsel %vm277_vm4, %v304_v55, %v305_v5  ;;  %v474_v19 = vpack.c.bf16 %v325_v13, %v293_v12  ;;  %537 = vmatpush.bf16.msra.mxu2 %v473_v16  ;;  %621 = vset.pattern.permute.xlu1 %v635_v38 }
  0xc3   :  { %v309_v5 = vsel %vm229_vm0, %v307_v60, %v776_v34  ;;  %v319_v34 = vperm.slane %v674_v2, 5  ;;  %v291_v25 = vmul.f32 %v287_v0, %v283_v18  ;;  %622 = vset.pattern.permute.xlu0 %v635_v38  ;;  %486 = vperm.xlu1 %621, %v483_v37  }
  0xc4   :  { %v314_v14 = vunpack.c.l.bf16 %v309_v5  ;;  %v315_v24 = vunpack.c.h.bf16 %v309_v5  ;;  %550 = vmatpush.bf16.msra.mxu3 %v474_v19 }
  0xc6   :  { %v322_v23 = vmul.f32 %v318_v1, %v314_v14  ;;  %v323_v27 = vmul.f32 %v319_v34, %v315_v24 }
  0xc8   :  { %v471_v26 = vpack.c.bf16 %v322_v23, %v290_v17  ;;  %v472_v28 = vpack.c.bf16 %v323_v27, %v291_v25 }
  0xca   :  { %511 = vmatpush.bf16.msra.mxu0 %v471_v26  ;;  %524 = vmatpush.bf16.msra.mxu1 %v472_v28 }
  0xf5   :  { %v833_v15 = vpop.permute.xlu0 %592 }
  0xf6   :  { %v583_v30 = vpop.permute.xlu2 %582  ;;  %v594_v53 = vunpack.i.l.bf16 %v833_v15  ;;  %v595_v12 = vunpack.i.h.bf16 %v833_v15 }
  0xf7   :  { %v584_v39 = vunpack.i.l.bf16 %v583_v30  ;;  %v585_v63 = vunpack.i.h.bf16 %v583_v30 }
  0xfd   :  { %v603_v32 = vpop.permute.xlu0 %602 }
  0xfe   :  { %v141_v36 = vpop.permute.xlu2 %140  ;;  %v605_v2 = vunpack.i.h.bf16 %v603_v32  ;;  %v604_v33 = vunpack.i.l.bf16 %v603_v32 }
 0x100   :  { %v261_v43 = vsel %vm258_vm5, %v604_v33, %v605_v2 }
 0x106   :  { %v608_v46 = vpop.permute.xlu2 %607 }
 0x107   :  { %v610_v50 = vunpack.i.h.bf16 %v608_v46  ;;  %v609_v51 = vunpack.i.l.bf16 %v608_v46 }
 0x109   :  { %v87_v56 = vsel %vm84_vm7, %v609_v51, %v610_v50  ;;  %v88_v58 = vsel %vm84_vm7, %v610_v50, %v594_v53 }
 0x10d   :  { %v588_v35 = vpop.permute.xlu1 %587  ;;  %v193_v47 = vpop.permute.xlu0 %192 }
 0x10e   :  { %v589_v31 = vunpack.i.l.bf16 %v588_v35  ;;  %v590_v4 = vunpack.i.h.bf16 %v588_v35  ;;  %v201_v8 = vsel %vm200_vm6, %v585_v63, %v193_v47  ;;  %v77_v10 = vpop.permute.xlu2 %76 }
 0x10f   :  { %v85_v1 = vsel %vm84_vm7, %v595_v12, %v77_v10  ;;  %v86_v16 = vsel %vm84_vm7, %v77_v10, %v609_v51 }
 0x110   :  { %v262_v45 = vsel %vm258_vm5, %v605_v2, %v589_v31 }
 0x115   :  { %v598_v29 = vpop.permute.xlu1 %597 }
 0x116   :  { %v600_v40 = vunpack.i.h.bf16 %v598_v29  ;;  %v599_v41 = vunpack.i.l.bf16 %v598_v29 }
 0x117   :  { %v618_v60 = vpop.permute.xlu0 %617 }
 0x118   :  { %v203_v42 = vsel %vm200_vm6, %v599_v41, %v600_v40  ;;  %v204_v44 = vsel %vm200_vm6, %v600_v40, %v584_v39  ;;  %v620_v6 = vunpack.i.h.bf16 %v618_v60  ;;  %v619_v7 = vunpack.i.l.bf16 %v618_v60 }
 0x119   :  { %v469_v48 = vpack.c.bf16 %v261_v43, %v203_v42  ;;  %v470_v49 = vpack.c.bf16 %v262_v45, %v204_v44  ;;  %v202_v9 = vsel %vm200_vm6, %v193_v47, %v599_v41 }
 0x11a   :  { %v143_v13 = vsel %vm142_vm8, %v619_v7, %v620_v6 }
 0x11b   :  { %538 = vmatpush.bf16.msra.mxu2 %v469_v48  ;;  %551 = vmatpush.bf16.msra.mxu3 %v470_v49  ;;  %v463_v17 = vpack.c.bf16 %v143_v13, %v85_v1 }
 0x11d   :  { %v613_v52 = vpop.permute.xlu1 %612 }
 0x11e   :  { %v615_v54 = vunpack.i.h.bf16 %v613_v52  ;;  %v614_v55 = vunpack.i.l.bf16 %v613_v52 }
 0x120   :  { %v145_v57 = vsel %vm142_vm8, %v614_v55, %v615_v54  ;;  %v146_v59 = vsel %vm142_vm8, %v615_v54, %v141_v36  ;;  %v144_v14 = vsel %vm142_vm8, %v620_v6, %v614_v55 }
 0x121   :  { %v465_v61 = vpack.c.bf16 %v145_v57, %v87_v56  ;;  %v466_v62 = vpack.c.bf16 %v146_v59, %v88_v58  ;;  %v464_v18 = vpack.c.bf16 %v144_v14, %v86_v16 }
 0x123   :  { %539 = vmatpush.bf16.msra.mxu2 %v465_v61  ;;  %552 = vmatpush.bf16.msra.mxu3 %v466_v62 }
 0x125   :  { %v251_v20 = vpop.permute.xlu1 %250 }
 0x126   :  { %v259_v21 = vsel %vm258_vm5, %v590_v4, %v251_v20  ;;  %v260_v5 = vsel %vm258_vm5, %v251_v20, %v604_v33  ;;  %570 = vmatmul.msk.bf16.vlgmr.msra.gmra.mxu2 %vm489_vm9, %v426_v3  ;;  %571 = vmatmul.msk.bf16.vlgmr.msra.gmra.mxu3 %vm489_vm9, %v426_v3 }
 0x127   :  { %v467_v11 = vpack.c.bf16 %v259_v21, %v201_v8  ;;  %v468_v22 = vpack.c.bf16 %v260_v5, %v202_v9 }
 0x129   :  { %512 = vmatpush.bf16.msra.mxu0 %v467_v11  ;;  %525 = vmatpush.bf16.msra.mxu1 %v468_v22 }
 0x12d   :  { %513 = vmatpush.bf16.msra.mxu0 %v463_v17  ;;  %526 = vmatpush.bf16.msra.mxu1 %v464_v18 }
 0x130   :  { %568 = vmatmul.msk.bf16.vlgmr.msra.gmra.mxu0 %vm489_vm9, %v426_v3  ;;  %569 = vmatmul.msk.bf16.vlgmr.msra.gmra.mxu1 %vm489_vm9, %v426_v3 }
 0x135   :  { %v487_v0 = vpop.permute.xlu1 %486 }
 0x1a9   :  { %v541_v19 = vpop.f32.mrf.mxu2  ;;  %v554_v23 = vpop.f32.mrf.mxu3 }
 0x1aa   :  { %v542_v24 = vadd.f32 %v541_v19, %v487_v0  ;;  %v555_v34 = vadd.f32 %v554_v23, %v487_v0 }
 0x1ac   :  { %v559_v25 = vpack.c.bf16 %v555_v34, %v542_v24 }
 0x1ad   :  { %v515_v26 = vpop.f32.mrf.mxu0  ;;  %v528_v27 = vpop.f32.mrf.mxu1 }
 0x1ae   :  { %v516_v28 = vadd.f32 %v515_v26, %v487_v0  ;;  %v529_v30 = vadd.f32 %v528_v27, %v487_v0  ;;  %561 = vst [vmem:[%s873_s4 + $0x8] sm:$0xff] %v559_v25 }
 0x1b0   :  { %v558_v15 = vpack.c.bf16 %v529_v30, %v516_v28 }
 0x1b1   :  { %v543_v35 = vpop.f32.mrf.mxu2  ;;  %v556_v36 = vpop.f32.mrf.mxu3 }
 0x1b2   :  { %560 = vst [vmem:[%s873_s4] sm:$0xff] %v558_v15 }
 0x1b5   :  { %v517_v37 = vpop.f32.mrf.mxu0  ;;  %v530_v32 = vpop.f32.mrf.mxu1 }

// kernel: _lambda_.14
= control target key start
LH: loop header
LB: loop body
LE: loop exit
PB: predicated region body
PF: predicated region fallthrough
CT: control target
= control target key end

     0   :  { %s1711_s13 = smov 0   ;;  %s1713_s14 = smov 0   ;;  %s2361_s0 = inlined_call_operand.vmem [shape: bf16[8,512], index: 0, kind: input, shape index: {}, may-alias: {0,1}]   ;;  %s2362_s1 = inlined_call_operand.vmem [shape: bf16[8,512], index: 1, kind: input, shape index: {}, may-alias: {0,1}]   ;;  %s2363_s2 = inlined_call_operand.vmem [shape: bf16[4,8], index: 2, kind: input, shape index: {}]   ;;  %s2364_s3 = inlined_call_operand.vmem [shape: f32[4,1], index: 3, kind: input, shape index: {}]   ;;  %s2365_s4 = inlined_call_operand.vmem [shape: bf16[4,8], index: 4, kind: input, shape index: {}]   ;;  %s2366_s5 = inlined_call_operand.vmem [shape: f32[4,1], index: 5, kind: input, shape index: {}]   ;;  %s2367_s6 = inlined_call_operand.vmem [shape: bf16[4,8], index: 6, kind: input, shape index: {}]   ;;  %s2368_s7 = inlined_call_operand.vmem [shape: f32[4,1], index: 7, kind: input, shape index: {}]   ;;  %s2369_s8 = inlined_call_operand.vmem [shape: bf16[8,4], index: 8, kind: input, shape index: {}]   ;;  %s2370_s9 = inlined_call_operand.vmem [shape: f32[8,1], index: 9, kind: input, shape index: {}]   ;;  %s2371_s10 = inlined_call_operand.vmem [shape: bf16[8,512], index: 10, kind: output, shape index: {}]  }
   0x1   :  { %s1715_s15 = smov 0  }
   0x2 LB: > { %s32_s16 = sadd.s32 1, %s1649_s14  ;;  %p1415_p0 = scmp.ge.s32.totalorder %s1653_s15, 1  ;;  %s1653_s15 = sphi %s1715_s15, %s20_s15   ;;  %s1649_s14 = sphi %s1713_s14, %s2434_s14   ;;  %s1645_s13 = sphi %s1711_s13, %s2433_s13  }
   0x3   : > { %p34_p1 = scmp.ge.s32.totalorder %s32_s16, 2  ;;  %p342_p2 = scmp.lt.s32.totalorder %s1653_s15, 3 }
   0x5   : > { %s2436_s16 = smov (%p34_p1, %s32_s16), 0  ;;  %p343_p3 = pnand %p1415_p0, %p342_p2 }
   0x7   : > { %346 = sbr.rel (%p343_p3) target bundleno = 1123 (0x463), region = 60 }
   0xc   : > { %s1416_s17 = sshll.u32 %s1645_s13, 1  ;;  %v1655_v0 = vmov 0   ;;  %v416_v1 = vld [vmem:[%s2366_s5] sm:$0xf]  ;;  %vm431_vm0 = vcmask 1043456   ;;  %vm427_vm1 = vcmask 64512  }
   0xd   : > { %p389_p4 = scmp.lt.s32.totalorder %s1416_s17, 3  ;;  %1491 = vset.pattern.permute.xlu0 %v1655_v0  ;;  %1492 = vset.pattern.permute.xlu1 %v1655_v0  ;;  %v415_v9 = vld [vmem:[%s2365_s4] sm:$0x3]  ;;  %vm467_vm2 = vcmask 1041408   ;;  %vm601_vm3 = vcmask 31744  }
   0xe   : > { %419 = vperm.xlu0 %1491, %v416_v1   ;;  %1493 = vset.pattern.permute.xlu2 %v1655_v0  ;;  %v519_v11 = vld [vmem:[%s2364_s3] sm:$0xf] }
   0xf   : > { %s2438_s17 = smov (!%p389_p4, %s1416_s17), 3  ;;  %522 = vperm.xlu1 %1492, %v519_v11   ;;  %v473_v14 = vld [vmem:[%s2367_s6] sm:$0x3] }
  0x10   : > { %s1732_s20 = sshll.u32 %s2438_s17, 2  ;;  %v518_v20 = vld [vmem:[%s2363_s2] sm:$0x3] }
  0x11   : > { %s399_s23 = scalar_lea.vmem %s2362_s1, %s1732_s20  ;;  %s1749_s28 = scalar_lea.vmem %s2361_s0, %s1732_s20  ;;  %v474_v21 = vld [vmem:[%s2368_s7] sm:$0xf] }
  0x12   : > { %v414_v2 = vld [vmem:[%s399_s23] sm:$0xff]  ;;  %s406_s27 = scalar_lea.vmem %s2371_s10, %s1732_s20 }
  0x13   : > { %v423_v3 = vunpack.c.l.b16 %v414_v2  ;;  %v424_v4 = vunpack.c.h.b16 %v414_v2  ;;  %v517_v10 = vld [vmem:[%s1749_s28] sm:$0xff] }
  0x14   : > { %v526_v12 = vunpack.c.l.b16 %v517_v10  ;;  %v527_v13 = vunpack.c.h.b16 %v517_v10 }
  0x15   : > { %v425_v5 = vpack.c.b16 %v423_v3, %v423_v3  ;;  %v426_v6 = vpack.c.b16 %v424_v4, %v424_v4 }
  0x16   : > { %v528_v15 = vpack.c.b16 %v526_v12, %v526_v12  ;;  %v529_v16 = vpack.c.b16 %v527_v13, %v527_v13 }
  0x17   : > { %v433_v7 = vsel %vm431_vm0, %v425_v5, 0  ;;  %v436_v8 = vsel %vm431_vm0, %v426_v6, 0  ;;  %477 = vperm.xlu1 %1492, %v474_v21  }
  0x18   : > { %445 = vmatpush.bf16.msra.mxu0 %v433_v7  ;;  %458 = vmatpush.bf16.msra.mxu1 %v436_v8  ;;  %v536_v17 = vsel %vm431_vm0, %v528_v15, 0  ;;  %v539_v18 = vsel %vm431_vm0, %v529_v16, 0 }
  0x19   : > { %490 = vmatpush.bf16.msra.mxu2 %v433_v7  ;;  %503 = vmatpush.bf16.msra.mxu3 %v436_v8 }
  0x1b   : > { %1422 = vmatmul.msk.bf16.vlgmr.msra.gmra.mxu0 %vm427_vm1, %v415_v9  ;;  %1423 = vmatmul.msk.bf16.vlgmr.msra.gmra.mxu1 %vm427_vm1, %v415_v9 }
  0x1c   : > { %1424 = vmatmul.msk.bf16.vlgmr.msra.gmra.mxu2 %vm427_vm1, %v473_v14  ;;  %1425 = vmatmul.msk.bf16.vlgmr.msra.gmra.mxu3 %vm427_vm1, %v473_v14 }
  0x1d   : > { %548 = vmatpush.bf16.msrb.mxu0 %v536_v17  ;;  %561 = vmatpush.bf16.msrb.mxu1 %v539_v18 }
  0x2b   : > { %1426 = vmatmul.msk.bf16.vlgmr.msrb.gmra.mxu0 %vm427_vm1, %v518_v20  ;;  %1427 = vmatmul.msk.bf16.vlgmr.msrb.gmra.mxu1 %vm427_vm1, %v518_v20 }
  0x80   : > { %v420_v19 = vpop.permute.xlu0 %419 }
  0x81   : > { %v523_v34 = vpop.permute.xlu1 %522 }
  0x89   : > { %v478_v50 = vpop.permute.xlu1 %477 }
  0x98   : > { %v447_v22 = vpop.f32.mrf.mxu0  ;;  %v460_v23 = vpop.f32.mrf.mxu1 }
  0x99   : > { %v448_v24 = vadd.f32 %v447_v22, %v420_v19  ;;  %v461_v25 = vadd.f32 %v460_v23, %v420_v19 }
  0x9b   : > { %v464_v26 = vpack.c.bf16 %v461_v25, %v448_v24 }
  0x9d   : > { %v466_v27 = vrot.slane %v464_v26, 2 }
  0x9f   : > { %v470_v28 = vsel %vm467_vm2, %v464_v26, %v466_v27  ;;  %v492_v51 = vpop.f32.mrf.mxu2  ;;  %v505_v53 = vpop.f32.mrf.mxu3 }
  0xa0   : > { %472 = vst [vmem:[#allocation2] sm:$0xf] %v470_v28  ;;  %v449_v29 = vpop.f32.mrf.mxu0  ;;  %v462_v30 = vpop.f32.mrf.mxu1  ;;  %v493_v52 = vadd.f32 %v492_v51, %v478_v50  ;;  %v506_v54 = vadd.f32 %v505_v53, %v478_v50 }
  0xa2   : > { %v509_v55 = vpack.c.bf16 %v506_v54, %v493_v52 }
  0xa4   : > { %v511_v56 = vrot.slane %v509_v55, 2 }
  0xa6   : > { %v514_v58 = vsel %vm467_vm2, %v509_v55, %v511_v56 }
  0xa7   : > { %v569_v31 = vld [vmem:[#allocation2] sm:$0xf]  ;;  %v494_v59 = vpop.f32.mrf.mxu2  ;;  %516 = vst [vmem:[#allocation3] sm:$0xf] %v514_v58  ;;  %v507_v60 = vpop.f32.mrf.mxu3 }
  0xa8   : > { %572 = vst [vmem:[#allocation1] ss:$4 sm:$0xff] %v569_v31  ;;  %v550_v35 = vpop.f32.mrf.mxu0  ;;  %v563_v36 = vpop.f32.mrf.mxu1 }
  0xa9   : > { %v551_v37 = vadd.f32 %v550_v35, %v523_v34  ;;  %v564_v38 = vadd.f32 %v563_v36, %v523_v34 }
  0xab   : > { %v567_v39 = vpack.c.bf16 %v551_v37, %v551_v37  ;;  %v568_v40 = vpack.c.bf16 %v564_v38, %v564_v38 }
  0xad   : > { %v652_v41 = vsel %vm467_vm2, %v567_v39, 0  ;;  %v655_v42 = vsel %vm467_vm2, %v568_v40, 0 }
  0xae   : > { %664 = vmatpush.bf16.msra.mxu0 %v652_v41  ;;  %753 = vmatpush.bf16.msra.mxu1 %v655_v42  ;;  %v570_v62 = vld [vmem:[#allocation3] sm:$0xf] }
  0xaf   : > { %v573_v32 = vld.sshfl [vmem:[#allocation1] sm:$0xff pattern:$0x73625140]  ;;  %v574_v33 = vld.sshfl [vmem:[#allocation1 + $0x8] sm:$0xff pattern:$0x73625140]  ;;  %1464 = vmatpush.bf16.msrb.mxu2 %v652_v41  ;;  %1465 = vmatpush.bf16.msrb.mxu3 %v655_v42 }
  0xb0   : > { %577 = vxpose.binary.xlu0.c.b16.start.end [1/2] (short) %v574_v33, %v573_v32, 128  ;;  %v552_v43 = vpop.f32.mrf.mxu0  ;;  %v565_v44 = vpop.f32.mrf.mxu1  ;;  %1218 = vst [vmem:[#allocation1] ss:$4 sm:$0xff] %v570_v62 }
 0x15c   : > { %v585_v45 = vpop.trf.xlu0 }
 0x15d   : > { %1428 = vmatmul.msk.bf16.vlgmr.msra.gmra.mxu0 %vm601_vm3, %v585_v45  ;;  %1444 = vmatmul.msk.bf16.vlgmr.msra.gmra.mxu1 %vm601_vm3, %v585_v45 }
 0x164   : > { %v586_v46 = vpop.trf.xlu0 }
 0x16c   : > { %v587_v47 = vpop.trf.xlu0 }
 0x16d   : > { %1429 = vmatmul.msk.bf16.gmra.mxu0 %vm601_vm3, %v587_v47  ;;  %1445 = vmatmul.msk.bf16.gmra.mxu1 %vm601_vm3, %v587_v47 }
 0x174   : > { %v588_v48 = vpop.trf.xlu0 }
 0x17c   : > { %v589_v49 = vpop.trf.xlu0 }
 0x17d   : > { %1430 = vmatmul.msk.bf16.gmra.mxu0 %vm601_vm3, %v589_v49  ;;  %1446 = vmatmul.msk.bf16.gmra.mxu1 %vm601_vm3, %v589_v49 }
 0x184   : > { %v590_v57 = vpop.trf.xlu0 }
 0x18c   : > { %v591_v61 = vpop.trf.xlu0 }
 0x18d   : > { %1431 = vmatmul.msk.bf16.gmra.mxu0 %vm601_vm3, %v591_v61  ;;  %1447 = vmatmul.msk.bf16.gmra.mxu1 %vm601_vm3, %v591_v61 }
 0x194   : > { %v592_v63 = vpop.trf.xlu0 }
 0x19c   : > { %v593_v0 = vpop.trf.xlu0 }
 0x19d   : > { %1432 = vmatmul.msk.bf16.gmra.mxu0 %vm601_vm3, %v593_v0  ;;  %1448 = vmatmul.msk.bf16.gmra.mxu1 %vm601_vm3, %v593_v0 }
 0x1a4   : > { %v594_v1 = vpop.trf.xlu0 }
 0x1ac   : > { %v595_v2 = vpop.trf.xlu0 }
 0x1ad   : > { %1433 = vmatmul.msk.bf16.vlgmr.msrb.gmra.mxu2 %vm601_vm3, %v595_v2  ;;  %1449 = vmatmul.msk.bf16.vlgmr.msrb.gmra.mxu3 %vm601_vm3, %v595_v2 }
 0x1b4   : > { %v596_v3 = vpop.trf.xlu0 }
 0x1bc   : > { %v597_v4 = vpop.trf.xlu0 }
 0x1bd   : > { %1434 = vmatmul.msk.bf16.gmra.mxu2 %vm601_vm3, %v597_v4  ;;  %1450 = vmatmul.msk.bf16.gmra.mxu3 %vm601_vm3, %v597_v4 }
 0x1c4   : > { %v598_v5 = vpop.trf.xlu0 }
 0x1cc   : > { %v599_v6 = vpop.trf.xlu0 }
 0x1cd   : > { %1435 = vmatmul.msk.bf16.gmra.mxu2 %vm601_vm3, %v599_v6  ;;  %1451 = vmatmul.msk.bf16.gmra.mxu3 %vm601_vm3, %v599_v6 }
 0x1d4   : > { %v600_v15 = vpop.trf.xlu0 }
 0x1da   : > { %v1834_v22 = vpop.f32.mrf.mxu0  ;;  %v1846_v28 = vpop.f32.mrf.mxu1 }
 0x1dd   : > { %1436 = vmatmul.msk.bf16.gmra.mxu2 %vm601_vm3, %v586_v46  ;;  %1452 = vmatmul.msk.bf16.gmra.mxu3 %vm601_vm3, %v586_v46 }
 0x1e2   : > { %v1840_v25 = vpop.f32.mrf.mxu0  ;;  %v1858_v34 = vpop.f32.mrf.mxu1 }
 0x1e3   : > { %2397 = vst [vmem:[#allocation9_spill] sm:$0xff] %v1858_v34 }
 0x1ea   : > { %v1852_v31 = vpop.f32.mrf.mxu0  ;;  %v1866_v38 = vpop.f32.mrf.mxu1 }
 0x1eb   : > { %2399 = vst [vmem:[#allocation11_spill] sm:$0xff] %v1866_v38  ;;  %v835_v59 = vmax.f32 %v1834_v22, %v1852_v31 }
 0x1ed   : > { %1437 = vmatmul.msk.bf16.gmra.mxu2 %vm601_vm3, %v588_v48  ;;  %1453 = vmatmul.msk.bf16.gmra.mxu3 %vm601_vm3, %v588_v48 }
 0x1f2   : > { %v1860_v35 = vpop.f32.mrf.mxu0  ;;  %v1874_v42 = vpop.f32.mrf.mxu1 }
 0x1f3   : > { %2398 = vst [vmem:[#allocation10_spill] sm:$0xff] %v1860_v35  ;;  %v836_v60 = vmax.f32 %v1840_v25, %v1860_v35 }
 0x1f4   : > { %2401 = vst [vmem:[#allocation13_spill] sm:$0xff] %v1874_v42 }
 0x1fa   : > { %v1868_v39 = vpop.f32.mrf.mxu0  ;;  %v1882_v46 = vpop.f32.mrf.mxu1 }
 0x1fb   : > { %2400 = vst [vmem:[#allocation12_spill] sm:$0xff] %v1868_v39  ;;  %v837_v62 = vmax.f32 %v835_v59, %v1868_v39 }
 0x1fd   : > { %1438 = vmatmul.msk.bf16.gmra.mxu2 %vm601_vm3, %v590_v57  ;;  %1454 = vmatmul.msk.bf16.gmra.mxu3 %vm601_vm3, %v590_v57 }
 0x202   : > { %v1876_v43 = vpop.f32.mrf.mxu0  ;;  %v1892_v51 = vpop.f32.mrf.mxu1 }
 0x203   : > { %2402 = vst [vmem:[#allocation14_spill] sm:$0xff] %v1876_v43 }
 0x20a   : > { %v1886_v48 = vpop.f32.mrf.mxu0  ;;  %v1900_v55 = vpop.f32.mrf.mxu1 }
 0x20d   : > { %1439 = vmatmul.msk.bf16.gmra.mxu2 %vm601_vm3, %v592_v63  ;;  %1455 = vmatmul.msk.bf16.gmra.mxu3 %vm601_vm3, %v592_v63  ;;  %v838_v63 = vmax.f32 %v836_v60, %v1876_v43 }
 0x212   : > { %v1894_v52 = vpop.f32.mrf.mxu0  ;;  %v1912_v61 = vpop.f32.mrf.mxu1 }
 0x213   : > { %2405 = vst [vmem:[#allocation17_spill] sm:$0xff] %v1894_v52  ;;  %v840_v4 = vmax.f32 %v838_v63, %v1894_v52 }
 0x214   : > { %2407 = vst [vmem:[#allocation19_spill] sm:$0xff] %v1912_v61 }
 0x21a   : > { %v1902_v56 = vpop.f32.mrf.mxu0  ;;  %v1930_v39 = vpop.f32.mrf.mxu1 }
 0x21d   : > { %1440 = vmatmul.msk.bf16.gmra.mxu2 %vm601_vm3, %v594_v1  ;;  %1456 = vmatmul.msk.bf16.gmra.mxu3 %vm601_vm3, %v594_v1 }
 0x222   : > { %v1916_v0 = vpop.f32.mrf.mxu0 }
 0x223   : > { %v842_v6 = vmax.f32 %v840_v4, %v1916_v0 }
 0x22d   : > { %1441 = vmatmul.msk.bf16.gmra.mxu2 %vm601_vm3, %v596_v3  ;;  %1457 = vmatmul.msk.bf16.gmra.mxu3 %vm601_vm3, %v596_v3  ;;  %v839_v3 = vmax.f32 %v837_v62, %v1886_v48 }
 0x230   : > { %v1802_v7 = vpop.f32.mrf.mxu2  ;;  %v1804_v8 = vpop.f32.mrf.mxu3 }
 0x238   : > { %v1806_v9 = vpop.f32.mrf.mxu2  ;;  %v1808_v10 = vpop.f32.mrf.mxu3 }
 0x239   : > { %2392 = vst [vmem:[#allocation4_spill] sm:$0xff] %v1808_v10  ;;  %v844_v59 = vmax.f32 %v842_v6, %v1806_v9 }
 0x23d   : > { %1442 = vmatmul.msk.bf16.gmra.mxu2 %vm601_vm3, %v598_v5  ;;  %1458 = vmatmul.msk.bf16.gmra.mxu3 %vm601_vm3, %v598_v5  ;;  %v841_v5 = vmax.f32 %v839_v3, %v1902_v56 }
 0x240   : > { %v1812_v11 = vpop.f32.mrf.mxu2  ;;  %v1814_v12 = vpop.f32.mrf.mxu3 }
 0x248   : > { %v1816_v13 = vpop.f32.mrf.mxu2  ;;  %v1818_v14 = vpop.f32.mrf.mxu3 }
 0x249   : > { %2393 = vst [vmem:[#allocation5_spill] sm:$0xff] %v1816_v13  ;;  %v846_v43 = vmax.f32 %v844_v59, %v1816_v13 }
 0x24a   : > { %2394 = vst [vmem:[#allocation6_spill] sm:$0xff] %v1818_v14 }
 0x24d   : > { %1443 = vmatmul.msk.bf16.gmra.mxu2 %vm601_vm3, %v600_v15  ;;  %1459 = vmatmul.msk.bf16.gmra.mxu3 %vm601_vm3, %v600_v15  ;;  %v843_v15 = vmax.f32 %v841_v5, %v1802_v7 }
 0x24f   : > { %v845_v60 = vmax.f32 %v843_v15, %v1812_v11  ;;  %v873_v15 = vmax.f32 %v1858_v34, %v1874_v42 }
 0x250   : > { %v1822_v16 = vpop.f32.mrf.mxu2  ;;  %v1824_v17 = vpop.f32.mrf.mxu3 }
 0x251   : > { %v847_v62 = vmax.f32 %v845_v60, %v1822_v16 }
 0x258   : > { %v1826_v18 = vpop.f32.mrf.mxu2  ;;  %v1828_v19 = vpop.f32.mrf.mxu3 }
 0x259   : > { %v848_v63 = vmax.f32 %v846_v43, %v1826_v18  ;;  %v872_v43 = vmax.f32 %v1846_v28, %v1866_v38 }
 0x260   : > { %v1830_v20 = vpop.f32.mrf.mxu2  ;;  %v1832_v21 = vpop.f32.mrf.mxu3 }
 0x261   : > { %v849_v3 = vmax.f32 %v847_v62, %v1830_v20  ;;  %v875_v62 = vmax.f32 %v873_v15, %v1892_v51 }
 0x263   : > { %v877_v42 = vmax.f32 %v875_v62, %v1912_v61 }
 0x268   : > { %v1836_v23 = vpop.f32.mrf.mxu2  ;;  %v1838_v24 = vpop.f32.mrf.mxu3 }
 0x269   : > { %2395 = vst [vmem:[#allocation7_spill] sm:$0xff] %v1838_v24  ;;  %v850_v4 = vmax.f32 %v848_v63, %v1836_v23 }
 0x270   : > { %v1842_v26 = vpop.f32.mrf.mxu2  ;;  %v1844_v27 = vpop.f32.mrf.mxu3 }
 0x271   : > { %2396 = vst [vmem:[#allocation8_spill] sm:$0xff] %v1842_v26  ;;  %v851_v5 = vmax.f32 %v849_v3, %v1842_v26  ;;  %v1953_v26 = vpop.f32.mrf.mxu1 }
 0x272   : > { %2408 = vst [vmem:[#allocation20_spill] sm:$0xff] %v1953_v26  ;;  %v879_v15 = vmax.f32 %v877_v42, %v1953_v26 }
 0x278   : > { %v1848_v29 = vpop.f32.mrf.mxu2  ;;  %v1850_v30 = vpop.f32.mrf.mxu3 }
 0x279   : > { %v852_v6 = vmax.f32 %v850_v4, %v1848_v29  ;;  %v874_v4 = vmax.f32 %v872_v43, %v1882_v46  ;;  %v881_v43 = vmax.f32 %v879_v15, %v1808_v10 }
 0x27b   : > { %v876_v38 = vmax.f32 %v874_v4, %v1900_v55  ;;  %v883_v4 = vmax.f32 %v881_v43, %v1818_v14 }
 0x280   : > { %v1854_v32 = vpop.f32.mrf.mxu2  ;;  %v1856_v33 = vpop.f32.mrf.mxu3 }
 0x281   : > { %v853_v59 = vmax.f32 %v851_v5, %v1854_v32 }
 0x288   : > { %v1862_v36 = vpop.f32.mrf.mxu2  ;;  %v1864_v37 = vpop.f32.mrf.mxu3 }
 0x289   : > { %v854_v13 = vmax.f32 %v852_v6, %v1862_v36 }
 0x290   : > { %v1870_v40 = vpop.f32.mrf.mxu2  ;;  %v1872_v41 = vpop.f32.mrf.mxu3 }
 0x291   : > { %v855_v63 = vmax.f32 %v853_v59, %v1870_v40 }
 0x298   : > { %v1878_v44 = vpop.f32.mrf.mxu2  ;;  %v1880_v45 = vpop.f32.mrf.mxu3 }
 0x299   : > { %2403 = vst [vmem:[#allocation15_spill] sm:$0xff] %v1878_v44  ;;  %v856_v3 = vmax.f32 %v854_v13, %v1878_v44  ;;  %v878_v44 = vmax.f32 %v876_v38, %v1930_v39  ;;  %v885_v38 = vmax.f32 %v883_v4, %v1828_v19 }
 0x29a   : > { %2404 = vst [vmem:[#allocation16_spill] sm:$0xff] %v1880_v45 }
 0x2a0   : > { %v1884_v47 = vpop.f32.mrf.mxu2  ;;  %v1888_v49 = vpop.f32.mrf.mxu3 }
 0x2a1   : > { %v857_v5 = vmax.f32 %v855_v63, %v1884_v47 }
 0x2a8   : > { %v1890_v50 = vpop.f32.mrf.mxu2  ;;  %v1896_v53 = vpop.f32.mrf.mxu3 }
 0x2a9   : > { %2406 = vst [vmem:[#allocation18_spill] sm:$0xff] %v1896_v53  ;;  %v858_v6 = vmax.f32 %v856_v3, %v1890_v50  ;;  %v880_v3 = vmax.f32 %v878_v44, %v1804_v8 }
 0x2b0   : > { %v1898_v54 = vpop.f32.mrf.mxu2  ;;  %v1904_v57 = vpop.f32.mrf.mxu3 }
 0x2b1   : > { %v859_v59 = vmax.f32 %v857_v5, %v1898_v54 }
 0x2b8   : > { %v1906_v58 = vpop.f32.mrf.mxu2  ;;  %v1918_v1 = vpop.f32.mrf.mxu3 }
 0x2b9   : > { %v860_v13 = vmax.f32 %v858_v6, %v1906_v58  ;;  %v882_v6 = vmax.f32 %v880_v3, %v1814_v12 }
 0x2bb   : > { %v884_v15 = vmax.f32 %v882_v6, %v1824_v17 }
 0x2bd   : > { %v886_v44 = vmax.f32 %v884_v15, %v1832_v21 }
 0x2c0   : > { %v1920_v2 = vpop.f32.mrf.mxu2  ;;  %v1936_v52 = vpop.f32.mrf.mxu3 }
 0x2c1   : > { %v861_v62 = vmax.f32 %v859_v59, %v1920_v2  ;;  %v887_v59 = vmax.f32 %v885_v38, %v1838_v24 }
 0x2c3   : > { %v889_v43 = vmax.f32 %v887_v59, %v1850_v30 }
 0x2c8   : > { %v1932_v35 = vpop.f32.mrf.mxu2  ;;  %v1959_v34 = vpop.f32.mrf.mxu3 }
 0x2c9   : > { %v862_v63 = vmax.f32 %v860_v13, %v1932_v35 }
 0x2d0   : > { %v1946_v60 = vpop.f32.mrf.mxu2  ;;  %v1979_v10 = vpop.f32.mrf.mxu3 }
 0x2d1   : > { %v863_v42 = vmax.f32 %v861_v62, %v1946_v60  ;;  %v888_v62 = vmax.f32 %v886_v44, %v1844_v27 }
 0x2d3   : > { %v890_v4 = vmax.f32 %v888_v62, %v1856_v33 }
 0x2d5   : > { %v892_v6 = vmax.f32 %v890_v4, %v1872_v41 }
 0x2d7   : > { %v894_v15 = vmax.f32 %v892_v6, %v1888_v49 }
 0x2d8   : > { %v1969_v61 = vpop.f32.mrf.mxu2 }
 0x2d9   : > { %v864_v5 = vmax.f32 %v862_v63, %v1969_v61  ;;  %v891_v63 = vmax.f32 %v889_v43, %v1864_v37 }
 0x2db   : > { %v865_v26 = vmax.f32 %v863_v42, %v864_v5  ;;  %v893_v42 = vmax.f32 %v891_v63, %v1880_v45 }
 0x2dd   : > { %v866_v13 = vrot.slane %v865_v26, 4  ;;  %v895_v38 = vmax.f32 %v893_v42, %v1896_v53 }
 0x2df   : > { %v867_v14 = vmax.f32 %v865_v26, %v866_v13  ;;  %v897_v59 = vmax.f32 %v895_v38, %v1918_v1  ;;  %v1991_v26 = vpop.f32.mrf.mxu3  ;;  %v896_v13 = vmax.f32 %v894_v15, %v1904_v57  ;;  %v2409_v38 = vld [vmem:[#allocation10_spill] sm:$0xff] }
 0x2e1   : > { %v868_v3 = vrot.slane %v867_v14, 2  ;;  %v899_v44 = vmax.f32 %v897_v59, %v1959_v34  ;;  %v898_v62 = vmax.f32 %v896_v13, %v1936_v52  ;;  %v2410_v59 = vld [vmem:[#allocation12_spill] sm:$0xff] }
 0x2e3   : > { %v869_v5 = vmax.f32 %v867_v14, %v868_v3  ;;  %v901_v14 = vmax.f32 %v899_v44, %v1991_v26  ;;  %v900_v63 = vmax.f32 %v898_v62, %v1979_v10 }
 0x2e5   : > { %v870_v24 = vrot.slane %v869_v5, 1  ;;  %v902_v6 = vmax.f32 %v900_v63, %v901_v14 }
 0x2e7   : > { %v1995_v43 = vmax.f32 %v869_v5, %v870_v24  ;;  %v903_v62 = vrot.slane %v902_v6, 4 }
 0x2e9   : > { %v915_v3 = vsub.f32 %v1834_v22, %v1995_v43  ;;  %v917_v4 = vsub.f32 %v1840_v25, %v1995_v43  ;;  %v919_v42 = vsub.f32 %v1852_v31, %v1995_v43  ;;  %v921_v24 = vsub.f32 %v2409_v38, %v1995_v43  ;;  %v2411_v22 = vld [vmem:[#allocation14_spill] sm:$0xff] }
 0x2ea   : > { %v923_v13 = vsub.f32 %v2410_v59, %v1995_v43  ;;  %v925_v45 = vsub.f32 %v2411_v22, %v1995_v43  ;;  %v927_v31 = vsub.f32 %v1886_v48, %v1995_v43  ;;  %v904_v63 = vmax.f32 %v902_v6, %v903_v62 }
 0x2eb   : > { %v979_v5 = vmul.f32 1.442695, %v915_v3  ;;  %v983_v15 = vmul.f32 1.442695, %v917_v4  ;;  %v987_v44 = vmul.f32 1.442695, %v919_v42  ;;  %v931_v42 = vsub.f32 %v1902_v56, %v1995_v43 }
 0x2ec   : > { %v991_v25 = vmul.f32 1.442695, %v921_v24  ;;  %v995_v14 = vmul.f32 1.442695, %v923_v13  ;;  %v2412_v3 = vld [vmem:[#allocation17_spill] sm:$0xff]  ;;  %v933_v24 = vsub.f32 %v1916_v0, %v1995_v43  ;;  %v935_v6 = vsub.f32 %v1802_v7, %v1995_v43 }
 0x2ed   : > { %1494 = vpow2.f32 %v979_v5  ;;  %v929_v4 = vsub.f32 %v2412_v3, %v1995_v43  ;;  %v999_v38 = vmul.f32 1.442695, %v925_v45  ;;  %v1003_v48 = vmul.f32 1.442695, %v927_v31  ;;  %v2415_v7 = vld [vmem:[#allocation5_spill] sm:$0xff] }
 0x2ee   : > { %1496 = vpow2.f32 %v983_v15  ;;  %v905_v13 = vrot.slane %v904_v63, 2  ;;  %v939_v62 = vsub.f32 %v1812_v11, %v1995_v43  ;;  %v1011_v0 = vmul.f32 1.442695, %v931_v42 }
 0x2ef   : > { %1498 = vpow2.f32 %v987_v44  ;;  %v937_v44 = vsub.f32 %v1806_v9, %v1995_v43  ;;  %v1007_v56 = vmul.f32 1.442695, %v929_v4  ;;  %v941_v31 = vsub.f32 %v2415_v7, %v1995_v43 }
 0x2f0   : > { %1500 = vpow2.f32 %v991_v25  ;;  %v943_v3 = vsub.f32 %v1822_v16, %v1995_v43  ;;  %v906_v4 = vmax.f32 %v904_v63, %v905_v13  ;;  %v945_v11 = vsub.f32 %v1826_v18, %v1995_v43  ;;  %v2416_v63 = vld [vmem:[#allocation8_spill] sm:$0xff] }
 0x2f1   : > { %1502 = vpow2.f32 %v995_v14  ;;  %v1015_v14 = vmul.f32 1.442695, %v933_v24  ;;  %v1023_v42 = vmul.f32 1.442695, %v937_v44  ;;  %v949_v16 = vsub.f32 %v1836_v23, %v1995_v43 }
 0x2f2   : > { %1504 = vpow2.f32 %v999_v38  ;;  %v1031_v13 = vmul.f32 1.442695, %v941_v31  ;;  %v1035_v18 = vmul.f32 1.442695, %v943_v3  ;;  %v955_v23 = vsub.f32 %v1854_v32, %v1995_v43 }
 0x2f3   : > { %v2016_v59 = vpop.eup %1494  ;;  %1506 = vpow2.f32 %v1003_v48  ;;  %v1027_v48 = vmul.f32 1.442695, %v939_v62  ;;  %v953_v62 = vsub.f32 %v1848_v29, %v1995_v43  ;;  %v959_v3 = vsub.f32 %v1870_v40, %v1995_v43 }
 0x2f4   : > { %2413 = vst [vmem:[#allocation10_spill] sm:$0xff] %v2016_v59  ;;  %v2020_v5 = vpop.eup %1496  ;;  %1508 = vpow2.f32 %v1007_v56  ;;  %v907_v56 = vrot.slane %v906_v4, 1  ;;  %v975_v40 = vsub.f32 %v1946_v60, %v1995_v43 }
 0x2f5   : > { %2414 = vst [vmem:[#allocation12_spill] sm:$0xff] %v2020_v5  ;;  %v1109_v15 = vadd.f32 %v2020_v5, %v2016_v59  ;;  %v2028_v45 = vpop.eup %1498  ;;  %v1019_v5 = vmul.f32 1.442695, %v935_v6  ;;  %1510 = vpow2.f32 %v1011_v0  ;;  %v951_v6 = vsub.f32 %v2416_v63, %v1995_v43 }
 0x2f6   : > { %v2035_v25 = vpop.eup %1500  ;;  %1512 = vpow2.f32 %v1015_v14  ;;  %v1039_v0 = vmul.f32 1.442695, %v945_v11 }
 0x2f7   : > { %v1110_v22 = vadd.f32 %v2028_v45, %v1109_v15  ;;  %v2042_v38 = vpop.eup %1502  ;;  %v947_v15 = vsub.f32 %v1830_v20, %v1995_v43  ;;  %1514 = vpow2.f32 %v1019_v5  ;;  %v957_v5 = vsub.f32 %v1862_v36, %v1995_v43 }
 0x2f8   : > { %v2049_v7 = vpop.eup %1504  ;;  %1516 = vpow2.f32 %v1023_v42  ;;  %v1051_v11 = vmul.f32 1.442695, %v951_v6  ;;  %v2072_v42 = vmax.f32 %v906_v4, %v907_v56  ;;  %v1055_v36 = vmul.f32 1.442695, %v953_v62 }
 0x2f9   : > { %v1111_v9 = vadd.f32 %v2035_v25, %v1110_v22  ;;  %v2056_v20 = vpop.eup %1506  ;;  %1518 = vpow2.f32 %v1027_v48  ;;  %v1043_v22 = vmul.f32 1.442695, %v947_v15  ;;  %v971_v48 = vsub.f32 %v1920_v2, %v1995_v43 }
 0x2fa   : > { %v2063_v31 = vpop.eup %1508  ;;  %1520 = vpow2.f32 %v1031_v13  ;;  %v977_v4 = vsub.f32 %v1969_v61, %v1995_v43  ;;  %v1063_v13 = vmul.f32 1.442695, %v957_v5  ;;  %v1067_v2 = vmul.f32 1.442695, %v959_v3 }
 0x2fb   : > { %v1112_v24 = vadd.f32 %v2042_v38, %v1111_v9  ;;  %v1047_v9 = vmul.f32 1.442695, %v949_v16  ;;  %v2069_v29 = vpop.eup %1510  ;;  %1522 = vpow2.f32 %v1035_v18  ;;  %v1059_v16 = vmul.f32 1.442695, %v955_v23 }
 0x2fc   : > { %v2074_v15 = vpop.eup %1512  ;;  %1524 = vpow2.f32 %v1039_v0  ;;  %v916_v60 = vsub.f32 %v1846_v28, %v2072_v42  ;;  %v1091_v62 = vmul.f32 1.442695, %v971_v48  ;;  %v2417_v0 = vld [vmem:[#allocation9_spill] sm:$0xff]  ;;  %v973_v61 = vsub.f32 %v1932_v35, %v1995_v43 }
 0x2fd   : > { %v1113_v44 = vadd.f32 %v2049_v7, %v1112_v24  ;;  %v2078_v24 = vpop.eup %1514  ;;  %1526 = vpow2.f32 %v1043_v22  ;;  %v918_v23 = vsub.f32 %v2417_v0, %v2072_v42  ;;  %v1103_v28 = vmul.f32 1.442695, %v977_v4 }
 0x2fe   : > { %v2083_v6 = vpop.eup %1516  ;;  %1528 = vpow2.f32 %v1047_v9  ;;  %v2418_v9 = vld [vmem:[#allocation11_spill] sm:$0xff]  ;;  %v967_v48 = vsub.f32 %v1898_v54, %v1995_v43  ;;  %v981_v35 = vmul.f32 1.442695, %v916_v60  ;;  %v1095_v0 = vmul.f32 1.442695, %v973_v61 }
 0x2ff   : > { %v1114_v14 = vadd.f32 %v2056_v20, %v1113_v44  ;;  %v2087_v18 = vpop.eup %1518  ;;  %1530 = vpow2.f32 %v1051_v11  ;;  %v920_v11 = vsub.f32 %v2418_v9, %v2072_v42  ;;  %v924_v60 = vsub.f32 %v1882_v46, %v2072_v42 }
 0x300   : > { %v2092_v56 = vpop.eup %1520  ;;  %1532 = vpow2.f32 %v1055_v36  ;;  %v1083_v9 = vmul.f32 1.442695, %v967_v48  ;;  %v926_v61 = vsub.f32 %v1892_v51, %v2072_v42  ;;  %v965_v46 = vsub.f32 %v1890_v50, %v1995_v43  ;;  %v2420_v51 = vld [vmem:[#allocation15_spill] sm:$0xff] }
 0x301   : > { %v1115_v32 = vadd.f32 %v2063_v31, %v1114_v14  ;;  %v2096_v22 = vpop.eup %1522  ;;  %1534 = vpow2.f32 %v1059_v16  ;;  %v1099_v14 = vmul.f32 1.442695, %v975_v40  ;;  %v2419_v40 = vld [vmem:[#allocation13_spill] sm:$0xff] }
 0x302   : > { %v2101_v3 = vpop.eup %1524  ;;  %1536 = vpow2.f32 %v1063_v13  ;;  %v985_v13 = vmul.f32 1.442695, %v918_v23  ;;  %v963_v23 = vsub.f32 %v1884_v47, %v1995_v43  ;;  %v1001_v59 = vmul.f32 1.442695, %v926_v61 }
 0x303   : > { %v1116_v63 = vadd.f32 %v2069_v29, %v1115_v32  ;;  %v2105_v32 = vpop.eup %1526  ;;  %1538 = vpow2.f32 %v1067_v2 }
 0x304   : > { %v2110_v16 = vpop.eup %1528  ;;  %1540 = vpow2.f32 %v1091_v62  ;;  %v989_v62 = vmul.f32 1.442695, %v920_v11 }
 0x305   : > { %v1117_v44 = vadd.f32 %v2074_v15, %v1116_v63  ;;  %v922_v63 = vsub.f32 %v2419_v40, %v2072_v42  ;;  %v2114_v4 = vpop.eup %1530  ;;  %1542 = vpow2.f32 %v1099_v14 }
 0x306   : > { %v2119_v2 = vpop.eup %1532  ;;  %1544 = vpow2.f32 %v1103_v28 }
 0x307   : > { %v1118_v5 = vadd.f32 %v2078_v24, %v1117_v44  ;;  %v969_v44 = vsub.f32 %v1906_v58, %v1995_v43  ;;  %1546 = vpow2.f32 %v981_v35  ;;  %v993_v14 = vmul.f32 1.442695, %v922_v63 }
 0x308   : > { %1548 = vpow2.f32 %v985_v13  ;;  %v997_v35 = vmul.f32 1.442695, %v924_v60  ;;  %v961_v63 = vsub.f32 %v2420_v51, %v1995_v43  ;;  %v1075_v13 = vmul.f32 1.442695, %v963_v23 }
 0x309   : > { %v1119_v36 = vadd.f32 %v2083_v6, %v1118_v5  ;;  %v2123_v5 = vpop.eup %1534  ;;  %v1087_v11 = vmul.f32 1.442695, %v969_v44  ;;  %1550 = vpow2.f32 %v1095_v0  ;;  %v2421_v0 = vld [vmem:[#allocation19_spill] sm:$0xff] }
 0x30a   : > { %v2128_v58 = vpop.eup %1536  ;;  %1552 = vpow2.f32 %v989_v62  ;;  %v1199_v62 = vpack.c.bf16 %v2101_v3, %v2096_v22  ;;  %v1071_v51 = vmul.f32 1.442695, %v961_v63 }
 0x30b   : > { %v1120_v54 = vadd.f32 %v2087_v18, %v1119_v36  ;;  %v2132_v28 = vpop.eup %1538  ;;  %v928_v36 = vsub.f32 %v1900_v55, %v2072_v42  ;;  %1554 = vpow2.f32 %v1083_v9  ;;  %v1079_v55 = vmul.f32 1.442695, %v965_v46 }
 0x30c   : > { %v2137_v48 = vpop.eup %1540  ;;  %1556 = vpow2.f32 %v993_v14  ;;  %v932_v9 = vsub.f32 %v1930_v39, %v2072_v42  ;;  %1223 = vmatpush.bf16.msrb.mxu0 %v1199_v62 }
 0x30d   : > { %v1121_v40 = vadd.f32 %v2092_v56, %v1120_v54  ;;  %v2141_v54 = vpop.eup %1542  ;;  %1558 = vpow2.f32 %v1087_v11 }
 0x30e   : > { %v2146_v44 = vpop.eup %1544  ;;  %1560 = vpow2.f32 %v997_v35  ;;  %v1013_v62 = vmul.f32 1.442695, %v932_v9 }
 0x30f   : > { %v1122_v47 = vadd.f32 %v2096_v22, %v1121_v40  ;;  %v930_v40 = vsub.f32 %v2421_v0, %v2072_v42  ;;  %v2150_v53 = vpop.eup %1546  ;;  %v1215_v14 = vpack.c.bf16 %v2146_v44, %v2141_v54  ;;  %1562 = vpow2.f32 %v1075_v13 }
 0x310   : > { %v2155_v23 = vpop.eup %1548  ;;  %1564 = vpow2.f32 %v1001_v59 }
 0x311   : > { %v1123_v50 = vadd.f32 %v2101_v3, %v1122_v47  ;;  %2422 = vst [vmem:[#allocation14_spill] sm:$0xff] %v2155_v23  ;;  %v1005_v47 = vmul.f32 1.442695, %v928_v36  ;;  %v2161_v61 = vpop.eup %1550  ;;  %v1146_v11 = vadd.f32 %v2155_v23, %v2150_v53  ;;  %v2423_v3 = vld [vmem:[#allocation20_spill] sm:$0xff]  ;;  %v1009_v36 = vmul.f32 1.442695, %v930_v40  ;;  %1236 = vmatpush.bf16.msrb.mxu1 %v1215_v14 }
 0x312   : > { %v2166_v22 = vpop.eup %1552  ;;  %v934_v39 = vsub.f32 %v2423_v3, %v2072_v42  ;;  %1566 = vpow2.f32 %v1079_v55  ;;  %v1213_v59 = vpack.c.bf16 %v2161_v61, %v2137_v48  ;;  %v1195_v3 = vpack.c.bf16 %v2083_v6, %v2078_v24 }
 0x313   : > { %v1124_v60 = vadd.f32 %v2105_v32, %v1123_v50  ;;  %v2170_v35 = vpop.eup %1554  ;;  %v1147_v13 = vadd.f32 %v2166_v22, %v1146_v11  ;;  %v1197_v50 = vpack.c.bf16 %v2092_v56, %v2087_v18  ;;  %1568 = vpow2.f32 %v1005_v47  ;;  %v2424_v18 = vld [vmem:[#allocation4_spill] sm:$0xff] }
 0x314   : > { %v2176_v0 = vpop.eup %1556  ;;  %1570 = vpow2.f32 %v1071_v51  ;;  %v938_v56 = vsub.f32 %v2424_v18, %v2072_v42  ;;  %v940_v11 = vsub.f32 %v1814_v12, %v2072_v42  ;;  %v944_v12 = vsub.f32 %v1824_v17, %v2072_v42 }
 0x315   : > { %v1125_v46 = vadd.f32 %v2110_v16, %v1124_v60  ;;  %v936_v60 = vsub.f32 %v1804_v8, %v2072_v42  ;;  %v2182_v40 = vpop.eup %1558  ;;  %v1148_v14 = vadd.f32 %v2176_v0, %v1147_v13  ;;  %1224 = vmatpush.bf16.msrb.mxu0 %v1197_v50  ;;  %1572 = vpow2.f32 %v1009_v36  ;;  %1237 = vmatpush.bf16.msrb.mxu1 %v1213_v59  ;;  %v2425_v13 = vld [vmem:[#allocation6_spill] sm:$0xff] }
 0x316   : > { %v1017_v8 = vmul.f32 1.442695, %v934_v39  ;;  %v942_v50 = vsub.f32 %v2425_v13, %v2072_v42  ;;  %1574 = vpow2.f32 %v1013_v62  ;;  %v1211_v39 = vpack.c.bf16 %v2182_v40, %v2170_v35  ;;  %v2426_v62 = vld [vmem:[#allocation7_spill] sm:$0xff] }
 0x317   : > { %v1126_v63 = vadd.f32 %v2114_v4, %v1125_v46  ;;  %v2186_v46 = vpop.eup %1560  ;;  %v1021_v36 = vmul.f32 1.442695, %v936_v60  ;;  %v948_v60 = vsub.f32 %v1832_v21, %v2072_v42  ;;  %v950_v18 = vsub.f32 %v2426_v62, %v2072_v42 }
 0x318   : > { %v1563_v9 = vpop.eup %1562  ;;  %v1149_v51 = vadd.f32 %v2186_v46, %v1148_v14  ;;  %v946_v14 = vsub.f32 %v1828_v19, %v2072_v42  ;;  %1576 = vpow2.f32 %v1017_v8  ;;  %v1025_v13 = vmul.f32 1.442695, %v938_v56 }
 0x319   : > { %v1127_v55 = vadd.f32 %v2119_v2, %v1126_v63  ;;  %v2196_v63 = vpop.eup %1564  ;;  %1225 = vmatpush.bf16.msrb.mxu0 %v1195_v3  ;;  %1238 = vmatpush.bf16.msrb.mxu1 %v1211_v39  ;;  %v952_v19 = vsub.f32 %v1844_v27, %v2072_v42  ;;  %v1193_v3 = vpack.c.bf16 %v2074_v15, %v2069_v29  ;;  %1578 = vpow2.f32 %v1021_v36 }
 0x31a   : > { %v1567_v59 = vpop.eup %1566  ;;  %v1150_v24 = vadd.f32 %v2196_v63, %v1149_v51  ;;  %v954_v21 = vsub.f32 %v1850_v30, %v2072_v42  ;;  %v1029_v8 = vmul.f32 1.442695, %v940_v11  ;;  %v1033_v62 = vmul.f32 1.442695, %v942_v50 }
 0x31b   : > { %v1128_v47 = vadd.f32 %v2123_v5, %v1127_v55  ;;  %v2208_v6 = vpop.eup %1568  ;;  %v1209_v56 = vpack.c.bf16 %v1567_v59, %v1563_v9  ;;  %v976_v15 = vsub.f32 %v1979_v10, %v2072_v42  ;;  %1580 = vpow2.f32 %v1025_v13 }
 0x31c   : > { %v1151_v51 = vadd.f32 %v2208_v6, %v1150_v24  ;;  %v1037_v30 = vmul.f32 1.442695, %v944_v12  ;;  %v1041_v36 = vmul.f32 1.442695, %v946_v14  ;;  %v1191_v50 = vpack.c.bf16 %v2063_v31, %v2056_v20 }
 0x31d   : > { %v1129_v55 = vadd.f32 %v2128_v58, %v1128_v47  ;;  %v1571_v47 = vpop.eup %1570  ;;  %1226 = vmatpush.bf16.msrb.mxu0 %v1193_v3  ;;  %1239 = vmatpush.bf16.msrb.mxu1 %v1209_v56  ;;  %v972_v3 = vsub.f32 %v1936_v52, %v2072_v42  ;;  %v978_v29 = vsub.f32 %v1991_v26, %v2072_v42  ;;  %1582 = vpow2.f32 %v1029_v8 }
 0x31e   : > { %v2220_v23 = vpop.eup %1572  ;;  %v1207_v10 = vpack.c.bf16 %v1571_v47, %v2132_v28  ;;  %1584 = vpow2.f32 %v1033_v62  ;;  %v974_v20 = vsub.f32 %v1959_v34, %v2072_v42  ;;  %v1049_v31 = vmul.f32 1.442695, %v950_v18 }
 0x31f   : > { %v1130_v17 = vadd.f32 %v2132_v28, %v1129_v55  ;;  %v956_v55 = vsub.f32 %v1856_v33, %v2072_v42  ;;  %v1152_v27 = vadd.f32 %v2220_v23, %v1151_v51  ;;  %v2227_v24 = vpop.eup %1574  ;;  %1586 = vpow2.f32 %v1037_v30 }
 0x320   : > { %v2236_v51 = vpop.eup %1576  ;;  %v1101_v52 = vmul.f32 1.442695, %v976_v15  ;;  %1588 = vpow2.f32 %v1041_v36  ;;  %v968_v34 = vsub.f32 %v1904_v57, %v2072_v42  ;;  %v1105_v8 = vmul.f32 1.442695, %v978_v29 }
 0x321   : > { %v1131_v39 = vadd.f32 %v1571_v47, %v1130_v17  ;;  %v1153_v17 = vadd.f32 %v2227_v24, %v1152_v27  ;;  %1227 = vmatpush.bf16.msrb.mxu0 %v1191_v50  ;;  %v2244_v13 = vpop.eup %1578  ;;  %1240 = vmatpush.bf16.msrb.mxu1 %v1207_v10  ;;  %v960_v47 = vsub.f32 %v1872_v41, %v2072_v42  ;;  %v1093_v56 = vmul.f32 1.442695, %v972_v3 }
 0x322   : > { %v1205_v18 = vpack.c.bf16 %v2128_v58, %v2123_v5  ;;  %v1053_v62 = vmul.f32 1.442695, %v952_v19  ;;  %v1097_v27 = vmul.f32 1.442695, %v974_v20  ;;  %v1187_v58 = vpack.c.bf16 %v2035_v25, %v2028_v45 }
 0x323   : > { %v1132_v11 = vadd.f32 %v1563_v9, %v1131_v39  ;;  %v1045_v9 = vmul.f32 1.442695, %v948_v60  ;;  %v1154_v14 = vadd.f32 %v2236_v51, %v1153_v17  ;;  %v2252_v60 = vpop.eup %1580  ;;  %v964_v15 = vsub.f32 %v1888_v49, %v2072_v42  ;;  %v2427_v17 = vld [vmem:[#allocation18_spill] sm:$0xff] }
 0x324   : > { %v1057_v30 = vmul.f32 1.442695, %v954_v21  ;;  %v1085_v36 = vmul.f32 1.442695, %v968_v34  ;;  %v966_v50 = vsub.f32 %v2427_v17, %v2072_v42  ;;  %v1061_v45 = vmul.f32 1.442695, %v956_v55 }
 0x325   : > { %v1133_v12 = vadd.f32 %v1567_v59, %v1132_v11  ;;  %v1155_v28 = vadd.f32 %v2244_v13, %v1154_v14  ;;  %v1189_v59 = vpack.c.bf16 %v2049_v7, %v2042_v38  ;;  %1590 = vpow2.f32 %v1045_v9  ;;  %v2262_v38 = vpop.eup %1582  ;;  %1241 = vmatpush.bf16.msrb.mxu1 %v1205_v18  ;;  %v2429_v21 = vld [vmem:[#allocation12_spill] sm:$0xff] }
 0x326   : > { %v970_v7 = vsub.f32 %v1918_v1, %v2072_v42  ;;  %1592 = vpow2.f32 %v1049_v31  ;;  %v1585_v57 = vpop.eup %1584  ;;  %v1203_v1 = vpack.c.bf16 %v2119_v2, %v2114_v4  ;;  %v1201_v55 = vpack.c.bf16 %v2110_v16, %v2105_v32 }
 0x327   : > { %v1134_v26 = vadd.f32 %v2170_v35, %v1133_v12  ;;  %v1156_v39 = vadd.f32 %v2252_v60, %v1155_v28  ;;  %1228 = vmatpush.bf16.msrb.mxu0 %v1189_v59  ;;  %1594 = vpow2.f32 %v1101_v52  ;;  %v2430_v12 = vsub.f32 %v1864_v37, %v2072_v42  ;;  %v2304_v59 = vld.sshfl [vmem:[#allocation1] sm:$0xff pattern:$0x73625140] }
 0x328   : > { %1596 = vpow2.f32 %v1105_v8  ;;  %v1089_v49 = vmul.f32 1.442695, %v970_v7  ;;  %v1077_v20 = vmul.f32 1.442695, %v964_v15  ;;  %v1081_v37 = vmul.f32 1.442695, %v966_v50 }
 0x329   : > { %v1135_v35 = vadd.f32 %v2182_v40, %v1134_v26  ;;  %v1157_v5 = vadd.f32 %v2262_v38, %v1156_v39  ;;  %v1587_v40 = vpop.eup %1586  ;;  %1598 = vpow2.f32 %v1093_v56  ;;  %1242 = vmatpush.bf16.msrb.mxu1 %v1203_v1  ;;  %v1065_v33 = vmul.f32 1.442695, %v2430_v12  ;;  %v2431_v26 = vld [vmem:[#allocation16_spill] sm:$0xff]  ;;  %v2312_v39 = vld.sshfl [vmem:[#allocation1 + $0x8] sm:$0xff pattern:$0x73625140] }
 0x32a   : > { %v1589_v19 = vpop.eup %1588  ;;  %1600 = vpow2.f32 %v1097_v27  ;;  %v962_v28 = vsub.f32 %v2431_v26, %v2072_v42  ;;  %v1069_v8 = vmul.f32 1.442695, %v960_v47  ;;  %v1198_v18 = vpack.c.bf16 %v1585_v57, %v2262_v38  ;;  %v2432_v12 = vld [vmem:[#allocation14_spill] sm:$0xff] }
 0x32b   : > { %v1136_v29 = vadd.f32 %v2137_v48, %v1135_v35  ;;  %v1158_v48 = vadd.f32 %v1585_v57, %v1157_v5  ;;  %1229 = vmatpush.bf16.msrb.mxu0 %v1187_v58  ;;  %v2280_v25 = vpop.eup %1590  ;;  %1602 = vpow2.f32 %v1053_v62  ;;  %v1200_v9 = vpack.c.bf16 %v1589_v19, %v1587_v40 }
 0x32c   : > { %v2285_v10 = vpop.eup %1592  ;;  %1604 = vpow2.f32 %v1057_v30  ;;  %v1073_v62 = vmul.f32 1.442695, %v962_v28  ;;  %v1196_v38 = vpack.c.bf16 %v2252_v60, %v2244_v13  ;;  %v1192_v60 = vpack.c.bf16 %v2220_v23, %v2208_v6 }
 0x32d   : > { %v1137_v11 = vadd.f32 %v2161_v61, %v1136_v29  ;;  %v1159_v2 = vadd.f32 %v1587_v40, %v1158_v48  ;;  %v2428_v61 = vld [vmem:[#allocation10_spill] sm:$0xff]  ;;  %v2292_v14 = vpop.eup %1594  ;;  %1606 = vpow2.f32 %v1085_v36  ;;  %1243 = vmatpush.bf16.msrb.mxu1 %v1201_v55 }
 0x32e   : > { %v1185_v3 = vpack.c.bf16 %v2429_v21, %v2428_v61  ;;  %v2297_v52 = vpop.eup %1596  ;;  %1608 = vpow2.f32 %v1089_v49  ;;  %v1188_v61 = vpack.c.bf16 %v2176_v0, %v2166_v22  ;;  %v1202_v22 = vpack.c.bf16 %v2285_v10, %v2280_v25 }
 0x32f   : > { %v1138_v4 = vadd.f32 %v2141_v54, %v1137_v11  ;;  %v1160_v31 = vadd.f32 %v1589_v19, %v1159_v2  ;;  %v1599_v32 = vpop.eup %1598  ;;  %1610 = vpow2.f32 %v1061_v45  ;;  %v1194_v19 = vpack.c.bf16 %v2236_v51, %v2227_v24 }
 0x330   : > { %1230 = vmatpush.bf16.msrb.mxu0 %v1185_v3  ;;  %v1601_v34 = vpop.eup %1600  ;;  %1612 = vpow2.f32 %v1065_v33  ;;  %1244 = vmatmul.bf16.vlgmr.msrb.gmra.mxu1 %v2312_v39  ;;  %v909_v3 = vsub.f32 -inf, %v1995_v43  ;;  %v1186_v33 = vpack.c.bf16 %v2432_v12, %v2150_v53 }
 0x331   : > { %v2295_v54 = vadd.f32 %v2146_v44, %v1138_v4  ;;  %v1161_v16 = vadd.f32 %v2280_v25, %v1160_v31  ;;  %v1216_v44 = vpack.c.bf16 %v2297_v52, %v2292_v14  ;;  %v1603_v35 = vpop.eup %1602  ;;  %1614 = vpow2.f32 %v1077_v20 }
 0x332   : > { %v1605_v7 = vpop.eup %1604  ;;  %1616 = vpow2.f32 %v1081_v37  ;;  %v1214_v47 = vpack.c.bf16 %v1601_v34, %v1599_v32  ;;  %v1190_v4 = vpack.c.bf16 %v2196_v63, %v2186_v46  ;;  %v910_v46 = vsub.f32 -inf, %v2072_v42 }
 0x333   : > { %1231 = vmatmul.bf16.vlgmr.msrb.gmra.mxu0 %v2304_v59  ;;  %v1162_v56 = vadd.f32 %v2285_v10, %v1161_v16  ;;  %1262 = vmatpush.bf16.msra.mxu1 %v1216_v44  ;;  %v1607_v27 = vpop.eup %1606  ;;  %1618 = vpow2.f32 %v1069_v8  ;;  %v1204_v6 = vpack.c.bf16 %v1605_v7, %v1603_v35  ;;  %v1140_v55 = vrot.slane %v2295_v54, 4 }
 0x334   : > { %1249 = vmatpush.bf16.msra.mxu0 %v1200_v9  ;;  %v1609_v29 = vpop.eup %1608  ;;  %1620 = vpow2.f32 %v1073_v62  ;;  %v911_v0 = vmul.f32 1.442695, %v909_v3  ;;  %v913_v20 = vmul.f32 1.442695, %v910_v46 }
 0x335   : > { %v1163_v41 = vadd.f32 %v1603_v35, %v1162_v56  ;;  %v1611_v57 = vpop.eup %1610  ;;  %v1212_v30 = vpack.c.bf16 %v1609_v29, %v1607_v27  ;;  %v1141_v53 = vadd.f32 %v1140_v55, %v2295_v54 }
 0x336   : > { %v1613_v58 = vpop.eup %1612  ;;  %1622 = vpow2.f32 %v911_v0 }
 0x337   : > { %v1164_v5 = vadd.f32 %v1605_v7, %v1163_v41  ;;  %1263 = vmatpush.bf16.msra.mxu1 %v1214_v47  ;;  %v1615_v40 = vpop.eup %1614  ;;  %v1206_v51 = vpack.c.bf16 %v1613_v58, %v1611_v57  ;;  %1624 = vpow2.f32 %v913_v20  ;;  %v1142_v26 = vrot.slane %v1141_v53, 2 }
 0x338   : > { %1250 = vmatpush.bf16.msra.mxu0 %v1198_v18  ;;  %v1617_v1 = vpop.eup %1616 }
 0x339   : > { %v1165_v15 = vadd.f32 %v1611_v57, %v1164_v5  ;;  %v1619_v36 = vpop.eup %1618  ;;  %v1210_v17 = vpack.c.bf16 %v1617_v1, %v1615_v40  ;;  %v1143_v28 = vadd.f32 %v1142_v26, %v1141_v53  ;;  %v1284_v57 = vld [vmem:[%s2370_s9] sm:$0xff] }
 0x33a   : > { %v1621_v13 = vpop.eup %1620  ;;  %1287 = vperm.xlu2 %1493, %v1284_v57  }
 0x33b   : > { %v1166_v11 = vadd.f32 %v1613_v58, %v1165_v15  ;;  %1264 = vmatpush.bf16.msra.mxu1 %v1212_v30  ;;  %v1208_v49 = vpack.c.bf16 %v1621_v13, %v1619_v36 }
 0x33c   : > { %1251 = vmatpush.bf16.msra.mxu0 %v1196_v38  ;;  %v1623_v37 = vpop.eup %1622  ;;  %v1281_v38 = vld [vmem:[%s2369_s8] sm:$0xf] }
 0x33d   : > { %v1167_v48 = vadd.f32 %v1619_v36, %v1166_v11  ;;  %v1625_v10 = vpop.eup %1624 }
 0x33f   : > { %v1168_v50 = vadd.f32 %v1621_v13, %v1167_v48  ;;  %1265 = vmatpush.bf16.msra.mxu1 %v1210_v17 }
 0x340   : > { %1252 = vmatpush.bf16.msra.mxu0 %v1194_v19 }
 0x341   : > { %v1169_v45 = vadd.f32 %v1615_v40, %v1168_v50 }
 0x343   : > { %v1170_v2 = vadd.f32 %v1617_v1, %v1169_v45  ;;  %1266 = vmatpush.bf16.msra.mxu1 %v1208_v49  ;;  %v1630_v45 = vld [vmem:[%s1749_s28] sm:$0xff] }
 0x344   : > { %1253 = vmatpush.bf16.msra.mxu0 %v1192_v60  ;;  %v1325_v49 = vunpack.c.l.bf16 %v1630_v45 }
 0x345   : > { %v1171_v24 = vadd.f32 %v1607_v27, %v1170_v2 }
 0x347   : > { %v1172_v21 = vadd.f32 %v1609_v29, %v1171_v24  ;;  %1267 = vmatpush.bf16.msra.mxu1 %v1206_v51 }
 0x348   : > { %1254 = vmatpush.bf16.msra.mxu0 %v1190_v4  ;;  %v1326_v4 = vunpack.c.h.bf16 %v1630_v45 }
 0x349   : > { %v1173_v23 = vadd.f32 %v1599_v32, %v1172_v21  ;;  %v1144_v32 = vrot.slane %v1143_v28, 1 }
 0x34b   : > { %v1174_v63 = vadd.f32 %v1601_v34, %v1173_v23  ;;  %1268 = vmatpush.bf16.msra.mxu1 %v1204_v6  ;;  %v1145_v44 = vadd.f32 %v1144_v32, %v1143_v28  ;;  %v1108_v34 = vmul.f32 0.0, %v1625_v10 }
 0x34c   : > { %1255 = vmatpush.bf16.msra.mxu0 %v1188_v61 }
 0x34d   : > { %v1175_v9 = vadd.f32 %v2292_v14, %v1174_v63 }
 0x34f   : > { %v1176_v31 = vadd.f32 %v2297_v52, %v1175_v9  ;;  %1269 = vmatpush.bf16.msra.mxu1 %v1202_v22  ;;  %v1107_v52 = vmul.f32 0.0, %v1623_v37 }
 0x350   : > { %1256 = vmatpush.bf16.msra.mxu0 %v1186_v33 }
 0x351   : > { %v1177_v43 = vrot.slane %v1176_v31, 4  ;;  %v1183_v8 = vadd.f32 %v1145_v44, %v1107_v52 }
 0x352   : > { %1270 = vmatmul.bf16.vlgmr.msra.gmra.mxu1 %v2312_v39 }
 0x353   : > { %1257 = vmatmul.bf16.vlgmr.msra.gmra.mxu0 %v2304_v59  ;;  %v1178_v42 = vadd.f32 %v1177_v43, %v1176_v31  ;;  %1626 = vrcp.f32 %v1183_v8 }
 0x355   : > { %v1179_v14 = vrot.slane %v1178_v42, 2 }
 0x357   : > { %v1180_v25 = vadd.f32 %v1179_v14, %v1178_v42 }
 0x359   : > { %v1181_v16 = vrot.slane %v1180_v25, 1  ;;  %v1627_v7 = vpop.eup %1626 }
 0x35b   : > { %v1182_v59 = vadd.f32 %v1181_v16, %v1180_v25 }
 0x35d   : > { %v1184_v54 = vadd.f32 %v1182_v59, %v1108_v34 }
 0x35f   : > { %1628 = vrcp.f32 %v1184_v54 }
 0x365   : > { %v1629_v30 = vpop.eup %1628 }
 0x394   : > { %v1288_v60 = vpop.permute.xlu2 %1287 }
 0x3ad   : > { %v1245_v35 = vpop.f32.mrf.mxu1 }
 0x3b0   : > { %v1232_v18 = vpop.f32.mrf.mxu0 }
 0x3b1   : > { %v1246_v56 = vadd.f32 %v1245_v35, %v1232_v18 }
 0x3b3   : > { %v1275_v39 = vadd.f32 %v1246_v56, %v1107_v52 }
 0x3b5   : > { %v1279_v62 = vmul.f32 %v1627_v7, %v1275_v39  ;;  %v1247_v47 = vpop.f32.mrf.mxu1 }
 0x3b7   : > { %v1282_v41 = vpack.c.bf16 %v1279_v62, %v1279_v62 }
 0x3b8   : > { %v1234_v27 = vpop.f32.mrf.mxu0 }
 0x3b9   : > { %v1294_v29 = vsel %vm467_vm2, %v1282_v41, 0 }
 0x3ba   : > { %1306 = vmatpush.bf16.msrb.mxu0 %v1294_v29 }
 0x3bd   : > { %1460 = vmatmul.msk.bf16.vlgmr.msrb.gmra.mxu0 %vm601_vm3, %v1281_v38 }
 0x3cf   : > { %v1271_v58 = vpop.f32.mrf.mxu1 }
 0x3d0   : > { %v1258_v5 = vpop.f32.mrf.mxu0 }
 0x3d1   : > { %v1272_v40 = vadd.f32 %v1271_v58, %v1258_v5 }
 0x3d3   : > { %v1276_v15 = vadd.f32 %v1272_v40, %v1108_v34 }
 0x3d5   : > { %v1280_v1 = vmul.f32 %v1629_v30, %v1276_v15 }
 0x3d7   : > { %v1283_v11 = vpack.c.bf16 %v1280_v1, %v1280_v1  ;;  %v1273_v36 = vpop.f32.mrf.mxu1 }
 0x3d8   : > { %v1260_v19 = vpop.f32.mrf.mxu0 }
 0x3d9   : > { %v1297_v48 = vsel %vm467_vm2, %v1283_v11, 0 }
 0x3da   : > { %1319 = vmatpush.bf16.msrb.mxu1 %v1297_v48 }
 0x3dd   : > { %1461 = vmatmul.msk.bf16.vlgmr.msrb.gmra.mxu1 %vm601_vm3, %v1281_v38 }
 0x43a   : > { %v1308_v17 = vpop.f32.mrf.mxu0 }
 0x43b   : > { %v1309_v50 = vadd.f32 %v1308_v17, %v1288_v60 }
 0x43d   : > { %v1327_v51 = vadd.f32 %v1325_v49, %v1309_v50 }
 0x442   : > { %v1310_v13 = vpop.f32.mrf.mxu0 }
 0x45a   : > { %v1321_v2 = vpop.f32.mrf.mxu1 }
 0x45b   : > { %v1322_v24 = vadd.f32 %v1321_v2, %v1288_v60 }
 0x45d   : > { %v1328_v61 = vadd.f32 %v1326_v4, %v1322_v24 }
 0x45f   : > { %v1329_v21 = vpack.c.bf16 %v1328_v61, %v1327_v51 }
 0x461   : > { %1330 = vst [vmem:[%s406_s27] sm:$0xff] %v1329_v21 }
 0x462   : > { %v1323_v23 = vpop.f32.mrf.mxu1 }
 0x463 PF: > { %s20_s15 = sadd.s32 1, %s1653_s15   ;;  %s2433_s13 = smov %s1649_s14 }
 0x464   : > { %p17_p5 = scmp.ge.s32.totalorder %s20_s15, 4   ;;  %s2434_s14 = smov %s2436_s16 }
 0x466   :  { %19 = sbr.rel (!%p17_p5) target bundleno = 2 (0x2), region = 97 }

// kernel: _lambda_.9
= control target key start
LH: loop header
LB: loop body
LE: loop exit
PB: predicated region body
PF: predicated region fallthrough
CT: control target
= control target key end

     0   :  { %vm46_vm0 = vcmask 1043456   ;;  %s672_s23 = smov 111   ;;  %s673_s24 = smov 112   ;;  %vm55_vm1 = vcmask 908288   ;;  %vm119_vm2 = vcmask 916480   ;;  %vm184_vm3 = vcmask 924672   ;;  %s904_s1 = inlined_call_operand.vmem [shape: f32[9,512], index: 1, kind: input, shape index: {}]   ;;  %s905_s0 = inlined_call_operand.vmem [shape: bf16[4,768], index: 0, kind: input, shape index: {}]   ;;  %s906_s3 = inlined_call_operand.vmem [shape: f32[8,1], index: 3, kind: input, shape index: {}]   ;;  %s907_s2 = inlined_call_operand.vmem [shape: bf16[8,36], index: 2, kind: input, shape index: {}]   ;;  %s908_s4 = inlined_call_operand.vmem [shape: bf16[8,512], index: 4, kind: output, shape index: {}]  }
   0x1   :  { %v709_v0 = vld [vmem:[%s904_s1] sm:$0xff]  ;;  %v714_v1 = vld [vmem:[%s904_s1 + $0x8] sm:$0xff]  ;;  %v723_v6 = vld [vmem:[%s904_s1 + $0x18] sm:$0xff]  ;;  %s674_s25 = smov 113   ;;  %s675_s26 = smov 127   ;;  %vm248_vm4 = vcmask 1039360  }
   0x2   :  { %v36_v2 = vperm.slane %v709_v0, 0  ;;  %v37_v3 = vperm.slane %v714_v1, 0  ;;  %v101_v4 = vperm.slane %v709_v0, 1  ;;  %v102_v5 = vperm.slane %v714_v1, 1  ;;  %v728_v7 = vld [vmem:[%s904_s1 + $0x10] sm:$0xff]  ;;  %v762_v37 = vld [vmem:[%s905_s0] sm:$0xff] }
   0x3   :  { %v39_v10 = vperm.slane %v723_v6, 0  ;;  %v104_v11 = vperm.slane %v723_v6, 1  ;;  %v38_v14 = vperm.slane %v728_v7, 0  ;;  %v103_v15 = vperm.slane %v728_v7, 1  ;;  %v757_v36 = vld [vmem:[%s905_s0 + $0x8] sm:$0xf] }
   0x4   :  { %v44_v8 = vrot.slane %v37_v3, 4  ;;  %v109_v9 = vrot.slane %v102_v5, 4  ;;  %v166_v18 = vperm.slane %v709_v0, 2  ;;  %v167_v19 = vperm.slane %v714_v1, 2  ;;  %s676_s0 = smov 17   ;;  %s677_s5 = smov 16  }
   0x5   :  { %v45_v16 = vrot.slane %v39_v10, 4  ;;  %v110_v17 = vrot.slane %v104_v11, 4  ;;  %v169_v21 = vperm.slane %v723_v6, 2  ;;  %v231_v22 = vperm.slane %v714_v1, 3  ;;  %s678_s6 = smov 15   ;;  %s679_s7 = smov 1  }
   0x6   :  { %v47_v12 = vsel %vm46_vm0, %v36_v2, %v44_v8  ;;  %v111_v13 = vsel %vm46_vm0, %v101_v4, %v109_v9  ;;  %v174_v20 = vrot.slane %v167_v19, 4  ;;  %v233_v25 = vperm.slane %v723_v6, 3 }
   0x7   :  { %49 = vrot.lane.b32.xlu0 %v47_v12, %s672_s23  ;;  %113 = vrot.lane.b32.xlu1 %v111_v13, %s673_s24  ;;  %v48_v23 = vsel %vm46_vm0, %v38_v14, %v45_v16  ;;  %v112_v24 = vsel %vm46_vm0, %v103_v15, %v110_v17  ;;  %v168_v27 = vperm.slane %v728_v7, 2  ;;  %v175_v28 = vrot.slane %v169_v21, 4 }
   0x8   :  { %v176_v26 = vsel %vm46_vm0, %v166_v18, %v174_v20  ;;  %v230_v29 = vperm.slane %v709_v0, 3  ;;  %v238_v30 = vrot.slane %v231_v22, 4  ;;  %v232_v31 = vperm.slane %v728_v7, 3 }
   0x9   :  { %178 = vrot.lane.b32.xlu2 %v176_v26, %s674_s25  ;;  %v239_v32 = vrot.slane %v233_v25, 4  ;;  %v177_v33 = vsel %vm46_vm0, %v168_v27, %v175_v28  ;;  %v777_v39 = vunpack.c.l.bf16 %v762_v37  ;;  %v783_v48 = vunpack.c.l.bf16 %v757_v36 }
   0xa   :  { %v240_v34 = vsel %vm46_vm0, %v230_v29, %v238_v30  ;;  %v786_v50 = vunpack.c.h.bf16 %v762_v37  ;;  %v297_v21 = vrot.slane %v762_v37, 2  ;;  %v305_v26 = vperm.slane %v714_v1, 4 }
   0xb   :  { %v241_v35 = vsel %vm46_vm0, %v232_v31, %v239_v32  ;;  %vm299_vm5 = vcmask 1045504   ;;  %vm575_vm6 = vcmask 1041408   ;;  %vm88_vm7 = vcmask 138240  }
   0xc   :  { %vm153_vm8 = vcmask 130048   ;;  %vm217_vm9 = vcmask 121856   ;;  %vm282_vm10 = vcmask 7168   ;;  %vm571_vm11 = vcmask 293888  }
   0xf   :  { %51 = vrot.lane.b32.xlu0 %v48_v23, %s672_s23  ;;  %115 = vrot.lane.b32.xlu1 %v112_v24, %s673_s24  ;;  %v298_v23 = vrot.slane %v757_v36, 2 }
  0x11   :  { %180 = vrot.lane.b32.xlu2 %v177_v33, %s674_s25 }
  0x17   :  { %242 = vrot.lane.b32.xlu0 %v240_v34, %s675_s26  ;;  %244 = vrot.lane.b32.xlu1 %v241_v35, %s675_s26  ;;  %v307_v34 = vperm.slane %v723_v6, 4 }
  0x19   :  { %337 = vrot.lane.b32.xlu2 %v762_v37, %s675_s26 }
  0x1f   :  { %339 = vrot.lane.b32.xlu0 %v757_v36, %s675_s26  ;;  %387 = vrot.lane.b32.xlu1 %v762_v37, %s674_s25 }
  0x21   :  { %389 = vrot.lane.b32.xlu2 %v757_v36, %s674_s25 }
  0x27   :  { %435 = vrot.lane.b32.xlu0 %v762_v37, %s673_s24  ;;  %437 = vrot.lane.b32.xlu1 %v757_v36, %s673_s24 }
  0x29   :  { %484 = vrot.lane.b32.xlu2 %v762_v37, %s672_s23  ;;  %v312_v37 = vrot.slane %v305_v26, 4 }
  0x2f   :  { %486 = vrot.lane.b32.xlu0 %v757_v36, %s672_s23  ;;  %v304_v36 = vperm.slane %v709_v0, 4 }
  0x63   :  { %v179_v45 = vpop.permute.xlu2 %178 }
  0x64   :  { %v182_v60 = vrot.slane %v179_v45, 4 }
  0x66   :  { %v185_v3 = vsel %vm184_vm3, %v182_v60, %v179_v45 }
  0x67   :  { %v191_v8 = vmul.f32 %v185_v3, %v777_v39 }
  0x6b   :  { %v181_v61 = vpop.permute.xlu2 %180 }
  0x6c   :  { %v183_v63 = vrot.slane %v181_v61, 4 }
  0x6e   :  { %v186_v9 = vsel %vm46_vm0, %v182_v60, %v183_v63  ;;  %v193_v22 = vmul.f32 %v183_v63, %v783_v48 }
  0x6f   :  { %v187_v17 = vsel %vm184_vm3, %v186_v9, %v181_v61  ;;  %v353_v61 = vperm.slane %v709_v0, 5 }
  0x70   :  { %v192_v20 = vmul.f32 %v187_v17, %v786_v50 }
  0x73   :  { %v338_v27 = vpop.permute.xlu2 %337 }
  0x79   :  { %v50_v38 = vpop.permute.xlu0 %49  ;;  %v114_v40 = vpop.permute.xlu1 %113 }
  0x7a   :  { %v53_v41 = vrot.slane %v50_v38, 4  ;;  %v117_v43 = vrot.slane %v114_v40, 4 }
  0x7c   :  { %v56_v42 = vsel %vm55_vm1, %v53_v41, %v50_v38  ;;  %v120_v46 = vsel %vm119_vm2, %v117_v43, %v114_v40  ;;  %v300_v38 = vsel %vm299_vm5, %v297_v21, %v298_v23  ;;  %v341_v40 = vrot.slane %v338_v27, 2 }
  0x7d   :  { %v62_v44 = vmul.f32 %v56_v42, %v777_v39  ;;  %v126_v52 = vmul.f32 %v120_v46, %v777_v39  ;;  %v306_v46 = vperm.slane %v728_v7, 4 }
  0x7f   :  { %68 = vst [vmem:[#allocation1] ss:$2 sm:$0xff] %v62_v44 }
  0x81   :  { %v52_v47 = vpop.permute.xlu0 %51  ;;  %v116_v49 = vpop.permute.xlu1 %115 }
  0x82   :  { %v54_v51 = vrot.slane %v52_v47, 4  ;;  %v118_v54 = vrot.slane %v116_v49, 4 }
  0x84   :  { %v57_v53 = vsel %vm46_vm0, %v53_v41, %v54_v51  ;;  %v64_v56 = vmul.f32 %v54_v51, %v783_v48  ;;  %v121_v62 = vsel %vm46_vm0, %v117_v43, %v118_v54  ;;  %v128_v4 = vmul.f32 %v118_v54, %v783_v48 }
  0x85   :  { %v58_v55 = vsel %vm55_vm1, %v57_v53, %v52_v47  ;;  %v122_v2 = vsel %vm119_vm2, %v121_v62, %v116_v49  ;;  %v313_v47 = vrot.slane %v307_v34, 4  ;;  %v354_v49 = vperm.slane %v714_v1, 5 }
  0x86   :  { %v73_v57 = vld.sshfl [vmem:[#allocation1] sm:$0xff pattern:$0x75316420]  ;;  %v74_v58 = vld.sshfl [vmem:[#allocation1 + $0x8] sm:$0xff pattern:$0x75316420]  ;;  %v63_v59 = vmul.f32 %v58_v55, %v786_v50  ;;  %v127_v5 = vmul.f32 %v122_v2, %v786_v50  ;;  %v314_v53 = vsel %vm46_vm0, %v304_v36, %v312_v37 }
  0x87   :  { %133 = vst [vmem:[#allocation1 + $0x1] ss:$2 sm:$0xff] %v126_v52  ;;  %80 = vrot.lane.b32.xlu2 %v74_v58, %s676_s0  ;;  %78 = vrot.lane.b32.xlu1 %v73_v57, %s676_s0  ;;  %v356_v51 = vperm.slane %v723_v6, 5  ;;  %v302_v52 = vunpack.c.l.bf16 %v300_v38  ;;  %v315_v60 = vsel %vm46_vm0, %v306_v46, %v313_v47  ;;  %v355_v62 = vperm.slane %v728_v7, 5 }
  0x88   :  { %70 = vst [vmem:[#allocation1 + $0x10] ss:$2 sm:$0xff] %v63_v59  ;;  %v361_v2 = vrot.slane %v354_v49, 4  ;;  %v453_v46 = vperm.slane %v723_v6, 7 }
  0x89   :  { %72 = vst [vmem:[#allocation1 + $0x20] ss:$2 sm:$0xff] %v64_v56  ;;  %v243_v14 = vpop.permute.xlu0 %242  ;;  %v245_v15 = vpop.permute.xlu1 %244  ;;  %v303_v56 = vunpack.c.h.bf16 %v300_v38  ;;  %v318_v63 = vmul.f32 %v314_v53, %v302_v52  ;;  %v362_v3 = vrot.slane %v356_v51, 4  ;;  %v450_v53 = vperm.slane %v709_v0, 7 }
  0x8a   :  { %v246_v18 = vrot.slane %v243_v14, 4  ;;  %v247_v19 = vrot.slane %v245_v15, 4  ;;  %v363_v17 = vsel %vm46_vm0, %v353_v61, %v361_v2 }
  0x8b   :  { %v364_v21 = vsel %vm46_vm0, %v355_v62, %v362_v3 }
  0x8c   :  { %v249_v24 = vsel %vm248_vm4, %v246_v18, %v243_v14  ;;  %v250_v25 = vsel %vm46_vm0, %v246_v18, %v247_v19  ;;  %v257_v45 = vmul.f32 %v247_v19, %v783_v48  ;;  %v390_v48 = vpop.permute.xlu2 %389 }
  0x8d   :  { %v255_v31 = vmul.f32 %v249_v24, %v777_v39  ;;  %v251_v32 = vsel %vm248_vm4, %v250_v25, %v245_v15  ;;  %v343_v39 = vrot.slane %v338_v27, 4  ;;  %v403_v15 = vperm.slane %v714_v1, 6 }
  0x8e   :  { %v139_v10 = vld.sshfl [vmem:[#allocation1 + $0x8] sm:$0xff pattern:$0x75316420]  ;;  %v800_v11 = vld.sshfl [vmem:[#allocation1] sm:$0xff pattern:$0x75316420]  ;;  %v256_v41 = vmul.f32 %v251_v32, %v786_v50 }
  0x8f   :  { %v75_v12 = vld.sshfl [vmem:[#allocation1 + $0x10] sm:$0xff pattern:$0x75316420]  ;;  %v76_v13 = vld.sshfl [vmem:[#allocation1 + $0x18] sm:$0xff pattern:$0x75316420] }
  0x90   :  { %135 = vst [vmem:[#allocation1 + $0x11] ss:$2 sm:$0xff] %v127_v5  ;;  %v77_v16 = vld.sshfl [vmem:[#allocation1 + $0x20] sm:$0xff pattern:$0x75316420]  ;;  %84 = vrot.lane.b32.xlu2 %v76_v13, %s676_s0  ;;  %82 = vrot.lane.b32.xlu1 %v75_v12, %s676_s0  ;;  %v392_v5 = vrot.slane %v390_v48, 2 }
  0x91   :  { %137 = vst [vmem:[#allocation1 + $0x21] ss:$2 sm:$0xff] %v128_v4  ;;  %86 = vrot.lane.b32.xlu0 %v77_v16, %s676_s0  ;;  %v340_v33 = vpop.permute.xlu0 %339  ;;  %v388_v54 = vpop.permute.xlu1 %387  ;;  %v394_v12 = vrot.slane %v390_v48, 4  ;;  %v405_v16 = vperm.slane %v723_v6, 6  ;;  %v402_v27 = vperm.slane %v709_v0, 6 }
  0x92   :  { %197 = vst [vmem:[#allocation1] ss:$2 sm:$0xff] %v191_v8  ;;  %v342_v42 = vrot.slane %v340_v33, 2  ;;  %v344_v43 = vrot.slane %v340_v33, 4  ;;  %v319_v8 = vmul.f32 %v315_v60, %v303_v56  ;;  %v391_v9 = vrot.slane %v388_v54, 2 }
  0x93   :  { %v459_v56 = vrot.slane %v453_v46, 4 }
  0x94   :  { %v345_v57 = vsel %vm299_vm5, %v341_v40, %v342_v42  ;;  %v347_v58 = vsel %vm46_vm0, %v343_v39, %v344_v43 }
  0x95   :  { %v349_v4 = vsel %vm248_vm4, %v345_v57, %v347_v58 }
  0x96   :  { %v352_v18 = vunpack.c.h.bf16 %v349_v4 }
  0x97   :  { %v141_v28 = vld.sshfl [vmem:[#allocation1 + $0x18] sm:$0xff pattern:$0x75316420]  ;;  %v140_v29 = vld.sshfl [vmem:[#allocation1 + $0x10] sm:$0xff pattern:$0x75316420] }
  0x98   :  { %v142_v30 = vld.sshfl [vmem:[#allocation1 + $0x20] sm:$0xff pattern:$0x75316420]  ;;  %149 = vrot.lane.b32.xlu2 %v141_v28, %s677_s5  ;;  %145 = vrot.lane.b32.xlu1 %v139_v10, %s677_s5  ;;  %199 = vst [vmem:[#allocation1 + $0x10] ss:$2 sm:$0xff] %v192_v20  ;;  %v393_v10 = vrot.slane %v388_v54, 4 }
  0x99   :  { %201 = vst [vmem:[#allocation1 + $0x20] ss:$2 sm:$0xff] %v193_v22  ;;  %151 = vrot.lane.b32.xlu0 %v142_v30, %s677_s5  ;;  %v202_v35 = vld.sshfl [vmem:[#allocation1] sm:$0xff pattern:$0x75316420]  ;;  %v395_v22 = vsel %vm299_vm5, %v391_v9, %v392_v5  ;;  %v436_v24 = vpop.permute.xlu0 %435  ;;  %v438_v25 = vpop.permute.xlu1 %437  ;;  %v404_v28 = vperm.slane %v728_v7, 6 }
  0x9a   :  { %v819_v44 = vld.sshfl [vmem:[#allocation1 + $0x8] sm:$0xff pattern:$0x75316420]  ;;  %v396_v23 = vsel %vm46_vm0, %v393_v10, %v394_v12  ;;  %v410_v30 = vrot.slane %v403_v15, 4  ;;  %v439_v33 = vrot.slane %v436_v24, 2  ;;  %v441_v34 = vrot.slane %v436_v24, 4 }
  0x9b   :  { %262 = vst [vmem:[#allocation1 + $0x1] ss:$2 sm:$0xff] %v255_v31  ;;  %v411_v31 = vrot.slane %v405_v16, 4  ;;  %v398_v32 = vsel %vm184_vm3, %v395_v22, %v396_v23  ;;  %v442_v36 = vrot.slane %v438_v25, 4  ;;  %v671_v9 = vld [vmem:[%s904_s1 + $0x38] ss:$0 sm:$0xff] }
  0x9c   :  { %v400_v40 = vunpack.c.l.bf16 %v398_v32  ;;  %v412_v42 = vsel %vm46_vm0, %v402_v27, %v410_v30  ;;  %v669_v12 = vld [vmem:[%s904_s1 + $0x28] ss:$0 sm:$0xff] }
  0x9d   :  { %v444_v49 = vsel %vm46_vm0, %v441_v34, %v442_v36  ;;  %v413_v52 = vsel %vm46_vm0, %v404_v28, %v411_v31 }
  0x9f   :  { %v204_v50 = vld.sshfl [vmem:[#allocation1 + $0x10] sm:$0xff pattern:$0x75316420]  ;;  %v205_v55 = vld.sshfl [vmem:[#allocation1 + $0x18] sm:$0xff pattern:$0x75316420] }
  0xa0   :  { %147 = vrot.lane.b32.xlu1 %v140_v29, %s677_s5  ;;  %207 = vrot.lane.b32.xlu2 %v202_v35, %s678_s6  ;;  %v206_v59 = vld.sshfl [vmem:[#allocation1 + $0x20] sm:$0xff pattern:$0x75316420]  ;;  %264 = vst [vmem:[#allocation1 + $0x11] ss:$2 sm:$0xff] %v256_v41  ;;  %v368_v29 = vmul.f32 %v364_v21, %v352_v18  ;;  %v440_v35 = vrot.slane %v438_v25, 2 }
  0xa1   :  { %143 = vrot.lane.b32.xlu0 %v800_v11, %s677_s5  ;;  %266 = vst [vmem:[#allocation1 + $0x21] ss:$2 sm:$0xff] %v257_v45  ;;  %v351_v11 = vunpack.c.l.bf16 %v349_v4  ;;  %v451_v41 = vperm.slane %v714_v1, 7  ;;  %v401_v45 = vunpack.c.h.bf16 %v398_v32  ;;  %v416_v1 = vmul.f32 %v412_v42, %v400_v40 }
  0xa2   :  { %v836_v13 = vld.sshfl [vmem:[#allocation1 + $0x8] sm:$0xff pattern:$0x75316420]  ;;  %v838_v14 = vld.sshfl [vmem:[#allocation1] sm:$0xff pattern:$0x75316420]  ;;  %v443_v47 = vsel %vm299_vm5, %v439_v33, %v440_v35 }
  0xa3   :  { %322 = vst [vmem:[#allocation1] ss:$2 sm:$0xff] %v318_v63  ;;  %v367_v26 = vmul.f32 %v363_v17, %v351_v11  ;;  %v458_v54 = vrot.slane %v451_v41, 4  ;;  %v446_v6 = vsel %vm119_vm2, %v443_v47, %v444_v49  ;;  %v487_v63 = vpop.permute.xlu0 %486  ;;  %v508_v11 = vrot.slane %v671_v9, 4 }
  0xa4   :  { %v448_v48 = vunpack.c.l.bf16 %v446_v6  ;;  %v449_v0 = vunpack.c.h.bf16 %v446_v6  ;;  %v489_v5 = vrot.slane %v487_v63, 2 }
  0xa5   :  { %v460_v60 = vsel %vm46_vm0, %v450_v53, %v458_v54 }
  0xa6   :  { %v464_v4 = vmul.f32 %v460_v60, %v448_v48 }
  0xa7   :  { %v269_v19 = vld.sshfl [vmem:[#allocation1 + $0x10] sm:$0xff pattern:$0x75316420]  ;;  %v270_v20 = vld.sshfl [vmem:[#allocation1 + $0x18] sm:$0xff pattern:$0x75316420] }
  0xa8   :  { %211 = vrot.lane.b32.xlu1 %v204_v50, %s678_s6  ;;  %213 = vrot.lane.b32.xlu2 %v205_v55, %s678_s6  ;;  %324 = vst [vmem:[#allocation1 + $0x10] ss:$2 sm:$0xff] %v319_v8  ;;  %v271_v51 = vld.sshfl [vmem:[#allocation1 + $0x20] sm:$0xff pattern:$0x75316420]  ;;  %v417_v50 = vmul.f32 %v413_v52, %v401_v45  ;;  %v452_v55 = vperm.slane %v728_v7, 7 }
  0xa9   :  { %215 = vrot.lane.b32.xlu0 %v206_v59, %s678_s6  ;;  %v485_v59 = vpop.permute.xlu2 %484  ;;  %v491_v8 = vrot.slane %v487_v63, 4 }
  0xaa   :  { %v325_v37 = vld.sshfl [vmem:[#allocation1] sm:$0xff pattern:$0x75316420]  ;;  %v326_v38 = vld.sshfl [vmem:[#allocation1 + $0x8] sm:$0xff pattern:$0x75316420]  ;;  %v461_v7 = vsel %vm46_vm0, %v452_v55, %v459_v56 }
  0xab   :  { %372 = vst [vmem:[#allocation1 + $0x1] ss:$2 sm:$0xff] %v367_v26  ;;  %v488_v2 = vrot.slane %v485_v59, 2  ;;  %v490_v3 = vrot.slane %v485_v59, 4  ;;  %v465_v10 = vmul.f32 %v461_v7, %v449_v0 }
  0xac   :  { %333 = vst [vmem:[#allocation2 + $0x8] sm:$0xf] %v325_v37 }
  0xad   :  { %334 = vst [vmem:[#allocation2 + $0x88] sm:$0xf] %v326_v38  ;;  %v492_v15 = vsel %vm299_vm5, %v488_v2, %v489_v5  ;;  %v493_v16 = vsel %vm46_vm0, %v490_v3, %v491_v8 }
  0xae   :  { %v495_v21 = vsel %vm55_vm1, %v492_v15, %v493_v16 }
  0xaf   :  { %v327_v43 = vld.sshfl [vmem:[#allocation1 + $0x10] sm:$0xff pattern:$0x75316420]  ;;  %v328_v39 = vld.sshfl [vmem:[#allocation1 + $0x18] sm:$0xff pattern:$0x75316420]  ;;  %v498_v22 = vunpack.c.h.bf16 %v495_v21  ;;  %v497_v24 = vunpack.c.l.bf16 %v495_v21 }
  0xb0   :  { %276 = vrot.lane.b32.xlu1 %v269_v19, %s679_s7  ;;  %374 = vst [vmem:[#allocation1 + $0x11] ss:$2 sm:$0xff] %v368_v29  ;;  %278 = vrot.lane.b32.xlu2 %v270_v20, %s679_s7  ;;  %v668_v19 = vld [vmem:[%s904_s1 + $0x20] ss:$0 sm:$0xff]  ;;  %v507_v20 = vrot.slane %v669_v12, 4 }
  0xb1   :  { %280 = vrot.lane.b32.xlu0 %v271_v51, %s679_s7  ;;  %335 = vst [vmem:[#allocation2 + $0x28] sm:$0xf] %v327_v43 }
  0xb2   :  { %336 = vst [vmem:[#allocation2 + $0x40] sm:$0xf] %v328_v39  ;;  %v375_v57 = vld.sshfl [vmem:[#allocation1] sm:$0xff pattern:$0x75316420]  ;;  %v509_v25 = vsel %vm46_vm0, %v668_v19, %v507_v20 }
  0xb3   :  { %v376_v58 = vld.sshfl [vmem:[#allocation1 + $0x8] sm:$0xff pattern:$0x75316420]  ;;  %383 = vst [vmem:[#allocation2 + $0x8] sm:$0xf0] %v375_v57  ;;  %v513_v30 = vmul.f32 %v509_v25, %v497_v24  ;;  %v565_v20 = vld [vmem:[%s906_s3] sm:$0xff] }
  0xb4   :  { %420 = vst [vmem:[#allocation1] ss:$2 sm:$0xff] %v416_v1 }
  0xb5   :  { %384 = vst [vmem:[#allocation2 + $0x88] sm:$0xf0] %v376_v58 }
  0xb7   :  { %v377_v61 = vld.sshfl [vmem:[#allocation1 + $0x10] sm:$0xff pattern:$0x75316420]  ;;  %v378_v62 = vld.sshfl [vmem:[#allocation1 + $0x18] sm:$0xff pattern:$0x75316420] }
  0xb8   :  { %422 = vst [vmem:[#allocation1 + $0x10] ss:$2 sm:$0xff] %v417_v50  ;;  %274 = vrot.lane.b32.xlu2 %v836_v13, %s679_s7  ;;  %272 = vrot.lane.b32.xlu1 %v838_v14, %s679_s7 }
  0xb9   :  { %385 = vst [vmem:[#allocation2 + $0x28] sm:$0xf0] %v377_v61  ;;  %209 = vrot.lane.b32.xlu0 %v819_v44, %s678_s6  ;;  %v670_v44 = vld [vmem:[%s904_s1 + $0x30] ss:$0 sm:$0xff] }
  0xba   :  { %386 = vst [vmem:[#allocation2 + $0x40] sm:$0xf0] %v378_v62  ;;  %v510_v23 = vsel %vm46_vm0, %v670_v44, %v508_v11  ;;  %v541_v54 = vld [vmem:[#allocation2 + $0x8] sm:$0xff] }
  0xbb   :  { %v423_v13 = vld.sshfl [vmem:[#allocation1] sm:$0xff pattern:$0x75316420]  ;;  %v424_v14 = vld.sshfl [vmem:[#allocation1 + $0x8] sm:$0xff pattern:$0x75316420]  ;;  %v514_v27 = vmul.f32 %v510_v23, %v498_v22 }
  0xbc   :  { %469 = vst [vmem:[#allocation1 + $0x1] ss:$2 sm:$0xff] %v464_v4  ;;  %v542_v56 = vld [vmem:[#allocation2 + $0x88] sm:$0xff]  ;;  %v680_v22 = vmov 0  }
  0xbd   :  { %431 = vst [vmem:[#allocation2 + $0x58] sm:$0xf] %v423_v13  ;;  %667 = vset.pattern.permute.xlu0 %v680_v22 }
  0xbe   :  { %432 = vst [vmem:[#allocation2 + $0x10] sm:$0xf] %v424_v14 }
  0xbf   :  { %v425_v17 = vld.sshfl [vmem:[#allocation1 + $0x10] sm:$0xff pattern:$0x75316420]  ;;  %v426_v18 = vld.sshfl [vmem:[#allocation1 + $0x18] sm:$0xff pattern:$0x75316420] }
  0xc0   :  { %471 = vst [vmem:[#allocation1 + $0x11] ss:$2 sm:$0xff] %v465_v10  ;;  %v543_v51 = vld [vmem:[#allocation2 + $0x28] sm:$0xff] }
  0xc1   :  { %433 = vst [vmem:[#allocation2 + $0x98] sm:$0xf] %v425_v17  ;;  %v544_v58 = vld [vmem:[#allocation2 + $0x40] sm:$0xff]  ;;  %568 = vperm.xlu0 %667, %v565_v20  }
  0xc2   :  { %434 = vst [vmem:[#allocation2 + $0x60] sm:$0xf] %v426_v18 }
  0xc3   :  { %v472_v26 = vld.sshfl [vmem:[#allocation1] sm:$0xff pattern:$0x75316420]  ;;  %v473_v31 = vld.sshfl [vmem:[#allocation1 + $0x8] sm:$0xff pattern:$0x75316420] }
  0xc4   :  { %480 = vst [vmem:[#allocation2 + $0x58] sm:$0xf0] %v472_v26 }
  0xc5   :  { %481 = vst [vmem:[#allocation2 + $0x10] sm:$0xf0] %v473_v31 }
  0xc6   :  { %517 = vst [vmem:[#allocation1] ss:$2 sm:$0xff] %v513_v30 }
  0xc7   :  { %v474_v28 = vld.sshfl [vmem:[#allocation1 + $0x10] sm:$0xff pattern:$0x75316420]  ;;  %v475_v29 = vld.sshfl [vmem:[#allocation1 + $0x18] sm:$0xff pattern:$0x75316420] }
  0xc8   :  { %482 = vst [vmem:[#allocation2 + $0x98] sm:$0xf0] %v474_v28 }
  0xc9   :  { %483 = vst [vmem:[#allocation2 + $0x60] sm:$0xf0] %v475_v29 }
  0xca   :  { %519 = vst [vmem:[#allocation1 + $0x10] ss:$2 sm:$0xff] %v514_v27 }
  0xcb   :  { %v545_v47 = vld [vmem:[#allocation2 + $0x58] sm:$0xff] }
  0xcc   :  { %v546_v1 = vld [vmem:[#allocation2 + $0x10] sm:$0xff]  ;;  %v557_v55 = vpack.c.bf16 %v545_v47, %v541_v54 }
  0xcd   :  { %v520_v34 = vld.sshfl [vmem:[#allocation1] sm:$0xff pattern:$0x75316420]  ;;  %v521_v35 = vld.sshfl [vmem:[#allocation1 + $0x8] sm:$0xff pattern:$0x75316420]  ;;  %v558_v57 = vpack.c.bf16 %v546_v1, %v542_v56 }
  0xce   :  { %528 = vst [vmem:[#allocation2 + $0x20] sm:$0xf] %v520_v34 }
  0xcf   :  { %529 = vst [vmem:[#allocation2 + $0x48] sm:$0xf] %v521_v35  ;;  %v547_v43 = vld [vmem:[#allocation2 + $0x98] sm:$0xff] }
  0xd0   :  { %v559_v53 = vpack.c.bf16 %v547_v43, %v543_v51  ;;  %v548_v50 = vld [vmem:[#allocation2 + $0x60] sm:$0xff] }
  0xd1   :  { %v522_v32 = vld.sshfl [vmem:[#allocation1 + $0x10] sm:$0xff pattern:$0x75316420]  ;;  %v523_v33 = vld.sshfl [vmem:[#allocation1 + $0x18] sm:$0xff pattern:$0x75316420]  ;;  %v560_v48 = vpack.c.bf16 %v548_v50, %v544_v58 }
  0xd2   :  { %530 = vst [vmem:[#allocation2 + $0x70] sm:$0xf] %v522_v32 }
  0xd3   :  { %531 = vst [vmem:[#allocation2 + $0x90] sm:$0xf] %v523_v33 }
  0xd5   :  { %v549_v38 = vld [vmem:[#allocation2 + $0x20] sm:$0xf] }
  0xd6   :  { %v561_v40 = vpack.c.bf16 %v549_v38, %v549_v38  ;;  %v550_v41 = vld [vmem:[#allocation2 + $0x48] sm:$0xf] }
  0xd7   :  { %v562_v39 = vpack.c.bf16 %v550_v41, %v550_v41  ;;  %v532_v41 = vld [vmem:[%s907_s2] sm:$0xf] }
  0xd8   :  { %v577_v46 = vsel %vm575_vm6, %v561_v40, 0 }
  0xd9   :  { %v551_v36 = vld [vmem:[#allocation2 + $0x70] sm:$0xf]  ;;  %593 = vmatpush.bf16.msra.mxu0 %v577_v46  ;;  %v580_v52 = vsel %vm575_vm6, %v562_v39, 0 }
  0xda   :  { %v563_v37 = vpack.c.bf16 %v551_v36, %v551_v36  ;;  %v552_v45 = vld [vmem:[#allocation2 + $0x90] sm:$0xf]  ;;  %606 = vmatpush.bf16.msra.mxu1 %v580_v52 }
  0xdb   :  { %v564_v49 = vpack.c.bf16 %v552_v45, %v552_v45 }
  0xdc   :  { %v583_v42 = vsel %vm575_vm6, %v563_v37, 0 }
  0xdd   :  { %619 = vmatpush.bf16.msra.mxu2 %v583_v42  ;;  %v586_v6 = vsel %vm575_vm6, %v564_v49, 0  ;;  %594 = vmatpush.bf16.msra.mxu0 %v557_v55 }
  0xde   :  { %632 = vmatpush.bf16.msra.mxu3 %v586_v6  ;;  %607 = vmatpush.bf16.msra.mxu1 %v558_v57 }
  0xe1   :  { %620 = vmatpush.bf16.msra.mxu2 %v559_v53  ;;  %v81_v59 = vpop.permute.xlu2 %80 }
  0xe2   :  { %633 = vmatpush.bf16.msra.mxu3 %v560_v48 }
  0xea   :  { %v85_v60 = vpop.permute.xlu2 %84 }
  0xf2   :  { %v150_v62 = vpop.permute.xlu2 %149 }
  0xf9   :  { %v79_v61 = vpop.permute.xlu1 %78 }
  0xfa   :  { %v89_v63 = vsel %vm88_vm7, %v79_v61, %v81_v59  ;;  %v208_v4 = vpop.permute.xlu2 %207 }
  0xfb   :  { %97 = vst [vmem:[#allocation2] sm:$0xf] %v89_v63 }
 0x102   :  { %v83_v0 = vpop.permute.xlu1 %82  ;;  %v214_v12 = vpop.permute.xlu2 %213 }
 0x103   :  { %v87_v7 = vpop.permute.xlu0 %86  ;;  %v90_v2 = vsel %vm88_vm7, %v81_v59, %v83_v0  ;;  %v91_v3 = vsel %vm88_vm7, %v83_v0, %v85_v60 }
 0x104   :  { %v92_v5 = vsel %vm88_vm7, %v85_v60, %v87_v7  ;;  %98 = vst [vmem:[#allocation2 + $0x38] sm:$0xf] %v90_v2 }
 0x105   :  { %100 = vst [vmem:[#allocation2 + $0x18] sm:$0xf] %v92_v5 }
 0x106   :  { %99 = vst [vmem:[#allocation2 + $0x50] sm:$0xf] %v91_v3 }
 0x10a   :  { %v146_v8 = vpop.permute.xlu1 %145  ;;  %v279_v16 = vpop.permute.xlu2 %278 }
 0x10b   :  { %v152_v9 = vpop.permute.xlu0 %151 }
 0x10c   :  { %v157_v10 = vsel %vm153_vm8, %v150_v62, %v152_v9 }
 0x10d   :  { %165 = vst [vmem:[#allocation2 + $0x18] sm:$0xf0] %v157_v10 }
 0x112   :  { %v148_v13 = vpop.permute.xlu1 %147  ;;  %v275_v23 = vpop.permute.xlu2 %274 }
 0x113   :  { %v144_v14 = vpop.permute.xlu0 %143  ;;  %v155_v44 = vsel %vm153_vm8, %v146_v8, %v148_v13  ;;  %v156_v11 = vsel %vm153_vm8, %v148_v13, %v150_v62 }
 0x114   :  { %v154_v15 = vsel %vm153_vm8, %v144_v14, %v146_v8  ;;  %163 = vst [vmem:[#allocation2 + $0x38] sm:$0xf0] %v155_v44  ;;  %v536_v34 = vld [vmem:[#allocation2 + $0x18] sm:$0xff] }
 0x115   :  { %162 = vst [vmem:[#allocation2] sm:$0xf0] %v154_v15 }
 0x116   :  { %164 = vst [vmem:[#allocation2 + $0x50] sm:$0xf0] %v156_v11 }
 0x11a   :  { %v212_v17 = vpop.permute.xlu1 %211 }
 0x11b   :  { %v216_v18 = vpop.permute.xlu0 %215  ;;  %v220_v19 = vsel %vm217_vm9, %v212_v17, %v214_v12  ;;  %v534_v39 = vld [vmem:[#allocation2 + $0x38] sm:$0xff] }
 0x11c   :  { %v221_v21 = vsel %vm217_vm9, %v214_v12, %v216_v18  ;;  %228 = vst [vmem:[#allocation2 + $0x78] sm:$0xf] %v220_v19  ;;  %v533_v42 = vld [vmem:[#allocation2] sm:$0xff] }
 0x11d   :  { %229 = vst [vmem:[#allocation2 + $0x80] sm:$0xf] %v221_v21  ;;  %v535_v37 = vld [vmem:[#allocation2 + $0x50] sm:$0xff] }
 0x122   :  { %v277_v24 = vpop.permute.xlu1 %276 }
 0x123   :  { %v281_v25 = vpop.permute.xlu0 %280  ;;  %v284_v26 = vsel %vm282_vm10, %v275_v23, %v277_v24  ;;  %v285_v27 = vsel %vm282_vm10, %v277_v24, %v279_v16 }
 0x124   :  { %v286_v28 = vsel %vm282_vm10, %v279_v16, %v281_v25  ;;  %292 = vst [vmem:[#allocation2 + $0x68] sm:$0xf0] %v284_v26 }
 0x125   :  { %294 = vst [vmem:[#allocation2 + $0x80] sm:$0xf0] %v286_v28 }
 0x126   :  { %293 = vst [vmem:[#allocation2 + $0x78] sm:$0xf0] %v285_v27 }
 0x12a   :  { %v273_v29 = vpop.permute.xlu1 %272 }
 0x12b   :  { %v210_v30 = vpop.permute.xlu0 %209  ;;  %v283_v31 = vsel %vm282_vm10, %v273_v29, %v275_v23 }
 0x12c   :  { %v218_v32 = vsel %vm217_vm9, %v208_v4, %v210_v30  ;;  %v219_v33 = vsel %vm217_vm9, %v210_v30, %v212_v17  ;;  %291 = vst [vmem:[#allocation2 + $0x30] sm:$0xf0] %v283_v31  ;;  %v540_v35 = vld [vmem:[#allocation2 + $0x80] sm:$0xff] }
 0x12d   :  { %226 = vst [vmem:[#allocation2 + $0x30] sm:$0xf] %v218_v32  ;;  %v556_v36 = vpack.c.bf16 %v540_v35, %v536_v34  ;;  %v539_v38 = vld [vmem:[#allocation2 + $0x78] sm:$0xff] }
 0x12e   :  { %227 = vst [vmem:[#allocation2 + $0x68] sm:$0xf] %v219_v33  ;;  %v555_v40 = vpack.c.bf16 %v539_v38, %v535_v37 }
 0x12f   :  { %634 = vmatpush.bf16.msra.mxu3 %v556_v36 }
 0x130   :  { %621 = vmatpush.bf16.msra.mxu2 %v555_v40 }
 0x132   :  { %657 = vmatmul.msk.bf16.vlgmr.msra.gmra.mxu3 %vm571_vm11, %v532_v41 }
 0x133   :  { %656 = vmatmul.msk.bf16.vlgmr.msra.gmra.mxu2 %vm571_vm11, %v532_v41  ;;  %v569_v49 = vpop.permute.xlu0 %568 }
 0x134   :  { %v537_v43 = vld [vmem:[#allocation2 + $0x30] sm:$0xff] }
 0x135   :  { %v538_v45 = vld [vmem:[#allocation2 + $0x68] sm:$0xff]  ;;  %v553_v46 = vpack.c.bf16 %v537_v43, %v533_v42 }
 0x136   :  { %v554_v47 = vpack.c.bf16 %v538_v45, %v534_v39 }
 0x137   :  { %595 = vmatpush.bf16.msra.mxu0 %v553_v46 }
 0x138   :  { %608 = vmatpush.bf16.msra.mxu1 %v554_v47 }
 0x13a   :  { %654 = vmatmul.msk.bf16.vlgmr.msra.gmra.mxu0 %vm571_vm11, %v532_v41 }
 0x13b   :  { %655 = vmatmul.msk.bf16.vlgmr.msra.gmra.mxu1 %vm571_vm11, %v532_v41 }
 0x1b5   :  { %v636_v51 = vpop.f32.mrf.mxu3 }
 0x1b6   :  { %v623_v52 = vpop.f32.mrf.mxu2  ;;  %v637_v1 = vadd.f32 %v636_v51, %v569_v49 }
 0x1b7   :  { %v624_v53 = vadd.f32 %v623_v52, %v569_v49  ;;  %v597_v54 = vpop.f32.mrf.mxu0 }
 0x1b8   :  { %v610_v6 = vpop.f32.mrf.mxu1  ;;  %v643_v50 = vmax.f32 %v637_v1, 0.0  ;;  %v598_v55 = vadd.f32 %v597_v54, %v569_v49 }
 0x1b9   :  { %v611_v56 = vadd.f32 %v610_v6, %v569_v49  ;;  %v642_v57 = vmax.f32 %v624_v53, 0.0 }
 0x1ba   :  { %v640_v58 = vmax.f32 %v598_v55, 0.0 }
 0x1bb   :  { %v641_v48 = vmax.f32 %v611_v56, 0.0  ;;  %v645_v59 = vpack.c.bf16 %v643_v50, %v642_v57 }
 0x1bd   :  { %v644_v60 = vpack.c.bf16 %v641_v48, %v640_v58  ;;  %647 = vst [vmem:[%s908_s4 + $0x8] sm:$0xff] %v645_v59  ;;  %v638_v61 = vpop.f32.mrf.mxu3 }
 0x1be   :  { %v625_v62 = vpop.f32.mrf.mxu2 }
 0x1bf   :  { %646 = vst [vmem:[%s908_s4] sm:$0xff] %v644_v60  ;;  %v599_v63 = vpop.f32.mrf.mxu0 }
 0x1c0   :  { %v612_v0 = vpop.f32.mrf.mxu1 }

// kernel: _lambda_.13
= control target key start
LH: loop header
LB: loop body
LE: loop exit
PB: predicated region body
PF: predicated region fallthrough
CT: control target
= control target key end

     0   :  { %s742_s21 = smov 0   ;;  %s744_s22 = smov 0   ;;  %s857_s0 = inlined_call_operand.vmem [shape: bf16[36,512], index: 0, kind: input, shape index: {}]   ;;  %s858_s1 = inlined_call_operand.vmem [shape: f32[9,256], index: 1, kind: input, shape index: {}]   ;;  %s859_s2 = inlined_call_operand.vmem [shape: f32[1,256], index: 2, kind: input, shape index: {}]   ;;  %s860_s3 = inlined_call_operand.vmem [shape: bf16[8,512], index: 3, kind: input, shape index: {}]   ;;  %s861_s4 = inlined_call_operand.vmem [shape: bf16[8,4], index: 4, kind: input, shape index: {}]   ;;  %s862_s5 = inlined_call_operand.vmem [shape: f32[8,1], index: 5, kind: input, shape index: {}]   ;;  %s863_s6 = inlined_call_operand.vmem [shape: bf16[8,512], index: 6, kind: output, shape index: {}]  }
   0x1   :  { %s746_s23 = smov 0  }
   0x2 LB: > { %s619_s24 = sadd.s32 4294967295, %s696_s23   ;;  %s759_s25 = sadd.s32 1, %s696_s23   ;;  %s696_s23 = sphi %s746_s23, %s866_s23   ;;  %s692_s22 = sphi %s744_s22, %s865_s22   ;;  %s688_s21 = sphi %s742_s21, %s864_s21  }
   0x3   : > { %s20_s26 = ssub.s32 %s696_s23, %s759_s25  ;;  %s23_s27 = sadd.s32 1, %s692_s22 }
   0x4   : > { %p21_p0 = scmp.eq.s32.totalorder %s20_s26, 0  ;;  %p30_p1 = scmp.ne.s32.totalorder %s692_s22, %s688_s21 }
   0x5   : > { %p31_p2 = scmp.eq.s32.totalorder %s696_s23, 0  ;;  %p622_p4 = scmp.ge.s32.totalorder %s696_s23, 2 }
   0x6   : > { %s768_s28 = scalar_select %p21_p0, %s692_s22, %s23_s27  }
   0x7   : > { %p32_p3 = por %p31_p2, %p30_p1  ;;  %204 = sbr.rel (%p622_p4) target bundleno = 21 (0x15), region = 32 }
   0xc   : > { %207 = sbr.rel (!%p32_p3) target bundleno = 21 (0x15), region = 36  ;;  %s209_s29 = sand.u32 (%p32_p3), 1, %s692_s22  }
   0xd   : > { %s634_s30 = sshll.u32 (%p32_p3), %s696_s23, 3  ;;  %s635_s7 = smul.u32 (%p32_p3), 40, %s209_s29 }
   0xe   : > { %s214_s10 = scalar_lea.vmem (%p32_p3), %s857_s0, %s634_s30 }
   0xf   : > { %v251_v0 = vld [vmem:[%s214_s10] sm:$0xff] (%p32_p3)  ;;  %v253_v1 = vld [vmem:[%s214_s10 + $0x10] sm:$0xff] (%p32_p3)  ;;  %s211_s11 = scalar_lea.vmem (%p32_p3), [#allocation2], %s635_s7 }
  0x10   : > { %v255_v2 = vld [vmem:[%s214_s10 + $0x20] sm:$0xff] (%p32_p3)  ;;  %252 = vst [vmem:[%s211_s11] sm:$0xff] (%p32_p3), %v251_v0  ;;  %v257_v3 = vld [vmem:[%s214_s10 + $0x30] sm:$0xff] (%p32_p3) }
  0x11   : > { %254 = vst [vmem:[%s211_s11 + $0x8] sm:$0xff] %v253_v1  ;;  %v259_v4 = vld [vmem:[%s214_s10 + $0x40] sm:$0xff] }
  0x12   : > { %256 = vst [vmem:[%s211_s11 + $0x10] sm:$0xff] %v255_v2 }
  0x13   : > { %258 = vst [vmem:[%s211_s11 + $0x18] sm:$0xff] %v257_v3 }
  0x14   : > { %260 = vst [vmem:[%s211_s11 + $0x20] sm:$0xff] %v259_v4 }
  0x15 PF: > { %p625_p5 = scmp.ge.s32.totalorder %s696_s23, 1  ;;  %p274_p6 = scmp.lt.s32.totalorder %s696_s23, 3 }
  0x17   : > { %p275_p7 = pnand %p625_p5, %p274_p6 }
  0x18   : > { %s281_s12 = sand.u32 (!%p275_p7), 1, %s688_s21   ;;  %s698_s19 = smov (!%p275_p7), 111  }
  0x19   : > { %278 = sbr.rel (%p275_p7) target bundleno = 336 (0x150), region = 78  ;;  %s699_s20 = smov (!%p275_p7), 113  }
  0x1a   : > { %s636_s15 = smul.u32 (!%p275_p7), 40, %s281_s12  ;;  %s700_s21 = smov (!%p275_p7), 112  }
  0x1b   : > { %s701_s26 = smov (!%p275_p7), 127   ;;  %s702_s27 = smov (!%p275_p7), 1  }
  0x1c   : > { %s786_s16 = scalar_lea.vmem (!%p275_p7), [#allocation2], %s636_s15  ;;  %s703_s29 = smov (!%p275_p7), 15  }
  0x1d   : > { %s704_s8 = smov (!%p275_p7), 16   ;;  %s705_s11 = smov (!%p275_p7), 17  }
  0x1e   : > { %v782_v5 = vld [vmem:[%s858_s1] sm:$0xff]  ;;  %v792_v9 = vld [vmem:[%s858_s1 + $0x8] sm:$0xff]  ;;  %v801_v26 = vld [vmem:[%s786_s16 + $0x10] sm:$0xff]  ;;  %v356_v2 = vlaneseq  ;;  %vm505_vm8 = vcmask 1041408   ;;  %vm501_vm9 = vcmask 31744   ;;  %s626_s18 = sshll.u32 %s619_s24, 1 }
  0x1f   : > { %v348_v6 = vperm.slane %v782_v5, 0  ;;  %v363_v7 = vperm.slane %v782_v5, 1  ;;  %v329_v8 = vld [vmem:[%s786_s16] sm:$0xff]  ;;  %v330_v10 = vld [vmem:[%s786_s16 + $0x8] sm:$0xff]  ;;  %v382_v11 = vperm.slane %v782_v5, 2  ;;  %v364_v17 = vperm.slane %v792_v9, 1 }
  0x20   : > { %v334_v12 = vunpack.c.l.bf16 %v329_v8  ;;  %v336_v13 = vunpack.c.l.bf16 %v330_v10  ;;  %v335_v14 = vunpack.c.h.bf16 %v329_v8  ;;  %v349_v20 = vperm.slane %v792_v9, 0  ;;  %v332_v40 = vld [vmem:[%s786_s16 + $0x18] sm:$0xff]  ;;  %v333_v52 = vld [vmem:[%s786_s16 + $0x20] sm:$0x33]  ;;  %v673_v54 = vld [vmem:[%s858_s1 + $0x10] ss:$0 sm:$0xff] }
  0x21   : > { %v383_v21 = vperm.slane %v792_v9, 2  ;;  %v337_v23 = vunpack.c.h.bf16 %v330_v10  ;;  %v395_v25 = vperm.slane %v782_v5, 3  ;;  %v338_v28 = vunpack.c.l.bf16 %v801_v26  ;;  %v672_v60 = vld [vmem:[%s858_s1 + $0x18] ss:$0 sm:$0xff]  ;;  %p317_p8 = scmp.lt.s32.totalorder %s626_s18, 3 }
  0x22   : > { %v350_v15 = vmul.f32 %v348_v6, %v334_v12  ;;  %v365_v16 = vmul.f32 %v363_v7, %v334_v12  ;;  %v384_v18 = vmul.f32 %v382_v11, %v336_v13  ;;  %v366_v22 = vmul.f32 %v364_v17, %v335_v14 }
  0x23   : > { %v351_v24 = vmul.f32 %v349_v20, %v335_v14  ;;  %v385_v27 = vmul.f32 %v383_v21, %v337_v23  ;;  %v420_v29 = vperm.slane %v782_v5, 5  ;;  %v396_v31 = vperm.slane %v792_v9, 3  ;;  %s868_s18 = smov (!%p317_p8, %s626_s18), 3 }
  0x24   : > { %352 = vrot.lane.b32.xlu0 %v350_v15, %s698_s19  ;;  %v369_v19 = vrot.slane %v365_v16, 4  ;;  %386 = vrot.lane.b32.xlu2 %v384_v18, %s699_s20  ;;  %v370_v30 = vrot.slane %v366_v22, 4  ;;  %v397_v32 = vmul.f32 %v395_v25, %v336_v13  ;;  %v339_v36 = vunpack.c.h.bf16 %v801_v26  ;;  %v495_v13 = vld [vmem:[%s862_s5] sm:$0xff] }
  0x25   : > { %v422_v33 = vmul.f32 %v420_v29, %v338_v28  ;;  %v398_v34 = vmul.f32 %v396_v31, %v337_v23  ;;  %v421_v37 = vperm.slane %v792_v9, 5  ;;  %v440_v42 = vperm.slane %v792_v9, 6  ;;  %v484_v26 = vld [vmem:[%s859_s2] sm:$0x3] }
  0x26   : > { %373 = vrot.lane.b32.xlu1 %v369_v19, %s700_s21  ;;  %v401_v35 = vrot.slane %v397_v32, 4  ;;  %v340_v43 = vunpack.c.l.bf16 %v332_v40  ;;  %v439_v44 = vperm.slane %v782_v5, 6  ;;  %v341_v45 = vunpack.c.h.bf16 %v332_v40 }
  0x27   : > { %v426_v38 = vrot.slane %v422_v33, 4  ;;  %v402_v39 = vrot.slane %v398_v34, 4  ;;  %v423_v41 = vmul.f32 %v421_v37, %v339_v36  ;;  %v452_v47 = vperm.slane %v782_v5, 7 }
  0x28   : > { %v442_v48 = vmul.f32 %v440_v42, %v341_v45  ;;  %v441_v49 = vmul.f32 %v439_v44, %v340_v43  ;;  %v453_v50 = vperm.slane %v792_v9, 7  ;;  %v342_v53 = vunpack.c.l.bf16 %v333_v52 }
  0x29   : > { %v427_v46 = vrot.slane %v423_v41, 4  ;;  %v454_v51 = vmul.f32 %v452_v47, %v340_v43  ;;  %v343_v59 = vunpack.c.h.bf16 %v333_v52  ;;  %v357_v6 = vand.u32 127, %v356_v2 }
  0x2a   : > { %v455_v55 = vmul.f32 %v453_v50, %v341_v45  ;;  %v473_v57 = vmul.f32 %v673_v54, %v342_v53  ;;  %v706_v16 = vmov 0   ;;  %v414_v19 = vperm.slane %v782_v5, 4 }
  0x2b   : > { %v458_v56 = vrot.slane %v454_v51, 4  ;;  %v474_v61 = vmul.f32 %v672_v60, %v343_v59  ;;  %vm377_vm0 = vcmp.lt.s32.totalorder %v357_v6, 112  ;;  %vm358_vm1 = vcmp.lt.s32.totalorder %v357_v6, 111  ;;  %670 = vset.pattern.permute.xlu1 %v706_v16  ;;  %671 = vset.pattern.permute.xlu0 %v706_v16 }
  0x2c   : > { %354 = vrot.lane.b32.xlu0 %v351_v24, %s698_s19  ;;  %388 = vrot.lane.b32.xlu2 %v385_v27, %s699_s20  ;;  %v459_v58 = vrot.slane %v455_v55, 4  ;;  %vm390_vm2 = vcmp.lt.s32.totalorder %v357_v6, 113  ;;  %vm409_vm3 = vcmp.lt.s32.totalorder %v357_v6, 127  ;;  %v415_v20 = vperm.slane %v792_v9, 4  ;;  %s627_s19 = sshll.u32 %s868_s18, 2 }
  0x2d   : > { %v416_v31 = vmul.f32 %v414_v19, %v338_v28  ;;  %vm434_vm4 = vcmp.lt.s32.totalorder %v357_v6, 1  ;;  %vm447_vm5 = vcmp.lt.s32.totalorder %v357_v6, 15  ;;  %vm466_vm6 = vcmp.lt.s32.totalorder %v357_v6, 16  ;;  %s326_s24 = scalar_lea.vmem %s863_s6, %s627_s19 }
  0x2e   : > { %375 = vrot.lane.b32.xlu1 %v370_v30, %s700_s21  ;;  %v417_v34 = vmul.f32 %v415_v20, %v339_v36  ;;  %vm479_vm7 = vcmp.lt.s32.totalorder %v357_v6, 17  ;;  %v486_v51 = vperm.slane %v484_v26, 0  ;;  %v487_v52 = vperm.slane %v484_v26, 1 }
  0x34   : > { %405 = vrot.lane.b32.xlu0 %v401_v35, %s701_s26  ;;  %430 = vrot.lane.b32.xlu2 %v426_v38, %s702_s27 }
  0x36   : > { %407 = vrot.lane.b32.xlu1 %v402_v39, %s701_s26  ;;  %s320_s26 = scalar_lea.vmem %s860_s3, %s627_s19 }
  0x3c   : > { %432 = vrot.lane.b32.xlu0 %v427_v46, %s702_s27  ;;  %445 = vrot.lane.b32.xlu2 %v442_v48, %s703_s29 }
  0x3e   : > { %443 = vrot.lane.b32.xlu1 %v441_v49, %s703_s29 }
  0x44   : > { %462 = vrot.lane.b32.xlu0 %v458_v56, %s704_s8  ;;  %475 = vrot.lane.b32.xlu2 %v473_v57, %s705_s11 }
  0x46   : > { %464 = vrot.lane.b32.xlu1 %v459_v58, %s704_s8 }
  0x4c   : > { %477 = vrot.lane.b32.xlu0 %v474_v61, %s705_s11 }
  0x4e   : > { %498 = vperm.xlu1 %670, %v495_v13  }
  0x7e   : > { %v387_v63 = vpop.permute.xlu2 %386 }
  0x86   : > { %v389_v4 = vpop.permute.xlu2 %388 }
  0x87   : > { %v391_v22 = vsel %vm390_vm2, %v387_v63, %v389_v4  ;;  %v392_v23 = vsel %vm390_vm2, %v389_v4, %v387_v63  ;;  %v492_v63 = vld [vmem:[%s861_s4] sm:$0xf] }
  0x8e   : > { %v431_v12 = vpop.permute.xlu2 %430 }
  0x96   : > { %v353_v62 = vpop.permute.xlu0 %352  ;;  %v446_v5 = vpop.permute.xlu2 %445 }
  0x98   : > { %v374_v0 = vpop.permute.xlu1 %373 }
  0x9e   : > { %v355_v1 = vpop.permute.xlu0 %354  ;;  %v476_v47 = vpop.permute.xlu2 %475 }
  0x9f   : > { %v359_v14 = vsel %vm358_vm1, %v353_v62, %v355_v1  ;;  %v360_v15 = vsel %vm358_vm1, %v355_v1, %v353_v62 }
  0xa0   : > { %v376_v3 = vpop.permute.xlu1 %375 }
  0xa1   : > { %v378_v10 = vsel %vm377_vm0, %v374_v0, %v376_v3  ;;  %v379_v11 = vsel %vm377_vm0, %v376_v3, %v374_v0  ;;  %v538_v0 = vld [vmem:[%s320_s26] sm:$0xff] }
  0xa2   : > { %v380_v17 = vadd.f32 %v378_v10, %v359_v14  ;;  %v381_v18 = vadd.f32 %v379_v11, %v360_v15  ;;  %v539_v2 = vunpack.c.l.bf16 %v538_v0  ;;  %v540_v3 = vunpack.c.h.bf16 %v538_v0 }
  0xa4   : > { %v393_v27 = vadd.f32 %v391_v22, %v380_v17  ;;  %v394_v29 = vadd.f32 %v392_v23, %v381_v18 }
  0xa6   : > { %v406_v7 = vpop.permute.xlu0 %405 }
  0xa8   : > { %v408_v8 = vpop.permute.xlu1 %407 }
  0xa9   : > { %v410_v24 = vsel %vm409_vm3, %v406_v7, %v408_v8  ;;  %v411_v25 = vsel %vm409_vm3, %v408_v8, %v406_v7 }
  0xaa   : > { %v412_v32 = vadd.f32 %v410_v24, %v393_v27  ;;  %v413_v33 = vadd.f32 %v411_v25, %v394_v29 }
  0xac   : > { %v418_v37 = vadd.f32 %v416_v31, %v412_v32  ;;  %v419_v38 = vadd.f32 %v417_v34, %v413_v33 }
  0xae   : > { %v433_v21 = vpop.permute.xlu0 %432 }
  0xaf   : > { %v435_v35 = vsel %vm434_vm4, %v431_v12, %v433_v21  ;;  %v436_v9 = vsel %vm434_vm4, %v433_v21, %v431_v12 }
  0xb0   : > { %v444_v30 = vpop.permute.xlu1 %443  ;;  %v437_v40 = vadd.f32 %v436_v9, %v418_v37  ;;  %v438_v41 = vadd.f32 %v435_v35, %v419_v38 }
  0xb1   : > { %v448_v43 = vsel %vm447_vm5, %v444_v30, %v446_v5  ;;  %v449_v44 = vsel %vm447_vm5, %v446_v5, %v444_v30 }
  0xb2   : > { %v450_v36 = vadd.f32 %v449_v44, %v437_v40  ;;  %v451_v46 = vadd.f32 %v448_v43, %v438_v41 }
  0xb6   : > { %v463_v39 = vpop.permute.xlu0 %462 }
  0xb8   : > { %v465_v42 = vpop.permute.xlu1 %464 }
  0xb9   : > { %v467_v28 = vsel %vm466_vm6, %v463_v39, %v465_v42  ;;  %v468_v45 = vsel %vm466_vm6, %v465_v42, %v463_v39 }
  0xba   : > { %v469_v48 = vadd.f32 %v468_v45, %v450_v36  ;;  %v470_v49 = vadd.f32 %v467_v28, %v451_v46 }
  0xbe   : > { %v478_v50 = vpop.permute.xlu0 %477 }
  0xbf   : > { %v480_v53 = vsel %vm479_vm7, %v476_v47, %v478_v50  ;;  %v481_v54 = vsel %vm479_vm7, %v478_v50, %v476_v47 }
  0xc0   : > { %v482_v55 = vadd.f32 %v481_v54, %v469_v48  ;;  %v483_v56 = vadd.f32 %v480_v53, %v470_v49  ;;  %v499_v1 = vpop.permute.xlu1 %498 }
  0xc2   : > { %v490_v57 = vmul.f32 %v486_v51, %v482_v55  ;;  %v491_v58 = vmul.f32 %v487_v52, %v483_v56 }
  0xc4   : > { %v493_v59 = vpack.c.bf16 %v490_v57, %v490_v57  ;;  %v494_v60 = vpack.c.bf16 %v491_v58, %v491_v58 }
  0xc6   : > { %v507_v61 = vsel %vm505_vm8, %v493_v59, 0  ;;  %v510_v62 = vsel %vm505_vm8, %v494_v60, 0 }
  0xc7   : > { %519 = vmatpush.bf16.msra.mxu0 %v507_v61  ;;  %532 = vmatpush.bf16.msra.mxu1 %v510_v62 }
  0xca   : > { %630 = vmatmul.msk.bf16.vlgmr.msra.gmra.mxu0 %vm501_vm9, %v492_v63  ;;  %631 = vmatmul.msk.bf16.vlgmr.msra.gmra.mxu1 %vm501_vm9, %v492_v63 }
 0x147   : > { %v521_v4 = vpop.f32.mrf.mxu0  ;;  %v534_v6 = vpop.f32.mrf.mxu1 }
 0x148   : > { %v522_v7 = vadd.f32 %v521_v4, %v499_v1  ;;  %v535_v8 = vadd.f32 %v534_v6, %v499_v1 }
 0x14a   : > { %v541_v10 = vadd.f32 %v539_v2, %v522_v7  ;;  %v542_v11 = vadd.f32 %v540_v3, %v535_v8 }
 0x14c   : > { %v543_v12 = vpack.c.bf16 %v542_v11, %v541_v10 }
 0x14e   : > { %544 = vst [vmem:[%s326_s24] sm:$0xff] %v543_v12 }
 0x14f   : > { %v523_v13 = vpop.f32.mrf.mxu0  ;;  %v536_v14 = vpop.f32.mrf.mxu1 }
 0x150 PF: > { %p13_p9 = scmp.ge.s32.totalorder %s759_s25, 4   ;;  %s864_s21 = smov %s692_s22 }
 0x151   : > { %s865_s22 = smov %s768_s28  ;;  %s866_s23 = smov %s759_s25 }
 0x152   :  { %15 = sbr.rel (!%p13_p9) target bundleno = 2 (0x2), region = 120 }

// kernel: _lambda_.17
= control target key start
LH: loop header
LB: loop body
LE: loop exit
PB: predicated region body
PF: predicated region fallthrough
CT: control target
= control target key end

     0   :  { %s641_s21 = smov 113   ;;  %s642_s22 = smov 127   ;;  %vm229_vm0 = vcmask 1039360   ;;  %vm171_vm1 = vcmask 924672   ;;  %vm113_vm2 = vcmask 916480   ;;  %vm55_vm3 = vcmask 908288   ;;  %s881_s1 = inlined_call_operand.vmem [shape: f32[9,512], index: 1, kind: input, shape index: {}]   ;;  %s882_s0 = inlined_call_operand.vmem [shape: bf16[8,768], index: 0, kind: input, shape index: {}]   ;;  %s883_s3 = inlined_call_operand.vmem [shape: f32[4,1], index: 3, kind: input, shape index: {}]   ;;  %s884_s2 = inlined_call_operand.vmem [shape: bf16[4,72], index: 2, kind: input, shape index: {}]   ;;  %s885_s4 = inlined_call_operand.vmem [shape: bf16[4,512], index: 4, kind: output, shape index: {}]  }
   0x1   :  { %v678_v0 = vld [vmem:[%s881_s1 + $0x18] sm:$0xff]  ;;  %v683_v1 = vld [vmem:[%s881_s1 + $0x10] sm:$0xff]  ;;  %v688_v2 = vld [vmem:[%s881_s1 + $0x8] sm:$0xff]  ;;  %s643_s23 = smov 111   ;;  %s644_s24 = smov 112   ;;  %vm277_vm4 = vcmask 1043456  }
   0x2   :  { %v158_v3 = vperm.slane %v678_v0, 2  ;;  %v215_v4 = vperm.slane %v683_v1, 3  ;;  %v156_v5 = vperm.slane %v688_v2, 2  ;;  %v216_v6 = vperm.slane %v678_v0, 3  ;;  %v714_v15 = vld [vmem:[%s881_s1] sm:$0xff]  ;;  %v726_v20 = vld [vmem:[%s882_s0 + $0x8] sm:$0xff] }
   0x3   :  { %v214_v7 = vperm.slane %v688_v2, 3  ;;  %v157_v8 = vperm.slane %v683_v1, 2  ;;  %v42_v9 = vperm.slane %v678_v0, 0  ;;  %v41_v10 = vperm.slane %v683_v1, 0  ;;  %v735_v21 = vld [vmem:[%s882_s0 + $0x10] sm:$0xff]  ;;  %v745_v22 = vld [vmem:[%s882_s0] sm:$0xff] }
   0x4   :  { %169 = vrot.lane.b32.xlu1 %v158_v3, %s641_s21  ;;  %225 = vrot.lane.b32.xlu2 %v215_v4, %s642_s22  ;;  %v40_v11 = vperm.slane %v688_v2, 0  ;;  %v100_v12 = vperm.slane %v678_v0, 1  ;;  %v99_v13 = vperm.slane %v683_v1, 1  ;;  %v98_v14 = vperm.slane %v688_v2, 1  ;;  %s645_s0 = smov 17   ;;  %s646_s7 = smov 1  }
   0x5   :  { %165 = vrot.lane.b32.xlu0 %v156_v5, %s641_s21  ;;  %v213_v16 = vperm.slane %v714_v15, 3  ;;  %v39_v17 = vperm.slane %v714_v15, 0  ;;  %v155_v18 = vperm.slane %v714_v15, 2  ;;  %v97_v19 = vperm.slane %v714_v15, 1  ;;  %s647_s8 = smov 15   ;;  %s648_s9 = smov 16  }
   0x6   :  { %v38_v29 = vunpack.c.l.bf16 %v735_v21  ;;  %v34_v30 = vunpack.c.l.bf16 %v745_v22  ;;  %v36_v36 = vunpack.c.l.bf16 %v726_v20  ;;  %v37_v39 = vunpack.c.h.bf16 %v726_v20 }
   0x7   :  { %v35_v48 = vunpack.c.h.bf16 %v745_v22  ;;  %vm258_vm5 = vcmask 7168   ;;  %vm200_vm6 = vcmask 121856   ;;  %vm84_vm7 = vcmask 138240  }
   0x8   :  { %vm142_vm8 = vcmask 130048   ;;  %vm489_vm9 = vcmask 588800   ;;  %vm569_vm10 = vcmask 1045508   ;;  %vm565_vm11 = vcmask 1041408  }
   0xc   :  { %227 = vrot.lane.b32.xlu2 %v216_v6, %s642_s22  ;;  %223 = vrot.lane.b32.xlu1 %v214_v7, %s642_s22 }
   0xd   :  { %167 = vrot.lane.b32.xlu0 %v157_v8, %s641_s21 }
  0x14   :  { %53 = vrot.lane.b32.xlu2 %v42_v9, %s643_s23  ;;  %51 = vrot.lane.b32.xlu1 %v41_v10, %s643_s23 }
  0x15   :  { %49 = vrot.lane.b32.xlu0 %v40_v11, %s643_s23 }
  0x1c   :  { %111 = vrot.lane.b32.xlu2 %v100_v12, %s644_s24  ;;  %109 = vrot.lane.b32.xlu1 %v99_v13, %s644_s24 }
  0x1d   :  { %107 = vrot.lane.b32.xlu0 %v98_v14, %s644_s24 }
  0x24   :  { %221 = vrot.lane.b32.xlu1 %v213_v16, %s642_s22  ;;  %47 = vrot.lane.b32.xlu2 %v39_v17, %s643_s23 }
  0x25   :  { %163 = vrot.lane.b32.xlu0 %v155_v18, %s641_s21 }
  0x2c   :  { %396 = vrot.lane.b32.xlu1 %v726_v20, %s643_s23  ;;  %398 = vrot.lane.b32.xlu2 %v735_v21, %s643_s23 }
  0x2d   :  { %105 = vrot.lane.b32.xlu0 %v97_v19, %s644_s24 }
  0x34   :  { %334 = vrot.lane.b32.xlu1 %v735_v21, %s641_s21  ;;  %364 = vrot.lane.b32.xlu2 %v726_v20, %s644_s24 }
  0x35   :  { %332 = vrot.lane.b32.xlu0 %v726_v20, %s641_s21 }
  0x3c   :  { %394 = vrot.lane.b32.xlu1 %v745_v22, %s643_s23  ;;  %300 = vrot.lane.b32.xlu2 %v726_v20, %s642_s22 }
  0x3d   :  { %366 = vrot.lane.b32.xlu0 %v735_v21, %s644_s24 }
  0x44   :  { %330 = vrot.lane.b32.xlu1 %v745_v22, %s641_s21  ;;  %362 = vrot.lane.b32.xlu2 %v745_v22, %s644_s24 }
  0x45   :  { %302 = vrot.lane.b32.xlu0 %v735_v21, %s642_s22 }
  0x4d   :  { %298 = vrot.lane.b32.xlu0 %v745_v22, %s642_s22 }
  0x5e   :  { %v226_v23 = vpop.permute.xlu2 %225 }
  0x66   :  { %v228_v24 = vpop.permute.xlu2 %227 }
  0x67   :  { %v232_v40 = vsel %vm229_vm0, %v226_v23, %v228_v24  ;;  %v242_v50 = vmul.f32 %v228_v24, %v38_v29 }
  0x68   :  { %v241_v43 = vmul.f32 %v232_v40, %v37_v39  ;;  %v638_v40 = vld [vmem:[%s881_s1 + $0x28] ss:$0 sm:$0xff] }
  0x6e   :  { %v54_v25 = vpop.permute.xlu2 %53 }
  0x6f   :  { %v68_v31 = vmul.f32 %v54_v25, %v38_v29 }
  0x76   :  { %v170_v26 = vpop.permute.xlu1 %169  ;;  %v112_v27 = vpop.permute.xlu2 %111 }
  0x77   :  { %v166_v28 = vpop.permute.xlu0 %165  ;;  %v184_v53 = vmul.f32 %v170_v26, %v38_v29  ;;  %v126_v7 = vmul.f32 %v112_v27, %v38_v29 }
  0x7e   :  { %v761_v32 = vpop.permute.xlu1 %223  ;;  %v763_v33 = vpop.permute.xlu2 %47 }
  0x7f   :  { %v168_v34 = vpop.permute.xlu0 %167  ;;  %v64_v35 = vmul.f32 %v763_v33, %v34_v30  ;;  %v231_v38 = vsel %vm229_vm0, %v761_v32, %v226_v23 }
  0x80   :  { %v240_v41 = vmul.f32 %v231_v38, %v36_v36  ;;  %v173_v58 = vsel %vm171_vm1, %v166_v28, %v168_v34  ;;  %v174_v59 = vsel %vm171_vm1, %v168_v34, %v170_v26 }
  0x81   :  { %v605_v37 = vpack.i.bf16 %v64_v35, %v68_v31  ;;  %v182_v61 = vmul.f32 %v173_v58, %v36_v36  ;;  %v183_v62 = vmul.f32 %v174_v59, %v37_v39 }
  0x82   :  { %v615_v45 = vpack.i.bf16 %v241_v43, %v240_v41 }
  0x83   :  { %606 = vrot.lane.b32.xlu0 %v605_v37, %s645_s0  ;;  %v610_v6 = vpack.i.bf16 %v183_v62, %v182_v61 }
  0x86   :  { %v52_v42 = vpop.permute.xlu1 %51  ;;  %v399_v19 = vpop.permute.xlu2 %398 }
  0x87   :  { %v50_v44 = vpop.permute.xlu0 %49  ;;  %v58_v10 = vsel %vm55_vm3, %v52_v42, %v54_v25 }
  0x88   :  { %v57_v11 = vsel %vm55_vm3, %v50_v44, %v52_v42  ;;  %v67_v16 = vmul.f32 %v58_v10, %v37_v39  ;;  %v56_v25 = vsel %vm55_vm3, %v763_v33, %v50_v44 }
  0x89   :  { %v66_v17 = vmul.f32 %v57_v11, %v36_v36  ;;  %v639_v11 = vld [vmem:[%s881_s1 + $0x30] ss:$0 sm:$0xff] }
  0x8b   :  { %616 = vrot.lane.b32.xlu0 %v615_v45, %s646_s7  ;;  %v620_v23 = vpack.i.bf16 %v67_v16, %v66_v17 }
  0x8e   :  { %v110_v46 = vpop.permute.xlu1 %109  ;;  %v365_v29 = vpop.permute.xlu2 %364 }
  0x8f   :  { %v108_v47 = vpop.permute.xlu0 %107  ;;  %v116_v8 = vsel %vm113_vm2, %v110_v46, %v112_v27 }
  0x90   :  { %v115_v9 = vsel %vm113_vm2, %v108_v47, %v110_v46  ;;  %v125_v13 = vmul.f32 %v116_v8, %v37_v39  ;;  %v637_v39 = vld [vmem:[%s881_s1 + $0x20] ss:$0 sm:$0xff] }
  0x91   :  { %v124_v14 = vmul.f32 %v115_v9, %v36_v36 }
  0x93   :  { %v625_v18 = vpack.i.bf16 %v125_v13, %v124_v14  ;;  %v640_v13 = vld [vmem:[%s881_s1 + $0x38] ss:$0 sm:$0xff] }
  0x96   :  { %v222_v49 = vpop.permute.xlu1 %221  ;;  %v790_v34 = vpop.permute.xlu2 %300 }
  0x97   :  { %v238_v51 = vmul.f32 %v222_v49, %v34_v30  ;;  %v164_v52 = vpop.permute.xlu0 %163  ;;  %v230_v24 = vsel %vm229_vm0, %v222_v49, %v761_v32 }
  0x98   :  { %v172_v54 = vsel %vm171_vm1, %v164_v52, %v166_v28  ;;  %v180_v55 = vmul.f32 %v164_v52, %v34_v30  ;;  %v239_v26 = vmul.f32 %v230_v24, %v35_v48  ;;  %v65_v28 = vmul.f32 %v56_v25, %v35_v48 }
  0x99   :  { %v600_v56 = vpack.i.bf16 %v238_v51, %v242_v50  ;;  %v181_v57 = vmul.f32 %v172_v54, %v35_v48  ;;  %v350_v25 = vperm.slane %v714_v15, 6 }
  0x9a   :  { %v595_v60 = vpack.i.bf16 %v180_v55, %v184_v53 }
  0x9b   :  { %192 = vrot.lane.b32.xlu0 %v181_v57, %s647_s8  ;;  %601 = vrot.lane.b32.xlu1 %v600_v56, %s646_s7 }
  0x9c   :  { %596 = vrot.lane.b32.xlu2 %v595_v60, %s647_s8 }
  0x9e   :  { %v397_v27 = vpop.permute.xlu1 %396  ;;  %v363_v44 = vpop.permute.xlu2 %362 }
  0x9f   :  { %v106_v63 = vpop.permute.xlu0 %105  ;;  %v401_v35 = vrot.slane %v397_v27, 4  ;;  %v368_v53 = vrot.slane %v363_v44, 4 }
  0xa0   :  { %v114_v3 = vsel %vm113_vm2, %v106_v63, %v108_v47  ;;  %v122_v4 = vmul.f32 %v106_v63, %v34_v30  ;;  %v402_v47 = vrot.slane %v399_v19, 4 }
  0xa1   :  { %v123_v5 = vmul.f32 %v114_v3, %v35_v48  ;;  %v369_v48 = vrot.slane %v365_v29, 4 }
  0xa2   :  { %v406_v58 = vsel %vm277_vm4, %v401_v35, %v402_v47 }
  0xa3   :  { %v630_v12 = vpack.i.bf16 %v123_v5, %v122_v4  ;;  %611 = vrot.lane.b32.xlu1 %v610_v6, %s647_s8  ;;  %v371_v63 = vsel %vm277_vm4, %v368_v53, %v369_v48  ;;  %v305_v5 = vrot.slane %v790_v34, 4  ;;  %v407_v6 = vsel %vm55_vm3, %v406_v58, %v399_v19 }
  0xa4   :  { %140 = vrot.lane.b32.xlu2 %v126_v7, %s648_s9  ;;  %v412_v10 = vunpack.c.l.bf16 %v407_v6  ;;  %v276_v58 = vrot.slane %v735_v21, 4 }
  0xa5   :  { %631 = vrot.lane.b32.xlu0 %v630_v12, %s648_s9  ;;  %v413_v12 = vunpack.c.h.bf16 %v407_v6  ;;  %v320_v6 = vperm.slane %v683_v1, 5 }
  0xa6   :  { %v335_v30 = vpop.permute.xlu1 %334  ;;  %v420_v19 = vmul.f32 %v639_v11, %v412_v10 }
  0xa7   :  { %v333_v31 = vpop.permute.xlu0 %332  ;;  %v338_v32 = vrot.slane %v335_v30, 4 }
  0xa8   :  { %v337_v43 = vrot.slane %v333_v31, 4 }
  0xaa   :  { %v342_v49 = vsel %vm277_vm4, %v337_v43, %v338_v32 }
  0xab   :  { %626 = vrot.lane.b32.xlu1 %v625_v18, %s648_s9  ;;  %v343_v59 = vsel %vm171_vm1, %v342_v49, %v335_v30  ;;  %v373_v18 = vsel %vm113_vm2, %v371_v63, %v365_v29  ;;  %v351_v30 = vperm.slane %v688_v2, 6  ;;  %v352_v29 = vperm.slane %v683_v1, 6 }
  0xac   :  { %621 = vrot.lane.b32.xlu2 %v620_v23, %s645_s0  ;;  %v348_v4 = vunpack.c.l.bf16 %v343_v59  ;;  %v349_v7 = vunpack.c.h.bf16 %v343_v59  ;;  %v421_v23 = vmul.f32 %v640_v13, %v413_v12  ;;  %v379_v32 = vunpack.c.h.bf16 %v373_v18 }
  0xad   :  { %v274_v63 = vrot.slane %v745_v22, 4  ;;  %v286_v22 = vperm.slane %v714_v15, 4 }
  0xae   :  { %v395_v36 = vpop.permute.xlu1 %394 }
  0xaf   :  { %v400_v37 = vrot.slane %v395_v36, 4  ;;  %v367_v38 = vpop.permute.xlu0 %366  ;;  %v482_v36 = vpack.c.bf16 %v421_v23, %v421_v23 }
  0xb0   :  { %v370_v41 = vrot.slane %v367_v38, 4 }
  0xb1   :  { %v403_v33 = vsel %vm277_vm4, %v400_v37, %v401_v35  ;;  %v481_v35 = vpack.c.bf16 %v420_v19, %v420_v19 }
  0xb2   :  { %v405_v42 = vsel %vm55_vm3, %v403_v33, %v397_v27  ;;  %v374_v52 = vsel %vm277_vm4, %v369_v48, %v370_v41  ;;  %v382_v27 = vperm.slane %v714_v15, 7  ;;  %v384_v41 = vperm.slane %v683_v1, 7 }
  0xb3   :  { %250 = vrot.lane.b32.xlu1 %v239_v26, %s646_s7  ;;  %v410_v45 = vunpack.c.l.bf16 %v405_v42  ;;  %v411_v46 = vunpack.c.h.bf16 %v405_v42  ;;  %v375_v60 = vsel %vm113_vm2, %v374_v52, %v367_v38  ;;  %v378_v26 = vunpack.c.l.bf16 %v373_v18 }
  0xb4   :  { %76 = vrot.lane.b32.xlu2 %v65_v28, %s645_s0  ;;  %v380_v8 = vunpack.c.l.bf16 %v375_v60  ;;  %v381_v14 = vunpack.c.h.bf16 %v375_v60  ;;  %v353_v42 = vperm.slane %v678_v0, 6 }
  0xb5   :  { %v418_v50 = vmul.f32 %v637_v39, %v410_v45  ;;  %v419_v51 = vmul.f32 %v638_v40, %v411_v46  ;;  %v386_v38 = vmul.f32 %v382_v27, %v378_v26  ;;  %v501_v39 = vsel %vm277_vm4, %v481_v35, 0 }
  0xb6   :  { %v331_v54 = vpop.permute.xlu1 %330  ;;  %v504_v40 = vsel %vm277_vm4, %v482_v36, 0  ;;  %535 = vmatpush.bf16.msra.mxu2 %v501_v39  ;;  %v356_v45 = vmul.f32 %v352_v29, %v348_v4  ;;  %v385_v46 = vperm.slane %v678_v0, 7  ;;  %v388_v47 = vmul.f32 %v384_v41, %v380_v8 }
  0xb7   :  { %v336_v55 = vrot.slane %v331_v54, 4  ;;  %v479_v56 = vpack.c.bf16 %v418_v50, %v418_v50  ;;  %v480_v57 = vpack.c.bf16 %v419_v51, %v419_v51  ;;  %v303_v9 = vpop.permute.xlu0 %302  ;;  %548 = vmatpush.bf16.msra.mxu3 %v504_v40  ;;  %v357_v48 = vmul.f32 %v353_v42, %v349_v7 }
  0xb8   :  { %v306_v16 = vrot.slane %v303_v9, 4  ;;  %v389_v50 = vmul.f32 %v385_v46, %v381_v14  ;;  %v477_v52 = vpack.c.bf16 %v388_v47, %v356_v45  ;;  %v288_v4 = vperm.slane %v683_v1, 4 }
  0xb9   :  { %v495_v61 = vsel %vm277_vm4, %v479_v56, 0  ;;  %v498_v62 = vsel %vm277_vm4, %v480_v57, 0  ;;  %v339_v3 = vsel %vm277_vm4, %v336_v55, %v337_v43  ;;  %v275_v57 = vrot.slane %v726_v20, 4 }
  0xba   :  { %509 = vmatpush.bf16.msra.mxu0 %v495_v61  ;;  %522 = vmatpush.bf16.msra.mxu1 %v498_v62  ;;  %v341_v17 = vsel %vm171_vm1, %v339_v3, %v333_v31  ;;  %v383_v31 = vperm.slane %v688_v2, 7  ;;  %v310_v51 = vsel %vm277_vm4, %v305_v5, %v306_v16  ;;  %v478_v54 = vpack.c.bf16 %v389_v50, %v357_v48 }
  0xbb   :  { %v346_v24 = vunpack.c.l.bf16 %v341_v17  ;;  %v347_v28 = vunpack.c.h.bf16 %v341_v17  ;;  %536 = vmatpush.bf16.msra.mxu2 %v477_v52  ;;  %v311_v56 = vsel %vm229_vm0, %v310_v51, %v303_v9  ;;  %v279_v62 = vsel %vm277_vm4, %v275_v57, %v276_v58 }
  0xbc   :  { %v387_v44 = vmul.f32 %v383_v31, %v379_v32  ;;  %549 = vmatpush.bf16.msra.mxu3 %v478_v54  ;;  %v316_v59 = vunpack.c.l.bf16 %v311_v56  ;;  %v317_v61 = vunpack.c.h.bf16 %v311_v56  ;;  %v284_v3 = vunpack.c.l.bf16 %v279_v62 }
  0xbd   :  { %v354_v37 = vmul.f32 %v350_v25, %v346_v24  ;;  %v355_v33 = vmul.f32 %v351_v30, %v347_v28  ;;  %v285_v7 = vunpack.c.h.bf16 %v279_v62  ;;  %v289_v8 = vperm.slane %v678_v0, 4 }
  0xbe   :  { %v321_v20 = vperm.slane %v678_v0, 5  ;;  %v278_v21 = vsel %vm277_vm4, %v274_v63, %v275_v57  ;;  %v292_v9 = vmul.f32 %v288_v4, %v284_v3  ;;  %v324_v10 = vmul.f32 %v320_v6, %v316_v59  ;;  %v426_v3 = vld [vmem:[%s884_s2] sm:$0x3] }
  0xbf   :  { %v475_v43 = vpack.c.bf16 %v386_v38, %v354_v37  ;;  %v476_v49 = vpack.c.bf16 %v387_v44, %v355_v33  ;;  %v299_v53 = vpop.permute.xlu0 %298  ;;  %v282_v11 = vunpack.c.l.bf16 %v278_v21  ;;  %v293_v12 = vmul.f32 %v289_v8, %v285_v7  ;;  %v483_v37 = vld [vmem:[%s883_s3] sm:$0xf] }
  0xc0   :  { %v304_v55 = vrot.slane %v299_v53, 4  ;;  %v325_v13 = vmul.f32 %v321_v20, %v317_v61  ;;  %v318_v1 = vperm.slane %v714_v15, 5  ;;  %v473_v16 = vpack.c.bf16 %v324_v10, %v292_v9 }
  0xc1   :  { %510 = vmatpush.bf16.msra.mxu0 %v475_v43  ;;  %523 = vmatpush.bf16.msra.mxu1 %v476_v49  ;;  %v290_v17 = vmul.f32 %v286_v22, %v282_v11  ;;  %v283_v18 = vunpack.c.h.bf16 %v278_v21  ;;  %v287_v0 = vperm.slane %v688_v2, 4  ;;  %v649_v38 = vmov 0  }
  0xc2   :  { %v307_v60 = vsel %vm277_vm4, %v304_v55, %v305_v5  ;;  %v474_v19 = vpack.c.bf16 %v325_v13, %v293_v12  ;;  %537 = vmatpush.bf16.msra.mxu2 %v473_v16  ;;  %635 = vset.pattern.permute.xlu1 %v649_v38 }
  0xc3   :  { %v309_v5 = vsel %vm229_vm0, %v307_v60, %v790_v34  ;;  %v319_v34 = vperm.slane %v688_v2, 5  ;;  %v291_v25 = vmul.f32 %v287_v0, %v283_v18  ;;  %636 = vset.pattern.permute.xlu0 %v649_v38  ;;  %486 = vperm.xlu1 %635, %v483_v37  }
  0xc4   :  { %v314_v14 = vunpack.c.l.bf16 %v309_v5  ;;  %v315_v24 = vunpack.c.h.bf16 %v309_v5  ;;  %550 = vmatpush.bf16.msra.mxu3 %v474_v19 }
  0xc6   :  { %v322_v23 = vmul.f32 %v318_v1, %v314_v14  ;;  %v323_v27 = vmul.f32 %v319_v34, %v315_v24 }
  0xc8   :  { %v471_v26 = vpack.c.bf16 %v322_v23, %v290_v17  ;;  %v472_v28 = vpack.c.bf16 %v323_v27, %v291_v25 }
  0xca   :  { %511 = vmatpush.bf16.msra.mxu0 %v471_v26  ;;  %524 = vmatpush.bf16.msra.mxu1 %v472_v28 }
  0xf5   :  { %v847_v15 = vpop.permute.xlu0 %606 }
  0xf6   :  { %v597_v30 = vpop.permute.xlu2 %596  ;;  %v608_v53 = vunpack.i.l.bf16 %v847_v15  ;;  %v609_v12 = vunpack.i.h.bf16 %v847_v15 }
  0xf7   :  { %v598_v39 = vunpack.i.l.bf16 %v597_v30  ;;  %v599_v63 = vunpack.i.h.bf16 %v597_v30 }
  0xfd   :  { %v617_v32 = vpop.permute.xlu0 %616 }
  0xfe   :  { %v141_v36 = vpop.permute.xlu2 %140  ;;  %v619_v2 = vunpack.i.h.bf16 %v617_v32  ;;  %v618_v33 = vunpack.i.l.bf16 %v617_v32 }
 0x100   :  { %v261_v43 = vsel %vm258_vm5, %v618_v33, %v619_v2 }
 0x106   :  { %v622_v46 = vpop.permute.xlu2 %621 }
 0x107   :  { %v624_v50 = vunpack.i.h.bf16 %v622_v46  ;;  %v623_v51 = vunpack.i.l.bf16 %v622_v46 }
 0x109   :  { %v87_v56 = vsel %vm84_vm7, %v623_v51, %v624_v50  ;;  %v88_v58 = vsel %vm84_vm7, %v624_v50, %v608_v53 }
 0x10d   :  { %v602_v35 = vpop.permute.xlu1 %601  ;;  %v193_v47 = vpop.permute.xlu0 %192 }
 0x10e   :  { %v603_v31 = vunpack.i.l.bf16 %v602_v35  ;;  %v604_v4 = vunpack.i.h.bf16 %v602_v35  ;;  %v201_v8 = vsel %vm200_vm6, %v599_v63, %v193_v47  ;;  %v77_v10 = vpop.permute.xlu2 %76 }
 0x10f   :  { %v85_v1 = vsel %vm84_vm7, %v609_v12, %v77_v10  ;;  %v86_v16 = vsel %vm84_vm7, %v77_v10, %v623_v51 }
 0x110   :  { %v262_v45 = vsel %vm258_vm5, %v619_v2, %v603_v31 }
 0x115   :  { %v612_v29 = vpop.permute.xlu1 %611 }
 0x116   :  { %v614_v40 = vunpack.i.h.bf16 %v612_v29  ;;  %v613_v41 = vunpack.i.l.bf16 %v612_v29 }
 0x117   :  { %v632_v60 = vpop.permute.xlu0 %631 }
 0x118   :  { %v203_v42 = vsel %vm200_vm6, %v613_v41, %v614_v40  ;;  %v204_v44 = vsel %vm200_vm6, %v614_v40, %v598_v39  ;;  %v634_v6 = vunpack.i.h.bf16 %v632_v60  ;;  %v633_v7 = vunpack.i.l.bf16 %v632_v60 }
 0x119   :  { %v469_v48 = vpack.c.bf16 %v261_v43, %v203_v42  ;;  %v470_v49 = vpack.c.bf16 %v262_v45, %v204_v44  ;;  %v202_v9 = vsel %vm200_vm6, %v193_v47, %v613_v41 }
 0x11a   :  { %v143_v13 = vsel %vm142_vm8, %v633_v7, %v634_v6 }
 0x11b   :  { %538 = vmatpush.bf16.msra.mxu2 %v469_v48  ;;  %551 = vmatpush.bf16.msra.mxu3 %v470_v49  ;;  %v463_v17 = vpack.c.bf16 %v143_v13, %v85_v1 }
 0x11d   :  { %v627_v52 = vpop.permute.xlu1 %626 }
 0x11e   :  { %v629_v54 = vunpack.i.h.bf16 %v627_v52  ;;  %v628_v55 = vunpack.i.l.bf16 %v627_v52 }
 0x120   :  { %v145_v57 = vsel %vm142_vm8, %v628_v55, %v629_v54  ;;  %v146_v59 = vsel %vm142_vm8, %v629_v54, %v141_v36  ;;  %v144_v14 = vsel %vm142_vm8, %v634_v6, %v628_v55 }
 0x121   :  { %v465_v61 = vpack.c.bf16 %v145_v57, %v87_v56  ;;  %v466_v62 = vpack.c.bf16 %v146_v59, %v88_v58  ;;  %v464_v18 = vpack.c.bf16 %v144_v14, %v86_v16 }
 0x123   :  { %539 = vmatpush.bf16.msra.mxu2 %v465_v61  ;;  %552 = vmatpush.bf16.msra.mxu3 %v466_v62 }
 0x125   :  { %v251_v20 = vpop.permute.xlu1 %250 }
 0x126   :  { %v259_v21 = vsel %vm258_vm5, %v604_v4, %v251_v20  ;;  %v260_v5 = vsel %vm258_vm5, %v251_v20, %v618_v33  ;;  %584 = vmatmul.msk.bf16.vlgmr.msra.gmra.mxu2 %vm489_vm9, %v426_v3  ;;  %585 = vmatmul.msk.bf16.vlgmr.msra.gmra.mxu3 %vm489_vm9, %v426_v3 }
 0x127   :  { %v467_v11 = vpack.c.bf16 %v259_v21, %v201_v8  ;;  %v468_v22 = vpack.c.bf16 %v260_v5, %v202_v9 }
 0x129   :  { %512 = vmatpush.bf16.msra.mxu0 %v467_v11  ;;  %525 = vmatpush.bf16.msra.mxu1 %v468_v22 }
 0x12d   :  { %513 = vmatpush.bf16.msra.mxu0 %v463_v17  ;;  %526 = vmatpush.bf16.msra.mxu1 %v464_v18 }
 0x130   :  { %582 = vmatmul.msk.bf16.vlgmr.msra.gmra.mxu0 %vm489_vm9, %v426_v3  ;;  %583 = vmatmul.msk.bf16.vlgmr.msra.gmra.mxu1 %vm489_vm9, %v426_v3 }
 0x135   :  { %v487_v0 = vpop.permute.xlu1 %486 }
 0x1a9   :  { %v541_v19 = vpop.f32.mrf.mxu2  ;;  %v554_v23 = vpop.f32.mrf.mxu3 }
 0x1aa   :  { %v542_v24 = vadd.f32 %v541_v19, %v487_v0  ;;  %v555_v34 = vadd.f32 %v554_v23, %v487_v0 }
 0x1ac   :  { %v559_v25 = vpack.c.bf16 %v555_v34, %v542_v24 }
 0x1ad   :  { %v515_v26 = vpop.f32.mrf.mxu0  ;;  %v528_v27 = vpop.f32.mrf.mxu1 }
 0x1ae   :  { %v563_v28 = vrot.slane %v559_v25, 4  ;;  %v564_v30 = vrot.slane %v559_v25, 6  ;;  %v516_v15 = vadd.f32 %v515_v26, %v487_v0  ;;  %v529_v35 = vadd.f32 %v528_v27, %v487_v0 }
 0x1b0   :  { %v558_v36 = vpack.c.bf16 %v529_v35, %v516_v15  ;;  %v572_v2 = vsel %vm569_vm10, %v563_v28, %v564_v30 }
 0x1b1   :  { %v543_v37 = vpop.f32.mrf.mxu2  ;;  %v556_v32 = vpop.f32.mrf.mxu3 }
 0x1b2   :  { %v562_v38 = vrot.slane %v558_v36, 2 }
 0x1b4   :  { %v568_v33 = vsel %vm565_vm11, %v558_v36, %v562_v38 }
 0x1b5   :  { %v573_v31 = vsel %vm277_vm4, %v568_v33, %v572_v2  ;;  %v517_v29 = vpop.f32.mrf.mxu0  ;;  %v530_v39 = vpop.f32.mrf.mxu1 }
 0x1b6   :  { %575 = vst [vmem:[%s885_s4] sm:$0xff] %v573_v31 }

// kernel: _lambda_.12
= control target key start
LH: loop header
LB: loop body
LE: loop exit
PB: predicated region body
PF: predicated region fallthrough
CT: control target
= control target key end

     0   :  { %s2336_s27 = smov 0   ;;  %s2338_s28 = smov 0   ;;  %s3424_s0 = inlined_call_operand.vmem [shape: bf16[8,512], index: 0, kind: input, shape index: {}]   ;;  %s3425_s1 = inlined_call_operand.vmem [shape: f32[9,256], index: 1, kind: input, shape index: {}]   ;;  %s3426_s2 = inlined_call_operand.vmem [shape: bf16[4,8], index: 2, kind: input, shape index: {}]   ;;  %s3427_s3 = inlined_call_operand.vmem [shape: f32[4,1], index: 3, kind: input, shape index: {}]   ;;  %s3428_s4 = inlined_call_operand.vmem [shape: bf16[4,8], index: 4, kind: input, shape index: {}]   ;;  %s3429_s5 = inlined_call_operand.vmem [shape: f32[4,1], index: 5, kind: input, shape index: {}]   ;;  %s3430_s6 = inlined_call_operand.vmem [shape: bf16[4,8], index: 6, kind: input, shape index: {}]   ;;  %s3431_s7 = inlined_call_operand.vmem [shape: f32[4,1], index: 7, kind: input, shape index: {}]   ;;  %s3432_s8 = inlined_call_operand.vmem [shape: bf16[36,512], index: 8, kind: output, shape index: {}]  }
   0x1   :  { %s2340_s29 = smov 0   ;;  %s2342_s30 = smov 0  }
   0x2   :  { %s2344_s9 = smov 0  }
   0x3 LB: > { %s1988_s10 = sadd.s32 4294967295, %s2280_s9   ;;  %s30_s11 = sadd.s32 1, %s2276_s30  ;;  %s2280_s9 = sphi %s2344_s9, %s18_s9   ;;  %s2276_s30 = sphi %s2342_s30, %s3502_s30   ;;  %s2272_s29 = sphi %s2340_s29, %s3501_s29   ;;  %s2268_s28 = sphi %s2338_s28, %s3500_s28   ;;  %s2264_s27 = sphi %s2336_s27, %s3499_s27  }
   0x4   : > { %p32_p0 = scmp.ge.s32.totalorder %s30_s11, 2  ;;  %s212_s12 = sadd.s32 1, %s2268_s28 }
   0x5   : > { %p222_p1 = scmp.ne.s32.totalorder %s2268_s28, %s2264_s27  ;;  %p223_p2 = scmp.eq.s32.totalorder %s1988_s10, 1 }
   0x6   : > { %s3504_s11 = smov (%p32_p0, %s30_s11), 0  ;;  %p1992_p4 = scmp.ge.s32.totalorder %s2280_s9, 1 }
   0x7   : > { %p2368_p3 = por %p223_p2, %p222_p1  ;;  %s209_s14 = ssub.s32 %s2276_s30, %s3504_s11 }
   0x8   : > { %p277_p5 = scmp.lt.s32.totalorder %s2280_s9, 3  ;;  %p210_p6 = scmp.eq.s32.totalorder %s209_s14, 0 }
   0xa   : > { %p278_p7 = pnand %p1992_p4, %p277_p5 }
   0xb   : > { %s2377_s15 = scalar_select %p210_p6, %s2268_s28, %s212_s12  }
   0xc   : > { %281 = sbr.rel (%p278_p7) target bundleno = 1255 (0x4e7), region = 52 }
  0x11   : > { %s1993_s16 = sshll.u32 %s2272_s29, 1  ;;  %v2282_v0 = vmov 0   ;;  %v374_v1 = vld [vmem:[%s3429_s5] sm:$0xf]  ;;  %vm340_vm0 = vcmask 1043456   ;;  %vm336_vm1 = vcmask 64512   ;;  %v453_v32 = vlaneseq }
  0x12   : > { %p311_p8 = scmp.lt.s32.totalorder %s1993_s16, 3  ;;  %2094 = vset.pattern.permute.xlu0 %v2282_v0  ;;  %2095 = vset.pattern.permute.xlu2 %v2282_v0  ;;  %v373_v9 = vld [vmem:[%s3428_s4] sm:$0x3]  ;;  %v2406_v12 = vld [vmem:[%s3425_s1 + $0x8] sm:$0xff]  ;;  %s2283_s17 = smov 16  }
  0x13   : > { %377 = vperm.xlu0 %2094, %v374_v1   ;;  %v324_v10 = vld [vmem:[%s3426_s2] sm:$0x3]  ;;  %v2412_v15 = vperm.slane %v2406_v12, 4  ;;  %s2284_s18 = smov 17   ;;  %s2286_s20 = smov 1   ;;  %v2443_v36 = vand.u32 127, %v453_v32 }
  0x14   : > { %s3506_s16 = smov (!%p311_p8, %s1993_s16), 3  ;;  %v2401_v11 = vld [vmem:[%s3425_s1] sm:$0xff]  ;;  %s2287_s21 = smov 127   ;;  %v2455_v42 = vperm.slane %v2406_v12, 0  ;;  %v2470_v57 = vperm.slane %v2406_v12, 1 }
  0x15   : > { %s1994_s19 = sshll.u32 %s3506_s16, 2  ;;  %v2409_v14 = vperm.slane %v2401_v11, 4  ;;  %s2289_s23 = smov 112   ;;  %v325_v24 = vld [vmem:[%s3427_s3] sm:$0xf]  ;;  %vm455_vm2 = vcmp.lt.s32.totalorder %v2443_v36, 17 }
  0x16   : > { %s314_s22 = scalar_lea.vmem %s3424_s0, %s1994_s19  ;;  %s2285_s19 = smov 15   ;;  %v409_v38 = vld [vmem:[%s3430_s6] sm:$0x3]  ;;  %v2452_v41 = vperm.slane %v2401_v11, 0  ;;  %vm506_vm3 = vcmp.lt.s32.totalorder %v2443_v36, 16  ;;  %v2467_v56 = vperm.slane %v2401_v11, 1 }
  0x17   : > { %v323_v2 = vld [vmem:[%s314_s22] sm:$0xff]  ;;  %s2288_s22 = smov 113   ;;  %s2290_s24 = smov 111   ;;  %vm575_vm4 = vcmp.lt.s32.totalorder %v2443_v36, 15  ;;  %vm626_vm5 = vcmp.lt.s32.totalorder %v2443_v36, 1  ;;  %vm727_vm6 = vcmp.lt.s32.totalorder %v2443_v36, 127 }
  0x18   : > { %v332_v3 = vunpack.c.l.b16 %v323_v2  ;;  %v333_v4 = vunpack.c.h.b16 %v323_v2  ;;  %vm796_vm7 = vcmp.lt.s32.totalorder %v2443_v36, 113  ;;  %vm847_vm8 = vcmp.lt.s32.totalorder %v2443_v36, 112 }
  0x19   : > { %vm916_vm9 = vcmp.lt.s32.totalorder %v2443_v36, 111 }
  0x1a   : > { %v334_v5 = vpack.c.b16 %v332_v3, %v332_v3  ;;  %v335_v6 = vpack.c.b16 %v333_v4, %v333_v4  ;;  %v2486_v4 = vperm.slane %v2401_v11, 2 }
  0x1c   : > { %v342_v7 = vsel %vm340_vm0, %v334_v5, 0  ;;  %v345_v8 = vsel %vm340_vm0, %v335_v6, 0  ;;  %v2489_v5 = vperm.slane %v2406_v12, 2 }
  0x1d   : > { %390 = vmatpush.bf16.msra.mxu2 %v342_v7  ;;  %403 = vmatpush.bf16.msra.mxu3 %v345_v8 }
  0x1e   : > { %354 = vmatpush.bf16.msra.mxu0 %v342_v7  ;;  %367 = vmatpush.bf16.msra.mxu1 %v345_v8 }
  0x20   : > { %1997 = vmatmul.msk.bf16.vlgmr.msra.gmra.mxu2 %vm336_vm1, %v373_v9  ;;  %1998 = vmatmul.msk.bf16.vlgmr.msra.gmra.mxu3 %vm336_vm1, %v373_v9 }
  0x21   : > { %1995 = vmatmul.msk.bf16.vlgmr.msra.gmra.mxu0 %vm336_vm1, %v324_v10  ;;  %1996 = vmatmul.msk.bf16.vlgmr.msra.gmra.mxu1 %vm336_vm1, %v324_v10 }
  0x22   : > { %426 = vmatpush.bf16.msrb.mxu0 %v342_v7  ;;  %439 = vmatpush.bf16.msrb.mxu1 %v345_v8 }
  0x31   : > { %2000 = vmatmul.msk.bf16.vlgmr.msrb.gmra.mxu1 %vm336_vm1, %v409_v38  ;;  %1999 = vmatmul.msk.bf16.vlgmr.msrb.gmra.mxu0 %vm336_vm1, %v409_v38 }
  0x85   : > { %v378_v13 = vpop.permute.xlu0 %377 }
  0x9e   : > { %v2435_v26 = vpop.f32.mrf.mxu1  ;;  %v2437_v29 = vpop.f32.mrf.mxu0 }
  0xa3   : > { %v392_v16 = vpop.f32.mrf.mxu2  ;;  %v405_v17 = vpop.f32.mrf.mxu3 }
  0xa4   : > { %v393_v18 = vadd.f32 %v392_v16, %v378_v13  ;;  %v406_v19 = vadd.f32 %v405_v17, %v378_v13 }
  0xa6   : > { %515 = vrot.lane.b32.xlu2 %v406_v19, %s2283_s17  ;;  %464 = vrot.lane.b32.xlu1 %v406_v19, %s2284_s18  ;;  %v696_v20 = vmul.f32 %v2412_v15, %v406_v19  ;;  %v695_v21 = vmul.f32 %v2409_v14, %v393_v18  ;;  %v371_v31 = vpop.f32.mrf.mxu1  ;;  %v358_v40 = vpop.f32.mrf.mxu0 }
  0xa7   : > { %462 = vrot.lane.b32.xlu0 %v393_v18, %s2284_s18 }
  0xa8   : > { %702 = vst [vmem:[#allocation3 + $0x8] sm:$0xf] %v696_v20  ;;  %v706_v28 = vmul.f32 %v696_v20, %v696_v20  ;;  %v705_v30 = vmul.f32 %v695_v21, %v695_v21 }
  0xa9   : > { %701 = vst [vmem:[#allocation3 + $0x38] sm:$0xf] %v695_v21 }
  0xaa   : > { %v714_v34 = vsel %vm340_vm0, %v706_v28, 0.0  ;;  %v707_v35 = vsel %vm340_vm0, %v705_v30, 0.0  ;;  %v2503_v30 = vperm.slane %v2401_v11, 3 }
  0xab   : > { %v394_v22 = vpop.f32.mrf.mxu2  ;;  %v407_v23 = vpop.f32.mrf.mxu3  ;;  %v715_v37 = vrot.slane %v714_v34, 4  ;;  %v708_v39 = vrot.slane %v707_v35, 4 }
  0xad   : > { %v716_v43 = vadd.f32 %v715_v37, %v714_v34  ;;  %v709_v46 = vadd.f32 %v708_v39, %v707_v35 }
  0xae   : > { %582 = vrot.lane.b32.xlu2 %v393_v18, %s2285_s19  ;;  %513 = vrot.lane.b32.xlu1 %v393_v18, %s2283_s17 }
  0xaf   : > { %584 = vrot.lane.b32.xlu0 %v406_v19, %s2285_s19  ;;  %v717_v52 = vrot.slane %v716_v43, 2  ;;  %v710_v53 = vrot.slane %v709_v46, 2 }
  0xb1   : > { %v2474_v60 = vadd.f32 %v717_v52, %v716_v43  ;;  %v2479_v1 = vadd.f32 %v710_v53, %v709_v46  ;;  %v2512_v43 = vperm.slane %v2401_v11, 5 }
  0xb3   : > { %v719_v17 = vrot.slane %v2474_v60, 1  ;;  %v712_v20 = vrot.slane %v2479_v1, 1 }
  0xb6   : > { %635 = vrot.lane.b32.xlu2 %v406_v19, %s2286_s20  ;;  %633 = vrot.lane.b32.xlu1 %v393_v18, %s2286_s20 }
  0xb7   : > { %734 = vrot.lane.b32.xlu0 %v393_v18, %s2287_s21 }
  0xbe   : > { %803 = vrot.lane.b32.xlu2 %v393_v18, %s2288_s22  ;;  %736 = vrot.lane.b32.xlu1 %v406_v19, %s2287_s21 }
  0xbf   : > { %805 = vrot.lane.b32.xlu0 %v406_v19, %s2288_s22 }
  0xc6   : > { %856 = vrot.lane.b32.xlu2 %v406_v19, %s2289_s23  ;;  %854 = vrot.lane.b32.xlu1 %v393_v18, %s2289_s23 }
  0xc7   : > { %923 = vrot.lane.b32.xlu0 %v393_v18, %s2290_s24 }
  0xce   : > { %328 = vperm.xlu2 %2095, %v325_v24   ;;  %925 = vrot.lane.b32.xlu1 %v406_v19, %s2290_s24 }
 0x100   : > { %v516_v25 = vpop.permute.xlu2 %515 }
 0x108   : > { %v583_v27 = vpop.permute.xlu2 %582 }
 0x110   : > { %v2439_v33 = vpop.permute.xlu2 %635 }
 0x118   : > { %v465_v44 = vpop.permute.xlu1 %464  ;;  %v2457_v45 = vpop.permute.xlu2 %803 }
 0x119   : > { %v463_v47 = vpop.permute.xlu0 %462 }
 0x11a   : > { %v466_v48 = vsel %vm455_vm2, %v463_v47, %v465_v44  ;;  %v467_v49 = vsel %vm455_vm2, %v465_v44, %v463_v47  ;;  %v2515_v44 = vperm.slane %v2406_v12, 5 }
 0x11b   : > { %v468_v50 = vmul.f32 %v467_v49, %v2452_v41  ;;  %v469_v51 = vmul.f32 %v466_v48, %v2455_v42 }
 0x11d   : > { %480 = vst [vmem:[#allocation3 + $0x48] sm:$0xf] %v468_v50  ;;  %v484_v54 = vmul.f32 %v468_v50, %v468_v50  ;;  %v485_v55 = vmul.f32 %v469_v51, %v469_v51 }
 0x11e   : > { %481 = vst [vmem:[#allocation3] sm:$0xf] %v469_v51 }
 0x11f   : > { %v486_v58 = vsel %vm340_vm0, %v484_v54, 0.0  ;;  %v493_v59 = vsel %vm340_vm0, %v485_v55, 0.0 }
 0x120   : > { %v487_v61 = vrot.slane %v486_v58, 4  ;;  %v494_v62 = vrot.slane %v493_v59, 4  ;;  %v2476_v63 = vpop.permute.xlu2 %856  ;;  %v514_v0 = vpop.permute.xlu1 %513 }
 0x121   : > { %v517_v2 = vsel %vm506_vm3, %v514_v0, %v516_v25  ;;  %v518_v3 = vsel %vm506_vm3, %v516_v25, %v514_v0  ;;  %v585_v6 = vpop.permute.xlu0 %584 }
 0x122   : > { %v488_v7 = vadd.f32 %v487_v61, %v486_v58  ;;  %v495_v8 = vadd.f32 %v494_v62, %v493_v59  ;;  %v519_v9 = vmul.f32 %v518_v3, %v2467_v56  ;;  %v520_v10 = vmul.f32 %v517_v2, %v2470_v57 }
 0x123   : > { %v586_v13 = vsel %vm575_vm4, %v583_v27, %v585_v6  ;;  %v587_v16 = vsel %vm575_vm4, %v585_v6, %v583_v27  ;;  %v2506_v27 = vperm.slane %v2406_v12, 3 }
 0x124   : > { %v539_v18 = vrot.slane %v519_v9, 4  ;;  %v540_v19 = vrot.slane %v520_v10, 4  ;;  %v553_v21 = vmul.f32 %v519_v9, %v519_v9  ;;  %v554_v22 = vmul.f32 %v520_v10, %v520_v10 }
 0x125   : > { %v588_v23 = vmul.f32 %v587_v16, %v2486_v4  ;;  %v589_v24 = vmul.f32 %v586_v13, %v2489_v5  ;;  %v489_v25 = vrot.slane %v488_v7, 2  ;;  %v496_v28 = vrot.slane %v495_v8, 2 }
 0x126   : > { %543 = vst [vmem:[#allocation3 + $0x48] sm:$0xf0] %v539_v18  ;;  %v555_v31 = vsel %vm340_vm0, %v553_v21, 0.0  ;;  %v562_v32 = vsel %vm340_vm0, %v554_v22, 0.0  ;;  %v2541_v13 = vperm.slane %v2401_v11, 6 }
 0x127   : > { %544 = vst [vmem:[#allocation3] sm:$0xf0] %v540_v19  ;;  %v604_v34 = vmul.f32 %v588_v23, %v588_v23  ;;  %v605_v35 = vmul.f32 %v589_v24, %v589_v24  ;;  %v556_v37 = vrot.slane %v555_v31, 4  ;;  %v563_v38 = vrot.slane %v562_v32, 4 }
 0x128   : > { %600 = vst [vmem:[#allocation3 + $0x10] sm:$0xf] %v588_v23  ;;  %v329_v39 = vpop.permute.xlu2 %328  ;;  %v634_v40 = vpop.permute.xlu1 %633  ;;  %v490_v51 = vadd.f32 %v489_v25, %v488_v7  ;;  %v497_v52 = vadd.f32 %v496_v28, %v495_v8  ;;  %v2548_v25 = vperm.slane %v2406_v12, 6 }
 0x129   : > { %601 = vst [vmem:[#allocation3 + $0x40] sm:$0xf] %v589_v24  ;;  %v606_v46 = vsel %vm340_vm0, %v604_v34, 0.0  ;;  %v613_v47 = vsel %vm340_vm0, %v605_v35, 0.0  ;;  %v2520_v48 = vadd.f32 %v2435_v26, %v329_v39  ;;  %v637_v49 = vsel %vm626_vm5, %v634_v40, %v2439_v33  ;;  %v735_v50 = vpop.permute.xlu0 %734 }
 0x12a   : > { %v557_v53 = vadd.f32 %v556_v37, %v555_v31  ;;  %v564_v54 = vadd.f32 %v563_v38, %v562_v32  ;;  %v607_v55 = vrot.slane %v606_v46, 4  ;;  %v614_v58 = vrot.slane %v613_v47, 4 }
 0x12b   : > { %v638_v59 = vsel %vm626_vm5, %v2439_v33, %v634_v40  ;;  %v640_v61 = vmul.f32 %v637_v49, %v2506_v27  ;;  %914 = vrot.lane.b32.xlu1 %v2520_v48, %s2290_s24  ;;  %v2534_v2 = vadd.f32 %v2437_v29, %v329_v39  ;;  %v694_v19 = vmul.f32 %v2412_v15, %v2520_v48 }
 0x12c   : > { %v558_v26 = vrot.slane %v557_v53, 2  ;;  %v565_v62 = vrot.slane %v564_v54, 2  ;;  %v639_v0 = vmul.f32 %v638_v59, %v2503_v30  ;;  %v608_v3 = vadd.f32 %v607_v55, %v606_v46 }
 0x12d   : > { %v615_v6 = vadd.f32 %v614_v58, %v613_v47  ;;  %v660_v7 = vrot.slane %v640_v61, 4  ;;  %v674_v8 = vmul.f32 %v640_v61, %v640_v61  ;;  %723 = vrot.lane.b32.xlu2 %v2534_v2, %s2287_s21  ;;  %912 = vrot.lane.b32.xlu0 %v2534_v2, %s2290_s24  ;;  %v491_v28 = vrot.slane %v490_v51, 1  ;;  %700 = vst [vmem:[#allocation2 + $0x28] sm:$0xf] %v694_v19 }
 0x12e   : > { %v559_v9 = vadd.f32 %v558_v26, %v557_v53  ;;  %v659_v33 = vrot.slane %v639_v0, 4  ;;  %v673_v10 = vmul.f32 %v639_v0, %v639_v0  ;;  %v566_v16 = vadd.f32 %v565_v62, %v564_v54 }
 0x12f   : > { %v609_v18 = vrot.slane %v608_v3, 2  ;;  %664 = vst [vmem:[#allocation3 + $0x40] sm:$0xf0] %v660_v7  ;;  %v682_v29 = vsel %vm340_vm0, %v674_v8, 0.0  ;;  %v616_v21 = vrot.slane %v615_v6, 2  ;;  %v498_v31 = vrot.slane %v497_v52, 1 }
 0x130   : > { %663 = vst [vmem:[#allocation3 + $0x10] sm:$0xf0] %v659_v33  ;;  %v675_v22 = vsel %vm340_vm0, %v673_v10, 0.0  ;;  %v683_v23 = vrot.slane %v682_v29, 4  ;;  %v737_v24 = vpop.permute.xlu1 %736  ;;  %v693_v34 = vmul.f32 %v2409_v14, %v2534_v2  ;;  %v560_v35 = vrot.slane %v559_v9, 1 }
 0x131   : > { %v676_v32 = vrot.slane %v675_v22, 4  ;;  %v610_v37 = vadd.f32 %v609_v18, %v608_v3  ;;  %v738_v38 = vsel %vm727_vm6, %v735_v50, %v737_v24  ;;  %v567_v39 = vrot.slane %v566_v16, 1  ;;  %v806_v49 = vpop.permute.xlu0 %805 }
 0x132   : > { %v684_v46 = vadd.f32 %v683_v23, %v682_v29  ;;  %699 = vst [vmem:[#allocation2 + $0x48] sm:$0xf] %v693_v34  ;;  %v739_v47 = vsel %vm727_vm6, %v737_v24, %v735_v50  ;;  %v617_v53 = vadd.f32 %v616_v21, %v615_v6  ;;  %v740_v54 = vmul.f32 %v738_v38, %v2512_v43 }
 0x133   : > { %v677_v40 = vadd.f32 %v676_v32, %v675_v22  ;;  %843 = vrot.lane.b32.xlu1 %v2534_v2, %s2289_s23  ;;  %v2561_v55 = vperm.slane %v2401_v11, 7  ;;  %v2564_v58 = vperm.slane %v2406_v12, 7  ;;  %v492_v59 = vadd.f32 %v491_v28, %v490_v51 }
 0x134   : > { %v499_v61 = vadd.f32 %v498_v31, %v497_v52  ;;  %v741_v62 = vmul.f32 %v739_v47, %v2515_v44  ;;  %v561_v0 = vadd.f32 %v560_v35, %v559_v9  ;;  %v760_v50 = vrot.slane %v740_v54, 4 }
 0x135   : > { %v678_v26 = vrot.slane %v677_v40, 2  ;;  %v774_v3 = vmul.f32 %v740_v54, %v740_v54  ;;  %v807_v6 = vsel %vm796_vm7, %v2457_v45, %v806_v49  ;;  %845 = vrot.lane.b32.xlu2 %v2520_v48, %s2289_s23  ;;  %725 = vrot.lane.b32.xlu0 %v2520_v48, %s2287_s21  ;;  %v568_v11 = vadd.f32 %v567_v39, %v566_v16 }
 0x136   : > { %v611_v12 = vrot.slane %v610_v37, 1  ;;  %v685_v51 = vrot.slane %v684_v46, 2  ;;  %v761_v52 = vrot.slane %v741_v62, 4  ;;  %v618_v7 = vrot.slane %v617_v53, 1  ;;  %764 = vst [vmem:[#allocation3 + $0x38] sm:$0xf0] %v760_v50 }
 0x137   : > { %v775_v8 = vmul.f32 %v741_v62, %v741_v62  ;;  %v776_v9 = vsel %vm340_vm0, %v774_v3, 0.0  ;;  %v808_v33 = vsel %vm796_vm7, %v806_v49, %v2457_v45  ;;  %v679_v18 = vadd.f32 %v678_v26, %v677_v40 }
 0x138   : > { %v855_v10 = vpop.permute.xlu1 %854  ;;  %765 = vst [vmem:[#allocation3 + $0x8] sm:$0xf0] %v761_v52  ;;  %v777_v29 = vrot.slane %v776_v9, 4  ;;  %v809_v19 = vmul.f32 %v807_v6, %v2541_v13  ;;  %v810_v16 = vmul.f32 %v808_v33, %v2548_v25  ;;  %v569_v21 = vadd.f32 %v561_v0, %v492_v59 }
 0x139   : > { %v783_v22 = vsel %vm340_vm0, %v775_v8, 0.0  ;;  %v858_v23 = vsel %vm847_vm8, %v855_v10, %v2476_v63  ;;  %v859_v24 = vsel %vm847_vm8, %v2476_v63, %v855_v10  ;;  %v686_v45 = vadd.f32 %v685_v51, %v684_v46  ;;  %v924_v33 = vpop.permute.xlu0 %923 }
 0x13a   : > { %v778_v28 = vadd.f32 %v777_v29, %v776_v9  ;;  %v784_v31 = vrot.slane %v783_v22, 4  ;;  %821 = vst [vmem:[#allocation3 + $0x30] sm:$0xf] %v809_v19  ;;  %v825_v32 = vmul.f32 %v809_v19, %v809_v19  ;;  %v570_v34 = vadd.f32 %v568_v11, %v499_v61  ;;  %v2608_v29 = vld [vmem:[%s3425_s1 + $0x18] ss:$0 sm:$0xff] }
 0x13b   : > { %794 = vrot.lane.b32.xlu1 %v2520_v48, %s2288_s22  ;;  %822 = vst [vmem:[#allocation3 + $0x18] sm:$0xf] %v810_v16  ;;  %v826_v35 = vmul.f32 %v810_v16, %v810_v16  ;;  %v860_v38 = vmul.f32 %v858_v23, %v2561_v55  ;;  %v861_v39 = vmul.f32 %v859_v24, %v2564_v58  ;;  %v680_v40 = vrot.slane %v679_v18, 1 }
 0x13c   : > { %v779_v47 = vrot.slane %v778_v28, 2  ;;  %v785_v49 = vadd.f32 %v784_v31, %v783_v22  ;;  %v827_v63 = vsel %vm340_vm0, %v825_v32, 0.0  ;;  %v612_v46 = vadd.f32 %v611_v12, %v610_v37  ;;  %v2600_v37 = vld [vmem:[%s3425_s1 + $0x10] ss:$0 sm:$0xff] }
 0x13d   : > { %v828_v54 = vrot.slane %v827_v63, 4  ;;  %v834_v59 = vsel %vm340_vm0, %v826_v35, 0.0  ;;  %v880_v26 = vrot.slane %v860_v38, 4  ;;  %502 = vrot.lane.b32.xlu2 %v2534_v2, %s2283_s17  ;;  %792 = vrot.lane.b32.xlu0 %v2534_v2, %s2288_s22  ;;  %v619_v61 = vadd.f32 %v618_v7, %v617_v53 }
 0x13e   : > { %v687_v62 = vrot.slane %v686_v45, 1  ;;  %v786_v0 = vrot.slane %v785_v49, 2  ;;  %v835_v50 = vrot.slane %v834_v59, 4  ;;  %v881_v6 = vrot.slane %v861_v39, 4 }
 0x13f   : > { %v829_v3 = vadd.f32 %v828_v54, %v827_v63  ;;  %884 = vst [vmem:[#allocation3 + $0x30] sm:$0xf0] %v880_v26  ;;  %v894_v11 = vmul.f32 %v860_v38, %v860_v38  ;;  %v895_v51 = vmul.f32 %v861_v39, %v861_v39  ;;  %v681_v52 = vadd.f32 %v680_v40, %v679_v18 }
 0x140   : > { %v926_v12 = vpop.permute.xlu1 %925  ;;  %v780_v8 = vadd.f32 %v779_v47, %v778_v28  ;;  %v836_v9 = vadd.f32 %v835_v50, %v834_v59  ;;  %v787_v53 = vadd.f32 %v786_v0, %v785_v49  ;;  %885 = vst [vmem:[#allocation3 + $0x18] sm:$0xf0] %v881_v6  ;;  %v620_v18 = vadd.f32 %v612_v46, %v569_v21 }
 0x141   : > { %v896_v7 = vsel %vm340_vm0, %v894_v11, 0.0  ;;  %v903_v10 = vsel %vm340_vm0, %v895_v51, 0.0  ;;  %v927_v19 = vsel %vm916_vm9, %v924_v33, %v926_v12  ;;  %v688_v16 = vadd.f32 %v687_v62, %v686_v45 }
 0x142   : > { %v830_v22 = vrot.slane %v829_v3, 2  ;;  %v897_v23 = vrot.slane %v896_v7, 4  ;;  %v837_v24 = vrot.slane %v836_v9, 2  ;;  %v904_v28 = vrot.slane %v903_v10, 4 }
 0x143   : > { %622 = vrot.lane.b32.xlu1 %v2534_v2, %s2286_s20  ;;  %v928_v31 = vsel %vm916_vm9, %v926_v12, %v924_v33  ;;  %v929_v32 = vmul.f32 %v2600_v37, %v927_v19  ;;  %v621_v35 = vadd.f32 %v619_v61, %v570_v34  ;;  %v689_v38 = vadd.f32 %v681_v52, %v620_v18 }
 0x144   : > { %v781_v39 = vrot.slane %v780_v8, 1  ;;  %v898_v40 = vadd.f32 %v897_v23, %v896_v7  ;;  %v788_v47 = vrot.slane %v787_v53, 1  ;;  %v905_v49 = vadd.f32 %v904_v28, %v903_v10 }
 0x145   : > { %v930_v21 = vmul.f32 %v2608_v29, %v928_v31  ;;  %941 = vst [vmem:[#allocation3 + $0x28] sm:$0xf] %v929_v32  ;;  %v945_v45 = vmul.f32 %v929_v32, %v929_v32  ;;  %624 = vrot.lane.b32.xlu2 %v2520_v48, %s2286_s20  ;;  %v690_v63 = vadd.f32 %v688_v16, %v621_v35 }
 0x146   : > { %v713_v46 = vadd.f32 %v712_v20, %v2479_v1  ;;  %v831_v54 = vadd.f32 %v830_v22, %v829_v3  ;;  %v899_v59 = vrot.slane %v898_v40, 2  ;;  %504 = vrot.lane.b32.xlu0 %v2520_v48, %s2283_s17  ;;  %v838_v34 = vadd.f32 %v837_v24, %v836_v9 }
 0x147   : > { %v906_v26 = vrot.slane %v905_v49, 2  ;;  %942 = vst [vmem:[#allocation3 + $0x20] sm:$0xf] %v930_v21  ;;  %v946_v61 = vmul.f32 %v930_v21, %v930_v21  ;;  %v947_v62 = vsel %vm340_vm0, %v945_v45, 0.0  ;;  %v720_v0 = vadd.f32 %v719_v17, %v2474_v60 }
 0x148   : > { %v782_v50 = vadd.f32 %v781_v39, %v780_v8  ;;  %v900_v6 = vadd.f32 %v899_v59, %v898_v40  ;;  %v948_v11 = vrot.slane %v947_v62, 4  ;;  %v721_v51 = vadd.f32 %v713_v46, %v689_v38 }
 0x149   : > { %v789_v1 = vadd.f32 %v788_v47, %v787_v53  ;;  %v907_v20 = vadd.f32 %v906_v26, %v905_v49  ;;  %v954_v3 = vsel %vm340_vm0, %v946_v61, 0.0  ;;  %v832_v12 = vrot.slane %v831_v54, 1  ;;  %v410_v49 = vld [vmem:[%s3431_s7] sm:$0xf] }
 0x14a   : > { %v901_v52 = vrot.slane %v900_v6, 1  ;;  %v949_v9 = vadd.f32 %v948_v11, %v947_v62  ;;  %v955_v33 = vrot.slane %v954_v3, 4  ;;  %v722_v7 = vadd.f32 %v720_v0, %v690_v63 }
 0x14b   : > { %451 = vrot.lane.b32.xlu1 %v2520_v48, %s2284_s18  ;;  %v839_v10 = vrot.slane %v838_v34, 1  ;;  %v790_v19 = vadd.f32 %v782_v50, %v721_v51  ;;  %v908_v18 = vrot.slane %v907_v20, 1  ;;  %v833_v53 = vadd.f32 %v832_v12, %v831_v54 }
 0x14c   : > { %v950_v60 = vrot.slane %v949_v9, 2  ;;  %v956_v17 = vadd.f32 %v955_v33, %v954_v3  ;;  %v791_v8 = vadd.f32 %v789_v1, %v722_v7  ;;  %v902_v16 = vadd.f32 %v901_v52, %v900_v6 }
 0x14d   : > { %571 = vrot.lane.b32.xlu2 %v2534_v2, %s2285_s19  ;;  %v840_v24 = vadd.f32 %v839_v10, %v838_v34  ;;  %v841_v28 = vadd.f32 %v833_v53, %v790_v19  ;;  %v909_v31 = vadd.f32 %v908_v18, %v907_v20 }
 0x14e   : > { %v951_v22 = vadd.f32 %v950_v60, %v949_v9  ;;  %v957_v23 = vrot.slane %v956_v17, 2  ;;  %449 = vrot.lane.b32.xlu0 %v2534_v2, %s2284_s18 }
 0x14f   : > { %v842_v38 = vadd.f32 %v840_v24, %v791_v8  ;;  %v910_v39 = vadd.f32 %v902_v16, %v841_v28 }
 0x150   : > { %v952_v32 = vrot.slane %v951_v22, 1  ;;  %v958_v35 = vadd.f32 %v957_v23, %v956_v17 }
 0x151   : > { %v911_v21 = vadd.f32 %v909_v31, %v842_v38 }
 0x152   : > { %v953_v40 = vadd.f32 %v952_v32, %v951_v22  ;;  %v959_v47 = vrot.slane %v958_v35, 1 }
 0x154   : > { %v960_v45 = vadd.f32 %v959_v47, %v958_v35  ;;  %v961_v63 = vadd.f32 %v953_v40, %v910_v39 }
 0x155   : > { %413 = vperm.xlu2 %2095, %v410_v49   ;;  %v1019_v49 = vld [vmem:[#allocation3 + $0x48] sm:$0xff] }
 0x156   : > { %v962_v46 = vadd.f32 %v960_v45, %v911_v21  ;;  %2098 = vrsqrt.f32 %v961_v63  ;;  %573 = vrot.lane.b32.xlu0 %v2520_v48, %s2285_s19  ;;  %vm970_vm10 = vcmp.eq.f32.partialorder %v961_v63, inf  ;;  %v973_v20 = vand.u32 2147483648, %v961_v63  ;;  %v1021_v21 = vld [vmem:[#allocation3 + $0x10] sm:$0xff] }
 0x157   : > { %vm972_vm11 = vcmp.eq.f32.partialorder %v961_v63, 0.0 }
 0x158   : > { %2100 = vrsqrt.f32 %v962_v46  ;;  %vm982_vm12 = vcmp.eq.f32.partialorder %v962_v46, inf  ;;  %v985_v52 = vand.u32 2147483648, %v962_v46  ;;  %vm984_vm13 = vcmp.eq.f32.partialorder %v962_v46, 0.0 }
 0x15c   : > { %v2099_v2 = vpop.eup %2098 }
 0x15d   : > { %v964_v54 = vmul.f32 %v2099_v2, %v961_v63 }
 0x15e   : > { %v2101_v59 = vpop.eup %2100 }
 0x15f   : > { %v965_v34 = vmul.f32 %v2099_v2, %v964_v54  ;;  %v976_v26 = vmul.f32 %v2101_v59, %v962_v46  ;;  %v1020_v54 = vld [vmem:[#allocation3] sm:$0xff] }
 0x161   : > { %v966_v61 = vmul.f32 0.5, %v965_v34  ;;  %v977_v62 = vmul.f32 %v2101_v59, %v976_v26  ;;  %v1023_v34 = vld [vmem:[#allocation3 + $0x38] sm:$0xff]  ;;  %v1024_v26 = vld [vmem:[#allocation3 + $0x8] sm:$0xff] }
 0x163   : > { %v967_v0 = vsub.f32 1.5, %v966_v61  ;;  %v978_v50 = vmul.f32 0.5, %v977_v62 }
 0x165   : > { %v968_v6 = vmul.f32 %v2099_v2, %v967_v0  ;;  %v979_v11 = vsub.f32 1.5, %v978_v50  ;;  %v1025_v50 = vld [vmem:[#allocation3 + $0x30] sm:$0xff] }
 0x167   : > { %v969_v51 = vmul.f32 %v968_v6, %v961_v63  ;;  %v980_v1 = vmul.f32 %v2101_v59, %v979_v11  ;;  %v1022_v59 = vld [vmem:[#allocation3 + $0x40] sm:$0xff] }
 0x169   : > { %v971_v3 = vsel %vm970_vm10, %v961_v63, %v969_v51  ;;  %v981_v12 = vmul.f32 %v980_v1, %v962_v46  ;;  %v1026_v51 = vld [vmem:[#allocation3 + $0x18] sm:$0xff] }
 0x16a   : > { %v974_v48 = vsel %vm972_vm11, %v973_v20, %v971_v3  ;;  %v1027_v3 = vld [vmem:[#allocation3 + $0x28] sm:$0xf] }
 0x16b   : > { %v983_v9 = vsel %vm982_vm12, %v962_v46, %v981_v12  ;;  %v987_v33 = vmax.f32 %v974_v48, 0.0001  ;;  %v1028_v48 = vld [vmem:[#allocation3 + $0x20] sm:$0xf] }
 0x16c   : > { %v986_v7 = vsel %vm984_vm13, %v985_v52, %v983_v9 }
 0x16d   : > { %v988_v10 = vmax.f32 %v986_v7, 0.0001  ;;  %2102 = vrcp.f32 %v987_v33  ;;  %v1000_v53 = vand.u32 2147483648, %v987_v33  ;;  %v998_v22 = vand.u32 2147483647, %v987_v33 }
 0x16e   : > { %vm994_vm15 = vweird.f32 %v987_v33 }
 0x16f   : > { %2104 = vrcp.f32 %v988_v10  ;;  %v1015_v24 = vand.u32 2147483648, %v988_v10  ;;  %v1013_v32 = vand.u32 2147483647, %v988_v10  ;;  %v1001_v35 = vor.u32 1.1754944e-38, %v1000_v53 }
 0x170   : > { %vm999_vm10 = vcmp.eq.f32.partialorder %v998_v22, 8.507059e+37  ;;  %vm1009_vm11 = vweird.f32 %v988_v10 }
 0x171   : > { %v1016_v47 = vor.u32 1.1754944e-38, %v1015_v24  ;;  %vm1014_vm13 = vcmp.eq.f32.partialorder %v1013_v32, 8.507059e+37 }
 0x173   : > { %v2103_v19 = vpop.eup %2102 }
 0x174   : > { %v990_v18 = vmul.f32 %v2103_v19, %v987_v33  ;;  %vm995_vm14 = vweird.f32 %v2103_v19 }
 0x175   : > { %v2105_v60 = vpop.eup %2104  ;;  %vm996_vm1 = vmor %vm994_vm15, %vm995_vm14  ;;  %vm1175_vm14 = vcmask 1041408  }
 0x176   : > { %v991_v17 = vsub.f32 1.0, %v990_v18  ;;  %v1005_v8 = vmul.f32 %v2105_v60, %v988_v10  ;;  %vm1010_vm0 = vweird.f32 %v2105_v60  ;;  %v428_v10 = vpop.f32.mrf.mxu0 }
 0x177   : > { %vm1011_vm12 = vmor %vm1009_vm11, %vm1010_vm0 }
 0x178   : > { %v992_v16 = vmul.f32 %v2103_v19, %v991_v17  ;;  %v1006_v23 = vsub.f32 1.0, %v1005_v8 }
 0x17a   : > { %v993_v28 = vadd.f32 %v2103_v19, %v992_v16  ;;  %v1007_v31 = vmul.f32 %v2105_v60, %v1006_v23 }
 0x17c   : > { %v997_v38 = vsel %vm996_vm1, %v2103_v19, %v993_v28  ;;  %v1008_v39 = vadd.f32 %v2105_v60, %v1007_v31  ;;  %v441_v19 = vpop.f32.mrf.mxu1 }
 0x17d   : > { %v1002_v40 = vsel %vm999_vm10, %v1001_v35, %v997_v38 }
 0x17e   : > { %v1012_v45 = vsel %vm1011_vm12, %v2105_v60, %v1008_v39  ;;  %v1029_v63 = vmul.f32 %v1019_v49, %v1002_v40  ;;  %v1031_v46 = vmul.f32 %v1021_v21, %v1002_v40  ;;  %v1033_v0 = vmul.f32 %v1023_v34, %v1002_v40  ;;  %v430_v8 = vpop.f32.mrf.mxu0 }
 0x17f   : > { %v1017_v2 = vsel %vm1014_vm13, %v1016_v47, %v1012_v45  ;;  %v1035_v1 = vmul.f32 %v1025_v50, %v1002_v40  ;;  %v1037_v52 = vmul.f32 %v1027_v3, %v1002_v40 }
 0x180   : > { %v1030_v61 = vmul.f32 %v1020_v54, %v1017_v2  ;;  %v1032_v62 = vmul.f32 %v1022_v59, %v1017_v2  ;;  %1039 = vst [vmem:[#allocation3 + $0x48] sm:$0xff] %v1029_v63  ;;  %v1034_v6 = vmul.f32 %v1024_v26, %v1017_v2  ;;  %v1080_v11 = vpack.c.bf16 %v1031_v46, %v1029_v63 }
 0x181   : > { %1041 = vst [vmem:[#allocation3 + $0x10] sm:$0xff] %v1031_v46  ;;  %v1036_v12 = vmul.f32 %v1026_v51, %v1017_v2  ;;  %v1038_v9 = vmul.f32 %v1028_v48, %v1017_v2  ;;  %v1082_v18 = vpack.c.bf16 %v1035_v1, %v1033_v0 }
 0x182   : > { %1040 = vst [vmem:[#allocation3] sm:$0xff] %v1030_v61  ;;  %v1081_v20 = vpack.c.bf16 %v1032_v62, %v1030_v61 }
 0x183   : > { %1042 = vst [vmem:[#allocation3 + $0x40] sm:$0xff] %v1032_v62  ;;  %v1083_v60 = vpack.c.bf16 %v1036_v12, %v1034_v6 }
 0x184   : > { %1043 = vst [vmem:[#allocation3 + $0x38] sm:$0xff] %v1033_v0  ;;  %1102 = vxpose.binary.xlu1.c.b16.start [1/6] (short) %v1081_v20, %v1080_v11, 128  ;;  %v443_v53 = vpop.f32.mrf.mxu1 }
 0x185   : > { %1044 = vst [vmem:[#allocation3 + $0x8] sm:$0xff] %v1034_v6 }
 0x186   : > { %1045 = vst [vmem:[#allocation3 + $0x30] sm:$0xff] %v1035_v1 }
 0x187   : > { %1046 = vst [vmem:[#allocation3 + $0x18] sm:$0xff] %v1036_v12  ;;  %v724_v33 = vpop.permute.xlu2 %723 }
 0x188   : > { %1047 = vst [vmem:[#allocation3 + $0x28] sm:$0xf] %v1037_v52 }
 0x189   : > { %1048 = vst [vmem:[#allocation3 + $0x20] sm:$0xf] %v1038_v9 }
 0x18f   : > { %v846_v7 = vpop.permute.xlu2 %845  ;;  %v1078_v24 = vld [vmem:[#allocation3 + $0x28] sm:$0xf] }
 0x190   : > { %v1079_v28 = vld [vmem:[#allocation3 + $0x20] sm:$0xf]  ;;  %v1084_v39 = vpack.c.bf16 %v1078_v24, %v1078_v24 }
 0x191   : > { %v1085_v40 = vpack.c.bf16 %v1079_v28, %v1079_v28 }
 0x194   : > { %1103 = vxpose.binary.xlu1.c.b16.cont [2/6] (short) %v1083_v60, %v1082_v18, 128 }
 0x197   : > { %v2641_v17 = vpop.permute.xlu2 %502 }
 0x19d   : > { %v915_v16 = vpop.permute.xlu1 %914 }
 0x19f   : > { %v625_v22 = vpop.permute.xlu2 %624  ;;  %v913_v23 = vpop.permute.xlu0 %912 }
 0x1a0   : > { %v917_v31 = vsel %vm916_vm9, %v913_v23, %v915_v16  ;;  %v918_v32 = vsel %vm916_vm9, %v915_v16, %v913_v23 }
 0x1a1   : > { %v921_v35 = vmul.f32 %v2600_v37, %v917_v31  ;;  %v922_v38 = vmul.f32 %v2608_v29, %v918_v32 }
 0x1a3   : > { %939 = vst [vmem:[#allocation2 + $0x40] sm:$0xf] %v921_v35 }
 0x1a4   : > { %940 = vst [vmem:[#allocation2 + $0x38] sm:$0xf] %v922_v38  ;;  %1104 = vxpose.binary.xlu1.c.b16.end [3/6] (short) %v1085_v40, %v1084_v39, 128 }
 0x1a5   : > { %v844_v47 = vpop.permute.xlu1 %843 }
 0x1a6   : > { %v848_v49 = vsel %vm847_vm8, %v844_v47, %v846_v7  ;;  %v849_v21 = vsel %vm847_vm8, %v846_v7, %v844_v47 }
 0x1a7   : > { %v852_v45 = vmul.f32 %v2561_v55, %v848_v49  ;;  %v853_v63 = vmul.f32 %v2564_v58, %v849_v21  ;;  %v2655_v46 = vpop.permute.xlu2 %571  ;;  %v726_v2 = vpop.permute.xlu0 %725 }
 0x1a8   : > { %v728_v34 = vsel %vm727_vm6, %v724_v33, %v726_v2  ;;  %v729_v26 = vsel %vm727_vm6, %v726_v2, %v724_v33 }
 0x1a9   : > { %v872_v54 = vrot.slane %v852_v45, 4  ;;  %v873_v59 = vrot.slane %v853_v63, 4  ;;  %v732_v61 = vmul.f32 %v2512_v43, %v728_v34  ;;  %v733_v62 = vmul.f32 %v2515_v44, %v729_v26 }
 0x1aa   : > { %v1062_v0 = vld [vmem:[#allocation2 + $0x40] sm:$0xf] }
 0x1ab   : > { %876 = vst [vmem:[#allocation2 + $0x8] sm:$0xf0] %v872_v54  ;;  %v752_v50 = vrot.slane %v732_v61, 4  ;;  %v753_v6 = vrot.slane %v733_v62, 4  ;;  %v1068_v11 = vpack.c.bf16 %v1062_v0, %v1062_v0  ;;  %v1063_v51 = vld [vmem:[#allocation2 + $0x38] sm:$0xf] }
 0x1ac   : > { %877 = vst [vmem:[#allocation2 + $0x20] sm:$0xf0] %v873_v59  ;;  %v1069_v20 = vpack.c.bf16 %v1063_v51, %v1063_v51 }
 0x1ad   : > { %v795_v1 = vpop.permute.xlu1 %794  ;;  %756 = vst [vmem:[#allocation2 + $0x48] sm:$0xf0] %v752_v50  ;;  %v1177_v3 = vsel %vm1175_vm14, %v1068_v11, 0 }
 0x1ae   : > { %757 = vst [vmem:[#allocation2 + $0x28] sm:$0xf0] %v753_v6  ;;  %1187 = vmatpush.bf16.msra.mxu0 %v1177_v3  ;;  %2038 = vmatpush.bf16.msrb.mxu2 %v1177_v3  ;;  %v1180_v12 = vsel %vm1175_vm14, %v1069_v20, 0 }
 0x1af   : > { %v414_v48 = vpop.permute.xlu2 %413  ;;  %v793_v52 = vpop.permute.xlu0 %792  ;;  %1276 = vmatpush.bf16.msra.mxu1 %v1180_v12  ;;  %2041 = vmatpush.bf16.msrb.mxu3 %v1180_v12 }
 0x1b0   : > { %v2663_v9 = vadd.f32 %v428_v10, %v414_v48  ;;  %v2665_v33 = vadd.f32 %v441_v19, %v414_v48  ;;  %v797_v7 = vsel %vm796_vm7, %v793_v52, %v795_v1  ;;  %v798_v18 = vsel %vm796_vm7, %v795_v1, %v793_v52 }
 0x1b1   : > { %v801_v60 = vmul.f32 %v2541_v13, %v797_v7  ;;  %v802_v8 = vmul.f32 %v2548_v25, %v798_v18 }
 0x1b2   : > { %523 = vrot.lane.b32.xlu2 %v2665_v33, %s2283_s17  ;;  %521 = vrot.lane.b32.xlu0 %v2663_v9, %s2283_s17  ;;  %v697_v48 = vmul.f32 %v2409_v14, %v2663_v9  ;;  %v698_v52 = vmul.f32 %v2412_v15, %v2665_v33  ;;  %s307_s17 = sand.u32 1, %s2264_s27   ;;  %s2037_s27 = sshll.u32 (%p2368_p3), %s2272_s29, 3 }
 0x1b3   : > { %819 = vst [vmem:[#allocation2 + $0x8] sm:$0xf] %v801_v60 }
 0x1b4   : > { %820 = vst [vmem:[#allocation2 + $0x20] sm:$0xf] %v802_v8  ;;  %v1058_v39 = vld [vmem:[#allocation2 + $0x48] sm:$0xff] }
 0x1b5   : > { %v623_v10 = vpop.permute.xlu1 %622  ;;  %v1059_v49 = vld [vmem:[#allocation2 + $0x28] sm:$0xff]  ;;  %703 = vst [vmem:[#allocation4] sm:$0xf] %v697_v48 }
 0x1b6   : > { %v627_v19 = vsel %vm626_vm5, %v623_v10, %v625_v22  ;;  %v628_v53 = vsel %vm626_vm5, %v625_v22, %v623_v10  ;;  %704 = vst [vmem:[#allocation4 + $0x28] sm:$0xf] %v698_v52 }
 0x1b7   : > { %v631_v16 = vmul.f32 %v2503_v30, %v628_v53  ;;  %v632_v23 = vmul.f32 %v2506_v27, %v627_v19 }
 0x1b8   : > { %v505_v31 = vpop.permute.xlu0 %504 }
 0x1b9   : > { %v651_v24 = vrot.slane %v631_v16, 4  ;;  %v652_v28 = vrot.slane %v632_v23, 4  ;;  %v507_v32 = vsel %vm506_vm3, %v2641_v17, %v505_v31  ;;  %v508_v35 = vsel %vm506_vm3, %v505_v31, %v2641_v17 }
 0x1ba   : > { %v511_v38 = vmul.f32 %v2467_v56, %v508_v35  ;;  %v512_v22 = vmul.f32 %v2470_v57, %v507_v32  ;;  %643 = vrot.lane.b32.xlu2 %v2665_v33, %s2286_s20  ;;  %641 = vrot.lane.b32.xlu0 %v2663_v9, %s2286_s20  ;;  %v1060_v40 = vld [vmem:[#allocation2 + $0x8] sm:$0xff] }
 0x1bb   : > { %655 = vst [vmem:[#allocation2 + $0x18] sm:$0xf0] %v651_v24  ;;  %v1066_v47 = vpack.c.bf16 %v1060_v40, %v1058_v39  ;;  %v1061_v21 = vld [vmem:[#allocation2 + $0x20] sm:$0xff] }
 0x1bc   : > { %656 = vst [vmem:[#allocation2 + $0x10] sm:$0xf0] %v652_v28  ;;  %v531_v45 = vrot.slane %v511_v38, 4  ;;  %v532_v63 = vrot.slane %v512_v22, 4  ;;  %v1067_v17 = vpack.c.bf16 %v1061_v21, %v1059_v49 }
 0x1bd   : > { %1188 = vmatpush.bf16.msra.mxu0 %v1066_v47  ;;  %2039 = vmatpush.bf16.msrb.mxu2 %v1066_v47  ;;  %v452_v2 = vpop.permute.xlu1 %451 }
 0x1be   : > { %535 = vst [vmem:[#allocation2 + $0x30] sm:$0xf0] %v531_v45  ;;  %1277 = vmatpush.bf16.msra.mxu1 %v1067_v17  ;;  %2042 = vmatpush.bf16.msrb.mxu3 %v1067_v17 }
 0x1bf   : > { %536 = vst [vmem:[#allocation2] sm:$0xf0] %v532_v63 }
 0x1c0   : > { %v450_v54 = vpop.permute.xlu0 %449 }
 0x1c1   : > { %v456_v59 = vsel %vm455_vm2, %v450_v54, %v452_v2  ;;  %v457_v34 = vsel %vm455_vm2, %v452_v2, %v450_v54 }
 0x1c2   : > { %v460_v26 = vmul.f32 %v2452_v41, %v457_v34  ;;  %v461_v61 = vmul.f32 %v2455_v42, %v456_v59  ;;  %472 = vrot.lane.b32.xlu2 %v2665_v33, %s2284_s18  ;;  %470 = vrot.lane.b32.xlu0 %v2663_v9, %s2284_s18  ;;  %s2044_s18 = smul.u32 40, %s307_s17 }
 0x1c4   : > { %478 = vst [vmem:[#allocation2 + $0x30] sm:$0xf] %v460_v26 }
 0x1c5   : > { %479 = vst [vmem:[#allocation2] sm:$0xf] %v461_v61 }
 0x1c8   : > { %v574_v62 = vpop.permute.xlu0 %573 }
 0x1c9   : > { %v576_v0 = vsel %vm575_vm4, %v2655_v46, %v574_v62  ;;  %v577_v50 = vsel %vm575_vm4, %v574_v62, %v2655_v46 }
 0x1ca   : > { %v580_v6 = vmul.f32 %v2486_v4, %v577_v50  ;;  %v581_v11 = vmul.f32 %v2489_v5, %v576_v0  ;;  %592 = vrot.lane.b32.xlu2 %v2665_v33, %s2285_s19  ;;  %590 = vrot.lane.b32.xlu0 %v2663_v9, %s2285_s19  ;;  %s3387_s19 = scalar_lea.vmem [#allocation5], %s2044_s18 }
 0x1cb   : > { %v1054_v51 = vld [vmem:[#allocation2 + $0x30] sm:$0xff] }
 0x1cc   : > { %598 = vst [vmem:[#allocation2 + $0x18] sm:$0xf] %v580_v6  ;;  %v1055_v20 = vld [vmem:[#allocation2] sm:$0xff] }
 0x1cd   : > { %599 = vst [vmem:[#allocation2 + $0x10] sm:$0xf] %v581_v11 }
 0x1d2   : > { %744 = vrot.lane.b32.xlu2 %v2665_v33, %s2287_s21  ;;  %742 = vrot.lane.b32.xlu0 %v2663_v9, %s2287_s21 }
 0x1d3   : > { %v1056_v46 = vld [vmem:[#allocation2 + $0x18] sm:$0xff] }
 0x1d4   : > { %v1064_v1 = vpack.c.bf16 %v1056_v46, %v1054_v51  ;;  %v1057_v3 = vld [vmem:[#allocation2 + $0x10] sm:$0xff] }
 0x1d5   : > { %v1065_v12 = vpack.c.bf16 %v1057_v3, %v1055_v20 }
 0x1d6   : > { %1189 = vmatpush.bf16.msra.mxu0 %v1064_v1  ;;  %2040 = vmatpush.bf16.msrb.mxu2 %v1064_v1 }
 0x1d7   : > { %1278 = vmatpush.bf16.msra.mxu1 %v1065_v12  ;;  %2043 = vmatpush.bf16.msrb.mxu3 %v1065_v12 }
 0x1da   : > { %864 = vrot.lane.b32.xlu2 %v2665_v33, %s2289_s23  ;;  %862 = vrot.lane.b32.xlu0 %v2663_v9, %s2289_s23 }
 0x1e2   : > { %813 = vrot.lane.b32.xlu2 %v2665_v33, %s2288_s22  ;;  %811 = vrot.lane.b32.xlu0 %v2663_v9, %s2288_s22  ;;  %s1876_s22 = scalar_lea.vmem (%p2368_p3), %s3432_s8, %s2037_s27 }
 0x1ea   : > { %933 = vrot.lane.b32.xlu2 %v2665_v33, %s2290_s24  ;;  %931 = vrot.lane.b32.xlu0 %v2663_v9, %s2290_s24 }
 0x20c   : > { %v524_v14 = vpop.permute.xlu2 %523 }
 0x214   : > { %v644_v15 = vpop.permute.xlu2 %643 }
 0x21c   : > { %v473_v16 = vpop.permute.xlu2 %472 }
 0x224   : > { %v522_v7 = vpop.permute.xlu0 %521  ;;  %v593_v32 = vpop.permute.xlu2 %592 }
 0x225   : > { %v525_v18 = vsel %vm506_vm3, %v522_v7, %v524_v14  ;;  %v526_v60 = vsel %vm506_vm3, %v524_v14, %v522_v7  ;;  %vm1126_vm3 = vcmask 293888  }
 0x226   : > { %v527_v8 = vmul.f32 %v526_v60, %v2467_v56  ;;  %v528_v10 = vmul.f32 %v525_v18, %v2470_v57 }
 0x228   : > { %v547_v19 = vrot.slane %v527_v8, 4  ;;  %v548_v53 = vrot.slane %v528_v10, 4 }
 0x22a   : > { %551 = vst [vmem:[#allocation4 + $0x8] sm:$0xf0] %v547_v19 }
 0x22b   : > { %552 = vst [vmem:[#allocation4 + $0x48] sm:$0xf0] %v548_v53 }
 0x22c   : > { %v642_v33 = vpop.permute.xlu0 %641  ;;  %v745_v21 = vpop.permute.xlu2 %744 }
 0x22d   : > { %v645_v9 = vsel %vm626_vm5, %v642_v33, %v644_v15  ;;  %v646_v23 = vsel %vm626_vm5, %v644_v15, %v642_v33 }
 0x22e   : > { %v647_v24 = vmul.f32 %v646_v23, %v2503_v30  ;;  %v648_v28 = vmul.f32 %v645_v9, %v2506_v27 }
 0x230   : > { %v667_v56 = vrot.slane %v647_v24, 4  ;;  %v668_v31 = vrot.slane %v648_v28, 4  ;;  %v1110_v57 = vpop.trf.xlu1 }
 0x231   : > { %2001 = vmatmul.msk.bf16.vlgmr.msra.gmra.mxu0 %vm1126_vm3, %v1110_v57  ;;  %2017 = vmatmul.msk.bf16.vlgmr.msra.gmra.mxu1 %vm1126_vm3, %v1110_v57 }
 0x232   : > { %671 = vst [vmem:[#allocation4 + $0x10] sm:$0xf0] %v667_v56 }
 0x233   : > { %672 = vst [vmem:[#allocation4 + $0x20] sm:$0xf0] %v668_v31 }
 0x234   : > { %v471_v35 = vpop.permute.xlu0 %470  ;;  %v865_v59 = vpop.permute.xlu2 %864 }
 0x235   : > { %v474_v38 = vsel %vm455_vm2, %v471_v35, %v473_v16  ;;  %v475_v30 = vsel %vm455_vm2, %v473_v16, %v471_v35 }
 0x236   : > { %v476_v27 = vmul.f32 %v475_v30, %v2452_v41  ;;  %v477_v22 = vmul.f32 %v474_v38, %v2455_v42 }
 0x238   : > { %482 = vst [vmem:[#allocation4 + $0x8] sm:$0xf] %v476_v27  ;;  %v2757_v39 = vpop.trf.xlu1 }
 0x239   : > { %483 = vst [vmem:[#allocation4 + $0x48] sm:$0xf] %v477_v22 }
 0x23c   : > { %v591_v40 = vpop.permute.xlu0 %590  ;;  %v814_v51 = vpop.permute.xlu2 %813 }
 0x23d   : > { %v594_v47 = vsel %vm575_vm4, %v591_v40, %v593_v32  ;;  %v595_v49 = vsel %vm575_vm4, %v593_v32, %v591_v40 }
 0x23e   : > { %v596_v45 = vmul.f32 %v595_v49, %v2486_v4  ;;  %v597_v63 = vmul.f32 %v594_v47, %v2489_v5 }
 0x240   : > { %602 = vst [vmem:[#allocation4 + $0x10] sm:$0xf] %v596_v45  ;;  %v1112_v41 = vpop.trf.xlu1 }
 0x241   : > { %603 = vst [vmem:[#allocation4 + $0x20] sm:$0xf] %v597_v63  ;;  %2002 = vmatmul.msk.bf16.gmra.mxu0 %vm1126_vm3, %v1112_v41  ;;  %2018 = vmatmul.msk.bf16.gmra.mxu1 %vm1126_vm3, %v1112_v41 }
 0x244   : > { %v743_v42 = vpop.permute.xlu0 %742  ;;  %v934_v12 = vpop.permute.xlu2 %933 }
 0x245   : > { %v746_v17 = vsel %vm727_vm6, %v743_v42, %v745_v21  ;;  %v747_v2 = vsel %vm727_vm6, %v745_v21, %v743_v42 }
 0x246   : > { %v748_v54 = vmul.f32 %v746_v17, %v2512_v43  ;;  %v749_v4 = vmul.f32 %v747_v2, %v2515_v44 }
 0x248   : > { %v768_v5 = vrot.slane %v748_v54, 4  ;;  %v769_v34 = vrot.slane %v749_v4, 4  ;;  %v1113_v26 = vpop.trf.xlu1 }
 0x24a   : > { %772 = vst [vmem:[#allocation4] sm:$0xf0] %v768_v5 }
 0x24b   : > { %773 = vst [vmem:[#allocation4 + $0x28] sm:$0xf0] %v769_v34 }
 0x24c   : > { %v863_v61 = vpop.permute.xlu0 %862 }
 0x24d   : > { %v866_v62 = vsel %vm847_vm8, %v863_v61, %v865_v59  ;;  %v867_v0 = vsel %vm847_vm8, %v865_v59, %v863_v61 }
 0x24e   : > { %v868_v50 = vmul.f32 %v866_v62, %v2561_v55  ;;  %v869_v6 = vmul.f32 %v867_v0, %v2564_v58 }
 0x250   : > { %v888_v43 = vrot.slane %v868_v50, 4  ;;  %v889_v11 = vrot.slane %v869_v6, 4  ;;  %v1114_v44 = vpop.trf.xlu1 }
 0x251   : > { %2003 = vmatmul.msk.bf16.gmra.mxu0 %vm1126_vm3, %v1114_v44  ;;  %2019 = vmatmul.msk.bf16.gmra.mxu1 %vm1126_vm3, %v1114_v44 }
 0x252   : > { %892 = vst [vmem:[#allocation4 + $0x40] sm:$0xf0] %v888_v43 }
 0x253   : > { %893 = vst [vmem:[#allocation4 + $0x38] sm:$0xf0] %v889_v11 }
 0x254   : > { %v812_v46 = vpop.permute.xlu0 %811 }
 0x255   : > { %v815_v1 = vsel %vm796_vm7, %v812_v46, %v814_v51  ;;  %v816_v20 = vsel %vm796_vm7, %v814_v51, %v812_v46 }
 0x256   : > { %v817_v55 = vmul.f32 %v815_v1, %v2541_v13  ;;  %v818_v58 = vmul.f32 %v816_v20, %v2548_v25 }
 0x258   : > { %823 = vst [vmem:[#allocation4 + $0x40] sm:$0xf] %v817_v55  ;;  %v1115_v3 = vpop.trf.xlu1 }
 0x259   : > { %824 = vst [vmem:[#allocation4 + $0x38] sm:$0xf] %v818_v58 }
 0x25c   : > { %v932_v48 = vpop.permute.xlu0 %931 }
 0x25d   : > { %v935_v52 = vsel %vm916_vm9, %v932_v48, %v934_v12  ;;  %v936_v14 = vsel %vm916_vm9, %v934_v12, %v932_v48 }
 0x25e   : > { %v937_v15 = vmul.f32 %v2600_v37, %v935_v52  ;;  %v938_v7 = vmul.f32 %v2608_v29, %v936_v14 }
 0x260   : > { %943 = vst [vmem:[#allocation4 + $0x30] sm:$0xf] %v937_v15  ;;  %v1116_v18 = vpop.trf.xlu1 }
 0x261   : > { %944 = vst [vmem:[#allocation4 + $0x18] sm:$0xf] %v938_v7  ;;  %2004 = vmatmul.msk.bf16.gmra.mxu0 %vm1126_vm3, %v1116_v18  ;;  %2020 = vmatmul.msk.bf16.gmra.mxu1 %vm1126_vm3, %v1116_v18 }
 0x268   : > { %v1117_v13 = vpop.trf.xlu1 }
 0x270   : > { %v1118_v25 = vpop.trf.xlu1 }
 0x271   : > { %2005 = vmatmul.msk.bf16.vlgmr.msrb.gmra.mxu2 %vm1126_vm3, %v1118_v25  ;;  %2021 = vmatmul.msk.bf16.vlgmr.msrb.gmra.mxu3 %vm1126_vm3, %v1118_v25 }
 0x278   : > { %v1119_v60 = vpop.trf.xlu1 }
 0x280   : > { %v1120_v36 = vpop.trf.xlu1 }
 0x281   : > { %2006 = vmatmul.msk.bf16.gmra.mxu2 %vm1126_vm3, %v1120_v36  ;;  %2022 = vmatmul.msk.bf16.gmra.mxu3 %vm1126_vm3, %v1120_v36 }
 0x288   : > { %v1121_v37 = vpop.trf.xlu1 }
 0x290   : > { %v1122_v29 = vpop.trf.xlu1 }
 0x291   : > { %2007 = vmatmul.msk.bf16.gmra.mxu2 %vm1126_vm3, %v1122_v29  ;;  %2023 = vmatmul.msk.bf16.gmra.mxu3 %vm1126_vm3, %v1122_v29 }
 0x298   : > { %v1123_v8 = vpop.trf.xlu1 }
 0x2a0   : > { %v1124_v10 = vpop.trf.xlu1 }
 0x2a1   : > { %2008 = vmatmul.msk.bf16.gmra.mxu2 %vm1126_vm3, %v1124_v10  ;;  %2024 = vmatmul.msk.bf16.gmra.mxu3 %vm1126_vm3, %v1124_v10 }
 0x2a8   : > { %v1125_v35 = vpop.trf.xlu1 }
 0x2ae   : > { %v2865_v63 = vpop.f32.mrf.mxu0  ;;  %v2881_v5 = vpop.f32.mrf.mxu1 }
 0x2b1   : > { %2009 = vmatmul.msk.bf16.gmra.mxu2 %vm1126_vm3, %v2757_v39  ;;  %2025 = vmatmul.msk.bf16.gmra.mxu3 %vm1126_vm3, %v2757_v39 }
 0x2b6   : > { %v2875_v54 = vpop.f32.mrf.mxu0  ;;  %v2889_v62 = vpop.f32.mrf.mxu1 }
 0x2b7   : > { %3462 = vst [vmem:[#allocation14_spill] sm:$0xff] %v2889_v62 }
 0x2be   : > { %v2883_v34 = vpop.f32.mrf.mxu0  ;;  %v2897_v43 = vpop.f32.mrf.mxu1 }
 0x2bf   : > { %3461 = vst [vmem:[#allocation13_spill] sm:$0xff] %v2883_v34  ;;  %v1360_v15 = vmax.f32 %v2865_v63, %v2883_v34 }
 0x2c0   : > { %3465 = vst [vmem:[#allocation17_spill] sm:$0xff] %v2897_v43 }
 0x2c1   : > { %2010 = vmatmul.msk.bf16.gmra.mxu2 %vm1126_vm3, %v1113_v26  ;;  %2026 = vmatmul.msk.bf16.gmra.mxu3 %vm1126_vm3, %v1113_v26 }
 0x2c6   : > { %v2891_v0 = vpop.f32.mrf.mxu0  ;;  %v2905_v46 = vpop.f32.mrf.mxu1 }
 0x2c7   : > { %3463 = vst [vmem:[#allocation15_spill] sm:$0xff] %v2891_v0  ;;  %v1361_v7 = vmax.f32 %v2875_v54, %v2891_v0 }
 0x2c8   : > { %3466 = vst [vmem:[#allocation18_spill] sm:$0xff] %v2905_v46 }
 0x2ce   : > { %v2899_v11 = vpop.f32.mrf.mxu0 }
 0x2d1   : > { %2011 = vmatmul.msk.bf16.gmra.mxu2 %vm1126_vm3, %v1115_v3  ;;  %2027 = vmatmul.msk.bf16.gmra.mxu3 %vm1126_vm3, %v1115_v3  ;;  %v2915_v3 = vpop.f32.mrf.mxu1 }
 0x2d6   : > { %v2909_v20 = vpop.f32.mrf.mxu0 }
 0x2d7   : > { %3467 = vst [vmem:[#allocation19_spill] sm:$0xff] %v2909_v20  ;;  %v1363_v25 = vmax.f32 %v1361_v7, %v2909_v20 }
 0x2d9   : > { %v2923_v14 = vpop.f32.mrf.mxu1 }
 0x2de   : > { %v2917_v12 = vpop.f32.mrf.mxu0 }
 0x2e1   : > { %2012 = vmatmul.msk.bf16.gmra.mxu2 %vm1126_vm3, %v1117_v13  ;;  %2028 = vmatmul.msk.bf16.gmra.mxu3 %vm1126_vm3, %v1117_v13  ;;  %v1362_v13 = vmax.f32 %v1360_v15, %v2899_v11  ;;  %v2943_v34 = vpop.f32.mrf.mxu1 }
 0x2e6   : > { %v2929_v18 = vpop.f32.mrf.mxu0 }
 0x2e7   : > { %3469 = vst [vmem:[#allocation21_spill] sm:$0xff] %v2929_v18  ;;  %v1365_v29 = vmax.f32 %v1363_v25, %v2929_v18 }
 0x2f1   : > { %2013 = vmatmul.msk.bf16.gmra.mxu2 %vm1126_vm3, %v1119_v60  ;;  %2029 = vmatmul.msk.bf16.gmra.mxu3 %vm1126_vm3, %v1119_v60 }
 0x2f4   : > { %v2815_v19 = vpop.f32.mrf.mxu2  ;;  %v2817_v53 = vpop.f32.mrf.mxu3 }
 0x2fc   : > { %v2819_v16 = vpop.f32.mrf.mxu2  ;;  %v2821_v33 = vpop.f32.mrf.mxu3 }
 0x2fd   : > { %3454 = vst [vmem:[#allocation6_spill] sm:$0xff] %v2821_v33  ;;  %v1367_v10 = vmax.f32 %v1365_v29, %v2819_v16 }
 0x301   : > { %2014 = vmatmul.msk.bf16.gmra.mxu2 %vm1126_vm3, %v1121_v37  ;;  %2030 = vmatmul.msk.bf16.gmra.mxu3 %vm1126_vm3, %v1121_v37  ;;  %v1364_v37 = vmax.f32 %v1362_v13, %v2917_v12 }
 0x304   : > { %v2825_v9 = vpop.f32.mrf.mxu2  ;;  %v2827_v23 = vpop.f32.mrf.mxu3 }
 0x30c   : > { %v2829_v24 = vpop.f32.mrf.mxu2  ;;  %v2831_v28 = vpop.f32.mrf.mxu3 }
 0x30d   : > { %3455 = vst [vmem:[#allocation7_spill] sm:$0xff] %v2831_v28  ;;  %v1369_v0 = vmax.f32 %v1367_v10, %v2829_v24 }
 0x311   : > { %2015 = vmatmul.msk.bf16.gmra.mxu2 %vm1126_vm3, %v1123_v8  ;;  %2031 = vmatmul.msk.bf16.gmra.mxu3 %vm1126_vm3, %v1123_v8  ;;  %v1366_v8 = vmax.f32 %v1364_v37, %v2815_v19 }
 0x314   : > { %v2835_v56 = vpop.f32.mrf.mxu2  ;;  %v2837_v31 = vpop.f32.mrf.mxu3 }
 0x31c   : > { %v2839_v57 = vpop.f32.mrf.mxu2  ;;  %v2841_v32 = vpop.f32.mrf.mxu3 }
 0x31d   : > { %3456 = vst [vmem:[#allocation8_spill] sm:$0xff] %v2839_v57  ;;  %v1371_v7 = vmax.f32 %v1369_v0, %v2839_v57 }
 0x31e   : > { %3457 = vst [vmem:[#allocation9_spill] sm:$0xff] %v2841_v32 }
 0x321   : > { %2016 = vmatmul.msk.bf16.gmra.mxu2 %vm1126_vm3, %v1125_v35  ;;  %2032 = vmatmul.msk.bf16.gmra.mxu3 %vm1126_vm3, %v1125_v35  ;;  %v1368_v35 = vmax.f32 %v1366_v8, %v2825_v9 }
 0x323   : > { %v1370_v15 = vmax.f32 %v1368_v35, %v2835_v56  ;;  %v1398_v35 = vmax.f32 %v2889_v62, %v2905_v46 }
 0x324   : > { %v2845_v38 = vpop.f32.mrf.mxu2  ;;  %v2847_v30 = vpop.f32.mrf.mxu3 }
 0x325   : > { %v1372_v13 = vmax.f32 %v1370_v15, %v2845_v38  ;;  %v2961_v15 = vpop.f32.mrf.mxu1 }
 0x326   : > { %3470 = vst [vmem:[#allocation22_spill] sm:$0xff] %v2961_v15 }
 0x32c   : > { %v2849_v27 = vpop.f32.mrf.mxu2  ;;  %v2851_v22 = vpop.f32.mrf.mxu3 }
 0x32d   : > { %v1373_v25 = vmax.f32 %v1371_v7, %v2849_v27 }
 0x334   : > { %v2853_v39 = vpop.f32.mrf.mxu2  ;;  %v2855_v40 = vpop.f32.mrf.mxu3 }
 0x335   : > { %v1374_v37 = vmax.f32 %v1372_v13, %v2853_v39  ;;  %v1397_v13 = vmax.f32 %v2881_v5, %v2897_v43 }
 0x33c   : > { %v2857_v47 = vpop.f32.mrf.mxu2  ;;  %v2859_v49 = vpop.f32.mrf.mxu3 }
 0x33d   : > { %3458 = vst [vmem:[#allocation10_spill] sm:$0xff] %v2859_v49  ;;  %v1375_v29 = vmax.f32 %v1373_v25, %v2857_v47  ;;  %v1400_v25 = vmax.f32 %v1398_v35, %v2923_v14 }
 0x33f   : > { %v1402_v46 = vmax.f32 %v1400_v25, %v2961_v15 }
 0x341   : > { %v1404_v43 = vmax.f32 %v1402_v46, %v2821_v33 }
 0x344   : > { %v2861_v21 = vpop.f32.mrf.mxu2  ;;  %v2863_v45 = vpop.f32.mrf.mxu3 }
 0x345   : > { %v1376_v8 = vmax.f32 %v1374_v37, %v2861_v21 }
 0x34c   : > { %v2867_v41 = vpop.f32.mrf.mxu2  ;;  %v2869_v42 = vpop.f32.mrf.mxu3 }
 0x34d   : > { %3459 = vst [vmem:[#allocation11_spill] sm:$0xff] %v2867_v41  ;;  %v1377_v10 = vmax.f32 %v1375_v29, %v2867_v41  ;;  %v1399_v41 = vmax.f32 %v1397_v13, %v2915_v3  ;;  %v1406_v13 = vmax.f32 %v1404_v43, %v2831_v28 }
 0x354   : > { %v2871_v17 = vpop.f32.mrf.mxu2  ;;  %v2873_v2 = vpop.f32.mrf.mxu3 }
 0x355   : > { %v1378_v0 = vmax.f32 %v1376_v8, %v2871_v17 }
 0x35c   : > { %v2877_v4 = vpop.f32.mrf.mxu2  ;;  %v2879_v59 = vpop.f32.mrf.mxu3 }
 0x35d   : > { %3460 = vst [vmem:[#allocation12_spill] sm:$0xff] %v2877_v4  ;;  %v1379_v57 = vmax.f32 %v1377_v10, %v2877_v4  ;;  %v1401_v4 = vmax.f32 %v1399_v41, %v2943_v34  ;;  %v1408_v41 = vmax.f32 %v1406_v13, %v2841_v32 }
 0x364   : > { %v2885_v26 = vpop.f32.mrf.mxu2  ;;  %v2887_v61 = vpop.f32.mrf.mxu3 }
 0x365   : > { %v1380_v37 = vmax.f32 %v1378_v0, %v2885_v26 }
 0x36c   : > { %v2893_v50 = vpop.f32.mrf.mxu2  ;;  %v2895_v6 = vpop.f32.mrf.mxu3 }
 0x36d   : > { %3464 = vst [vmem:[#allocation16_spill] sm:$0xff] %v2895_v6  ;;  %v1381_v29 = vmax.f32 %v1379_v57, %v2893_v50  ;;  %v1403_v57 = vmax.f32 %v1401_v4, %v2817_v53  ;;  %v1410_v4 = vmax.f32 %v1408_v41, %v2851_v22 }
 0x374   : > { %v2901_v44 = vpop.f32.mrf.mxu2  ;;  %v2903_v51 = vpop.f32.mrf.mxu3 }
 0x375   : > { %v1382_v8 = vmax.f32 %v1380_v37, %v2901_v44 }
 0x37c   : > { %v2907_v1 = vpop.f32.mrf.mxu2  ;;  %v2911_v55 = vpop.f32.mrf.mxu3 }
 0x37d   : > { %3468 = vst [vmem:[#allocation20_spill] sm:$0xff] %v2911_v55  ;;  %v1383_v10 = vmax.f32 %v1381_v29, %v2907_v1  ;;  %v1405_v29 = vmax.f32 %v1403_v57, %v2827_v23 }
 0x384   : > { %v2913_v58 = vpop.f32.mrf.mxu2  ;;  %v2919_v48 = vpop.f32.mrf.mxu3 }
 0x385   : > { %v1384_v35 = vmax.f32 %v1382_v8, %v2913_v58 }
 0x38c   : > { %v2921_v52 = vpop.f32.mrf.mxu2  ;;  %v2933_v60 = vpop.f32.mrf.mxu3 }
 0x38d   : > { %v1385_v0 = vmax.f32 %v1383_v10, %v2921_v52  ;;  %v1407_v10 = vmax.f32 %v1405_v29, %v2837_v31 }
 0x38f   : > { %v1409_v43 = vmax.f32 %v1407_v10, %v2847_v30 }
 0x391   : > { %v1411_v57 = vmax.f32 %v1409_v43, %v2855_v40 }
 0x394   : > { %v2935_v36 = vpop.f32.mrf.mxu2  ;;  %v2951_v18 = vpop.f32.mrf.mxu3 }
 0x395   : > { %v1386_v25 = vmax.f32 %v1384_v35, %v2935_v36  ;;  %v1412_v35 = vmax.f32 %v1410_v4, %v2859_v49 }
 0x397   : > { %v1414_v13 = vmax.f32 %v1412_v35, %v2869_v42 }
 0x39c   : > { %v2947_v20 = vpop.f32.mrf.mxu2  ;;  %v2974_v62 = vpop.f32.mrf.mxu3 }
 0x39d   : > { %v1387_v37 = vmax.f32 %v1385_v0, %v2947_v20 }
 0x3a4   : > { %v2963_v7 = vpop.f32.mrf.mxu2  ;;  %v2994_v28 = vpop.f32.mrf.mxu3 }
 0x3a5   : > { %v1388_v46 = vmax.f32 %v1386_v25, %v2963_v7  ;;  %v1413_v25 = vmax.f32 %v1411_v57, %v2863_v45 }
 0x3a7   : > { %v1415_v41 = vmax.f32 %v1413_v25, %v2873_v2 }
 0x3a9   : > { %v1417_v10 = vmax.f32 %v1415_v41, %v2887_v61 }
 0x3ab   : > { %v1419_v43 = vmax.f32 %v1417_v10, %v2903_v51 }
 0x3ac   : > { %v2984_v15 = vpop.f32.mrf.mxu2 }
 0x3ad   : > { %v1389_v8 = vmax.f32 %v1387_v37, %v2984_v15  ;;  %v1416_v37 = vmax.f32 %v1414_v13, %v2879_v59 }
 0x3af   : > { %v1390_v33 = vmax.f32 %v1388_v46, %v1389_v8  ;;  %v1418_v46 = vmax.f32 %v1416_v37, %v2895_v6 }
 0x3b1   : > { %v1391_v0 = vrot.slane %v1390_v33, 4  ;;  %v1420_v4 = vmax.f32 %v1418_v46, %v2911_v55  ;;  %v3471_v46 = vld [vmem:[#allocation13_spill] sm:$0xff] }
 0x3b3   : > { %v1392_v32 = vmax.f32 %v1390_v33, %v1391_v0  ;;  %v1422_v35 = vmax.f32 %v1420_v4, %v2933_v60  ;;  %v3006_v33 = vpop.f32.mrf.mxu3  ;;  %v1421_v0 = vmax.f32 %v1419_v43, %v2919_v48  ;;  %v3472_v43 = vld [vmem:[#allocation15_spill] sm:$0xff] }
 0x3b5   : > { %v1393_v29 = vrot.slane %v1392_v32, 2  ;;  %v1424_v57 = vmax.f32 %v1422_v35, %v2974_v62  ;;  %v1423_v25 = vmax.f32 %v1421_v0, %v2951_v18 }
 0x3b7   : > { %v1394_v8 = vmax.f32 %v1392_v32, %v1393_v29  ;;  %v1426_v32 = vmax.f32 %v1424_v57, %v3006_v33  ;;  %v1425_v37 = vmax.f32 %v1423_v25, %v2994_v28 }
 0x3b9   : > { %v1395_v49 = vrot.slane %v1394_v8, 1  ;;  %v1427_v4 = vmax.f32 %v1425_v37, %v1426_v32 }
 0x3bb   : > { %v3010_v13 = vmax.f32 %v1394_v8, %v1395_v49  ;;  %v1428_v25 = vrot.slane %v1427_v4, 4 }
 0x3bd   : > { %v1440_v29 = vsub.f32 %v2865_v63, %v3010_v13  ;;  %v1442_v41 = vsub.f32 %v2875_v54, %v3010_v13  ;;  %v1444_v10 = vsub.f32 %v3471_v46, %v3010_v13  ;;  %v1446_v49 = vsub.f32 %v3472_v43, %v3010_v13  ;;  %v3473_v63 = vld [vmem:[#allocation19_spill] sm:$0xff] }
 0x3be   : > { %v1448_v0 = vsub.f32 %v2899_v11, %v3010_v13  ;;  %v1450_v6 = vsub.f32 %v3473_v63, %v3010_v13  ;;  %v1452_v46 = vsub.f32 %v2917_v12, %v3010_v13  ;;  %v1429_v37 = vmax.f32 %v1427_v4, %v1428_v25  ;;  %v3475_v11 = vld [vmem:[#allocation21_spill] sm:$0xff] }
 0x3bf   : > { %v1504_v8 = vmul.f32 1.442695, %v1440_v29  ;;  %v1508_v35 = vmul.f32 1.442695, %v1442_v41  ;;  %v1512_v57 = vmul.f32 1.442695, %v1444_v10  ;;  %v1454_v43 = vsub.f32 %v3475_v11, %v3010_v13 }
 0x3c0   : > { %v1516_v54 = vmul.f32 1.442695, %v1446_v49  ;;  %v1520_v32 = vmul.f32 1.442695, %v1448_v0  ;;  %v1434_v29 = vsub.f32 -inf, %v3010_v13  ;;  %v1456_v49 = vsub.f32 %v2815_v19, %v3010_v13 }
 0x3c1   : > { %2106 = vpow2.f32 %v1504_v8  ;;  %v1524_v10 = vmul.f32 1.442695, %v1450_v6  ;;  %v1458_v12 = vsub.f32 %v2819_v16, %v3010_v13  ;;  %v1430_v4 = vrot.slane %v1429_v37, 2 }
 0x3c2   : > { %2108 = vpow2.f32 %v1508_v35  ;;  %v1528_v35 = vmul.f32 1.442695, %v1452_v46  ;;  %v1436_v0 = vmul.f32 1.442695, %v1434_v29  ;;  %v1462_v6 = vsub.f32 %v2829_v24, %v3010_v13 }
 0x3c3   : > { %2110 = vpow2.f32 %v1512_v57  ;;  %v1460_v57 = vsub.f32 %v2825_v9, %v3010_v13  ;;  %v1532_v19 = vmul.f32 1.442695, %v1454_v43  ;;  %v1464_v16 = vsub.f32 %v2835_v56, %v3010_v13  ;;  %v3477_v9 = vld [vmem:[#allocation8_spill] sm:$0xff] }
 0x3c4   : > { %2112 = vpow2.f32 %v1516_v54  ;;  %v1536_v54 = vmul.f32 1.442695, %v1456_v49  ;;  %v1466_v29 = vsub.f32 %v3477_v9, %v3010_v13  ;;  %v1540_v11 = vmul.f32 1.442695, %v1458_v12 }
 0x3c5   : > { %2114 = vpow2.f32 %v1520_v32  ;;  %v1468_v24 = vsub.f32 %v2845_v38, %v3010_v13  ;;  %v1470_v56 = vsub.f32 %v2849_v27, %v3010_v13  ;;  %v1548_v49 = vmul.f32 1.442695, %v1462_v6 }
 0x3c6   : > { %2116 = vpow2.f32 %v1524_v10  ;;  %v1544_v10 = vmul.f32 1.442695, %v1460_v57  ;;  %v1552_v12 = vmul.f32 1.442695, %v1464_v16  ;;  %v1474_v38 = vsub.f32 %v2857_v47, %v3010_v13 }
 0x3c7   : > { %v3030_v41 = vpop.eup %2106  ;;  %2118 = vpow2.f32 %v1528_v35  ;;  %v1560_v27 = vmul.f32 1.442695, %v1468_v24  ;;  %v1480_v47 = vsub.f32 %v2871_v17, %v3010_v13 }
 0x3c8   : > { %3474 = vst [vmem:[#allocation13_spill] sm:$0xff] %v3030_v41  ;;  %v3034_v8 = vpop.eup %2108  ;;  %2120 = vpow2.f32 %v1436_v0  ;;  %v1556_v0 = vmul.f32 1.442695, %v1466_v29 }
 0x3c9   : > { %3476 = vst [vmem:[#allocation15_spill] sm:$0xff] %v3034_v8  ;;  %v1634_v25 = vadd.f32 %v3034_v8, %v3030_v41  ;;  %v3044_v63 = vpop.eup %2110  ;;  %v1431_v8 = vmax.f32 %v1429_v37, %v1430_v4  ;;  %2122 = vpow2.f32 %v1532_v19  ;;  %v1476_v4 = vsub.f32 %v2861_v21, %v3010_v13  ;;  %v3478_v19 = vld [vmem:[#allocation11_spill] sm:$0xff] }
 0x3ca   : > { %v3051_v32 = vpop.eup %2112  ;;  %2124 = vpow2.f32 %v1536_v54  ;;  %v1478_v16 = vsub.f32 %v3478_v19, %v3010_v13  ;;  %v1564_v54 = vmul.f32 1.442695, %v1470_v56 }
 0x3cb   : > { %v1635_v46 = vadd.f32 %v3044_v63, %v1634_v25  ;;  %v3058_v41 = vpop.eup %2114  ;;  %v1472_v25 = vsub.f32 %v2853_v39, %v3010_v13  ;;  %2126 = vpow2.f32 %v1540_v11  ;;  %v1432_v6 = vrot.slane %v1431_v8, 1  ;;  %v3480_v11 = vld [vmem:[#allocation12_spill] sm:$0xff] }
 0x3cc   : > { %v3065_v35 = vpop.eup %2116  ;;  %2128 = vpow2.f32 %v1544_v10  ;;  %v1482_v24 = vsub.f32 %v3480_v11, %v3010_v13  ;;  %v1484_v10 = vsub.f32 %v2885_v26, %v3010_v13  ;;  %v1500_v26 = vsub.f32 %v2963_v7, %v3010_v13 }
 0x3cd   : > { %v1636_v43 = vadd.f32 %v3051_v32, %v1635_v46  ;;  %v3072_v39 = vpop.eup %2118  ;;  %2130 = vpow2.f32 %v1548_v49  ;;  %v1568_v21 = vmul.f32 1.442695, %v1472_v25  ;;  %v1576_v49 = vmul.f32 1.442695, %v1476_v4 }
 0x3ce   : > { %v3076_v46 = vpop.eup %2120  ;;  %2132 = vpow2.f32 %v1552_v12  ;;  %v3090_v12 = vmax.f32 %v1431_v8, %v1432_v6  ;;  %v1502_v8 = vsub.f32 %v2984_v15, %v3010_v13  ;;  %v1498_v15 = vsub.f32 %v2947_v20, %v3010_v13 }
 0x3cf   : > { %v1637_v37 = vadd.f32 %v3058_v41, %v1636_v43  ;;  %3479 = vst [vmem:[#allocation19_spill] sm:$0xff] %v3076_v46  ;;  %v3081_v29 = vpop.eup %2122  ;;  %2134 = vpow2.f32 %v1556_v0  ;;  %v1572_v43 = vmul.f32 1.442695, %v1474_v38  ;;  %v1584_v38 = vmul.f32 1.442695, %v1480_v47 }
 0x3d0   : > { %v3087_v56 = vpop.eup %2124  ;;  %2136 = vpow2.f32 %v1560_v27  ;;  %v1588_v27 = vmul.f32 1.442695, %v1482_v24  ;;  %v1441_v7 = vsub.f32 %v2881_v5, %v3090_v12  ;;  %v1624_v24 = vmul.f32 1.442695, %v1500_v26  ;;  %v3483_v26 = vld [vmem:[#allocation18_spill] sm:$0xff] }
 0x3d1   : > { %v1638_v57 = vadd.f32 %v3065_v35, %v1637_v37  ;;  %v3092_v25 = vpop.eup %2126  ;;  %v1496_v37 = vsub.f32 %v2935_v36, %v3010_v13  ;;  %2138 = vpow2.f32 %v1564_v54  ;;  %v1592_v36 = vmul.f32 1.442695, %v1484_v10 }
 0x3d2   : > { %v3096_v19 = vpop.eup %2128  ;;  %2140 = vpow2.f32 %v1568_v21  ;;  %v3481_v21 = vld [vmem:[#allocation14_spill] sm:$0xff]  ;;  %v1628_v5 = vmul.f32 1.442695, %v1502_v8  ;;  %v1506_v20 = vmul.f32 1.442695, %v1441_v7  ;;  %v1449_v7 = vsub.f32 %v2915_v3, %v3090_v12 }
 0x3d3   : > { %v1639_v9 = vadd.f32 %v3072_v39, %v1638_v57  ;;  %v1580_v57 = vmul.f32 1.442695, %v1478_v16  ;;  %v3101_v0 = vpop.eup %2130  ;;  %2142 = vpow2.f32 %v1572_v43  ;;  %v1616_v47 = vmul.f32 1.442695, %v1496_v37 }
 0x3d4   : > { %v3105_v6 = vpop.eup %2132  ;;  %2144 = vpow2.f32 %v1576_v49  ;;  %v3482_v49 = vld [vmem:[#allocation17_spill] sm:$0xff] }
 0x3d5   : > { %v1640_v17 = vadd.f32 %v3081_v29, %v1639_v9  ;;  %v3110_v54 = vpop.eup %2134  ;;  %2146 = vpow2.f32 %v1580_v57  ;;  %v1443_v9 = vsub.f32 %v3481_v21, %v3090_v12  ;;  %v1492_v57 = vsub.f32 %v2913_v58, %v3010_v13 }
 0x3d6   : > { %v3114_v11 = vpop.eup %2136  ;;  %2148 = vpow2.f32 %v1584_v38  ;;  %v1494_v21 = vsub.f32 %v2921_v52, %v3010_v13 }
 0x3d7   : > { %v1641_v4 = vadd.f32 %v3087_v56, %v1640_v17  ;;  %v3119_v43 = vpop.eup %2138  ;;  %2150 = vpow2.f32 %v1588_v27  ;;  %v1445_v17 = vsub.f32 %v3482_v49, %v3090_v12  ;;  %v1510_v27 = vmul.f32 1.442695, %v1443_v9 }
 0x3d8   : > { %v3123_v37 = vpop.eup %2140  ;;  %2152 = vpow2.f32 %v1592_v36  ;;  %v1620_v49 = vmul.f32 1.442695, %v1498_v15  ;;  %v1488_v9 = vsub.f32 %v2901_v44, %v3010_v13  ;;  %v1486_v15 = vsub.f32 %v2893_v50, %v3010_v13 }
 0x3d9   : > { %v1642_v16 = vadd.f32 %v3092_v25, %v1641_v4  ;;  %v3128_v38 = vpop.eup %2142  ;;  %2154 = vpow2.f32 %v1616_v47  ;;  %v1514_v47 = vmul.f32 1.442695, %v1445_v17  ;;  %v1490_v17 = vsub.f32 %v2907_v1, %v3010_v13  ;;  %v3484_v1 = vld [vmem:[#allocation22_spill] sm:$0xff] }
 0x3da   : > { %v3132_v8 = vpop.eup %2144  ;;  %2156 = vpow2.f32 %v1624_v24  ;;  %v1451_v24 = vsub.f32 %v2923_v14, %v3090_v12  ;;  %v1612_v44 = vmul.f32 1.442695, %v1494_v21  ;;  %v1522_v50 = vmul.f32 1.442695, %v1449_v7 }
 0x3db   : > { %v1643_v10 = vadd.f32 %v3096_v19, %v1642_v16  ;;  %v1447_v16 = vsub.f32 %v3483_v26, %v3090_v12  ;;  %v3137_v36 = vpop.eup %2146  ;;  %2158 = vpow2.f32 %v1628_v5  ;;  %v1608_v26 = vmul.f32 1.442695, %v1492_v57 }
 0x3dc   : > { %2160 = vpow2.f32 %v1506_v20  ;;  %v1453_v20 = vsub.f32 %v2943_v34, %v3090_v12  ;;  %v1600_v14 = vmul.f32 1.442695, %v1488_v9  ;;  %v1455_v13 = vsub.f32 %v3484_v1, %v3090_v12 }
 0x3dd   : > { %v1644_v4 = vadd.f32 %v3101_v0, %v1643_v10  ;;  %v3141_v10 = vpop.eup %2148  ;;  %2162 = vpow2.f32 %v1510_v27  ;;  %v1518_v3 = vmul.f32 1.442695, %v1447_v16  ;;  %v1604_v55 = vmul.f32 1.442695, %v1490_v17 }
 0x3de   : > { %v3146_v52 = vpop.eup %2150  ;;  %2164 = vpow2.f32 %v1620_v49  ;;  %v1596_v49 = vmul.f32 1.442695, %v1486_v15  ;;  %v1530_v9 = vmul.f32 1.442695, %v1453_v20  ;;  %v1534_v20 = vmul.f32 1.442695, %v1455_v13 }
 0x3df   : > { %v1645_v58 = vadd.f32 %v3105_v6, %v1644_v4  ;;  %v3152_v5 = vpop.eup %2152  ;;  %2166 = vpow2.f32 %v1514_v47  ;;  %v1457_v47 = vsub.f32 %v2817_v53, %v3090_v12  ;;  %v3486_v53 = vld [vmem:[#allocation6_spill] sm:$0xff] }
 0x3e0   : > { %v3157_v4 = vpop.eup %2154  ;;  %2168 = vpow2.f32 %v1608_v26  ;;  %v1724_v26 = vpack.c.bf16 %v3119_v43, %v3114_v11 }
 0x3e1   : > { %v1646_v46 = vadd.f32 %v3110_v54, %v1645_v58  ;;  %v3161_v58 = vpop.eup %2156  ;;  %2170 = vpow2.f32 %v1518_v3  ;;  %v1538_v1 = vmul.f32 1.442695, %v1457_v47 }
 0x3e2   : > { %v3164_v27 = vpop.eup %2158  ;;  %2172 = vpow2.f32 %v1612_v44  ;;  %v1459_v44 = vsub.f32 %v3486_v53, %v3090_v12  ;;  %1742 = vmatpush.bf16.msrb.mxu0 %v1724_v26 }
 0x3e3   : > { %v1647_v57 = vadd.f32 %v3114_v11, %v1646_v46  ;;  %v1526_v46 = vmul.f32 1.442695, %v1451_v24  ;;  %v3168_v21 = vpop.eup %2160  ;;  %2174 = vpow2.f32 %v1522_v50  ;;  %v1740_v3 = vpack.c.bf16 %v3164_v27, %v3161_v58 }
 0x3e4   : > { %v3171_v7 = vpop.eup %2162  ;;  %2176 = vpow2.f32 %v1600_v14  ;;  %v1542_v47 = vmul.f32 1.442695, %v1459_v44 }
 0x3e5   : > { %v1648_v16 = vadd.f32 %v3119_v43, %v1647_v57  ;;  %3485 = vst [vmem:[#allocation21_spill] sm:$0xff] %v3171_v7  ;;  %v3177_v57 = vpop.eup %2164  ;;  %v1671_v15 = vadd.f32 %v3171_v7, %v3168_v21  ;;  %2178 = vpow2.f32 %v1526_v46  ;;  %1765 = vmatpush.bf16.msrb.mxu1 %v1740_v3  ;;  %v1722_v46 = vpack.c.bf16 %v3110_v54, %v3105_v6 }
 0x3e6   : > { %v3184_v17 = vpop.eup %2166  ;;  %2180 = vpow2.f32 %v1604_v55  ;;  %v1738_v26 = vpack.c.bf16 %v3177_v57, %v3157_v4  ;;  %v1465_v54 = vsub.f32 %v2837_v31, %v3090_v12  ;;  %v1471_v31 = vsub.f32 %v2851_v22, %v3090_v12 }
 0x3e7   : > { %v1649_v34 = vadd.f32 %v3123_v37, %v1648_v16  ;;  %v3188_v11 = vpop.eup %2168  ;;  %v1672_v50 = vadd.f32 %v3184_v17, %v1671_v15  ;;  %v1461_v16 = vsub.f32 %v2827_v23, %v3090_v12  ;;  %2182 = vpow2.f32 %v1530_v9  ;;  %v3487_v15 = vld [vmem:[#allocation7_spill] sm:$0xff]  ;;  %1743 = vmatpush.bf16.msrb.mxu0 %v1722_v46 }
 0x3e8   : > { %v3192_v14 = vpop.eup %2170  ;;  %2184 = vpow2.f32 %v1596_v49  ;;  %v1463_v23 = vsub.f32 %v3487_v15, %v3090_v12  ;;  %v3488_v49 = vld [vmem:[#allocation9_spill] sm:$0xff]  ;;  %v1477_v22 = vsub.f32 %v2863_v45, %v3090_v12  ;;  %v1503_v45 = vsub.f32 %v3006_v33, %v3090_v12 }
 0x3e9   : > { %v1650_v24 = vadd.f32 %v3128_v38, %v1649_v34  ;;  %v3198_v13 = vpop.eup %2172  ;;  %v1673_v34 = vadd.f32 %v3192_v14, %v1672_v50  ;;  %2186 = vpow2.f32 %v1534_v20  ;;  %v1467_v3 = vsub.f32 %v3488_v49, %v3090_v12  ;;  %1766 = vmatpush.bf16.msrb.mxu1 %v1738_v26 }
 0x3ea   : > { %v1469_v50 = vsub.f32 %v2847_v30, %v3090_v12  ;;  %2188 = vpow2.f32 %v1538_v1  ;;  %v1546_v44 = vmul.f32 1.442695, %v1461_v16  ;;  %v1720_v20 = vpack.c.bf16 %v3101_v0, %v3096_v19  ;;  %v3489_v16 = vld [vmem:[#allocation10_spill] sm:$0xff] }
 0x3eb   : > { %v1651_v43 = vadd.f32 %v3132_v8, %v1650_v24  ;;  %v3204_v24 = vpop.eup %2174  ;;  %v1473_v30 = vsub.f32 %v2855_v40, %v3090_v12  ;;  %v1475_v1 = vsub.f32 %v3489_v16, %v3090_v12  ;;  %2190 = vpow2.f32 %v1542_v47 }
 0x3ec   : > { %v2177_v9 = vpop.eup %2176  ;;  %v1674_v53 = vadd.f32 %v3204_v24, %v1673_v34  ;;  %v1736_v34 = vpack.c.bf16 %v3198_v13, %v3188_v11  ;;  %v1550_v19 = vmul.f32 1.442695, %v1463_v23  ;;  %1744 = vmatpush.bf16.msrb.mxu0 %v1720_v20  ;;  %v1481_v40 = vsub.f32 %v2873_v2, %v3090_v12 }
 0x3ed   : > { %v1652_v55 = vadd.f32 %v3137_v36, %v1651_v43  ;;  %v3214_v43 = vpop.eup %2178  ;;  %2192 = vpow2.f32 %v1546_v44  ;;  %v1554_v23 = vmul.f32 1.442695, %v1465_v54  ;;  %v1718_v47 = vpack.c.bf16 %v3092_v25, %v3087_v56 }
 0x3ee   : > { %v2181_v46 = vpop.eup %2180  ;;  %v1675_v15 = vadd.f32 %v3214_v43, %v1674_v53  ;;  %1767 = vmatpush.bf16.msrb.mxu1 %v1736_v34  ;;  %v1497_v34 = vsub.f32 %v2951_v18, %v3090_v12  ;;  %2194 = vpow2.f32 %v1550_v19  ;;  %v1558_v54 = vmul.f32 1.442695, %v1467_v3 }
 0x3ef   : > { %v1653_v6 = vadd.f32 %v3141_v10, %v1652_v55  ;;  %v3226_v26 = vpop.eup %2182  ;;  %v1734_v16 = vpack.c.bf16 %v2181_v46, %v2177_v9  ;;  %v1501_v56 = vsub.f32 %v2994_v28, %v3090_v12  ;;  %v1562_v25 = vmul.f32 1.442695, %v1469_v50 }
 0x3f0   : > { %v2185_v0 = vpop.eup %2184  ;;  %v1676_v53 = vadd.f32 %v3226_v26, %v1675_v15  ;;  %1745 = vmatpush.bf16.msrb.mxu0 %v1718_v47  ;;  %2196 = vpow2.f32 %v1554_v23  ;;  %v1566_v15 = vmul.f32 1.442695, %v1471_v31  ;;  %v1716_v18 = vpack.c.bf16 %v3081_v29, %v3072_v39 }
 0x3f1   : > { %v1654_v55 = vadd.f32 %v3146_v52, %v1653_v6  ;;  %v3238_v7 = vpop.eup %2186  ;;  %v1570_v19 = vmul.f32 1.442695, %v1473_v30  ;;  %v1732_v28 = vpack.c.bf16 %v2185_v0, %v3152_v5  ;;  %v1493_v47 = vsub.f32 %v2919_v48, %v3090_v12 }
 0x3f2   : > { %v3247_v49 = vpop.eup %2188  ;;  %1768 = vmatpush.bf16.msrb.mxu1 %v1734_v16  ;;  %2198 = vpow2.f32 %v1558_v54  ;;  %v1574_v33 = vmul.f32 1.442695, %v1475_v1  ;;  %v1626_v39 = vmul.f32 1.442695, %v1501_v56  ;;  %v1630_v30 = vmul.f32 1.442695, %v1503_v45 }
 0x3f3   : > { %v1655_v6 = vadd.f32 %v3152_v5, %v1654_v55  ;;  %v1677_v55 = vadd.f32 %v3238_v7, %v1676_v53  ;;  %v3256_v53 = vpop.eup %2190  ;;  %2200 = vpow2.f32 %v1562_v25  ;;  %v1618_v5 = vmul.f32 1.442695, %v1497_v34 }
 0x3f4   : > { %v3264_v50 = vpop.eup %2192  ;;  %1746 = vmatpush.bf16.msrb.mxu0 %v1716_v18  ;;  %2202 = vpow2.f32 %v1566_v15  ;;  %v1714_v48 = vpack.c.bf16 %v3065_v35, %v3058_v41  ;;  %v1489_v23 = vsub.f32 %v2903_v51, %v3090_v12  ;;  %v1578_v35 = vmul.f32 1.442695, %v1477_v22 }
 0x3f5   : > { %v1656_v20 = vadd.f32 %v2185_v0, %v1655_v6  ;;  %v1678_v6 = vadd.f32 %v3247_v49, %v1677_v55  ;;  %2204 = vpow2.f32 %v1570_v19  ;;  %v1495_v55 = vsub.f32 %v2933_v60, %v3090_v12 }
 0x3f6   : > { %1769 = vmatpush.bf16.msrb.mxu1 %v1732_v28  ;;  %2206 = vpow2.f32 %v1574_v33  ;;  %v1610_v51 = vmul.f32 1.442695, %v1493_v47  ;;  %v1712_v60 = vpack.c.bf16 %v3051_v32, %v3044_v63  ;;  %v1728_v22 = vpack.c.bf16 %v3137_v36, %v3132_v8  ;;  %v1089_v33 = vld [vmem:[#allocation4 + $0x20] sm:$0xff] }
 0x3f7   : > { %v1657_v44 = vadd.f32 %v2177_v9, %v1656_v20  ;;  %v1679_v9 = vadd.f32 %v3256_v53, %v1678_v6  ;;  %v1499_v20 = vsub.f32 %v2974_v62, %v3090_v12  ;;  %2208 = vpow2.f32 %v1626_v39  ;;  %v1088_v6 = vld [vmem:[#allocation4 + $0x10] sm:$0xff] }
 0x3f8   : > { %1747 = vmatpush.bf16.msrb.mxu0 %v1714_v48  ;;  %2210 = vpow2.f32 %v1630_v30  ;;  %v1614_v25 = vmul.f32 1.442695, %v1495_v55  ;;  %v1602_v2 = vmul.f32 1.442695, %v1489_v23  ;;  %v3495_v39 = vld [vmem:[#allocation16_spill] sm:$0xff] }
 0x3f9   : > { %v1658_v3 = vadd.f32 %v2181_v46, %v1657_v44  ;;  %v1680_v29 = vadd.f32 %v3264_v50, %v1679_v9  ;;  %v3272_v46 = vpop.eup %2194  ;;  %v1622_v45 = vmul.f32 1.442695, %v1499_v20  ;;  %2212 = vpow2.f32 %v1618_v5  ;;  %v3491_v44 = vld [vmem:[#allocation20_spill] sm:$0xff]  ;;  %v1086_v20 = vld [vmem:[#allocation4 + $0x8] sm:$0xff] }
 0x3fa   : > { %v3280_v0 = vpop.eup %2196  ;;  %v1491_v56 = vsub.f32 %v3491_v44, %v3090_v12  ;;  %v1726_v9 = vpack.c.bf16 %v3128_v38, %v3123_v37  ;;  %v3323_v30 = vpack.c.bf16 %v1088_v6, %v1086_v20  ;;  %v1090_v20 = vld [vmem:[#allocation4] sm:$0xff] }
 0x3fb   : > { %v1659_v31 = vadd.f32 %v3188_v11, %v1658_v3  ;;  %v1681_v1 = vadd.f32 %v3272_v46, %v1680_v29  ;;  %v1730_v11 = vpack.c.bf16 %v3146_v52, %v3141_v10  ;;  %v3288_v16 = vpop.eup %2198  ;;  %v3490_v10 = vsub.f32 %v2869_v42, %v3090_v12  ;;  %v3494_v3 = vld [vmem:[#allocation15_spill] sm:$0xff] }
 0x3fc   : > { %v2201_v15 = vpop.eup %2200  ;;  %v1586_v42 = vmul.f32 1.442695, %v1481_v40  ;;  %2214 = vpow2.f32 %v1622_v45  ;;  %1748 = vmatpush.bf16.msrb.mxu0 %v1712_v60  ;;  %v3493_v40 = vld [vmem:[#allocation13_spill] sm:$0xff]  ;;  %v1487_v29 = vsub.f32 %v3495_v39, %v3090_v12  ;;  %v1606_v5 = vmul.f32 1.442695, %v1491_v56 }
 0x3fd   : > { %v1660_v62 = vadd.f32 %v3198_v13, %v1659_v31  ;;  %v1682_v13 = vadd.f32 %v3280_v0, %v1681_v1  ;;  %1770 = vmatpush.bf16.msrb.mxu1 %v1730_v11  ;;  %v1582_v52 = vmul.f32 1.442695, %v3490_v10  ;;  %v2203_v54 = vpop.eup %2202  ;;  %2216 = vpow2.f32 %v1578_v35 }
 0x3fe   : > { %v3304_v63 = vpop.eup %2204  ;;  %v1710_v19 = vpack.c.bf16 %v3494_v3, %v3493_v40  ;;  %v1725_v47 = vpack.c.bf16 %v2203_v54, %v2201_v15  ;;  %v3496_v11 = vsub.f32 %v2887_v61, %v3090_v12 }
 0x3ff   : > { %v1661_v41 = vadd.f32 %v3157_v4, %v1660_v62  ;;  %v1683_v4 = vadd.f32 %v3288_v16, %v1682_v13  ;;  %v3310_v18 = vpop.eup %2206  ;;  %2218 = vpow2.f32 %v1582_v52  ;;  %v1087_v62 = vld [vmem:[#allocation4 + $0x48] sm:$0xff]  ;;  %v1723_v13 = vpack.c.bf16 %v3288_v16, %v3280_v0 }
 0x400   : > { %v3316_v28 = vpop.eup %2208  ;;  %2220 = vpow2.f32 %v1610_v51  ;;  %1749 = vmatpush.bf16.msrb.mxu0 %v1710_v19  ;;  %v1594_v23 = vmul.f32 1.442695, %v3496_v11  ;;  %v3335_v55 = vpack.c.bf16 %v1089_v33, %v1087_v62  ;;  %v1598_v52 = vmul.f32 1.442695, %v1487_v29 }
 0x401   : > { %v1662_v34 = vadd.f32 %v3177_v57, %v1661_v41  ;;  %v3492_v57 = vsub.f32 %v2879_v59, %v3090_v12  ;;  %v1684_v36 = vadd.f32 %v2201_v15, %v1683_v4  ;;  %1771 = vmatpush.bf16.msrb.mxu1 %v1728_v22  ;;  %v3319_v31 = vpop.eup %2210  ;;  %2222 = vpow2.f32 %v1614_v25 }
 0x402   : > { %v3325_v37 = vpop.eup %2212  ;;  %2224 = vpow2.f32 %v1586_v42  ;;  %v1741_v48 = vpack.c.bf16 %v3319_v31, %v3316_v28  ;;  %v1721_v16 = vpack.c.bf16 %v3272_v46, %v3264_v50 }
 0x403   : > { %v1663_v32 = vadd.f32 %v3161_v58, %v1662_v34  ;;  %v1590_v8 = vmul.f32 1.442695, %v3492_v57  ;;  %v1685_v59 = vadd.f32 %v2203_v54, %v1684_v36  ;;  %v3330_v1 = vpop.eup %2214  ;;  %1750 = vmatmul.bf16.vlgmr.msrb.gmra.mxu0 %v3323_v30  ;;  %v3497_v57 = vld [vmem:[#allocation19_spill] sm:$0xff] }
 0x404   : > { %1788 = vmatpush.bf16.msra.mxu0 %v1725_v47  ;;  %v3337_v45 = vpop.eup %2216  ;;  %v1739_v15 = vpack.c.bf16 %v3330_v1, %v3325_v37  ;;  %v1093_v47 = vld [vmem:[#allocation4 + $0x38] sm:$0xff] }
 0x405   : > { %v1664_v58 = vadd.f32 %v3164_v27, %v1663_v32  ;;  %v1686_v27 = vadd.f32 %v3304_v63, %v1685_v59  ;;  %1772 = vmatpush.bf16.msrb.mxu1 %v1726_v9  ;;  %2226 = vpow2.f32 %v1590_v8  ;;  %v3343_v10 = vpop.eup %2218  ;;  %v3353_v8 = vmul.f32 0.0, %v3497_v57  ;;  %v1092_v9 = vld [vmem:[#allocation4 + $0x40] sm:$0xff] }
 0x406   : > { %2228 = vpow2.f32 %v1602_v2  ;;  %v2221_v61 = vpop.eup %2220  ;;  %v1719_v2 = vpack.c.bf16 %v3256_v53, %v3247_v49  ;;  %v1717_v59 = vpack.c.bf16 %v3238_v7, %v3226_v26  ;;  %v1098_v29 = vpack.c.bf16 %v1092_v9, %v1090_v20  ;;  %v1091_v49 = vld [vmem:[#allocation4 + $0x28] sm:$0xff] }
 0x407   : > { %v1665_v38 = vrot.slane %v1664_v58, 4  ;;  %v1687_v35 = vadd.f32 %v3310_v18, %v1686_v27  ;;  %2230 = vpow2.f32 %v1606_v5  ;;  %v2223_v34 = vpop.eup %2222  ;;  %v1099_v53 = vpack.c.bf16 %v1093_v47, %v1091_v49 }
 0x408   : > { %1773 = vmatmul.bf16.vlgmr.msrb.gmra.mxu1 %v3335_v55  ;;  %1789 = vmatpush.bf16.msra.mxu0 %v1723_v13  ;;  %2232 = vpow2.f32 %v1594_v23  ;;  %v2225_v4 = vpop.eup %2224  ;;  %v1737_v25 = vpack.c.bf16 %v2223_v34, %v2221_v61  ;;  %v1713_v7 = vpack.c.bf16 %v3192_v14, %v3184_v17  ;;  %v1729_v11 = vpack.c.bf16 %v3343_v10, %v3337_v45 }
 0x409   : > { %v1666_v41 = vadd.f32 %v1665_v38, %v1664_v58  ;;  %1811 = vmatpush.bf16.msra.mxu1 %v1741_v48  ;;  %v1688_v60 = vadd.f32 %v3337_v45, %v1687_v35  ;;  %2234 = vpow2.f32 %v1598_v52  ;;  %v1715_v38 = vpack.c.bf16 %v3214_v43, %v3204_v24  ;;  %v3498_v24 = vld [vmem:[#allocation21_spill] sm:$0xff] }
 0x40a   : > { %v1435_v23 = vsub.f32 -inf, %v3090_v12  ;;  %v1711_v43 = vpack.c.bf16 %v3498_v24, %v3168_v21  ;;  %v1727_v17 = vpack.c.bf16 %v3310_v18, %v3304_v63  ;;  %v1095_v45 = vld [vmem:[#allocation4 + $0x18] sm:$0xf] }
 0x40b   : > { %v1667_v51 = vrot.slane %v1666_v41, 2  ;;  %v1689_v0 = vadd.f32 %v3343_v10, %v1688_v60  ;;  %v2227_v54 = vpop.eup %2226 }
 0x40c   : > { %v2229_v44 = vpop.eup %2228  ;;  %1790 = vmatpush.bf16.msra.mxu0 %v1721_v16  ;;  %v1731_v48 = vpack.c.bf16 %v2227_v54, %v2225_v4  ;;  %v1438_v14 = vmul.f32 1.442695, %v1435_v23 }
 0x40d   : > { %v1668_v22 = vadd.f32 %v1667_v51, %v1666_v41  ;;  %1812 = vmatpush.bf16.msra.mxu1 %v1739_v15  ;;  %v1690_v42 = vadd.f32 %v2225_v4, %v1689_v0  ;;  %v2231_v32 = vpop.eup %2230 }
 0x40e   : > { %v2233_v40 = vpop.eup %2232  ;;  %v1735_v3 = vpack.c.bf16 %v2231_v32, %v2229_v44  ;;  %2236 = vpow2.f32 %v1438_v14 }
 0x40f   : > { %v1669_v56 = vrot.slane %v1668_v22, 1  ;;  %v1691_v6 = vadd.f32 %v2227_v54, %v1690_v42  ;;  %v2235_v19 = vpop.eup %2234 }
 0x410   : > { %1791 = vmatpush.bf16.msra.mxu0 %v1719_v2  ;;  %v1733_v39 = vpack.c.bf16 %v2235_v19, %v2233_v40 }
 0x411   : > { %v1670_v36 = vadd.f32 %v1669_v56, %v1668_v22  ;;  %1813 = vmatpush.bf16.msra.mxu1 %v1737_v25  ;;  %v1692_v46 = vadd.f32 %v2233_v40, %v1691_v6 }
 0x413   : > { %v1708_v50 = vadd.f32 %v1670_v36, %v3353_v8  ;;  %v1693_v58 = vadd.f32 %v2235_v19, %v1692_v46  ;;  %1755 = vmatmul.bf16.gmra.mxu0 %v1098_v29 }
 0x414   : > { %1792 = vmatpush.bf16.msra.mxu0 %v1717_v59 }
 0x415   : > { %1814 = vmatpush.bf16.msra.mxu1 %v1735_v3  ;;  %v1694_v33 = vadd.f32 %v2229_v44, %v1693_v58  ;;  %2238 = vrcp.f32 %v1708_v50 }
 0x417   : > { %v1695_v5 = vadd.f32 %v2231_v32, %v1694_v33 }
 0x418   : > { %1778 = vmatmul.bf16.gmra.mxu1 %v1099_v53  ;;  %1793 = vmatpush.bf16.msra.mxu0 %v1715_v38 }
 0x419   : > { %1815 = vmatpush.bf16.msra.mxu1 %v1733_v39  ;;  %v1696_v27 = vadd.f32 %v2221_v61, %v1695_v5 }
 0x41b   : > { %v1697_v62 = vadd.f32 %v2223_v34, %v1696_v27 }
 0x41c   : > { %1794 = vmatpush.bf16.msra.mxu0 %v1713_v7 }
 0x41d   : > { %1816 = vmatpush.bf16.msra.mxu1 %v1731_v48  ;;  %v1698_v26 = vadd.f32 %v3325_v37, %v1697_v62  ;;  %v1094_v37 = vld [vmem:[#allocation4 + $0x30] sm:$0xf] }
 0x41e   : > { %v1100_v12 = vpack.c.bf16 %v1094_v37, %v1094_v37 }
 0x41f   : > { %v1699_v41 = vadd.f32 %v3330_v1, %v1698_v26  ;;  %v1101_v1 = vpack.c.bf16 %v1095_v45, %v1095_v45 }
 0x420   : > { %1795 = vmatpush.bf16.msra.mxu0 %v1711_v43 }
 0x421   : > { %1817 = vmatpush.bf16.msra.mxu1 %v1729_v11  ;;  %v1700_v35 = vadd.f32 %v3316_v28, %v1699_v41  ;;  %v2237_v28 = vpop.eup %2236 }
 0x422   : > { %v3375_v60 = vmul.f32 0.0, %v2237_v28  ;;  %v2239_v22 = vpop.eup %2238 }
 0x423   : > { %v1701_v13 = vadd.f32 %v3319_v31, %v1700_v35  ;;  %1760 = vmatmul.bf16.gmra.mxu0 %v1100_v12 }
 0x425   : > { %1818 = vmatpush.bf16.msra.mxu1 %v1727_v17  ;;  %v1702_v10 = vrot.slane %v1701_v13, 4 }
 0x427   : > { %v1703_v52 = vadd.f32 %v1702_v10, %v1701_v13 }
 0x428   : > { %1783 = vmatmul.bf16.gmra.mxu1 %v1101_v1 }
 0x429   : > { %v1704_v21 = vrot.slane %v1703_v52, 2 }
 0x42b   : > { %v1705_v61 = vadd.f32 %v1704_v21, %v1703_v52 }
 0x42d   : > { %v1706_v51 = vrot.slane %v1705_v61, 1 }
 0x42f   : > { %v1707_v63 = vadd.f32 %v1706_v51, %v1705_v61 }
 0x431   : > { %v1709_v18 = vadd.f32 %v1707_v63, %v3375_v60 }
 0x433   : > { %1796 = vmatmul.bf16.vlgmr.msra.gmra.mxu0 %v3323_v30  ;;  %2240 = vrcp.f32 %v1709_v18 }
 0x438   : > { %1819 = vmatmul.bf16.vlgmr.msra.gmra.mxu1 %v3335_v55 }
 0x439   : > { %v2241_v49 = vpop.eup %2240 }
 0x443   : > { %1801 = vmatmul.bf16.gmra.mxu0 %v1098_v29 }
 0x448   : > { %1824 = vmatmul.bf16.gmra.mxu1 %v1099_v53 }
 0x453   : > { %1806 = vmatmul.bf16.gmra.mxu0 %v1100_v12 }
 0x458   : > { %1829 = vmatmul.bf16.gmra.mxu1 %v1101_v1 }
 0x480   : > { %v1751_v31 = vpop.f32.mrf.mxu0 }
 0x485   : > { %v1774_v15 = vpop.f32.mrf.mxu1 }
 0x486   : > { %v1775_v34 = vadd.f32 %v1774_v15, %v1751_v31 }
 0x488   : > { %v1834_v4 = vadd.f32 %v1775_v34, %v3353_v8  ;;  %v1753_v16 = vpop.f32.mrf.mxu0 }
 0x48a   : > { %v1846_v0 = vmul.f32 %v2239_v22, %v1834_v4 }
 0x48d   : > { %v1776_v54 = vpop.f32.mrf.mxu1 }
 0x48e   : > { %v1777_v44 = vadd.f32 %v1776_v54, %v1753_v16 }
 0x490   : > { %v1836_v56 = vadd.f32 %v1777_v44, %v3353_v8  ;;  %v1756_v42 = vpop.f32.mrf.mxu0 }
 0x492   : > { %v1848_v30 = vmul.f32 %v2239_v22, %v1836_v56 }
 0x495   : > { %v1779_v55 = vpop.f32.mrf.mxu1 }
 0x496   : > { %v1780_v25 = vadd.f32 %v1779_v55, %v1756_v42 }
 0x498   : > { %v1838_v32 = vadd.f32 %v1780_v25, %v3353_v8  ;;  %v1758_v36 = vpop.f32.mrf.mxu0 }
 0x49a   : > { %v1850_v57 = vmul.f32 %v2239_v22, %v1838_v32 }
 0x49d   : > { %v1781_v6 = vpop.f32.mrf.mxu1 }
 0x49e   : > { %v1782_v2 = vadd.f32 %v1781_v6, %v1758_v36 }
 0x4a0   : > { %v1840_v40 = vadd.f32 %v1782_v2, %v3353_v8  ;;  %v1761_v46 = vpop.f32.mrf.mxu0 }
 0x4a2   : > { %v1852_v50 = vmul.f32 %v2239_v22, %v1840_v40 }
 0x4a5   : > { %v1784_v3 = vpop.f32.mrf.mxu1 }
 0x4a6   : > { %v1785_v19 = vadd.f32 %v1784_v3, %v1761_v46 }
 0x4a8   : > { %v1842_v9 = vadd.f32 %v1785_v19, %v3353_v8  ;;  %v1763_v59 = vpop.f32.mrf.mxu0 }
 0x4aa   : > { %v1854_v58 = vmul.f32 %v2239_v22, %v1842_v9 }
 0x4ad   : > { %v1786_v47 = vpop.f32.mrf.mxu1 }
 0x4b0   : > { %v1797_v20 = vpop.f32.mrf.mxu0 }
 0x4b5   : > { %v1820_v33 = vpop.f32.mrf.mxu1 }
 0x4b6   : > { %v1821_v39 = vadd.f32 %v1820_v33, %v1797_v20 }
 0x4b8   : > { %v1835_v29 = vadd.f32 %v1821_v39, %v3375_v60  ;;  %v1799_v38 = vpop.f32.mrf.mxu0 }
 0x4ba   : > { %v1847_v53 = vmul.f32 %v2241_v49, %v1835_v29 }
 0x4bc   : > { %v1856_v5 = vpack.c.bf16 %v1847_v53, %v1846_v0 }
 0x4bd   : > { %v1822_v27 = vpop.f32.mrf.mxu1 }
 0x4be   : > { %1861 = vst [vmem:[%s3387_s19] sm:$0xff] %v1856_v5  ;;  %v1823_v8 = vadd.f32 %v1822_v27, %v1799_v38 }
 0x4c0   : > { %v1837_v48 = vadd.f32 %v1823_v8, %v3375_v60  ;;  %v1802_v26 = vpop.f32.mrf.mxu0 }
 0x4c2   : > { %v1849_v62 = vmul.f32 %v2241_v49, %v1837_v48 }
 0x4c4   : > { %v1857_v7 = vpack.c.bf16 %v1849_v62, %v1848_v30 }
 0x4c5   : > { %v1825_v11 = vpop.f32.mrf.mxu1  ;;  %v1913_v63 = vld [vmem:[%s3387_s19] sm:$0xff] (%p2368_p3) }
 0x4c6   : > { %1862 = vst [vmem:[%s3387_s19 + $0x8] sm:$0xff] %v1857_v7  ;;  %v1826_v23 = vadd.f32 %v1825_v11, %v1802_v26 }
 0x4c7   : > { %1914 = vst [vmem:[%s1876_s22] sm:$0xff] (%p2368_p3), %v1913_v63 }
 0x4c8   : > { %v1839_v41 = vadd.f32 %v1826_v23, %v3375_v60  ;;  %v1804_v35 = vpop.f32.mrf.mxu0 }
 0x4ca   : > { %v1851_v24 = vmul.f32 %v2241_v49, %v1839_v41 }
 0x4cc   : > { %v1858_v43 = vpack.c.bf16 %v1851_v24, %v1850_v57 }
 0x4cd   : > { %v1827_v17 = vpop.f32.mrf.mxu1  ;;  %v1915_v18 = vld [vmem:[%s3387_s19 + $0x8] sm:$0xff] (%p2368_p3) }
 0x4ce   : > { %1863 = vst [vmem:[%s3387_s19 + $0x10] sm:$0xff] %v1858_v43  ;;  %v1828_v14 = vadd.f32 %v1827_v17, %v1804_v35 }
 0x4cf   : > { %1916 = vst [vmem:[%s1876_s22 + $0x10] sm:$0xff] (%p2368_p3), %v1915_v18 }
 0x4d0   : > { %v1841_v37 = vadd.f32 %v1828_v14, %v3375_v60  ;;  %v1807_v10 = vpop.f32.mrf.mxu0 }
 0x4d2   : > { %v1853_v13 = vmul.f32 %v2241_v49, %v1841_v37 }
 0x4d4   : > { %v1859_v45 = vpack.c.bf16 %v1853_v13, %v1852_v50 }
 0x4d5   : > { %v1830_v12 = vpop.f32.mrf.mxu1 }
 0x4d6   : > { %1864 = vst [vmem:[%s3387_s19 + $0x18] sm:$0xff] %v1859_v45  ;;  %v1831_v1 = vadd.f32 %v1830_v12, %v1807_v10 }
 0x4d8   : > { %v1843_v52 = vadd.f32 %v1831_v1, %v3375_v60  ;;  %v1809_v28 = vpop.f32.mrf.mxu0  ;;  %v1917_v60 = vld [vmem:[%s3387_s19 + $0x10] sm:$0xff] (%p2368_p3) }
 0x4d9   : > { %1918 = vst [vmem:[%s1876_s22 + $0x20] sm:$0xff] (%p2368_p3), %v1917_v60 }
 0x4da   : > { %v1855_v21 = vmul.f32 %v2241_v49, %v1843_v52  ;;  %1872 = sbr.rel (!%p2368_p3) target bundleno = 1255 (0x4e7), region = 60 }
 0x4dc   : > { %v1860_v61 = vpack.c.bf16 %v1855_v21, %v1854_v58 }
 0x4dd   : > { %v1832_v51 = vpop.f32.mrf.mxu1  ;;  %v1919_v31 = vld [vmem:[%s3387_s19 + $0x18] sm:$0xff] (%p2368_p3) }
 0x4de   : > { %1865 = vst [vmem:[%s3387_s19 + $0x20] sm:$0x33] %v1860_v61 }
 0x4df   : > { %1920 = vst [vmem:[%s1876_s22 + $0x30] sm:$0xff] %v1919_v31 }
 0x4e5   : > { %v1921_v15 = vld [vmem:[%s3387_s19 + $0x20] sm:$0xff] }
 0x4e6   : > { %1922 = vst [vmem:[%s1876_s22 + $0x40] sm:$0xff] %v1921_v15 }
 0x4e7 PF: > { %s18_s9 = sadd.s32 1, %s2280_s9   ;;  %s3499_s27 = smov %s2268_s28 }
 0x4e8   : > { %p15_p9 = scmp.ge.s32.totalorder %s18_s9, 4   ;;  %s3500_s28 = smov %s2377_s15 }
 0x4e9   : > { %s3501_s29 = smov %s2276_s30  ;;  %s3502_s30 = smov %s3504_s11 }
 0x4ea   :  { %17 = sbr.rel (!%p15_p9) target bundleno = 3 (0x3), region = 125 }

</bundles_post_ra>
